<compile_context>
chip_gen: v7x
topology: tpu7x:2x2x1
jax: 0.10.0
libtpu: 0.0.40
codegen_flags: <defaults>
</compile_context>

<pallas_src>
import functools
import math

import jax
import jax.numpy as jnp
from jax import lax
from jax.experimental import pallas as pl
from jax.experimental.pallas import tpu as pltpu

TAU = 0.5
_NORM_EPS = 1e-12


def _round_up(x, m):
    return ((x + m - 1) // m) * m


# ---------------------------------------------------------------------------
# Kernel 1: fused projection MLP (both views stacked) + L2 row-normalization,
# pre-scaled by sqrt(1/tau).  Padded rows (per half) are zeroed.
# ---------------------------------------------------------------------------
def _proj_kernel(z_ref, w1_ref, b1_ref, w2_ref, b2_ref, out_ref, *,
                 n_valid, n_half, block_rows, scale):
    i = pl.program_id(0)                                    # top level only
    z = z_ref[...]                                          # (bm, hid)
    h = jnp.dot(z, w1_ref[...], preferred_element_type=jnp.float32) + b1_ref[...]
    # ELU (alpha=1.0); clamp exp arg so a derived backward never sees inf*0.
    h = jnp.where(h > 0, h, jnp.exp(jnp.minimum(h, 0.0)) - 1.0)
    o = jnp.dot(h, w2_ref[...], preferred_element_type=jnp.float32) + b2_ref[...]
    # fused F.normalize(o, p=2, dim=1, eps=1e-12), then * sqrt(1/tau) so the
    # loss-kernel dot products are already sim/tau.
    nrm = jnp.sqrt(jnp.sum(o * o, axis=1, keepdims=True))
    o = o * (scale / jnp.maximum(nrm, _NORM_EPS))
    # Zero padded rows of each half (they contribute exactly exp(0)=1 to the
    # loss denominators; corrected analytically in the loss kernel).
    row = i * block_rows + lax.broadcasted_iota(jnp.int32, (block_rows, 1), 0)
    half_row = jnp.where(row >= n_half, row - n_half, row)
    o = jnp.where(half_row < n_valid, o, 0.0)
    # TODO(synk): hout (=32) < 128 means this store is lane-masked; a lane-dense
    # relayout of the output would shave store bundles but adds relayout risk.
    out_ref[...] = o.astype(out_ref.dtype)


def project_both_views(z1, z2, w1, b1, w2, b2, *, n_pad, block_rows, scale,
                       out_dtype=jnp.bfloat16):
    n, hid = z1.shape
    p = w1.shape[1]
    hout = w2.shape[1]
    pad = n_pad - n
    if pad:
        z1 = jnp.pad(z1, ((0, pad), (0, 0)))
        z2 = jnp.pad(z2, ((0, pad), (0, 0)))
    zs = jnp.concatenate([z1, z2], axis=0)                  # (2*n_pad, hid)
    total = 2 * n_pad
    assert total % block_rows == 0
    kernel = functools.partial(_proj_kernel, n_valid=n, n_half=n_pad,
                               block_rows=block_rows, scale=scale)
    out = pl.pallas_call(
        kernel,
        out_shape=jax.ShapeDtypeStruct((total, hout), out_dtype),
        grid=(total // block_rows,),
        in_specs=[
            pl.BlockSpec((block_rows, hid), lambda i: (i, 0)),
            pl.BlockSpec((hid, p), lambda i: (0, 0)),
            pl.BlockSpec((1, p), lambda i: (0, 0)),
            pl.BlockSpec((p, hout), lambda i: (0, 0)),
            pl.BlockSpec((1, hout), lambda i: (0, 0)),
        ],
        out_specs=pl.BlockSpec((block_rows, hout), lambda i: (i, 0)),
        compiler_params=pltpu.CompilerParams(
            dimension_semantics=("parallel",),
            vmem_limit_bytes=32 * 1024 * 1024),
        cost_estimate=pl.CostEstimate(
            flops=2 * total * hid * p + 2 * total * p * hout,
            transcendentals=total * (p + 1),
            bytes_accessed=4 * (total * hid + hid * p + p + p * hout + hout)
            + total * hout * jnp.dtype(out_dtype).itemsize),
    )(zs, w1, b1.reshape(1, p), w2, b2.reshape(1, hout))
    return out   # (2*n_pad, hout): rows [0,n)=view1, [n_pad,n_pad+n)=view2


# ---------------------------------------------------------------------------
# Kernel 2: flash-style symmetric contrastive loss.
# Grid = (q_block [parallel], kv_block [arbitrary, last]).
# The kv stream is the whole stacked/normalized/scaled array itself.
# ---------------------------------------------------------------------------
def _loss_kernel(q1_ref, q2_ref, kv_ref, out_ref, acc_ref, *,
                 zero_cols, n_valid, block_q, exp_dtype):
    # Grid queries hoisted out of pl.when closures (interpret/CPU lowering
    # cannot bind program_id inside the cond branches).
    qi = pl.program_id(0)
    j = pl.program_id(1)
    nk = pl.num_programs(1)

    @pl.when(j == 0)
    def _init():
        acc_ref[...] = jnp.zeros_like(acc_ref)

    q1 = q1_ref[...]                                     # (bq, H)   view-1 rows
    q2 = q2_ref[...]                                     # (bq, H)   view-2 rows
    q = jnp.concatenate([q1, q2], axis=0)                # (2*bq, H) single MXU LHS
    kv = kv_ref[...]                                     # (bk, H)
    # s[r, c] = <a_r, a_c> = sim(r, c) / tau   (rows already scaled by sqrt(1/tau))
    s = lax.dot_general(q, kv, (((1,), (1,)), ((), ())),
                        preferred_element_type=jnp.float32)   # (2*bq, bk)
    # exp in bf16 on the bf16 path (EUP bf16 on v6e/v7x); accumulate in f32.
    p = jnp.exp(s.astype(exp_dtype))
    acc_ref[...] += jnp.sum(p.astype(jnp.float32), axis=1, keepdims=True)

    @pl.when(j == nk - 1)
    def _finalize():
        q1f = q1.astype(jnp.float32)
        q2f = q2.astype(jnp.float32)
        # Numerator: log(exp(sim(n1_i,n2_i)/tau)) = <a1_i, a2_i>.
        num_log = jnp.sum(q1f * q2f, axis=1, keepdims=True)
        # refl diagonal recomputed from the *stored* values -> cancels the
        # accumulator exactly (no bf16 bias), per direction.
        diag1 = jnp.exp(jnp.sum(q1f * q1f, axis=1, keepdims=True))
        diag2 = jnp.exp(jnp.sum(q2f * q2f, axis=1, keepdims=True))
        acc = acc_ref[...]
        d1 = acc[:block_q] - zero_cols - diag1           # refl+between-diag(refl)
        d2 = acc[block_q:] - zero_cols - diag2
        loss_rows = 0.5 * (jnp.log(d1) + jnp.log(d2)) - num_log    # (bq, 1)
        row = qi * block_q + lax.broadcasted_iota(jnp.int32, (block_q, 1), 0)
        loss_rows = jnp.where(row < n_valid, loss_rows, 0.0)
        # lane-dense (1,1,128) store of this block's partial sum
        out_ref[...] = jnp.broadcast_to(jnp.sum(loss_rows), (1, 1, 128))


def contrastive_loss_mean(hq, n_valid, n_pad, *, block_q=256, block_kv=512,
                          exp_in_low_precision=None):
    total, hout = hq.shape                  # total == 2 * n_pad
    assert n_pad % block_q == 0 and total == 2 * n_pad
    nqb = n_pad // block_q
    # Keep the entire kv stream VMEM-resident when it is small; otherwise
    # stream it in block_kv chunks (must divide total; 2*block_q always does).
    if total <= 2048:
        block_kv = total
    if block_kv > total or total % block_kv != 0:
        block_kv = 2 * block_q
    nkb = total // block_kv
    if exp_in_low_precision is None:
        exp_in_low_precision = (hq.dtype == jnp.bfloat16)
    exp_dtype = jnp.bfloat16 if exp_in_low_precision else jnp.float32
    # Every exactly-zero kv row contributes exp(0)=1 to each denominator.
    zero_cols = float(2 * (n_pad - n_valid))
    itemsize = jnp.dtype(hq.dtype).itemsize
    kernel = functools.partial(_loss_kernel, zero_cols=zero_cols,
                               n_valid=n_valid, block_q=block_q,
                               exp_dtype=exp_dtype)
    # TODO(synk): deduplicating the "between" exponentials (3N^2 instead of
    # 4N^2 exps) needs cross-q-block column-sum accumulators; not done here.
    out = pl.pallas_call(
        kernel,
        out_shape=jax.ShapeDtypeStruct((nqb, 1, 128), jnp.float32),
        grid=(nqb, nkb),
        in_specs=[
            pl.BlockSpec((block_q, hout), lambda i, j: (i, 0)),          # q1
            pl.BlockSpec((block_q, hout), lambda i, j: (i + nqb, 0)),    # q2
            pl.BlockSpec((block_kv, hout), lambda i, j: (j, 0)),         # kv
        ],
        out_specs=pl.BlockSpec((1, 1, 128), lambda i, j: (i, 0, 0)),
        scratch_shapes=[pltpu.VMEM((2 * block_q, 1), jnp.float32)],
        compiler_params=pltpu.CompilerParams(
            dimension_semantics=("parallel", "arbitrary"),
            vmem_limit_bytes=32 * 1024 * 1024),
        cost_estimate=pl.CostEstimate(
            flops=2 * total * total * hout,
            transcendentals=total * total + 3 * total,
            bytes_accessed=(nqb * total + total) * hout * itemsize
            + nqb * 128 * 4),
    )(hq, hq, hq)
    return jnp.sum(out[:, 0, 0]) / n_valid


# ---------------------------------------------------------------------------
# GRACE.loss_contra (mean=True, batch_size=None)
# ---------------------------------------------------------------------------
def grace_loss_contra(z1, z2, params, tau=TAU, *, sim_dtype=jnp.bfloat16,
                      block_q=256, block_kv=512):
    w1, b1, w2, b2 = params
    n = z1.shape[0]
    n_pad = _round_up(n, block_q)
    block_rows = 2 * block_q          # projection row tile; divides 2*n_pad
    scale = math.sqrt(1.0 / tau)
    hq = project_both_views(z1, z2, w1, b1, w2, b2, n_pad=n_pad,
                            block_rows=block_rows, scale=scale,
                            out_dtype=sim_dtype)
    return contrastive_loss_mean(hq, n, n_pad, block_q=block_q,
                                 block_kv=block_kv)


# ---------------------------------------------------------------------------
# Pure-JAX reference for verification
# ---------------------------------------------------------------------------
def ref_loss_contra(z1, z2, params, tau=TAU):
    w1, b1, w2, b2 = params

    def proj(z):
        h = z @ w1 + b1
        h = jnp.where(h > 0, h, jnp.exp(jnp.minimum(h, 0.0)) - 1.0)
        return h @ w2 + b2

    def norm(x):
        return x / jnp.maximum(jnp.linalg.norm(x, axis=1, keepdims=True), 1e-12)

    def semi(a, b):
        refl = jnp.exp(norm(a) @ norm(a).T / tau)
        bet = jnp.exp(norm(a) @ norm(b).T / tau)
        return -jnp.log(jnp.diag(bet) / (refl.sum(1) + bet.sum(1) - jnp.diag(refl)))

    h1, h2 = proj(z1), proj(z2)
    return jnp.mean((semi(h1, h2) + semi(h2, h1)) * 0.5)


# TODO(synk): fit/train/test, Logger, external encoder/classifier GNN calls and
# the modify_label label-propagation loop are host-side training orchestration
# with data-dependent Python control flow — not expressed as Pallas kernels.

if __name__ == "__main__":
    num_nodes = 256
    num_hidden = 32
    num_proj_hidden = 32

    key = jax.random.PRNGKey(0)
    k1, k2, k3, k4, k5, k6 = jax.random.split(key, 6)

    # Deterministic parameter init (matches torch.nn.Linear fan_in-uniform scale).
    lim1 = 1.0 / jnp.sqrt(num_hidden)
    lim2 = 1.0 / jnp.sqrt(num_proj_hidden)
    w1 = jax.random.uniform(k1, (num_hidden, num_proj_hidden), jnp.float32, -lim1, lim1)
    b1 = jax.random.uniform(k2, (num_proj_hidden,), jnp.float32, -lim1, lim1)
    w2 = jax.random.uniform(k3, (num_proj_hidden, num_hidden), jnp.float32, -lim2, lim2)
    b2 = jax.random.uniform(k4, (num_hidden,), jnp.float32, -lim2, lim2)
    params = (w1, b1, w2, b2)

    # Synthetic encoder outputs (two augmented views).
    z1 = jax.random.normal(k5, (num_nodes, num_hidden), jnp.float32)
    z2 = jax.random.normal(k6, (num_nodes, num_hidden), jnp.float32)

    ref = ref_loss_contra(z1, z2, params)

    # Fast path: bf16 similarity matmuls + bf16 exponentials (f32 accumulation).
    loss_bf16 = jax.jit(
        lambda a, b, p: grace_loss_contra(a, b, p, sim_dtype=jnp.bfloat16))(
            z1, z2, params)
    loss_bf16 = jax.block_until_ready(loss_bf16)
    assert jnp.allclose(loss_bf16, ref, rtol=2.5e-2, atol=2.5e-2), (loss_bf16, ref)

    # f32 path: tighter check of the tiling / algebraic-diagonal math.
    loss_f32 = jax.jit(
        lambda a, b, p: grace_loss_contra(a, b, p, sim_dtype=jnp.float32))(
            z1, z2, params)
    loss_f32 = jax.block_until_ready(loss_f32)
    assert jnp.allclose(loss_f32, ref, rtol=5e-3, atol=5e-3), (loss_f32, ref)

    print("KERNEL_OK")
</pallas_src>

<mosaic_0001>
module attributes {stable_mosaic.version = 11 : i64} {
  func.func @_loss_kernel(%arg0: i32, %arg1: i32, %arg2: memref<256x32xbf16, #tpu.memory_space<vmem>>, %arg3: memref<256x32xbf16, #tpu.memory_space<vmem>>, %arg4: memref<512x32xbf16, #tpu.memory_space<vmem>>, %arg5: memref<1x1x128xf32, #tpu.memory_space<vmem>>, %arg6: memref<512x1xf32, #tpu.memory_space<vmem>>) attributes {dimension_semantics = [#tpu.dimension_semantics<parallel>, #tpu.dimension_semantics<arbitrary>], iteration_bounds = array<i64: 1, 1>, scalar_prefetch = 0 : i64, scratch_operands = 1 : i64, tpu.core_type = #tpu.core_type<tc>, window_params = [{transform_indices = @transform_0, window_bounds = array<i64: 256, 32>}, {transform_indices = @transform_1, window_bounds = array<i64: 256, 32>}, {transform_indices = @transform_2, window_bounds = array<i64: 512, 32>}, {transform_indices = @transform_3, window_bounds = array<i64: 1, 1, 128>}]} {
    %c0_i32 = arith.constant 0 : i32
    %0 = arith.cmpi eq, %arg1, %c0_i32 : i32
    %1 = arith.extui %0 : i1 to i32
    %c0_i32_0 = arith.constant 0 : i32
    %2 = arith.cmpi ne, %1, %c0_i32_0 : i32
    scf.if %2 {
      %cst_13 = arith.constant 0.000000e+00 : f32
      %19 = vector.broadcast %cst_13 : f32 to vector<512x1xf32>
      %c0_14 = arith.constant 0 : index
      %c0_15 = arith.constant 0 : index
      %20 = vector.load %arg6[%c0_14, %c0_15] : memref<512x1xf32, #tpu.memory_space<vmem>>, vector<512x1xf32>
      tpu.vector_store %arg6[%c0_14, %c0_15], %19 {strides = array<i32>} : memref<512x1xf32, #tpu.memory_space<vmem>>, vector<512x1xf32>,
    } else {
    }
    %c0 = arith.constant 0 : index
    %c0_1 = arith.constant 0 : index
    %3 = vector.load %arg2[%c0, %c0_1] : memref<256x32xbf16, #tpu.memory_space<vmem>>, vector<256x32xbf16>
    %c0_2 = arith.constant 0 : index
    %c0_3 = arith.constant 0 : index
    %4 = vector.load %arg3[%c0_2, %c0_3] : memref<256x32xbf16, #tpu.memory_space<vmem>>, vector<256x32xbf16>
    %5 = tpu.concatenate %3, %4 in 0 : vector<256x32xbf16>, vector<256x32xbf16> -> vector<512x32xbf16>
    %c0_4 = arith.constant 0 : index
    %c0_5 = arith.constant 0 : index
    %6 = vector.load %arg4[%c0_4, %c0_5] : memref<512x32xbf16, #tpu.memory_space<vmem>>, vector<512x32xbf16>
    %cst = arith.constant dense<0.000000e+00> : vector<512x512xf32>
    %7 = tpu.matmul %5, %6, %cst {dimension_numbers = #tpu.dot_dimension_numbers<[1], [1], [0], [0], [0, 0, 1, 0], [], []>} : vector<512x32xbf16>, vector<512x32xbf16>, vector<512x512xf32> -> vector<512x512xf32>
    %8 = arith.truncf %7 : vector<512x512xf32> to vector<512x512xbf16>
    %9 = math.exp %8 : vector<512x512xbf16>
    %c0_6 = arith.constant 0 : index
    %c0_7 = arith.constant 0 : index
    %10 = vector.load %arg6[%c0_6, %c0_7] : memref<512x1xf32, #tpu.memory_space<vmem>>, vector<512x1xf32>
    %11 = arith.extf %9 : vector<512x512xbf16> to vector<512x512xf32>
    %cst_8 = arith.constant dense<0.000000e+00> : vector<512xf32>
    %12 = vector.multi_reduction <add>, %11, %cst_8 [1] : vector<512x512xf32> to vector<512xf32>
    %13 = vector.shape_cast %12 : vector<512xf32> to vector<512x1xf32>
    %14 = arith.addf %10, %13 : vector<512x1xf32>
    %c0_9 = arith.constant 0 : index
    %c0_10 = arith.constant 0 : index
    %15 = vector.load %arg6[%c0_9, %c0_10] : memref<512x1xf32, #tpu.memory_space<vmem>>, vector<512x1xf32>
    tpu.vector_store %arg6[%c0_9, %c0_10], %14 {strides = array<i32>} : memref<512x1xf32, #tpu.memory_space<vmem>>, vector<512x1xf32>,
    %c0_i32_11 = arith.constant 0 : i32
    %16 = arith.cmpi eq, %arg1, %c0_i32_11 : i32
    %17 = arith.extui %16 : i1 to i32
    %c0_i32_12 = arith.constant 0 : i32
    %18 = arith.cmpi ne, %17, %c0_i32_12 : i32
    scf.if %18 {
      %19 = arith.extf %3 : vector<256x32xbf16> to vector<256x32xf32>
      %20 = arith.extf %4 : vector<256x32xbf16> to vector<256x32xf32>
      %21 = arith.mulf %19, %20 : vector<256x32xf32>
      %cst_13 = arith.constant dense<0.000000e+00> : vector<256xf32>
      %22 = vector.multi_reduction <add>, %21, %cst_13 [1] : vector<256x32xf32> to vector<256xf32>
      %23 = vector.shape_cast %22 : vector<256xf32> to vector<256x1xf32>
      %24 = arith.mulf %19, %19 : vector<256x32xf32>
      %cst_14 = arith.constant dense<0.000000e+00> : vector<256xf32>
      %25 = vector.multi_reduction <add>, %24, %cst_14 [1] : vector<256x32xf32> to vector<256xf32>
      %26 = vector.shape_cast %25 : vector<256xf32> to vector<256x1xf32>
      %27 = math.exp %26 : vector<256x1xf32>
      %28 = arith.mulf %20, %20 : vector<256x32xf32>
      %cst_15 = arith.constant dense<0.000000e+00> : vector<256xf32>
      %29 = vector.multi_reduction <add>, %28, %cst_15 [1] : vector<256x32xf32> to vector<256xf32>
      %30 = vector.shape_cast %29 : vector<256xf32> to vector<256x1xf32>
      %31 = math.exp %30 : vector<256x1xf32>
      %c0_16 = arith.constant 0 : index
      %c0_17 = arith.constant 0 : index
      %32 = vector.load %arg6[%c0_16, %c0_17] : memref<512x1xf32, #tpu.memory_space<vmem>>, vector<512x1xf32>
      %33 = vector.extract_strided_slice %32 {offsets = [0, 0], sizes = [256, 1], strides = [1, 1]} : vector<512x1xf32> to vector<256x1xf32>
      %cst_18 = arith.constant 0.000000e+00 : f32
      %34 = vector.broadcast %cst_18 : f32 to vector<256x1xf32>
      %35 = arith.subf %33, %34 : vector<256x1xf32>
      %36 = arith.subf %35, %27 : vector<256x1xf32>
      %37 = vector.extract_strided_slice %32 {offsets = [256, 0], sizes = [256, 1], strides = [1, 1]} : vector<512x1xf32> to vector<256x1xf32>
      %cst_19 = arith.constant 0.000000e+00 : f32
      %38 = vector.broadcast %cst_19 : f32 to vector<256x1xf32>
      %39 = arith.subf %37, %38 : vector<256x1xf32>
      %40 = arith.subf %39, %31 : vector<256x1xf32>
      %41 = math.log %36 : vector<256x1xf32>
      %42 = math.log %40 : vector<256x1xf32>
      %43 = arith.addf %41, %42 : vector<256x1xf32>
      %cst_20 = arith.constant 5.000000e-01 : f32
      %44 = vector.broadcast %cst_20 : f32 to vector<256x1xf32>
      %45 = arith.mulf %44, %43 : vector<256x1xf32>
      %46 = arith.subf %45, %23 : vector<256x1xf32>
      %c256_i32 = arith.constant 256 : i32
      %47 = arith.muli %arg0, %c256_i32 : i32
      %48 = tpu.iota {dimensions = array<i32: 0>} : vector<256x1xi32>
      %49 = vector.broadcast %47 : i32 to vector<256x1xi32>
      %50 = arith.addi %49, %48 : vector<256x1xi32>
      %c256_i32_21 = arith.constant 256 : i32
      %51 = vector.broadcast %c256_i32_21 : i32 to vector<256x1xi32>
      %52 = arith.cmpi slt, %50, %51 : vector<256x1xi32>
      %cst_22 = arith.constant 0.000000e+00 : f32
      %53 = vector.broadcast %cst_22 : f32 to vector<256x1xf32>
      %54 = arith.select %52, %46, %53 : vector<256x1xi1>, vector<256x1xf32>
      %55 = vector.shape_cast %54 : vector<256x1xf32> to vector<1x256x1xf32>
      %cst_23 = arith.constant dense<0.000000e+00> : vector<1xf32>
      %56 = vector.multi_reduction <add>, %55, %cst_23 [1, 2] : vector<1x256x1xf32> to vector<1xf32>
      %57 = vector.shape_cast %56 : vector<1xf32> to vector<1x1x1xf32>
      %58 = vector.extract %57[0, 0, 0] : f32 from vector<1x1x1xf32>
      %59 = vector.broadcast %58 : f32 to vector<1x1x128xf32>
      %c0_24 = arith.constant 0 : index
      %c0_25 = arith.constant 0 : index
      %c0_26 = arith.constant 0 : index
      %60 = vector.load %arg5[%c0_24, %c0_25, %c0_26] : memref<1x1x128xf32, #tpu.memory_space<vmem>>, vector<1x1x128xf32>
      tpu.vector_store %arg5[%c0_24, %c0_25, %c0_26], %59 {strides = array<i32>} : memref<1x1x128xf32, #tpu.memory_space<vmem>>, vector<1x1x128xf32>,
    } else {
    }
    return
  }
  func.func @transform_0(%arg0: i32, %arg1: i32) -> (i32, i32) {
    %c0_i32 = arith.constant 0 : i32
    %c0_i32_0 = arith.constant 0 : i32
    return %arg0, %c0_i32 : i32, i32
  }
  func.func @transform_1(%arg0: i32, %arg1: i32) -> (i32, i32) {
    %c1_i32 = arith.constant 1 : i32
    %0 = arith.addi %arg0, %c1_i32 : i32
    %c0_i32 = arith.constant 0 : i32
    %c0_i32_0 = arith.constant 0 : i32
    return %0, %c0_i32 : i32, i32
  }
  func.func @transform_2(%arg0: i32, %arg1: i32) -> (i32, i32) {
    %c0_i32 = arith.constant 0 : i32
    %c0_i32_0 = arith.constant 0 : i32
    return %arg1, %c0_i32 : i32, i32
  }
  func.func @transform_3(%arg0: i32, %arg1: i32) -> (i32, i32, i32) {
    %c0_i32 = arith.constant 0 : i32
    %c0_i32_0 = arith.constant 0 : i32
    %c0_i32_1 = arith.constant 0 : i32
    return %arg0, %c0_i32, %c0_i32_0 : i32, i32, i32
  }
}

module attributes {stable_mosaic.version = 11 : i64} {
  func.func @_proj_kernel(%arg0: i32, %arg1: memref<512x32xf32, #tpu.memory_space<vmem>>, %arg2: memref<32x32xf32, #tpu.memory_space<vmem>>, %arg3: memref<1x32xf32, #tpu.memory_space<vmem>>, %arg4: memref<32x32xf32, #tpu.memory_space<vmem>>, %arg5: memref<1x32xf32, #tpu.memory_space<vmem>>, %arg6: memref<512x32xbf16, #tpu.memory_space<vmem>>) attributes {dimension_semantics = [#tpu.dimension_semantics<parallel>], iteration_bounds = array<i64: 1>, scalar_prefetch = 0 : i64, scratch_operands = 0 : i64, tpu.core_type = #tpu.core_type<tc>, window_params = [{transform_indices = @transform_0, window_bounds = array<i64: 512, 32>}, {pipeline_mode = #tpu.pipeline_mode<synchronous>, transform_indices = @transform_1, window_bounds = array<i64: 32, 32>}, {pipeline_mode = #tpu.pipeline_mode<synchronous>, transform_indices = @transform_2, window_bounds = array<i64: 1, 32>}, {pipeline_mode = #tpu.pipeline_mode<synchronous>, transform_indices = @transform_3, window_bounds = array<i64: 32, 32>}, {pipeline_mode = #tpu.pipeline_mode<synchronous>, transform_indices = @transform_4, window_bounds = array<i64: 1, 32>}, {transform_indices = @transform_5, window_bounds = array<i64: 512, 32>}]} {
    %c0 = arith.constant 0 : index
    %c0_0 = arith.constant 0 : index
    %0 = vector.load %arg1[%c0, %c0_0] : memref<512x32xf32, #tpu.memory_space<vmem>>, vector<512x32xf32>
    %c0_1 = arith.constant 0 : index
    %c0_2 = arith.constant 0 : index
    %1 = vector.load %arg2[%c0_1, %c0_2] : memref<32x32xf32, #tpu.memory_space<vmem>>, vector<32x32xf32>
    %cst = arith.constant dense<0.000000e+00> : vector<512x32xf32>
    %2 = tpu.matmul %0, %1, %cst {dimension_numbers = #tpu.dot_dimension_numbers<[1], [0], [0], [1], [0, 0, 1, 1], [], []>} : vector<512x32xf32>, vector<32x32xf32>, vector<512x32xf32> -> vector<512x32xf32>
    %c0_3 = arith.constant 0 : index
    %c0_4 = arith.constant 0 : index
    %3 = vector.load %arg3[%c0_3, %c0_4] : memref<1x32xf32, #tpu.memory_space<vmem>>, vector<1x32xf32>
    %4 = vector.broadcast %3 : vector<1x32xf32> to vector<512x32xf32>
    %5 = arith.addf %2, %4 : vector<512x32xf32>
    %cst_5 = arith.constant 0.000000e+00 : f32
    %6 = vector.broadcast %cst_5 : f32 to vector<512x32xf32>
    %7 = arith.cmpf ogt, %5, %6 : vector<512x32xf32>
    %cst_6 = arith.constant 0.000000e+00 : f32
    %8 = vector.broadcast %cst_6 : f32 to vector<512x32xf32>
    %9 = arith.minimumf %5, %8 : vector<512x32xf32>
    %10 = math.exp %9 : vector<512x32xf32>
    %cst_7 = arith.constant 1.000000e+00 : f32
    %11 = vector.broadcast %cst_7 : f32 to vector<512x32xf32>
    %12 = arith.subf %10, %11 : vector<512x32xf32>
    %13 = arith.select %7, %5, %12 : vector<512x32xi1>, vector<512x32xf32>
    %c0_8 = arith.constant 0 : index
    %c0_9 = arith.constant 0 : index
    %14 = vector.load %arg4[%c0_8, %c0_9] : memref<32x32xf32, #tpu.memory_space<vmem>>, vector<32x32xf32>
    %cst_10 = arith.constant dense<0.000000e+00> : vector<512x32xf32>
    %15 = tpu.matmul %13, %14, %cst_10 {dimension_numbers = #tpu.dot_dimension_numbers<[1], [0], [0], [1], [0, 0, 1, 1], [], []>} : vector<512x32xf32>, vector<32x32xf32>, vector<512x32xf32> -> vector<512x32xf32>
    %c0_11 = arith.constant 0 : index
    %c0_12 = arith.constant 0 : index
    %16 = vector.load %arg5[%c0_11, %c0_12] : memref<1x32xf32, #tpu.memory_space<vmem>>, vector<1x32xf32>
    %17 = vector.broadcast %16 : vector<1x32xf32> to vector<512x32xf32>
    %18 = arith.addf %15, %17 : vector<512x32xf32>
    %19 = arith.mulf %18, %18 : vector<512x32xf32>
    %cst_13 = arith.constant dense<0.000000e+00> : vector<512xf32>
    %20 = vector.multi_reduction <add>, %19, %cst_13 [1] : vector<512x32xf32> to vector<512xf32>
    %21 = vector.shape_cast %20 : vector<512xf32> to vector<512x1xf32>
    %22 = math.sqrt %21 : vector<512x1xf32>
    %cst_14 = arith.constant 9.99999996E-13 : f32
    %23 = vector.broadcast %cst_14 : f32 to vector<512x1xf32>
    %24 = arith.maximumf %22, %23 : vector<512x1xf32>
    %cst_15 = arith.constant 1.41421354 : f32
    %25 = vector.broadcast %cst_15 : f32 to vector<512x1xf32>
    %26 = arith.divf %25, %24 : vector<512x1xf32>
    %27 = vector.broadcast %26 : vector<512x1xf32> to vector<512x32xf32>
    %28 = arith.mulf %18, %27 : vector<512x32xf32>
    %c512_i32 = arith.constant 512 : i32
    %29 = arith.muli %arg0, %c512_i32 : i32
    %30 = tpu.iota {dimensions = array<i32: 0>} : vector<512x1xi32>
    %31 = vector.broadcast %29 : i32 to vector<512x1xi32>
    %32 = arith.addi %31, %30 : vector<512x1xi32>
    %c256_i32 = arith.constant 256 : i32
    %33 = vector.broadcast %c256_i32 : i32 to vector<512x1xi32>
    %34 = arith.cmpi sge, %32, %33 : vector<512x1xi32>
    %c256_i32_16 = arith.constant 256 : i32
    %35 = vector.broadcast %c256_i32_16 : i32 to vector<512x1xi32>
    %36 = arith.subi %32, %35 : vector<512x1xi32>
    %37 = arith.select %34, %36, %32 : vector<512x1xi1>, vector<512x1xi32>
    %c256_i32_17 = arith.constant 256 : i32
    %38 = vector.broadcast %c256_i32_17 : i32 to vector<512x1xi32>
    %39 = arith.cmpi slt, %37, %38 : vector<512x1xi32>
    %cst_18 = arith.constant 0.000000e+00 : f32
    %40 = vector.shape_cast %39 : vector<512x1xi1> to vector<512x1xi1>
    %41 = vector.broadcast %40 : vector<512x1xi1> to vector<512x32xi1>
    %42 = vector.broadcast %cst_18 : f32 to vector<512x32xf32>
    %43 = arith.select %41, %28, %42 : vector<512x32xi1>, vector<512x32xf32>
    %44 = arith.truncf %43 : vector<512x32xf32> to vector<512x32xbf16>
    %c0_19 = arith.constant 0 : index
    %c0_20 = arith.constant 0 : index
    %45 = vector.load %arg6[%c0_19, %c0_20] : memref<512x32xbf16, #tpu.memory_space<vmem>>, vector<512x32xbf16>
    tpu.vector_store %arg6[%c0_19, %c0_20], %44 {strides = array<i32>} : memref<512x32xbf16, #tpu.memory_space<vmem>>, vector<512x32xbf16>,
    return
  }
  func.func @transform_0(%arg0: i32) -> (i32, i32) {
    %c0_i32 = arith.constant 0 : i32
    %c0_i32_0 = arith.constant 0 : i32
    return %arg0, %c0_i32 : i32, i32
  }
  func.func @transform_1(%arg0: i32) -> (i32, i32) {
    %c0_i32 = arith.constant 0 : i32
    %c0_i32_0 = arith.constant 0 : i32
    %c0_i32_1 = arith.constant 0 : i32
    return %c0_i32, %c0_i32_0 : i32, i32
  }
  func.func @transform_2(%arg0: i32) -> (i32, i32) {
    %c0_i32 = arith.constant 0 : i32
    %c0_i32_0 = arith.constant 0 : i32
    %c0_i32_1 = arith.constant 0 : i32
    return %c0_i32, %c0_i32_0 : i32, i32
  }
  func.func @transform_3(%arg0: i32) -> (i32, i32) {
    %c0_i32 = arith.constant 0 : i32
    %c0_i32_0 = arith.constant 0 : i32
    %c0_i32_1 = arith.constant 0 : i32
    return %c0_i32, %c0_i32_0 : i32, i32
  }
  func.func @transform_4(%arg0: i32) -> (i32, i32) {
    %c0_i32 = arith.constant 0 : i32
    %c0_i32_0 = arith.constant 0 : i32
    %c0_i32_1 = arith.constant 0 : i32
    return %c0_i32, %c0_i32_0 : i32, i32
  }
  func.func @transform_5(%arg0: i32) -> (i32, i32) {
    %c0_i32 = arith.constant 0 : i32
    %c0_i32_0 = arith.constant 0 : i32
    return %arg0, %c0_i32 : i32, i32
  }
}

</mosaic_0001>

<bundles_post_ra>
// kernel: _lambda_.2
= control target key start
LH: loop header
LB: loop body
LE: loop exit
PB: predicated region body
PF: predicated region fallthrough
CT: control target
= control target key end

     0   :  { %vm95_vm0 = vcmask 261120   ;;  %s6792_s1 = inlined_call_operand.vmem [shape: f32[32,32], index: 1, kind: input, shape index: {}]   ;;  %s6793_s0 = inlined_call_operand.vmem [shape: f32[512,32], index: 0, kind: input, shape index: {}]   ;;  %s6794_s3 = inlined_call_operand.vmem [shape: f32[32,32], index: 3, kind: input, shape index: {}]   ;;  %s6795_s2 = inlined_call_operand.vmem [shape: f32[1,32], index: 2, kind: input, shape index: {}]   ;;  %s6796_s4 = inlined_call_operand.vmem [shape: f32[1,32], index: 4, kind: input, shape index: {}]   ;;  %s6797_s5 = inlined_call_operand.vmem [shape: bf16[512,32], index: 5, kind: output, shape index: {}]  }
   0x1   :  { %v84_v0 = vld [vmem:[%s6792_s1] sm:$0xff]  ;;  %v85_v1 = vld [vmem:[%s6792_s1 + $0x8] sm:$0xff]  ;;  %v86_v2 = vld [vmem:[%s6792_s1 + $0x10] sm:$0xff] }
   0x2   :  { %v4239_v3 = vpack.c.bf16 %v85_v1, %v84_v0  ;;  %v87_v4 = vld [vmem:[%s6792_s1 + $0x18] sm:$0xff]  ;;  %v20_v5 = vld [vmem:[%s6793_s0] sm:$0xff]  ;;  %v21_v7 = vld [vmem:[%s6793_s0 + $0x8] sm:$0xff] }
   0x3   :  { %v4243_v6 = vpack.c.bf16 %v87_v4, %v86_v2  ;;  %4039 = vmatprep.mubr.msk.f32.mxu0 %vm95_vm0, %v20_v5  ;;  %v22_v8 = vld [vmem:[%s6793_s0 + $0x10] sm:$0xff]  ;;  %v23_v9 = vld [vmem:[%s6793_s0 + $0x18] sm:$0xff]  ;;  %v24_v10 = vld [vmem:[%s6793_s0 + $0x20] sm:$0xff] }
   0x4   :  { %4240 = vmatprep.subr.bf16.mxu0 %v4239_v3  ;;  %v25_v11 = vld [vmem:[%s6793_s0 + $0x28] sm:$0xff]  ;;  %v26_v12 = vld [vmem:[%s6793_s0 + $0x30] sm:$0xff]  ;;  %v27_v13 = vld [vmem:[%s6793_s0 + $0x38] sm:$0xff] }
   0x5   :  { %4242 = vmatpush3.bf16.msra.mxu0 %v4239_v3  ;;  %v28_v14 = vld [vmem:[%s6793_s0 + $0x40] sm:$0xff]  ;;  %v29_v15 = vld [vmem:[%s6793_s0 + $0x48] sm:$0xff]  ;;  %v30_v16 = vld [vmem:[%s6793_s0 + $0x50] sm:$0xff] }
   0x6   :  { %4244 = vmatprep.subr.bf16.mxu0 %v4243_v6  ;;  %v31_v17 = vld [vmem:[%s6793_s0 + $0x58] sm:$0xff]  ;;  %v32_v18 = vld [vmem:[%s6793_s0 + $0x60] sm:$0xff]  ;;  %v33_v19 = vld [vmem:[%s6793_s0 + $0x68] sm:$0xff] }
   0x7   :  { %v34_v20 = vld [vmem:[%s6793_s0 + $0x70] sm:$0xff]  ;;  %v35_v21 = vld [vmem:[%s6793_s0 + $0x78] sm:$0xff]  ;;  %v36_v22 = vld [vmem:[%s6793_s0 + $0x80] sm:$0xff] }
   0x8   :  { %v37_v23 = vld [vmem:[%s6793_s0 + $0x88] sm:$0xff]  ;;  %v38_v24 = vld [vmem:[%s6793_s0 + $0x90] sm:$0xff]  ;;  %v39_v25 = vld [vmem:[%s6793_s0 + $0x98] sm:$0xff] }
   0x9   :  { %4246 = vmatpush3.bf16.msra.mxu0 %v4243_v6  ;;  %v40_v26 = vld [vmem:[%s6793_s0 + $0xa0] sm:$0xff]  ;;  %v41_v27 = vld [vmem:[%s6793_s0 + $0xa8] sm:$0xff]  ;;  %v42_v28 = vld [vmem:[%s6793_s0 + $0xb0] sm:$0xff] }
   0xa   :  { %v43_v29 = vld [vmem:[%s6793_s0 + $0xb8] sm:$0xff]  ;;  %v44_v30 = vld [vmem:[%s6793_s0 + $0xc0] sm:$0xff]  ;;  %v45_v31 = vld [vmem:[%s6793_s0 + $0xc8] sm:$0xff] }
   0xb   :  { %v46_v32 = vld [vmem:[%s6793_s0 + $0xd0] sm:$0xff]  ;;  %v47_v33 = vld [vmem:[%s6793_s0 + $0xd8] sm:$0xff]  ;;  %v48_v34 = vld [vmem:[%s6793_s0 + $0xe0] sm:$0xff] }
   0xc   :  { %4040 = vmatmul.mubr.msk.f32.vlgmr.msra.gmra.mrb[0].mxu0 %vm95_vm0, %v21_v7  ;;  %v49_v35 = vld [vmem:[%s6793_s0 + $0xe8] sm:$0xff]  ;;  %v50_v36 = vld [vmem:[%s6793_s0 + $0xf0] sm:$0xff]  ;;  %v51_v37 = vld [vmem:[%s6793_s0 + $0xf8] sm:$0xff] }
   0xd   :  { %4042 = vmatprep.mubr.msk.f32.mxu0 %vm95_vm0, %v22_v8  ;;  %v52_v38 = vld [vmem:[%s6793_s0 + $0x100] sm:$0xff]  ;;  %v53_v39 = vld [vmem:[%s6793_s0 + $0x108] sm:$0xff]  ;;  %v54_v40 = vld [vmem:[%s6793_s0 + $0x110] sm:$0xff] }
   0xe   :  { %v55_v41 = vld [vmem:[%s6793_s0 + $0x118] sm:$0xff]  ;;  %v56_v42 = vld [vmem:[%s6793_s0 + $0x120] sm:$0xff]  ;;  %v57_v43 = vld [vmem:[%s6793_s0 + $0x128] sm:$0xff] }
   0xf   :  { %v58_v44 = vld [vmem:[%s6793_s0 + $0x130] sm:$0xff]  ;;  %v59_v45 = vld [vmem:[%s6793_s0 + $0x138] sm:$0xff]  ;;  %v60_v46 = vld [vmem:[%s6793_s0 + $0x140] sm:$0xff] }
  0x10   :  { %4043 = vmatmul.mubr.msk.f32.gmra.mrb[2].mxu0 %vm95_vm0, %v23_v9  ;;  %v61_v47 = vld [vmem:[%s6793_s0 + $0x148] sm:$0xff]  ;;  %v62_v48 = vld [vmem:[%s6793_s0 + $0x150] sm:$0xff]  ;;  %v63_v49 = vld [vmem:[%s6793_s0 + $0x158] sm:$0xff] }
  0x11   :  { %4045 = vmatprep.mubr.msk.f32.mxu0 %vm95_vm0, %v24_v10  ;;  %v64_v50 = vld [vmem:[%s6793_s0 + $0x160] sm:$0xff]  ;;  %v65_v51 = vld [vmem:[%s6793_s0 + $0x168] sm:$0xff]  ;;  %v66_v52 = vld [vmem:[%s6793_s0 + $0x170] sm:$0xff] }
  0x12   :  { %v67_v53 = vld [vmem:[%s6793_s0 + $0x178] sm:$0xff]  ;;  %v68_v54 = vld [vmem:[%s6793_s0 + $0x180] sm:$0xff]  ;;  %v69_v55 = vld [vmem:[%s6793_s0 + $0x188] sm:$0xff] }
  0x13   :  { %v70_v56 = vld [vmem:[%s6793_s0 + $0x190] sm:$0xff]  ;;  %v1057_v57 = vld [vmem:[%s6794_s3] sm:$0xff]  ;;  %v1058_v58 = vld [vmem:[%s6794_s3 + $0x8] sm:$0xff] }
  0x14   :  { %4046 = vmatmul.mubr.msk.f32.gmra.mrb[4].mxu0 %vm95_vm0, %v25_v11  ;;  %v4247_v59 = vpack.c.bf16 %v1058_v58, %v1057_v57  ;;  %v71_v60 = vld [vmem:[%s6793_s0 + $0x198] sm:$0xff]  ;;  %v72_v61 = vld [vmem:[%s6793_s0 + $0x1a0] sm:$0xff]  ;;  %v1059_v62 = vld [vmem:[%s6794_s3 + $0x10] sm:$0xff] }
  0x15   :  { %4048 = vmatprep.mubr.msk.f32.mxu0 %vm95_vm0, %v26_v12  ;;  %v1060_v63 = vld [vmem:[%s6794_s3 + $0x18] sm:$0xff]  ;;  %v73_v1 = vld [vmem:[%s6793_s0 + $0x1a8] sm:$0xff]  ;;  %v74_v2 = vld [vmem:[%s6793_s0 + $0x1b0] sm:$0xff] }
  0x16   :  { %4248 = vmatprep.subr.bf16.mxu1 %v4247_v59  ;;  %v4251_v0 = vpack.c.bf16 %v1060_v63, %v1059_v62  ;;  %v75_v3 = vld [vmem:[%s6793_s0 + $0x1b8] sm:$0xff]  ;;  %v76_v4 = vld [vmem:[%s6793_s0 + $0x1c0] sm:$0xff]  ;;  %v77_v5 = vld [vmem:[%s6793_s0 + $0x1c8] sm:$0xff] }
  0x17   :  { %4250 = vmatpush3.bf16.msra.mxu1 %v4247_v59  ;;  %v78_v6 = vld [vmem:[%s6793_s0 + $0x1d0] sm:$0xff]  ;;  %v79_v7 = vld [vmem:[%s6793_s0 + $0x1d8] sm:$0xff]  ;;  %v80_v8 = vld [vmem:[%s6793_s0 + $0x1e0] sm:$0xff] }
  0x18   :  { %4049 = vmatmul.mubr.msk.f32.gmra.mrb[6].mxu0 %vm95_vm0, %v27_v13  ;;  %4252 = vmatprep.subr.bf16.mxu1 %v4251_v0  ;;  %v81_v9 = vld [vmem:[%s6793_s0 + $0x1e8] sm:$0xff]  ;;  %v82_v10 = vld [vmem:[%s6793_s0 + $0x1f0] sm:$0xff]  ;;  %v83_v11 = vld [vmem:[%s6793_s0 + $0x1f8] sm:$0xff] }
  0x19   :  { %4051 = vmatprep.mubr.msk.f32.mxu0 %vm95_vm0, %v28_v14  ;;  %v4953_v12 = vld [vmem:[%s6795_s2] ss:$0 sm:$0xff] }
  0x1b   :  { %4254 = vmatpush3.bf16.msra.mxu1 %v4251_v0 }
  0x1c   :  { %4052 = vmatmul.mubr.msk.f32.gmra.mrb[8].mxu0 %vm95_vm0, %v29_v15 }
  0x1d   :  { %4054 = vmatprep.mubr.msk.f32.mxu0 %vm95_vm0, %v30_v16 }
  0x20   :  { %4055 = vmatmul.mubr.msk.f32.gmra.mrb[10].mxu0 %vm95_vm0, %v31_v17 }
  0x21   :  { %4057 = vmatprep.mubr.msk.f32.mxu0 %vm95_vm0, %v32_v18 }
  0x24   :  { %4058 = vmatmul.mubr.msk.f32.gmra.mrb[12].mxu0 %vm95_vm0, %v33_v19 }
  0x25   :  { %4060 = vmatprep.mubr.msk.f32.mxu0 %vm95_vm0, %v34_v20 }
  0x28   :  { %4061 = vmatmul.mubr.msk.f32.gmra.mrb[14].mxu0 %vm95_vm0, %v35_v21 }
  0x29   :  { %4063 = vmatprep.mubr.msk.f32.mxu0 %vm95_vm0, %v36_v22 }
  0x2c   :  { %4064 = vmatmul.mubr.msk.f32.gmra.mrb[16].mxu0 %vm95_vm0, %v37_v23 }
  0x2d   :  { %4066 = vmatprep.mubr.msk.f32.mxu0 %vm95_vm0, %v38_v24 }
  0x30   :  { %4067 = vmatmul.mubr.msk.f32.gmra.mrb[18].mxu0 %vm95_vm0, %v39_v25 }
  0x31   :  { %4069 = vmatprep.mubr.msk.f32.mxu0 %vm95_vm0, %v40_v26 }
  0x34   :  { %4070 = vmatmul.mubr.msk.f32.gmra.mrb[20].mxu0 %vm95_vm0, %v41_v27 }
  0x35   :  { %4072 = vmatprep.mubr.msk.f32.mxu0 %vm95_vm0, %v42_v28 }
  0x38   :  { %4073 = vmatmul.mubr.msk.f32.gmra.mrb[22].mxu0 %vm95_vm0, %v43_v29 }
  0x39   :  { %4075 = vmatprep.mubr.msk.f32.mxu0 %vm95_vm0, %v44_v30 }
  0x3c   :  { %4076 = vmatmul.mubr.msk.f32.gmra.mrb[24].mxu0 %vm95_vm0, %v45_v31 }
  0x3d   :  { %4078 = vmatprep.mubr.msk.f32.mxu0 %vm95_vm0, %v46_v32 }
  0x40   :  { %4079 = vmatmul.mubr.msk.f32.gmra.mrb[26].mxu0 %vm95_vm0, %v47_v33 }
  0x41   :  { %4081 = vmatprep.mubr.msk.f32.mxu0 %vm95_vm0, %v48_v34 }
  0x44   :  { %4082 = vmatmul.mubr.msk.f32.gmra.mrb[28].mxu0 %vm95_vm0, %v49_v35 }
  0x45   :  { %4084 = vmatprep.mubr.msk.f32.mxu0 %vm95_vm0, %v50_v36 }
  0x48   :  { %4085 = vmatmul.mubr.msk.f32.gmra.mrb[30].mxu0 %vm95_vm0, %v51_v37 }
  0x49   :  { %4087 = vmatprep.mubr.msk.f32.mxu0 %vm95_vm0, %v52_v38 }
  0x4c   :  { %4088 = vmatmul.mubr.msk.f32.gmra.mrb[32].mxu0 %vm95_vm0, %v53_v39 }
  0x4d   :  { %4090 = vmatprep.mubr.msk.f32.mxu0 %vm95_vm0, %v54_v40 }
  0x50   :  { %4091 = vmatmul.mubr.msk.f32.gmra.mrb[34].mxu0 %vm95_vm0, %v55_v41 }
  0x51   :  { %4093 = vmatprep.mubr.msk.f32.mxu0 %vm95_vm0, %v56_v42 }
  0x54   :  { %4094 = vmatmul.mubr.msk.f32.gmra.mrb[36].mxu0 %vm95_vm0, %v57_v43 }
  0x55   :  { %4096 = vmatprep.mubr.msk.f32.mxu0 %vm95_vm0, %v58_v44 }
  0x58   :  { %4097 = vmatmul.mubr.msk.f32.gmra.mrb[38].mxu0 %vm95_vm0, %v59_v45 }
  0x59   :  { %4099 = vmatprep.mubr.msk.f32.mxu0 %vm95_vm0, %v60_v46 }
  0x5c   :  { %4100 = vmatmul.mubr.msk.f32.gmra.mrb[40].mxu0 %vm95_vm0, %v61_v47 }
  0x5d   :  { %4102 = vmatprep.mubr.msk.f32.mxu0 %vm95_vm0, %v62_v48 }
  0x60   :  { %4103 = vmatmul.mubr.msk.f32.gmra.mrb[42].mxu0 %vm95_vm0, %v63_v49 }
  0x61   :  { %4105 = vmatprep.mubr.msk.f32.mxu0 %vm95_vm0, %v64_v50 }
  0x64   :  { %4106 = vmatmul.mubr.msk.f32.gmra.mrb[44].mxu0 %vm95_vm0, %v65_v51 }
  0x65   :  { %4108 = vmatprep.mubr.msk.f32.mxu0 %vm95_vm0, %v66_v52 }
  0x68   :  { %4109 = vmatmul.mubr.msk.f32.gmra.mrb[46].mxu0 %vm95_vm0, %v67_v53 }
  0x69   :  { %4111 = vmatprep.mubr.msk.f32.mxu0 %vm95_vm0, %v68_v54 }
  0x6c   :  { %4112 = vmatmul.mubr.msk.f32.gmra.mrb[48].mxu0 %vm95_vm0, %v69_v55 }
  0x6d   :  { %4114 = vmatprep.mubr.msk.f32.mxu0 %vm95_vm0, %v70_v56 }
  0x70   :  { %4115 = vmatmul.mubr.msk.f32.gmra.mrb[50].mxu0 %vm95_vm0, %v71_v60 }
  0x71   :  { %4117 = vmatprep.mubr.msk.f32.mxu0 %vm95_vm0, %v72_v61 }
  0x74   :  { %4118 = vmatmul.mubr.msk.f32.gmra.mrb[52].mxu0 %vm95_vm0, %v73_v1 }
  0x75   :  { %4120 = vmatprep.mubr.msk.f32.mxu0 %vm95_vm0, %v74_v2 }
  0x78   :  { %4121 = vmatmul.mubr.msk.f32.gmra.mrb[54].mxu0 %vm95_vm0, %v75_v3 }
  0x79   :  { %4123 = vmatprep.mubr.msk.f32.mxu0 %vm95_vm0, %v76_v4 }
  0x7c   :  { %4124 = vmatmul.mubr.msk.f32.gmra.mrb[56].mxu0 %vm95_vm0, %v77_v5 }
  0x7d   :  { %4126 = vmatprep.mubr.msk.f32.mxu0 %vm95_vm0, %v78_v6 }
  0x80   :  { %4127 = vmatmul.mubr.msk.f32.gmra.mrb[58].mxu0 %vm95_vm0, %v79_v7 }
  0x81   :  { %4129 = vmatprep.mubr.msk.f32.mxu0 %vm95_vm0, %v80_v8 }
  0x84   :  { %4130 = vmatmul.mubr.msk.f32.gmra.mrb[60].mxu0 %vm95_vm0, %v81_v9 }
  0x85   :  { %4132 = vmatprep.mubr.msk.f32.mxu0 %vm95_vm0, %v82_v10 }
  0x88   :  { %4133 = vmatmul.mubr.msk.f32.gmra.mrb[62].mxu0 %vm95_vm0, %v83_v11 }
  0xdf   :  { %v4041_v13 = vpop.f32.mrb[0].mxu0 }
  0xe0   :  { %v360_v14 = vadd.f32 %v4041_v13, %v4953_v12  ;;  %v354_v15 = vpop.f32.mrb[1].mxu0 }
  0xe1   :  { %v355_v16 = vadd.f32 %v4953_v12, %v354_v15 }
  0xe2   :  { %v738_v17 = vmin.f32 %v360_v14, 0.0  ;;  %vm674_vm2 = vcmp.gt.f32.partialorder %v360_v14, 0.0 }
  0xe3   :  { %v737_v18 = vmin.f32 %v355_v16, 0.0  ;;  %v4044_v19 = vpop.f32.mrb[2].mxu0  ;;  %vm673_vm1 = vcmp.gt.f32.partialorder %v355_v16, 0.0 }
  0xe4   :  { %v803_v20 = vmul.f32 1.442695, %v738_v17  ;;  %v4958_v21 = vadd.f32 %v4044_v19, %v4953_v12  ;;  %v364_v22 = vpop.f32.mrb[3].mxu0 }
  0xe5   :  { %v801_v23 = vmul.f32 1.442695, %v737_v18  ;;  %v4961_v24 = vadd.f32 %v4953_v12, %v364_v22 }
  0xe6   :  { %4255 = vpow2.f32 %v803_v20  ;;  %v740_v25 = vmin.f32 %v4958_v21, 0.0  ;;  %vm676_vm4 = vcmp.gt.f32.partialorder %v4958_v21, 0.0 }
  0xe7   :  { %4257 = vpow2.f32 %v801_v23  ;;  %v739_v26 = vmin.f32 %v4961_v24, 0.0  ;;  %v4047_v27 = vpop.f32.mrb[4].mxu0  ;;  %vm675_vm3 = vcmp.gt.f32.partialorder %v4961_v24, 0.0 }
  0xe8   :  { %v807_v28 = vmul.f32 1.442695, %v740_v25  ;;  %v4966_v29 = vadd.f32 %v4047_v27, %v4953_v12  ;;  %v374_v30 = vpop.f32.mrb[5].mxu0 }
  0xe9   :  { %v805_v31 = vmul.f32 1.442695, %v739_v26  ;;  %v4969_v32 = vadd.f32 %v4953_v12, %v374_v30 }
  0xea   :  { %4259 = vpow2.f32 %v807_v28  ;;  %v742_v33 = vmin.f32 %v4966_v29, 0.0  ;;  %vm678_vm6 = vcmp.gt.f32.partialorder %v4966_v29, 0.0 }
  0xeb   :  { %4261 = vpow2.f32 %v805_v31  ;;  %v741_v34 = vmin.f32 %v4969_v32, 0.0  ;;  %v4050_v35 = vpop.f32.mrb[6].mxu0  ;;  %vm677_vm5 = vcmp.gt.f32.partialorder %v4969_v32, 0.0 }
  0xec   :  { %v811_v36 = vmul.f32 1.442695, %v742_v33  ;;  %v4974_v37 = vadd.f32 %v4050_v35, %v4953_v12  ;;  %v384_v38 = vpop.f32.mrb[7].mxu0 }
  0xed   :  { %v809_v39 = vmul.f32 1.442695, %v741_v34  ;;  %v4977_v40 = vadd.f32 %v4953_v12, %v384_v38 }
  0xee   :  { %4263 = vpow2.f32 %v811_v36  ;;  %v744_v41 = vmin.f32 %v4974_v37, 0.0  ;;  %vm680_vm8 = vcmp.gt.f32.partialorder %v4974_v37, 0.0 }
  0xef   :  { %4265 = vpow2.f32 %v809_v39  ;;  %v743_v42 = vmin.f32 %v4977_v40, 0.0  ;;  %v4053_v43 = vpop.f32.mrb[8].mxu0  ;;  %vm679_vm7 = vcmp.gt.f32.partialorder %v4977_v40, 0.0 }
  0xf0   :  { %v4256_v44 = vpop.eup %4255  ;;  %v815_v45 = vmul.f32 1.442695, %v744_v41  ;;  %v4982_v46 = vadd.f32 %v4053_v43, %v4953_v12  ;;  %v394_v47 = vpop.f32.mrb[9].mxu0 }
  0xf1   :  { %v4258_v48 = vpop.eup %4257  ;;  %v813_v49 = vmul.f32 1.442695, %v743_v42  ;;  %v4985_v50 = vadd.f32 %v4953_v12, %v394_v47  ;;  %v3575_v51 = vadd.f32 -1.0, %v4256_v44 }
  0xf2   :  { %4267 = vpow2.f32 %v815_v45  ;;  %v746_v52 = vmin.f32 %v4982_v46, 0.0  ;;  %v3574_v53 = vadd.f32 -1.0, %v4258_v48  ;;  %vm682_vm10 = vcmp.gt.f32.partialorder %v4982_v46, 0.0 }
  0xf3   :  { %4269 = vpow2.f32 %v813_v49  ;;  %v745_v54 = vmin.f32 %v4985_v50, 0.0  ;;  %v4056_v55 = vpop.f32.mrb[10].mxu0  ;;  %v994_v0 = vsel %vm674_vm2, %v360_v14, %v3575_v51  ;;  %vm681_vm9 = vcmp.gt.f32.partialorder %v4985_v50, 0.0 }
  0xf4   :  { %v4260_v56 = vpop.eup %4259  ;;  %v819_v57 = vmul.f32 1.442695, %v746_v52  ;;  %v4990_v58 = vadd.f32 %v4056_v55, %v4953_v12  ;;  %v404_v59 = vpop.f32.mrb[11].mxu0  ;;  %v993_v60 = vsel %vm673_vm1, %v355_v16, %v3574_v53 }
  0xf5   :  { %v4262_v61 = vpop.eup %4261  ;;  %v817_v62 = vmul.f32 1.442695, %v745_v54  ;;  %v4993_v63 = vadd.f32 %v4953_v12, %v404_v59  ;;  %4143 = vmatprep.mubr.msk.f32.mxu1 %vm95_vm0, %v993_v60  ;;  %v3577_v1 = vadd.f32 -1.0, %v4260_v56 }
  0xf6   :  { %4271 = vpow2.f32 %v819_v57  ;;  %v748_v2 = vmin.f32 %v4990_v58, 0.0  ;;  %4144 = vmatmul.mubr.msk.f32.vlgmr.msra.gmra.mrb[0].mxu1 %vm95_vm0, %v994_v0  ;;  %v3576_v3 = vadd.f32 -1.0, %v4262_v61  ;;  %vm684_vm12 = vcmp.gt.f32.partialorder %v4990_v58, 0.0 }
  0xf7   :  { %4273 = vpow2.f32 %v817_v62  ;;  %v747_v4 = vmin.f32 %v4993_v63, 0.0  ;;  %v4059_v5 = vpop.f32.mrb[12].mxu0  ;;  %v996_v15 = vsel %vm676_vm4, %v4958_v21, %v3577_v1  ;;  %vm683_vm11 = vcmp.gt.f32.partialorder %v4993_v63, 0.0 }
  0xf8   :  { %v4264_v6 = vpop.eup %4263  ;;  %v823_v7 = vmul.f32 1.442695, %v748_v2  ;;  %v5002_v8 = vadd.f32 %v4059_v5, %v4953_v12  ;;  %v414_v9 = vpop.f32.mrb[13].mxu0  ;;  %v995_v10 = vsel %vm675_vm3, %v4961_v24, %v3576_v3 }
  0xf9   :  { %v4266_v11 = vpop.eup %4265  ;;  %v821_v13 = vmul.f32 1.442695, %v747_v4  ;;  %v5006_v14 = vadd.f32 %v4953_v12, %v414_v9  ;;  %4146 = vmatprep.mubr.msk.f32.mxu1 %vm95_vm0, %v995_v10  ;;  %v3579_v16 = vadd.f32 -1.0, %v4264_v6 }
  0xfa   :  { %4275 = vpow2.f32 %v823_v7  ;;  %v750_v17 = vmin.f32 %v5002_v8, 0.0  ;;  %4147 = vmatmul.mubr.msk.f32.gmra.mrb[2].mxu1 %vm95_vm0, %v996_v15  ;;  %v3578_v18 = vadd.f32 -1.0, %v4266_v11  ;;  %vm686_vm14 = vcmp.gt.f32.partialorder %v5002_v8, 0.0 }
  0xfb   :  { %4277 = vpow2.f32 %v821_v13  ;;  %v749_v19 = vmin.f32 %v5006_v14, 0.0  ;;  %v4062_v20 = vpop.f32.mrb[14].mxu0  ;;  %v998_v30 = vsel %vm678_vm6, %v4966_v29, %v3579_v16  ;;  %vm685_vm13 = vcmp.gt.f32.partialorder %v5006_v14, 0.0 }
  0xfc   :  { %v4268_v22 = vpop.eup %4267  ;;  %v827_v23 = vmul.f32 1.442695, %v750_v17  ;;  %v5016_v24 = vadd.f32 %v4062_v20, %v4953_v12  ;;  %v424_v21 = vpop.f32.mrb[15].mxu0  ;;  %v997_v25 = vsel %vm677_vm5, %v4969_v32, %v3578_v18 }
  0xfd   :  { %v4270_v26 = vpop.eup %4269  ;;  %v825_v27 = vmul.f32 1.442695, %v749_v19  ;;  %v5020_v28 = vadd.f32 %v4953_v12, %v424_v21  ;;  %4149 = vmatprep.mubr.msk.f32.mxu1 %vm95_vm0, %v997_v25  ;;  %v3581_v31 = vadd.f32 -1.0, %v4268_v22 }
  0xfe   :  { %4279 = vpow2.f32 %v827_v23  ;;  %v752_v33 = vmin.f32 %v5016_v24, 0.0  ;;  %4150 = vmatmul.mubr.msk.f32.gmra.mrb[4].mxu1 %vm95_vm0, %v998_v30  ;;  %v3580_v34 = vadd.f32 -1.0, %v4270_v26  ;;  %vm688_vm1 = vcmp.gt.f32.partialorder %v5016_v24, 0.0 }
  0xff   :  { %4281 = vpow2.f32 %v825_v27  ;;  %v751_v32 = vmin.f32 %v5020_v28, 0.0  ;;  %v4065_v35 = vpop.f32.mrb[16].mxu0  ;;  %v1000_v45 = vsel %vm680_vm8, %v4974_v37, %v3581_v31  ;;  %vm687_vm15 = vcmp.gt.f32.partialorder %v5020_v28, 0.0 }
 0x100   :  { %v4272_v36 = vpop.eup %4271  ;;  %v831_v38 = vmul.f32 1.442695, %v752_v33  ;;  %v5030_v39 = vadd.f32 %v4065_v35, %v4953_v12  ;;  %v434_v29 = vpop.f32.mrb[17].mxu0  ;;  %v999_v41 = vsel %vm679_vm7, %v4977_v40, %v3580_v34 }
 0x101   :  { %v4274_v42 = vpop.eup %4273  ;;  %v829_v43 = vmul.f32 1.442695, %v751_v32  ;;  %v5034_v44 = vadd.f32 %v4953_v12, %v434_v29  ;;  %4152 = vmatprep.mubr.msk.f32.mxu1 %vm95_vm0, %v999_v41  ;;  %v3583_v47 = vadd.f32 -1.0, %v4272_v36 }
 0x102   :  { %4283 = vpow2.f32 %v831_v38  ;;  %v754_v48 = vmin.f32 %v5030_v39, 0.0  ;;  %4153 = vmatmul.mubr.msk.f32.gmra.mrb[6].mxu1 %vm95_vm0, %v1000_v45  ;;  %v3582_v49 = vadd.f32 -1.0, %v4274_v42  ;;  %vm690_vm3 = vcmp.gt.f32.partialorder %v5030_v39, 0.0 }
 0x103   :  { %4285 = vpow2.f32 %v829_v43  ;;  %v753_v40 = vmin.f32 %v5034_v44, 0.0  ;;  %v4068_v51 = vpop.f32.mrb[18].mxu0  ;;  %v1002_v60 = vsel %vm682_vm10, %v4982_v46, %v3583_v47  ;;  %vm689_vm2 = vcmp.gt.f32.partialorder %v5034_v44, 0.0 }
 0x104   :  { %v4276_v52 = vpop.eup %4275  ;;  %v835_v53 = vmul.f32 1.442695, %v754_v48  ;;  %v5044_v54 = vadd.f32 %v4068_v51, %v4953_v12  ;;  %v444_v37 = vpop.f32.mrb[19].mxu0  ;;  %v1001_v55 = vsel %vm681_vm9, %v4985_v50, %v3582_v49 }
 0x105   :  { %v4278_v56 = vpop.eup %4277  ;;  %v833_v57 = vmul.f32 1.442695, %v753_v40  ;;  %v5048_v59 = vadd.f32 %v4953_v12, %v444_v37  ;;  %4155 = vmatprep.mubr.msk.f32.mxu1 %vm95_vm0, %v1001_v55  ;;  %v3585_v61 = vadd.f32 -1.0, %v4276_v52 }
 0x106   :  { %4287 = vpow2.f32 %v835_v53  ;;  %v756_v62 = vmin.f32 %v5044_v54, 0.0  ;;  %4156 = vmatmul.mubr.msk.f32.gmra.mrb[8].mxu1 %vm95_vm0, %v1002_v60  ;;  %v3584_v0 = vadd.f32 -1.0, %v4278_v56  ;;  %vm692_vm5 = vcmp.gt.f32.partialorder %v5044_v54, 0.0 }
 0x107   :  { %4289 = vpow2.f32 %v833_v57  ;;  %v755_v50 = vmin.f32 %v5048_v59, 0.0  ;;  %v4071_v1 = vpop.f32.mrb[20].mxu0  ;;  %v1004_v10 = vsel %vm684_vm12, %v4990_v58, %v3585_v61  ;;  %vm691_vm4 = vcmp.gt.f32.partialorder %v5048_v59, 0.0 }
 0x108   :  { %v4280_v2 = vpop.eup %4279  ;;  %v839_v3 = vmul.f32 1.442695, %v756_v62  ;;  %v5058_v4 = vadd.f32 %v4071_v1, %v4953_v12  ;;  %v454_v46 = vpop.f32.mrb[21].mxu0  ;;  %v1003_v5 = vsel %vm683_vm11, %v4993_v63, %v3584_v0 }
 0x109   :  { %v4282_v6 = vpop.eup %4281  ;;  %v837_v7 = vmul.f32 1.442695, %v755_v50  ;;  %v5062_v9 = vadd.f32 %v4953_v12, %v454_v46  ;;  %4158 = vmatprep.mubr.msk.f32.mxu1 %vm95_vm0, %v1003_v5  ;;  %v3587_v11 = vadd.f32 -1.0, %v4280_v2 }
 0x10a   :  { %4291 = vpow2.f32 %v839_v3  ;;  %v758_v13 = vmin.f32 %v5058_v4, 0.0  ;;  %4159 = vmatmul.mubr.msk.f32.gmra.mrb[10].mxu1 %vm95_vm0, %v1004_v10  ;;  %v3586_v15 = vadd.f32 -1.0, %v4282_v6  ;;  %vm694_vm7 = vcmp.gt.f32.partialorder %v5058_v4, 0.0 }
 0x10b   :  { %4293 = vpow2.f32 %v837_v7  ;;  %v757_v63 = vmin.f32 %v5062_v9, 0.0  ;;  %v4074_v16 = vpop.f32.mrb[22].mxu0  ;;  %v1006_v25 = vsel %vm686_vm14, %v5002_v8, %v3587_v11  ;;  %vm693_vm6 = vcmp.gt.f32.partialorder %v5062_v9, 0.0 }
 0x10c   :  { %v4284_v17 = vpop.eup %4283  ;;  %v843_v18 = vmul.f32 1.442695, %v758_v13  ;;  %v5072_v19 = vadd.f32 %v4074_v16, %v4953_v12  ;;  %v464_v58 = vpop.f32.mrb[23].mxu0  ;;  %v1005_v20 = vsel %vm685_vm13, %v5006_v14, %v3586_v15 }
 0x10d   :  { %v4286_v22 = vpop.eup %4285  ;;  %v841_v23 = vmul.f32 1.442695, %v757_v63  ;;  %v5076_v21 = vadd.f32 %v4953_v12, %v464_v58  ;;  %4161 = vmatprep.mubr.msk.f32.mxu1 %vm95_vm0, %v1005_v20  ;;  %v3589_v26 = vadd.f32 -1.0, %v4284_v17 }
 0x10e   :  { %4295 = vpow2.f32 %v843_v18  ;;  %v760_v27 = vmin.f32 %v5072_v19, 0.0  ;;  %4162 = vmatmul.mubr.msk.f32.gmra.mrb[12].mxu1 %vm95_vm0, %v1006_v25  ;;  %v3588_v30 = vadd.f32 -1.0, %v4286_v22  ;;  %vm696_vm9 = vcmp.gt.f32.partialorder %v5072_v19, 0.0 }
 0x10f   :  { %4297 = vpow2.f32 %v841_v23  ;;  %v759_v14 = vmin.f32 %v5076_v21, 0.0  ;;  %v4077_v31 = vpop.f32.mrb[24].mxu0  ;;  %v1008_v41 = vsel %vm688_vm1, %v5016_v24, %v3589_v26  ;;  %vm695_vm8 = vcmp.gt.f32.partialorder %v5076_v21, 0.0 }
 0x110   :  { %v4288_v33 = vpop.eup %4287  ;;  %v847_v34 = vmul.f32 1.442695, %v760_v27  ;;  %v5086_v32 = vadd.f32 %v4077_v31, %v4953_v12  ;;  %v474_v8 = vpop.f32.mrb[25].mxu0  ;;  %v1007_v35 = vsel %vm687_vm15, %v5020_v28, %v3588_v30 }
 0x111   :  { %v4290_v36 = vpop.eup %4289  ;;  %v845_v38 = vmul.f32 1.442695, %v759_v14  ;;  %v5090_v29 = vadd.f32 %v4953_v12, %v474_v8  ;;  %4164 = vmatprep.mubr.msk.f32.mxu1 %vm95_vm0, %v1007_v35  ;;  %v3591_v42 = vadd.f32 -1.0, %v4288_v33 }
 0x112   :  { %4299 = vpow2.f32 %v847_v34  ;;  %v762_v43 = vmin.f32 %v5086_v32, 0.0  ;;  %4165 = vmatmul.mubr.msk.f32.gmra.mrb[14].mxu1 %vm95_vm0, %v1008_v41  ;;  %v3590_v45 = vadd.f32 -1.0, %v4290_v36  ;;  %vm698_vm11 = vcmp.gt.f32.partialorder %v5086_v32, 0.0 }
 0x113   :  { %4301 = vpow2.f32 %v845_v38  ;;  %v761_v28 = vmin.f32 %v5090_v29, 0.0  ;;  %v4080_v47 = vpop.f32.mrb[26].mxu0  ;;  %v1010_v55 = vsel %vm690_vm3, %v5030_v39, %v3591_v42  ;;  %vm697_vm10 = vcmp.gt.f32.partialorder %v5090_v29, 0.0 }
 0x114   :  { %v4292_v48 = vpop.eup %4291  ;;  %v851_v49 = vmul.f32 1.442695, %v762_v43  ;;  %v5100_v40 = vadd.f32 %v4080_v47, %v4953_v12  ;;  %v484_v24 = vpop.f32.mrb[27].mxu0  ;;  %v1009_v51 = vsel %vm689_vm2, %v5034_v44, %v3590_v45 }
 0x115   :  { %v4294_v52 = vpop.eup %4293  ;;  %v849_v53 = vmul.f32 1.442695, %v761_v28  ;;  %v5104_v37 = vadd.f32 %v4953_v12, %v484_v24  ;;  %4167 = vmatprep.mubr.msk.f32.mxu1 %vm95_vm0, %v1009_v51  ;;  %v3593_v56 = vadd.f32 -1.0, %v4292_v48 }
 0x116   :  { %4303 = vpow2.f32 %v851_v49  ;;  %v764_v57 = vmin.f32 %v5100_v40, 0.0  ;;  %4168 = vmatmul.mubr.msk.f32.gmra.mrb[16].mxu1 %vm95_vm0, %v1010_v55  ;;  %v3592_v60 = vadd.f32 -1.0, %v4294_v52  ;;  %vm700_vm13 = vcmp.gt.f32.partialorder %v5100_v40, 0.0 }
 0x117   :  { %4305 = vpow2.f32 %v849_v53  ;;  %v763_v44 = vmin.f32 %v5104_v37, 0.0  ;;  %v4083_v61 = vpop.f32.mrb[28].mxu0  ;;  %v1012_v5 = vsel %vm692_vm5, %v5044_v54, %v3593_v56  ;;  %vm699_vm12 = vcmp.gt.f32.partialorder %v5104_v37, 0.0 }
 0x118   :  { %v4296_v62 = vpop.eup %4295  ;;  %v855_v0 = vmul.f32 1.442695, %v764_v57  ;;  %v5114_v50 = vadd.f32 %v4083_v61, %v4953_v12  ;;  %v494_v39 = vpop.f32.mrb[29].mxu0  ;;  %v1011_v1 = vsel %vm691_vm4, %v5048_v59, %v3592_v60 }
 0x119   :  { %v4298_v2 = vpop.eup %4297  ;;  %v853_v3 = vmul.f32 1.442695, %v763_v44  ;;  %v5118_v46 = vadd.f32 %v4953_v12, %v494_v39  ;;  %4170 = vmatprep.mubr.msk.f32.mxu1 %vm95_vm0, %v1011_v1  ;;  %v3595_v6 = vadd.f32 -1.0, %v4296_v62 }
 0x11a   :  { %4307 = vpow2.f32 %v855_v0  ;;  %v766_v7 = vmin.f32 %v5114_v50, 0.0  ;;  %4171 = vmatmul.mubr.msk.f32.gmra.mrb[18].mxu1 %vm95_vm0, %v1012_v5  ;;  %v3594_v10 = vadd.f32 -1.0, %v4298_v2  ;;  %vm702_vm15 = vcmp.gt.f32.partialorder %v5114_v50, 0.0 }
 0x11b   :  { %4309 = vpow2.f32 %v853_v3  ;;  %v765_v59 = vmin.f32 %v5118_v46, 0.0  ;;  %v4086_v11 = vpop.f32.mrb[30].mxu0  ;;  %v1014_v20 = vsel %vm694_vm7, %v5058_v4, %v3595_v6  ;;  %vm701_vm14 = vcmp.gt.f32.partialorder %v5118_v46, 0.0 }
 0x11c   :  { %v4300_v13 = vpop.eup %4299  ;;  %v859_v15 = vmul.f32 1.442695, %v766_v7  ;;  %v5128_v63 = vadd.f32 %v4086_v11, %v4953_v12  ;;  %v504_v54 = vpop.f32.mrb[31].mxu0  ;;  %v1013_v16 = vsel %vm693_vm6, %v5062_v9, %v3594_v10 }
 0x11d   :  { %v4302_v17 = vpop.eup %4301  ;;  %v857_v18 = vmul.f32 1.442695, %v765_v59  ;;  %v5132_v58 = vadd.f32 %v4953_v12, %v504_v54  ;;  %4173 = vmatprep.mubr.msk.f32.mxu1 %vm95_vm0, %v1013_v16  ;;  %v3597_v22 = vadd.f32 -1.0, %v4300_v13 }
 0x11e   :  { %4311 = vpow2.f32 %v859_v15  ;;  %v768_v23 = vmin.f32 %v5128_v63, 0.0  ;;  %4174 = vmatmul.mubr.msk.f32.gmra.mrb[20].mxu1 %vm95_vm0, %v1014_v20  ;;  %v3596_v25 = vadd.f32 -1.0, %v4302_v17  ;;  %vm704_vm2 = vcmp.gt.f32.partialorder %v5128_v63, 0.0 }
 0x11f   :  { %4313 = vpow2.f32 %v857_v18  ;;  %v767_v9 = vmin.f32 %v5132_v58, 0.0  ;;  %v4089_v26 = vpop.f32.mrb[32].mxu0  ;;  %v1016_v35 = vsel %vm696_vm9, %v5072_v19, %v3597_v22  ;;  %vm703_vm1 = vcmp.gt.f32.partialorder %v5132_v58, 0.0 }
 0x120   :  { %v4304_v27 = vpop.eup %4303  ;;  %v863_v30 = vmul.f32 1.442695, %v768_v23  ;;  %v5142_v14 = vadd.f32 %v4089_v26, %v4953_v12  ;;  %v514_v4 = vpop.f32.mrb[33].mxu0  ;;  %v1015_v31 = vsel %vm695_vm8, %v5076_v21, %v3596_v25 }
 0x121   :  { %v4306_v33 = vpop.eup %4305  ;;  %v861_v34 = vmul.f32 1.442695, %v767_v9  ;;  %v5146_v8 = vadd.f32 %v4953_v12, %v514_v4  ;;  %4176 = vmatprep.mubr.msk.f32.mxu1 %vm95_vm0, %v1015_v31  ;;  %v3599_v36 = vadd.f32 -1.0, %v4304_v27 }
 0x122   :  { %4315 = vpow2.f32 %v863_v30  ;;  %v770_v38 = vmin.f32 %v5142_v14, 0.0  ;;  %4177 = vmatmul.mubr.msk.f32.gmra.mrb[22].mxu1 %vm95_vm0, %v1016_v35  ;;  %v3598_v41 = vadd.f32 -1.0, %v4306_v33  ;;  %vm706_vm4 = vcmp.gt.f32.partialorder %v5142_v14, 0.0 }
 0x123   :  { %4317 = vpow2.f32 %v861_v34  ;;  %v769_v21 = vmin.f32 %v5146_v8, 0.0  ;;  %v4092_v42 = vpop.f32.mrb[34].mxu0  ;;  %v1018_v51 = vsel %vm698_vm11, %v5086_v32, %v3599_v36  ;;  %vm705_vm3 = vcmp.gt.f32.partialorder %v5146_v8, 0.0 }
 0x124   :  { %v4308_v43 = vpop.eup %4307  ;;  %v867_v45 = vmul.f32 1.442695, %v770_v38  ;;  %v5156_v28 = vadd.f32 %v4092_v42, %v4953_v12  ;;  %v524_v19 = vpop.f32.mrb[35].mxu0  ;;  %v1017_v47 = vsel %vm697_vm10, %v5090_v29, %v3598_v41 }
 0x125   :  { %v4310_v48 = vpop.eup %4309  ;;  %v865_v49 = vmul.f32 1.442695, %v769_v21  ;;  %v5160_v24 = vadd.f32 %v4953_v12, %v524_v19  ;;  %4179 = vmatprep.mubr.msk.f32.mxu1 %vm95_vm0, %v1017_v47  ;;  %v3601_v52 = vadd.f32 -1.0, %v4308_v43 }
 0x126   :  { %4319 = vpow2.f32 %v867_v45  ;;  %v772_v53 = vmin.f32 %v5156_v28, 0.0  ;;  %4180 = vmatmul.mubr.msk.f32.gmra.mrb[24].mxu1 %vm95_vm0, %v1018_v51  ;;  %v3600_v55 = vadd.f32 -1.0, %v4310_v48  ;;  %vm708_vm6 = vcmp.gt.f32.partialorder %v5156_v28, 0.0 }
 0x127   :  { %4321 = vpow2.f32 %v865_v49  ;;  %v771_v29 = vmin.f32 %v5160_v24, 0.0  ;;  %v4095_v56 = vpop.f32.mrb[36].mxu0  ;;  %v1020_v1 = vsel %vm700_vm13, %v5100_v40, %v3601_v52  ;;  %vm707_vm5 = vcmp.gt.f32.partialorder %v5160_v24, 0.0 }
 0x128   :  { %v4312_v57 = vpop.eup %4311  ;;  %v871_v60 = vmul.f32 1.442695, %v772_v53  ;;  %v5170_v44 = vadd.f32 %v4095_v56, %v4953_v12  ;;  %v534_v32 = vpop.f32.mrb[37].mxu0  ;;  %v1019_v61 = vsel %vm699_vm12, %v5104_v37, %v3600_v55 }
 0x129   :  { %v4314_v62 = vpop.eup %4313  ;;  %v869_v0 = vmul.f32 1.442695, %v771_v29  ;;  %v5174_v39 = vadd.f32 %v4953_v12, %v534_v32  ;;  %4182 = vmatprep.mubr.msk.f32.mxu1 %vm95_vm0, %v1019_v61  ;;  %v3603_v2 = vadd.f32 -1.0, %v4312_v57 }
 0x12a   :  { %4323 = vpow2.f32 %v871_v60  ;;  %v774_v3 = vmin.f32 %v5170_v44, 0.0  ;;  %4183 = vmatmul.mubr.msk.f32.gmra.mrb[26].mxu1 %vm95_vm0, %v1020_v1  ;;  %v3602_v5 = vadd.f32 -1.0, %v4314_v62  ;;  %vm710_vm8 = vcmp.gt.f32.partialorder %v5170_v44, 0.0 }
 0x12b   :  { %4325 = vpow2.f32 %v869_v0  ;;  %v773_v37 = vmin.f32 %v5174_v39, 0.0  ;;  %v4098_v6 = vpop.f32.mrb[38].mxu0  ;;  %v1022_v16 = vsel %vm702_vm15, %v5114_v50, %v3603_v2  ;;  %vm709_vm7 = vcmp.gt.f32.partialorder %v5174_v39, 0.0 }
 0x12c   :  { %v4316_v7 = vpop.eup %4315  ;;  %v875_v10 = vmul.f32 1.442695, %v774_v3  ;;  %v5184_v59 = vadd.f32 %v4098_v6, %v4953_v12  ;;  %v544_v40 = vpop.f32.mrb[39].mxu0  ;;  %v1021_v11 = vsel %vm701_vm14, %v5118_v46, %v3602_v5 }
 0x12d   :  { %v4318_v13 = vpop.eup %4317  ;;  %v873_v15 = vmul.f32 1.442695, %v773_v37  ;;  %v5188_v54 = vadd.f32 %v4953_v12, %v544_v40  ;;  %4185 = vmatprep.mubr.msk.f32.mxu1 %vm95_vm0, %v1021_v11  ;;  %v3605_v17 = vadd.f32 -1.0, %v4316_v7 }
 0x12e   :  { %4327 = vpow2.f32 %v875_v10  ;;  %v776_v18 = vmin.f32 %v5184_v59, 0.0  ;;  %4186 = vmatmul.mubr.msk.f32.gmra.mrb[28].mxu1 %vm95_vm0, %v1022_v16  ;;  %v3604_v20 = vadd.f32 -1.0, %v4318_v13  ;;  %vm712_vm10 = vcmp.gt.f32.partialorder %v5184_v59, 0.0 }
 0x12f   :  { %4329 = vpow2.f32 %v873_v15  ;;  %v775_v46 = vmin.f32 %v5188_v54, 0.0  ;;  %v4101_v22 = vpop.f32.mrb[40].mxu0  ;;  %v1024_v31 = vsel %vm704_vm2, %v5128_v63, %v3605_v17  ;;  %vm711_vm9 = vcmp.gt.f32.partialorder %v5188_v54, 0.0 }
 0x130   :  { %v4320_v23 = vpop.eup %4319  ;;  %v879_v25 = vmul.f32 1.442695, %v776_v18  ;;  %v5198_v9 = vadd.f32 %v4101_v22, %v4953_v12  ;;  %v554_v50 = vpop.f32.mrb[41].mxu0  ;;  %v1023_v26 = vsel %vm703_vm1, %v5132_v58, %v3604_v20 }
 0x131   :  { %v4322_v27 = vpop.eup %4321  ;;  %v877_v30 = vmul.f32 1.442695, %v775_v46  ;;  %v5202_v4 = vadd.f32 %v4953_v12, %v554_v50  ;;  %4188 = vmatprep.mubr.msk.f32.mxu1 %vm95_vm0, %v1023_v26  ;;  %v3607_v33 = vadd.f32 -1.0, %v4320_v23 }
 0x132   :  { %4331 = vpow2.f32 %v879_v25  ;;  %v778_v34 = vmin.f32 %v5198_v9, 0.0  ;;  %4189 = vmatmul.mubr.msk.f32.gmra.mrb[30].mxu1 %vm95_vm0, %v1024_v31  ;;  %v3606_v35 = vadd.f32 -1.0, %v4322_v27  ;;  %vm714_vm12 = vcmp.gt.f32.partialorder %v5198_v9, 0.0 }
 0x133   :  { %4333 = vpow2.f32 %v877_v30  ;;  %v777_v58 = vmin.f32 %v5202_v4, 0.0  ;;  %v4104_v36 = vpop.f32.mrb[42].mxu0  ;;  %v1026_v47 = vsel %vm706_vm4, %v5142_v14, %v3607_v33  ;;  %vm713_vm11 = vcmp.gt.f32.partialorder %v5202_v4, 0.0 }
 0x134   :  { %v4324_v38 = vpop.eup %4323  ;;  %v883_v41 = vmul.f32 1.442695, %v778_v34  ;;  %v5212_v21 = vadd.f32 %v4104_v36, %v4953_v12  ;;  %v564_v63 = vpop.f32.mrb[43].mxu0  ;;  %v1025_v42 = vsel %vm705_vm3, %v5146_v8, %v3606_v35 }
 0x135   :  { %v4326_v43 = vpop.eup %4325  ;;  %v881_v45 = vmul.f32 1.442695, %v777_v58  ;;  %v5216_v19 = vadd.f32 %v4953_v12, %v564_v63  ;;  %4191 = vmatprep.mubr.msk.f32.mxu1 %vm95_vm0, %v1025_v42  ;;  %v3609_v48 = vadd.f32 -1.0, %v4324_v38 }
 0x136   :  { %4335 = vpow2.f32 %v883_v41  ;;  %v780_v49 = vmin.f32 %v5212_v21, 0.0  ;;  %4192 = vmatmul.mubr.msk.f32.gmra.mrb[32].mxu1 %vm95_vm0, %v1026_v47  ;;  %v3608_v51 = vadd.f32 -1.0, %v4326_v43  ;;  %vm716_vm14 = vcmp.gt.f32.partialorder %v5212_v21, 0.0 }
 0x137   :  { %4337 = vpow2.f32 %v881_v45  ;;  %v779_v8 = vmin.f32 %v5216_v19, 0.0  ;;  %v4107_v52 = vpop.f32.mrb[44].mxu0  ;;  %v1028_v61 = vsel %vm708_vm6, %v5156_v28, %v3609_v48  ;;  %vm715_vm13 = vcmp.gt.f32.partialorder %v5216_v19, 0.0 }
 0x138   :  { %v4328_v53 = vpop.eup %4327  ;;  %v887_v55 = vmul.f32 1.442695, %v780_v49  ;;  %v5226_v29 = vadd.f32 %v4107_v52, %v4953_v12  ;;  %v574_v14 = vpop.f32.mrb[45].mxu0  ;;  %v1027_v56 = vsel %vm707_vm5, %v5160_v24, %v3608_v51 }
 0x139   :  { %v4330_v57 = vpop.eup %4329  ;;  %v885_v60 = vmul.f32 1.442695, %v779_v8  ;;  %v5230_v32 = vadd.f32 %v4953_v12, %v574_v14  ;;  %4194 = vmatprep.mubr.msk.f32.mxu1 %vm95_vm0, %v1027_v56  ;;  %v3611_v62 = vadd.f32 -1.0, %v4328_v53 }
 0x13a   :  { %4339 = vpow2.f32 %v887_v55  ;;  %v782_v0 = vmin.f32 %v5226_v29, 0.0  ;;  %4195 = vmatmul.mubr.msk.f32.gmra.mrb[34].mxu1 %vm95_vm0, %v1028_v61  ;;  %v3610_v1 = vadd.f32 -1.0, %v4330_v57  ;;  %vm718_vm1 = vcmp.gt.f32.partialorder %v5226_v29, 0.0 }
 0x13b   :  { %4341 = vpow2.f32 %v885_v60  ;;  %v781_v24 = vmin.f32 %v5230_v32, 0.0  ;;  %v4110_v2 = vpop.f32.mrb[46].mxu0  ;;  %v1030_v11 = vsel %vm710_vm8, %v5170_v44, %v3611_v62  ;;  %vm717_vm15 = vcmp.gt.f32.partialorder %v5230_v32, 0.0 }
 0x13c   :  { %v4332_v3 = vpop.eup %4331  ;;  %v891_v5 = vmul.f32 1.442695, %v782_v0  ;;  %v5240_v37 = vadd.f32 %v4110_v2, %v4953_v12  ;;  %v584_v28 = vpop.f32.mrb[47].mxu0  ;;  %v1029_v6 = vsel %vm709_vm7, %v5174_v39, %v3610_v1 }
 0x13d   :  { %v4334_v7 = vpop.eup %4333  ;;  %v889_v10 = vmul.f32 1.442695, %v781_v24  ;;  %v5244_v40 = vadd.f32 %v4953_v12, %v584_v28  ;;  %4197 = vmatprep.mubr.msk.f32.mxu1 %vm95_vm0, %v1029_v6  ;;  %v3613_v13 = vadd.f32 -1.0, %v4332_v3 }
 0x13e   :  { %4343 = vpow2.f32 %v891_v5  ;;  %v784_v15 = vmin.f32 %v5240_v37, 0.0  ;;  %4198 = vmatmul.mubr.msk.f32.gmra.mrb[36].mxu1 %vm95_vm0, %v1030_v11  ;;  %v3612_v16 = vadd.f32 -1.0, %v4334_v7  ;;  %vm720_vm3 = vcmp.gt.f32.partialorder %v5240_v37, 0.0 }
 0x13f   :  { %4345 = vpow2.f32 %v889_v10  ;;  %v783_v39 = vmin.f32 %v5244_v40, 0.0  ;;  %v4113_v17 = vpop.f32.mrb[48].mxu0  ;;  %v1032_v26 = vsel %vm712_vm10, %v5184_v59, %v3613_v13  ;;  %vm719_vm2 = vcmp.gt.f32.partialorder %v5244_v40, 0.0 }
 0x140   :  { %v4336_v18 = vpop.eup %4335  ;;  %v895_v20 = vmul.f32 1.442695, %v784_v15  ;;  %v5254_v46 = vadd.f32 %v4113_v17, %v4953_v12  ;;  %v594_v44 = vpop.f32.mrb[49].mxu0  ;;  %v1031_v22 = vsel %vm711_vm9, %v5188_v54, %v3612_v16 }
 0x141   :  { %v4338_v23 = vpop.eup %4337  ;;  %v893_v25 = vmul.f32 1.442695, %v783_v39  ;;  %v5258_v50 = vadd.f32 %v4953_v12, %v594_v44  ;;  %4200 = vmatprep.mubr.msk.f32.mxu1 %vm95_vm0, %v1031_v22  ;;  %v3615_v27 = vadd.f32 -1.0, %v4336_v18 }
 0x142   :  { %4347 = vpow2.f32 %v895_v20  ;;  %v786_v30 = vmin.f32 %v5254_v46, 0.0  ;;  %4201 = vmatmul.mubr.msk.f32.gmra.mrb[38].mxu1 %vm95_vm0, %v1032_v26  ;;  %v3614_v31 = vadd.f32 -1.0, %v4338_v23  ;;  %vm722_vm5 = vcmp.gt.f32.partialorder %v5254_v46, 0.0 }
 0x143   :  { %4349 = vpow2.f32 %v893_v25  ;;  %v785_v54 = vmin.f32 %v5258_v50, 0.0  ;;  %v4116_v33 = vpop.f32.mrb[50].mxu0  ;;  %v1034_v42 = vsel %vm714_vm12, %v5198_v9, %v3615_v27  ;;  %vm721_vm4 = vcmp.gt.f32.partialorder %v5258_v50, 0.0 }
 0x144   :  { %v4340_v34 = vpop.eup %4339  ;;  %v899_v35 = vmul.f32 1.442695, %v786_v30  ;;  %v5268_v58 = vadd.f32 %v4116_v33, %v4953_v12  ;;  %v604_v59 = vpop.f32.mrb[51].mxu0  ;;  %v1033_v36 = vsel %vm713_vm11, %v5202_v4, %v3614_v31 }
 0x145   :  { %v4342_v38 = vpop.eup %4341  ;;  %v897_v41 = vmul.f32 1.442695, %v785_v54  ;;  %v5272_v63 = vadd.f32 %v4953_v12, %v604_v59  ;;  %4203 = vmatprep.mubr.msk.f32.mxu1 %vm95_vm0, %v1033_v36  ;;  %v3617_v43 = vadd.f32 -1.0, %v4340_v34 }
 0x146   :  { %4351 = vpow2.f32 %v899_v35  ;;  %v788_v45 = vmin.f32 %v5268_v58, 0.0  ;;  %4204 = vmatmul.mubr.msk.f32.gmra.mrb[40].mxu1 %vm95_vm0, %v1034_v42  ;;  %v3616_v47 = vadd.f32 -1.0, %v4342_v38  ;;  %vm724_vm7 = vcmp.gt.f32.partialorder %v5268_v58, 0.0 }
 0x147   :  { %4353 = vpow2.f32 %v897_v41  ;;  %v787_v4 = vmin.f32 %v5272_v63, 0.0  ;;  %v4119_v48 = vpop.f32.mrb[52].mxu0  ;;  %v1036_v56 = vsel %vm716_vm14, %v5212_v21, %v3617_v43  ;;  %vm723_vm6 = vcmp.gt.f32.partialorder %v5272_v63, 0.0 }
 0x148   :  { %v4344_v49 = vpop.eup %4343  ;;  %v903_v51 = vmul.f32 1.442695, %v788_v45  ;;  %v5282_v8 = vadd.f32 %v4119_v48, %v4953_v12  ;;  %v614_v9 = vpop.f32.mrb[53].mxu0  ;;  %v1035_v52 = vsel %vm715_vm13, %v5216_v19, %v3616_v47 }
 0x149   :  { %v4346_v53 = vpop.eup %4345  ;;  %v901_v55 = vmul.f32 1.442695, %v787_v4  ;;  %v5286_v14 = vadd.f32 %v4953_v12, %v614_v9  ;;  %4206 = vmatprep.mubr.msk.f32.mxu1 %vm95_vm0, %v1035_v52  ;;  %v3619_v57 = vadd.f32 -1.0, %v4344_v49 }
 0x14a   :  { %4355 = vpow2.f32 %v903_v51  ;;  %v790_v60 = vmin.f32 %v5282_v8, 0.0  ;;  %4207 = vmatmul.mubr.msk.f32.gmra.mrb[42].mxu1 %vm95_vm0, %v1036_v56  ;;  %v3618_v61 = vadd.f32 -1.0, %v4346_v53  ;;  %vm726_vm9 = vcmp.gt.f32.partialorder %v5282_v8, 0.0 }
 0x14b   :  { %4357 = vpow2.f32 %v901_v55  ;;  %v789_v19 = vmin.f32 %v5286_v14, 0.0  ;;  %v4122_v62 = vpop.f32.mrb[54].mxu0  ;;  %v1038_v6 = vsel %vm718_vm1, %v5226_v29, %v3619_v57  ;;  %v5312_v29 = vld [vmem:[%s6795_s2] ss:$0 sm:$0xff]  ;;  %vm725_vm8 = vcmp.gt.f32.partialorder %v5286_v14, 0.0 }
 0x14c   :  { %v4348_v0 = vpop.eup %4347  ;;  %v907_v1 = vmul.f32 1.442695, %v790_v60  ;;  %v5296_v24 = vadd.f32 %v4122_v62, %v4953_v12  ;;  %v624_v21 = vpop.f32.mrb[55].mxu0  ;;  %v1037_v2 = vsel %vm717_vm15, %v5230_v32, %v3618_v61 }
 0x14d   :  { %v4350_v3 = vpop.eup %4349  ;;  %v905_v5 = vmul.f32 1.442695, %v789_v19  ;;  %v5300_v28 = vadd.f32 %v4953_v12, %v624_v21  ;;  %4209 = vmatprep.mubr.msk.f32.mxu1 %vm95_vm0, %v1037_v2  ;;  %v3621_v7 = vadd.f32 -1.0, %v4348_v0 }
 0x14e   :  { %4359 = vpow2.f32 %v907_v1  ;;  %v792_v10 = vmin.f32 %v5296_v24, 0.0  ;;  %4210 = vmatmul.mubr.msk.f32.gmra.mrb[44].mxu1 %vm95_vm0, %v1038_v6  ;;  %v3620_v11 = vadd.f32 -1.0, %v4350_v3  ;;  %vm728_vm11 = vcmp.gt.f32.partialorder %v5296_v24, 0.0 }
 0x14f   :  { %4361 = vpow2.f32 %v905_v5  ;;  %v791_v32 = vmin.f32 %v5300_v28, 0.0  ;;  %v4125_v13 = vpop.f32.mrb[56].mxu0  ;;  %v1040_v22 = vsel %vm720_vm3, %v5240_v37, %v3621_v7  ;;  %vm727_vm10 = vcmp.gt.f32.partialorder %v5300_v28, 0.0 }
 0x150   :  { %v4352_v15 = vpop.eup %4351  ;;  %v911_v12 = vmul.f32 1.442695, %v792_v10  ;;  %v5315_v16 = vadd.f32 %v5312_v29, %v4125_v13  ;;  %v634_v39 = vpop.f32.mrb[57].mxu0  ;;  %v1039_v17 = vsel %vm719_vm2, %v5244_v40, %v3620_v11 }
 0x151   :  { %v4354_v18 = vpop.eup %4353  ;;  %v909_v20 = vmul.f32 1.442695, %v791_v32  ;;  %v5319_v44 = vadd.f32 %v5312_v29, %v634_v39  ;;  %4212 = vmatprep.mubr.msk.f32.mxu1 %vm95_vm0, %v1039_v17  ;;  %v3623_v23 = vadd.f32 -1.0, %v4352_v15 }
 0x152   :  { %4363 = vpow2.f32 %v911_v12  ;;  %v794_v25 = vmin.f32 %v5315_v16, 0.0  ;;  %4213 = vmatmul.mubr.msk.f32.gmra.mrb[46].mxu1 %vm95_vm0, %v1040_v22  ;;  %v3622_v26 = vadd.f32 -1.0, %v4354_v18  ;;  %vm730_vm13 = vcmp.gt.f32.partialorder %v5315_v16, 0.0 }
 0x153   :  { %4365 = vpow2.f32 %v909_v20  ;;  %v793_v40 = vmin.f32 %v5319_v44, 0.0  ;;  %v4128_v27 = vpop.f32.mrb[58].mxu0  ;;  %v1042_v36 = vsel %vm722_vm5, %v5254_v46, %v3623_v23  ;;  %vm729_vm12 = vcmp.gt.f32.partialorder %v5319_v44, 0.0 }
 0x154   :  { %v4356_v30 = vpop.eup %4355  ;;  %v915_v31 = vmul.f32 1.442695, %v794_v25  ;;  %v5329_v54 = vadd.f32 %v5312_v29, %v4128_v27  ;;  %v644_v37 = vpop.f32.mrb[59].mxu0  ;;  %v1041_v33 = vsel %vm721_vm4, %v5258_v50, %v3622_v26 }
 0x155   :  { %v4358_v34 = vpop.eup %4357  ;;  %v913_v35 = vmul.f32 1.442695, %v793_v40  ;;  %v5333_v59 = vadd.f32 %v5312_v29, %v644_v37  ;;  %4215 = vmatprep.mubr.msk.f32.mxu1 %vm95_vm0, %v1041_v33  ;;  %v3625_v38 = vadd.f32 -1.0, %v4356_v30 }
 0x156   :  { %4367 = vpow2.f32 %v915_v31  ;;  %v796_v41 = vmin.f32 %v5329_v54, 0.0  ;;  %4216 = vmatmul.mubr.msk.f32.gmra.mrb[48].mxu1 %vm95_vm0, %v1042_v36  ;;  %v3624_v42 = vadd.f32 -1.0, %v4358_v34  ;;  %vm732_vm15 = vcmp.gt.f32.partialorder %v5329_v54, 0.0  ;;  %v5396_v34 = vld [vmem:[%s6796_s4] ss:$0 sm:$0xff] }
 0x157   :  { %4369 = vpow2.f32 %v913_v35  ;;  %v795_v50 = vmin.f32 %v5333_v59, 0.0  ;;  %v4131_v43 = vpop.f32.mrb[60].mxu0  ;;  %v1044_v52 = vsel %vm724_vm7, %v5268_v58, %v3625_v38  ;;  %vm731_vm14 = vcmp.gt.f32.partialorder %v5333_v59, 0.0 }
 0x158   :  { %v4360_v45 = vpop.eup %4359  ;;  %v919_v47 = vmul.f32 1.442695, %v796_v41  ;;  %v5343_v4 = vadd.f32 %v5312_v29, %v4131_v43  ;;  %v654_v46 = vpop.f32.mrb[61].mxu0  ;;  %v1043_v48 = vsel %vm723_vm6, %v5272_v63, %v3624_v42 }
 0x159   :  { %v4362_v49 = vpop.eup %4361  ;;  %v917_v51 = vmul.f32 1.442695, %v795_v50  ;;  %v5347_v9 = vadd.f32 %v5312_v29, %v654_v46  ;;  %4218 = vmatprep.mubr.msk.f32.mxu1 %vm95_vm0, %v1043_v48  ;;  %v3627_v53 = vadd.f32 -1.0, %v4360_v45 }
 0x15a   :  { %4371 = vpow2.f32 %v919_v47  ;;  %v798_v55 = vmin.f32 %v5343_v4, 0.0  ;;  %4219 = vmatmul.mubr.msk.f32.gmra.mrb[50].mxu1 %vm95_vm0, %v1044_v52  ;;  %v3626_v56 = vadd.f32 -1.0, %v4362_v49  ;;  %vm734_vm2 = vcmp.gt.f32.partialorder %v5343_v4, 0.0 }
 0x15b   :  { %4373 = vpow2.f32 %v917_v51  ;;  %v797_v63 = vmin.f32 %v5347_v9, 0.0  ;;  %v4134_v57 = vpop.f32.mrb[62].mxu0  ;;  %v1046_v2 = vsel %vm726_vm9, %v5282_v8, %v3627_v53  ;;  %vm733_vm1 = vcmp.gt.f32.partialorder %v5347_v9, 0.0 }
 0x15c   :  { %v4364_v60 = vpop.eup %4363  ;;  %v923_v61 = vmul.f32 1.442695, %v798_v55  ;;  %v5357_v19 = vadd.f32 %v5312_v29, %v4134_v57  ;;  %v664_v58 = vpop.f32.mrb[63].mxu0  ;;  %v1045_v62 = vsel %vm725_vm8, %v5286_v14, %v3626_v56 }
 0x15d   :  { %v4366_v0 = vpop.eup %4365  ;;  %v921_v1 = vmul.f32 1.442695, %v797_v63  ;;  %v665_v21 = vadd.f32 %v5312_v29, %v664_v58  ;;  %4221 = vmatprep.mubr.msk.f32.mxu1 %vm95_vm0, %v1045_v62  ;;  %v3629_v3 = vadd.f32 -1.0, %v4364_v60 }
 0x15e   :  { %4375 = vpow2.f32 %v923_v61  ;;  %v800_v5 = vmin.f32 %v5357_v19, 0.0  ;;  %4222 = vmatmul.mubr.msk.f32.gmra.mrb[52].mxu1 %vm95_vm0, %v1046_v2  ;;  %v3628_v6 = vadd.f32 -1.0, %v4366_v0  ;;  %vm736_vm4 = vcmp.gt.f32.partialorder %v5357_v19, 0.0 }
 0x15f   :  { %4377 = vpow2.f32 %v921_v1  ;;  %v799_v7 = vmin.f32 %v665_v21, 0.0  ;;  %v1048_v8 = vsel %vm728_vm11, %v5296_v24, %v3629_v3  ;;  %vm735_vm3 = vcmp.gt.f32.partialorder %v665_v21, 0.0 }
 0x160   :  { %v4368_v14 = vpop.eup %4367  ;;  %v927_v10 = vmul.f32 1.442695, %v800_v5  ;;  %v1047_v11 = vsel %vm727_vm10, %v5300_v28, %v3628_v6 }
 0x161   :  { %v4370_v32 = vpop.eup %4369  ;;  %v925_v13 = vmul.f32 1.442695, %v799_v7  ;;  %4224 = vmatprep.mubr.msk.f32.mxu1 %vm95_vm0, %v1047_v11  ;;  %v3631_v15 = vadd.f32 -1.0, %v4368_v14 }
 0x162   :  { %4379 = vpow2.f32 %v927_v10  ;;  %4225 = vmatmul.mubr.msk.f32.gmra.mrb[54].mxu1 %vm95_vm0, %v1048_v8  ;;  %v3630_v12 = vadd.f32 -1.0, %v4370_v32 }
 0x163   :  { %4381 = vpow2.f32 %v925_v13  ;;  %v1050_v17 = vsel %vm730_vm13, %v5315_v16, %v3631_v15 }
 0x164   :  { %v4372_v29 = vpop.eup %4371  ;;  %v1049_v39 = vsel %vm729_vm12, %v5319_v44, %v3630_v12 }
 0x165   :  { %v4374_v28 = vpop.eup %4373  ;;  %4227 = vmatprep.mubr.msk.f32.mxu1 %vm95_vm0, %v1049_v39  ;;  %v3633_v18 = vadd.f32 -1.0, %v4372_v29 }
 0x166   :  { %4228 = vmatmul.mubr.msk.f32.gmra.mrb[56].mxu1 %vm95_vm0, %v1050_v17  ;;  %v3632_v24 = vadd.f32 -1.0, %v4374_v28 }
 0x167   :  { %v1052_v44 = vsel %vm732_vm15, %v5329_v54, %v3633_v18 }
 0x168   :  { %v4376_v20 = vpop.eup %4375  ;;  %v1051_v22 = vsel %vm731_vm14, %v5333_v59, %v3632_v24 }
 0x169   :  { %v4378_v23 = vpop.eup %4377  ;;  %4230 = vmatprep.mubr.msk.f32.mxu1 %vm95_vm0, %v1051_v22  ;;  %v3635_v25 = vadd.f32 -1.0, %v4376_v20 }
 0x16a   :  { %4231 = vmatmul.mubr.msk.f32.gmra.mrb[58].mxu1 %vm95_vm0, %v1052_v44  ;;  %v3634_v16 = vadd.f32 -1.0, %v4378_v23 }
 0x16b   :  { %v1054_v30 = vsel %vm734_vm2, %v5343_v4, %v3635_v25 }
 0x16c   :  { %v4380_v26 = vpop.eup %4379  ;;  %v1053_v40 = vsel %vm733_vm1, %v5347_v9, %v3634_v16 }
 0x16d   :  { %v4382_v27 = vpop.eup %4381  ;;  %4233 = vmatprep.mubr.msk.f32.mxu1 %vm95_vm0, %v1053_v40  ;;  %v3637_v31 = vadd.f32 -1.0, %v4380_v26 }
 0x16e   :  { %4234 = vmatmul.mubr.msk.f32.gmra.mrb[60].mxu1 %vm95_vm0, %v1054_v30  ;;  %v3636_v54 = vadd.f32 -1.0, %v4382_v27 }
 0x16f   :  { %v1056_v33 = vsel %vm736_vm4, %v5357_v19, %v3637_v31 }
 0x170   :  { %v1055_v37 = vsel %vm735_vm3, %v665_v21, %v3636_v54 }
 0x171   :  { %4236 = vmatprep.mubr.msk.f32.mxu1 %vm95_vm0, %v1055_v37 }
 0x172   :  { %4237 = vmatmul.mubr.msk.f32.gmra.mrb[62].mxu1 %vm95_vm0, %v1056_v33 }
 0x1c9   :  { %v4145_v35 = vpop.f32.mrb[0].mxu1 }
 0x1ca   :  { %v5399_v59 = vadd.f32 %v4145_v35, %v5396_v34  ;;  %v1326_v36 = vpop.f32.mrb[1].mxu1 }
 0x1cb   :  { %v5402_v38 = vadd.f32 %v5396_v34, %v1326_v36 }
 0x1cc   :  { %v1646_v41 = vmul.f32 %v5399_v59, %v5399_v59 }
 0x1cd   :  { %v4148_v42 = vpop.f32.mrb[2].mxu1  ;;  %v1645_v47 = vmul.f32 %v5402_v38, %v5402_v38 }
 0x1ce   :  { %v5407_v50 = vadd.f32 %v4148_v42, %v5396_v34  ;;  %v1336_v43 = vpop.f32.mrb[3].mxu1  ;;  %v1712_v45 = vsel %vm95_vm0, %v1646_v41, 0.0 }
 0x1cf   :  { %v5413_v4 = vadd.f32 %v5396_v34, %v1336_v43  ;;  %1713 = vadd.xlane.f32.xlu0 %v1712_v45  ;;  %v1709_v52 = vsel %vm95_vm0, %v1645_v47, 0.0 }
 0x1d0   :  { %v1648_v46 = vmul.f32 %v5407_v50, %v5407_v50 }
 0x1d1   :  { %v4151_v48 = vpop.f32.mrb[4].mxu1  ;;  %v1647_v53 = vmul.f32 %v5413_v4, %v5413_v4 }
 0x1d2   :  { %v5418_v49 = vadd.f32 %v4151_v48, %v5396_v34  ;;  %v1346_v51 = vpop.f32.mrb[5].mxu1  ;;  %v1718_v9 = vsel %vm95_vm0, %v1648_v46, 0.0 }
 0x1d3   :  { %v5425_v55 = vadd.f32 %v5396_v34, %v1346_v51  ;;  %1719 = vadd.xlane.f32.xlu1 %v1718_v9  ;;  %1710 = vadd.xlane.f32.xlu0 %v1709_v52  ;;  %v1715_v61 = vsel %vm95_vm0, %v1647_v53, 0.0 }
 0x1d4   :  { %v1650_v19 = vmul.f32 %v5418_v49, %v5418_v49 }
 0x1d5   :  { %v4154_v56 = vpop.f32.mrb[6].mxu1  ;;  %v1649_v63 = vmul.f32 %v5425_v55, %v5425_v55 }
 0x1d6   :  { %v5430_v57 = vadd.f32 %v4154_v56, %v5396_v34  ;;  %v1356_v60 = vpop.f32.mrb[7].mxu1  ;;  %v1724_v3 = vsel %vm95_vm0, %v1650_v19, 0.0 }
 0x1d7   :  { %v5436_v58 = vadd.f32 %v5396_v34, %v1356_v60  ;;  %1716 = vadd.xlane.f32.xlu1 %v1715_v61  ;;  %v1721_v62 = vsel %vm95_vm0, %v1649_v63, 0.0 }
 0x1d8   :  { %1722 = vadd.xlane.f32.xlu0 %v1721_v62  ;;  %v1652_v5 = vmul.f32 %v5430_v57, %v5430_v57 }
 0x1d9   :  { %v4157_v0 = vpop.f32.mrb[8].mxu1  ;;  %v1651_v1 = vmul.f32 %v5436_v58, %v5436_v58 }
 0x1da   :  { %v5442_v21 = vadd.f32 %v4157_v0, %v5396_v34  ;;  %v1366_v2 = vpop.f32.mrb[9].mxu1  ;;  %v1730_v13 = vsel %vm95_vm0, %v1652_v5, 0.0 }
 0x1db   :  { %v5448_v6 = vadd.f32 %v5396_v34, %v1366_v2  ;;  %1725 = vadd.xlane.f32.xlu1 %v1724_v3  ;;  %v1727_v7 = vsel %vm95_vm0, %v1651_v1, 0.0 }
 0x1dc   :  { %1728 = vadd.xlane.f32.xlu0 %v1727_v7  ;;  %v1654_v8 = vmul.f32 %v5442_v21, %v5442_v21 }
 0x1dd   :  { %v4160_v14 = vpop.f32.mrb[10].mxu1  ;;  %v1653_v10 = vmul.f32 %v5448_v6, %v5448_v6 }
 0x1de   :  { %v5454_v11 = vadd.f32 %v4160_v14, %v5396_v34  ;;  %v1376_v32 = vpop.f32.mrb[11].mxu1  ;;  %v1736_v18 = vsel %vm95_vm0, %v1654_v8, 0.0 }
 0x1df   :  { %v5460_v15 = vadd.f32 %v5396_v34, %v1376_v32  ;;  %1731 = vadd.xlane.f32.xlu1 %v1730_v13  ;;  %v1733_v12 = vsel %vm95_vm0, %v1653_v10, 0.0 }
 0x1e0   :  { %1734 = vadd.xlane.f32.xlu0 %v1733_v12  ;;  %v1656_v24 = vmul.f32 %v5454_v11, %v5454_v11 }
 0x1e1   :  { %v4163_v29 = vpop.f32.mrb[12].mxu1  ;;  %v1655_v39 = vmul.f32 %v5460_v15, %v5460_v15 }
 0x1e2   :  { %v5466_v28 = vadd.f32 %v4163_v29, %v5396_v34  ;;  %v1386_v17 = vpop.f32.mrb[13].mxu1  ;;  %v1742_v26 = vsel %vm95_vm0, %v1656_v24, 0.0 }
 0x1e3   :  { %v5472_v20 = vadd.f32 %v5396_v34, %v1386_v17  ;;  %1737 = vadd.xlane.f32.xlu1 %v1736_v18  ;;  %v1739_v22 = vsel %vm95_vm0, %v1655_v39, 0.0 }
 0x1e4   :  { %1740 = vadd.xlane.f32.xlu0 %v1739_v22  ;;  %v1658_v40 = vmul.f32 %v5466_v28, %v5466_v28 }
 0x1e5   :  { %v4166_v23 = vpop.f32.mrb[14].mxu1  ;;  %v1657_v44 = vmul.f32 %v5472_v20, %v5472_v20 }
 0x1e6   :  { %v5478_v25 = vadd.f32 %v4166_v23, %v5396_v34  ;;  %v1396_v16 = vpop.f32.mrb[15].mxu1  ;;  %v1748_v35 = vsel %vm95_vm0, %v1658_v40, 0.0 }
 0x1e7   :  { %v5484_v27 = vadd.f32 %v5396_v34, %v1396_v16  ;;  %1743 = vadd.xlane.f32.xlu1 %v1742_v26  ;;  %v1745_v30 = vsel %vm95_vm0, %v1657_v44, 0.0 }
 0x1e8   :  { %1746 = vadd.xlane.f32.xlu0 %v1745_v30  ;;  %v1660_v36 = vmul.f32 %v5478_v25, %v5478_v25 }
 0x1e9   :  { %v4169_v31 = vpop.f32.mrb[16].mxu1  ;;  %v1659_v54 = vmul.f32 %v5484_v27, %v5484_v27 }
 0x1ea   :  { %v5490_v37 = vadd.f32 %v4169_v31, %v5396_v34  ;;  %v1406_v33 = vpop.f32.mrb[17].mxu1  ;;  %v1754_v48 = vsel %vm95_vm0, %v1660_v36, 0.0 }
 0x1eb   :  { %v5496_v41 = vadd.f32 %v5396_v34, %v1406_v33  ;;  %1749 = vadd.xlane.f32.xlu1 %v1748_v35  ;;  %v1751_v42 = vsel %vm95_vm0, %v1659_v54, 0.0 }
 0x1ec   :  { %1752 = vadd.xlane.f32.xlu0 %v1751_v42  ;;  %v1662_v51 = vmul.f32 %v5490_v37, %v5490_v37 }
 0x1ed   :  { %v4172_v43 = vpop.f32.mrb[18].mxu1  ;;  %v1661_v45 = vmul.f32 %v5496_v41, %v5496_v41 }
 0x1ee   :  { %v5502_v47 = vadd.f32 %v4172_v43, %v5396_v34  ;;  %v1416_v46 = vpop.f32.mrb[19].mxu1  ;;  %v1760_v61 = vsel %vm95_vm0, %v1662_v51, 0.0 }
 0x1ef   :  { %v5508_v9 = vadd.f32 %v5396_v34, %v1416_v46  ;;  %1755 = vadd.xlane.f32.xlu1 %v1754_v48  ;;  %v1757_v52 = vsel %vm95_vm0, %v1661_v45, 0.0 }
 0x1f0   :  { %1758 = vadd.xlane.f32.xlu0 %v1757_v52  ;;  %v1664_v19 = vmul.f32 %v5502_v47, %v5502_v47 }
 0x1f1   :  { %v4175_v53 = vpop.f32.mrb[20].mxu1  ;;  %v1663_v56 = vmul.f32 %v5508_v9, %v5508_v9 }
 0x1f2   :  { %v5514_v63 = vadd.f32 %v4175_v53, %v5396_v34  ;;  %v1426_v60 = vpop.f32.mrb[21].mxu1  ;;  %v1766_v7 = vsel %vm95_vm0, %v1664_v19, 0.0 }
 0x1f3   :  { %v5520_v62 = vadd.f32 %v5396_v34, %v1426_v60  ;;  %1761 = vadd.xlane.f32.xlu1 %v1760_v61  ;;  %v1763_v0 = vsel %vm95_vm0, %v1663_v56, 0.0 }
 0x1f4   :  { %1764 = vadd.xlane.f32.xlu0 %v1763_v0  ;;  %v1666_v14 = vmul.f32 %v5514_v63, %v5514_v63 }
 0x1f5   :  { %v4178_v1 = vpop.f32.mrb[22].mxu1  ;;  %v1665_v2 = vmul.f32 %v5520_v62, %v5520_v62 }
 0x1f6   :  { %v5526_v3 = vadd.f32 %v4178_v1, %v5396_v34  ;;  %v1436_v5 = vpop.f32.mrb[23].mxu1  ;;  %v1772_v39 = vsel %vm95_vm0, %v1666_v14, 0.0 }
 0x1f7   :  { %v5532_v10 = vadd.f32 %v5396_v34, %v1436_v5  ;;  %1767 = vadd.xlane.f32.xlu1 %v1766_v7  ;;  %v1769_v32 = vsel %vm95_vm0, %v1665_v2, 0.0 }
 0x1f8   :  { %1770 = vadd.xlane.f32.xlu0 %v1769_v32  ;;  %v1668_v17 = vmul.f32 %v5526_v3, %v5526_v3 }
 0x1f9   :  { %v4181_v13 = vpop.f32.mrb[24].mxu1  ;;  %v1667_v8 = vmul.f32 %v5532_v10, %v5532_v10 }
 0x1fa   :  { %v5538_v12 = vadd.f32 %v4181_v13, %v5396_v34  ;;  %v1446_v29 = vpop.f32.mrb[25].mxu1  ;;  %v1778_v26 = vsel %vm95_vm0, %v1668_v17, 0.0 }
 0x1fb   :  { %v5544_v18 = vadd.f32 %v5396_v34, %v1446_v29  ;;  %1773 = vadd.xlane.f32.xlu1 %v1772_v39  ;;  %v1775_v24 = vsel %vm95_vm0, %v1667_v8, 0.0 }
 0x1fc   :  { %1776 = vadd.xlane.f32.xlu0 %v1775_v24  ;;  %v1670_v40 = vmul.f32 %v5538_v12, %v5538_v12 }
 0x1fd   :  { %v4184_v22 = vpop.f32.mrb[26].mxu1  ;;  %v1669_v23 = vmul.f32 %v5544_v18, %v5544_v18 }
 0x1fe   :  { %v5550_v44 = vadd.f32 %v4184_v22, %v5396_v34  ;;  %v1456_v16 = vpop.f32.mrb[27].mxu1  ;;  %v1784_v42 = vsel %vm95_vm0, %v1670_v40, 0.0 }
 0x1ff   :  { %v5556_v30 = vadd.f32 %v5396_v34, %v1456_v16  ;;  %1779 = vadd.xlane.f32.xlu1 %v1778_v26  ;;  %v1781_v31 = vsel %vm95_vm0, %v1669_v23, 0.0 }
 0x200   :  { %1782 = vadd.xlane.f32.xlu0 %v1781_v31  ;;  %v1672_v43 = vmul.f32 %v5550_v44, %v5550_v44 }
 0x201   :  { %v4187_v54 = vpop.f32.mrb[28].mxu1  ;;  %v1671_v33 = vmul.f32 %v5556_v30, %v5556_v30 }
 0x202   :  { %v5562_v35 = vadd.f32 %v4187_v54, %v5396_v34  ;;  %v1466_v36 = vpop.f32.mrb[29].mxu1  ;;  %v1790_v56 = vsel %vm95_vm0, %v1672_v43, 0.0 }
 0x203   :  { %v5568_v45 = vadd.f32 %v5396_v34, %v1466_v36  ;;  %1785 = vadd.xlane.f32.xlu1 %v1784_v42  ;;  %v1787_v46 = vsel %vm95_vm0, %v1671_v33, 0.0 }
 0x204   :  { %1788 = vadd.xlane.f32.xlu0 %v1787_v46  ;;  %v1674_v60 = vmul.f32 %v5562_v35, %v5562_v35 }
 0x205   :  { %v4190_v48 = vpop.f32.mrb[30].mxu1  ;;  %v1673_v51 = vmul.f32 %v5568_v45, %v5568_v45 }
 0x206   :  { %v5574_v52 = vadd.f32 %v4190_v48, %v5396_v34  ;;  %v1476_v53 = vpop.f32.mrb[31].mxu1  ;;  %v1796_v7 = vsel %vm95_vm0, %v1674_v60, 0.0 }
 0x207   :  { %v5580_v61 = vadd.f32 %v5396_v34, %v1476_v53  ;;  %1791 = vadd.xlane.f32.xlu1 %v1790_v56  ;;  %v1793_v19 = vsel %vm95_vm0, %v1673_v51, 0.0 }
 0x208   :  { %1794 = vadd.xlane.f32.xlu0 %v1793_v19  ;;  %v1676_v14 = vmul.f32 %v5574_v52, %v5574_v52 }
 0x209   :  { %v4193_v0 = vpop.f32.mrb[32].mxu1  ;;  %v1675_v1 = vmul.f32 %v5580_v61, %v5580_v61 }
 0x20a   :  { %v5586_v2 = vadd.f32 %v4193_v0, %v5396_v34  ;;  %v1486_v5 = vpop.f32.mrb[33].mxu1  ;;  %v1802_v24 = vsel %vm95_vm0, %v1676_v14, 0.0 }
 0x20b   :  { %v5592_v32 = vadd.f32 %v5396_v34, %v1486_v5  ;;  %1797 = vadd.xlane.f32.xlu1 %v1796_v7  ;;  %v1799_v13 = vsel %vm95_vm0, %v1675_v1, 0.0 }
 0x20c   :  { %1800 = vadd.xlane.f32.xlu0 %v1799_v13  ;;  %v1678_v22 = vmul.f32 %v5586_v2, %v5586_v2 }
 0x20d   :  { %v4196_v8 = vpop.f32.mrb[34].mxu1  ;;  %v1677_v29 = vmul.f32 %v5592_v32, %v5592_v32 }
 0x20e   :  { %v5598_v39 = vadd.f32 %v4196_v8, %v5396_v34  ;;  %v1496_v17 = vpop.f32.mrb[35].mxu1  ;;  %v1808_v33 = vsel %vm95_vm0, %v1678_v22, 0.0 }
 0x20f   :  { %v5604_v23 = vadd.f32 %v5396_v34, %v1496_v17  ;;  %1803 = vadd.xlane.f32.xlu1 %v1802_v24  ;;  %v1805_v16 = vsel %vm95_vm0, %v1677_v29, 0.0 }
 0x210   :  { %1806 = vadd.xlane.f32.xlu0 %v1805_v16  ;;  %v1680_v36 = vmul.f32 %v5598_v39, %v5598_v39 }
 0x211   :  { %v4199_v26 = vpop.f32.mrb[36].mxu1  ;;  %v1679_v40 = vmul.f32 %v5604_v23, %v5604_v23 }
 0x212   :  { %v5610_v31 = vadd.f32 %v4199_v26, %v5396_v34  ;;  %v1506_v54 = vpop.f32.mrb[37].mxu1  ;;  %v1814_v56 = vsel %vm95_vm0, %v1680_v36, 0.0 }
 0x213   :  { %v5616_v42 = vadd.f32 %v5396_v34, %v1506_v54  ;;  %1809 = vadd.xlane.f32.xlu1 %v1808_v33  ;;  %v1811_v43 = vsel %vm95_vm0, %v1679_v40, 0.0 }
 0x214   :  { %1812 = vadd.xlane.f32.xlu0 %v1811_v43  ;;  %v1682_v60 = vmul.f32 %v5610_v31, %v5610_v31 }
 0x215   :  { %v4202_v46 = vpop.f32.mrb[38].mxu1  ;;  %v1681_v48 = vmul.f32 %v5616_v42, %v5616_v42 }
 0x216   :  { %v5622_v51 = vadd.f32 %v4202_v46, %v5396_v34  ;;  %v1516_v53 = vpop.f32.mrb[39].mxu1  ;;  %v1820_v13 = vsel %vm95_vm0, %v1682_v60, 0.0 }
 0x217   :  { %v5628_v19 = vadd.f32 %v5396_v34, %v1516_v53  ;;  %1815 = vadd.xlane.f32.xlu1 %v1814_v56  ;;  %v1817_v0 = vsel %vm95_vm0, %v1681_v48, 0.0 }
 0x218   :  { %6823 = vst [vmem:[#allocation2_spill] sm:$0xff] %v5622_v51  ;;  %1818 = vadd.xlane.f32.xlu0 %v1817_v0  ;;  %v1684_v8 = vmul.f32 %v5622_v51, %v5622_v51 }
 0x219   :  { %v4205_v1 = vpop.f32.mrb[40].mxu1  ;;  %v1683_v5 = vmul.f32 %v5628_v19, %v5628_v19 }
 0x21a   :  { %v5634_v7 = vadd.f32 %v4205_v1, %v5396_v34  ;;  %v1526_v14 = vpop.f32.mrb[41].mxu1  ;;  %v1826_v40 = vsel %vm95_vm0, %v1684_v8, 0.0 }
 0x21b   :  { %v5640_v29 = vadd.f32 %v5396_v34, %v1526_v14  ;;  %1821 = vadd.xlane.f32.xlu1 %v1820_v13  ;;  %v1823_v17 = vsel %vm95_vm0, %v1683_v5, 0.0 }
 0x21c   :  { %6824 = vst [vmem:[#allocation3_spill] sm:$0xff] %v5634_v7  ;;  %1824 = vadd.xlane.f32.xlu0 %v1823_v17  ;;  %v1686_v54 = vmul.f32 %v5634_v7, %v5634_v7 }
 0x21d   :  { %6825 = vst [vmem:[#allocation4_spill] sm:$0xff] %v5640_v29  ;;  %v4208_v24 = vpop.f32.mrb[42].mxu1  ;;  %v1685_v22 = vmul.f32 %v5640_v29, %v5640_v29 }
 0x21e   :  { %v5646_v16 = vadd.f32 %v4208_v24, %v5396_v34  ;;  %v1536_v26 = vpop.f32.mrb[43].mxu1  ;;  %v1832_v56 = vsel %vm95_vm0, %v1686_v54, 0.0 }
 0x21f   :  { %v5652_v33 = vadd.f32 %v5396_v34, %v1536_v26  ;;  %1827 = vadd.xlane.f32.xlu1 %v1826_v40  ;;  %v1829_v36 = vsel %vm95_vm0, %v1685_v22, 0.0 }
 0x220   :  { %6826 = vst [vmem:[#allocation5_spill] sm:$0xff] %v5646_v16  ;;  %1830 = vadd.xlane.f32.xlu0 %v1829_v36  ;;  %v1688_v60 = vmul.f32 %v5646_v16, %v5646_v16 }
 0x221   :  { %6827 = vst [vmem:[#allocation6_spill] sm:$0xff] %v5652_v33  ;;  %v4211_v43 = vpop.f32.mrb[44].mxu1  ;;  %v1687_v46 = vmul.f32 %v5652_v33, %v5652_v33 }
 0x222   :  { %v5658_v48 = vadd.f32 %v4211_v43, %v5396_v34  ;;  %v1546_v53 = vpop.f32.mrb[45].mxu1  ;;  %v1838_v17 = vsel %vm95_vm0, %v1688_v60, 0.0 }
 0x223   :  { %v5664_v0 = vadd.f32 %v5396_v34, %v1546_v53  ;;  %1833 = vadd.xlane.f32.xlu1 %v1832_v56  ;;  %v1835_v1 = vsel %vm95_vm0, %v1687_v46, 0.0 }
 0x224   :  { %6828 = vst [vmem:[#allocation7_spill] sm:$0xff] %v5658_v48  ;;  %1836 = vadd.xlane.f32.xlu0 %v1835_v1  ;;  %v1690_v24 = vmul.f32 %v5658_v48, %v5658_v48 }
 0x225   :  { %6829 = vst [vmem:[#allocation8_spill] sm:$0xff] %v5664_v0  ;;  %v4214_v5 = vpop.f32.mrb[46].mxu1  ;;  %v1689_v14 = vmul.f32 %v5664_v0, %v5664_v0 }
 0x226   :  { %v5670_v13 = vadd.f32 %v4214_v5, %v5396_v34  ;;  %v1556_v8 = vpop.f32.mrb[47].mxu1  ;;  %v1844_v46 = vsel %vm95_vm0, %v1690_v24, 0.0 }
 0x227   :  { %v5676_v22 = vadd.f32 %v5396_v34, %v1556_v8  ;;  %1839 = vadd.xlane.f32.xlu1 %v1838_v17  ;;  %v1841_v26 = vsel %vm95_vm0, %v1689_v14, 0.0 }
 0x228   :  { %6830 = vst [vmem:[#allocation9_spill] sm:$0xff] %v5670_v13  ;;  %1842 = vadd.xlane.f32.xlu0 %v1841_v26  ;;  %v1692_v53 = vmul.f32 %v5670_v13, %v5670_v13 }
 0x229   :  { %6831 = vst [vmem:[#allocation10_spill] sm:$0xff] %v5676_v22  ;;  %v4217_v40 = vpop.f32.mrb[48].mxu1  ;;  %v1691_v54 = vmul.f32 %v5676_v22, %v5676_v22 }
 0x22a   :  { %v5682_v36 = vadd.f32 %v4217_v40, %v5396_v34  ;;  %v1566_v43 = vpop.f32.mrb[49].mxu1  ;;  %v1850_v17 = vsel %vm95_vm0, %v1692_v53, 0.0 }
 0x22b   :  { %v5688_v56 = vadd.f32 %v5396_v34, %v1566_v43  ;;  %1845 = vadd.xlane.f32.xlu1 %v1844_v46  ;;  %v1847_v60 = vsel %vm95_vm0, %v1691_v54, 0.0 }
 0x22c   :  { %6832 = vst [vmem:[#allocation11_spill] sm:$0xff] %v5682_v36  ;;  %1848 = vadd.xlane.f32.xlu0 %v1847_v60  ;;  %v1694_v24 = vmul.f32 %v5682_v36, %v5682_v36 }
 0x22d   :  { %6833 = vst [vmem:[#allocation12_spill] sm:$0xff] %v5688_v56  ;;  %v4220_v1 = vpop.f32.mrb[50].mxu1  ;;  %v1693_v5 = vmul.f32 %v5688_v56, %v5688_v56 }
 0x22e   :  { %v5694_v14 = vadd.f32 %v4220_v1, %v5396_v34  ;;  %v1576_v8 = vpop.f32.mrb[51].mxu1  ;;  %v1856_v53 = vsel %vm95_vm0, %v1694_v24, 0.0 }
 0x22f   :  { %v5700_v26 = vadd.f32 %v5396_v34, %v1576_v8  ;;  %1851 = vadd.xlane.f32.xlu1 %v1850_v17  ;;  %v1853_v40 = vsel %vm95_vm0, %v1693_v5, 0.0 }
 0x230   :  { %6834 = vst [vmem:[#allocation13_spill] sm:$0xff] %v5694_v14  ;;  %1854 = vadd.xlane.f32.xlu0 %v1853_v40  ;;  %v1696_v1 = vmul.f32 %v5694_v14, %v5694_v14 }
 0x231   :  { %6835 = vst [vmem:[#allocation14_spill] sm:$0xff] %v5700_v26  ;;  %v4223_v54 = vpop.f32.mrb[52].mxu1  ;;  %v1695_v43 = vmul.f32 %v5700_v26, %v5700_v26 }
 0x232   :  { %v5706_v46 = vadd.f32 %v4223_v54, %v5396_v34  ;;  %v1586_v60 = vpop.f32.mrb[53].mxu1  ;;  %v1862_v24 = vsel %vm95_vm0, %v1696_v1, 0.0 }
 0x233   :  { %v5712_v8 = vadd.f32 %v5396_v34, %v1586_v60  ;;  %1857 = vadd.xlane.f32.xlu1 %v1856_v53  ;;  %v1859_v5 = vsel %vm95_vm0, %v1695_v43, 0.0 }
 0x234   :  { %6836 = vst [vmem:[#allocation15_spill] sm:$0xff] %v5706_v46  ;;  %1860 = vadd.xlane.f32.xlu0 %v1859_v5  ;;  %v1698_v14 = vmul.f32 %v5706_v46, %v5706_v46 }
 0x235   :  { %6837 = vst [vmem:[#allocation16_spill] sm:$0xff] %v5712_v8  ;;  %v4226_v17 = vpop.f32.mrb[54].mxu1  ;;  %v1697_v40 = vmul.f32 %v5712_v8, %v5712_v8 }
 0x236   :  { %v5718_v54 = vadd.f32 %v4226_v17, %v5396_v34  ;;  %v1596_v26 = vpop.f32.mrb[55].mxu1  ;;  %v1868_v1 = vsel %vm95_vm0, %v1698_v14, 0.0 }
 0x237   :  { %v5724_v60 = vadd.f32 %v5396_v34, %v1596_v26  ;;  %1863 = vadd.xlane.f32.xlu1 %v1862_v24  ;;  %v1865_v43 = vsel %vm95_vm0, %v1697_v40, 0.0 }
 0x238   :  { %6838 = vst [vmem:[#allocation17_spill] sm:$0xff] %v5718_v54  ;;  %1866 = vadd.xlane.f32.xlu0 %v1865_v43  ;;  %v1700_v46 = vmul.f32 %v5718_v54, %v5718_v54 }
 0x239   :  { %6839 = vst [vmem:[#allocation18_spill] sm:$0xff] %v5724_v60  ;;  %v4229_v53 = vpop.f32.mrb[56].mxu1  ;;  %v1699_v5 = vmul.f32 %v5724_v60, %v5724_v60 }
 0x23a   :  { %v5730_v17 = vadd.f32 %v4229_v53, %v5396_v34  ;;  %v1606_v8 = vpop.f32.mrb[57].mxu1  ;;  %v1874_v14 = vsel %vm95_vm0, %v1700_v46, 0.0 }
 0x23b   :  { %v5736_v26 = vadd.f32 %v5396_v34, %v1606_v8  ;;  %1869 = vadd.xlane.f32.xlu1 %v1868_v1  ;;  %v1871_v40 = vsel %vm95_vm0, %v1699_v5, 0.0 }
 0x23c   :  { %6840 = vst [vmem:[#allocation19_spill] sm:$0xff] %v5730_v17  ;;  %1872 = vadd.xlane.f32.xlu0 %v1871_v40  ;;  %v1702_v54 = vmul.f32 %v5730_v17, %v5730_v17 }
 0x23d   :  { %6841 = vst [vmem:[#allocation20_spill] sm:$0xff] %v5736_v26  ;;  %v4232_v24 = vpop.f32.mrb[58].mxu1  ;;  %v1701_v43 = vmul.f32 %v5736_v26, %v5736_v26 }
 0x23e   :  { %v5742_v53 = vadd.f32 %v4232_v24, %v5396_v34  ;;  %v1616_v60 = vpop.f32.mrb[59].mxu1  ;;  %v1880_v46 = vsel %vm95_vm0, %v1702_v54, 0.0 }
 0x23f   :  { %v5748_v8 = vadd.f32 %v5396_v34, %v1616_v60  ;;  %1875 = vadd.xlane.f32.xlu1 %v1874_v14  ;;  %v1877_v5 = vsel %vm95_vm0, %v1701_v43, 0.0 }
 0x240   :  { %6842 = vst [vmem:[#allocation21_spill] sm:$0xff] %v5742_v53  ;;  %1878 = vadd.xlane.f32.xlu0 %v1877_v5  ;;  %v1704_v17 = vmul.f32 %v5742_v53, %v5742_v53 }
 0x241   :  { %6843 = vst [vmem:[#allocation22_spill] sm:$0xff] %v5748_v8  ;;  %v4235_v1 = vpop.f32.mrb[60].mxu1  ;;  %v1703_v40 = vmul.f32 %v5748_v8, %v5748_v8 }
 0x242   :  { %v5754_v24 = vadd.f32 %v4235_v1, %v5396_v34  ;;  %v1626_v26 = vpop.f32.mrb[61].mxu1  ;;  %v1886_v54 = vsel %vm95_vm0, %v1704_v17, 0.0 }
 0x243   :  { %v5760_v60 = vadd.f32 %v5396_v34, %v1626_v26  ;;  %1881 = vadd.xlane.f32.xlu1 %v1880_v46  ;;  %v1883_v43 = vsel %vm95_vm0, %v1703_v40, 0.0 }
 0x244   :  { %6844 = vst [vmem:[#allocation23_spill] sm:$0xff] %v5754_v24  ;;  %1884 = vadd.xlane.f32.xlu0 %v1883_v43  ;;  %v1706_v53 = vmul.f32 %v5754_v24, %v5754_v24 }
 0x245   :  { %6845 = vst [vmem:[#allocation24_spill] sm:$0xff] %v5760_v60  ;;  %v4238_v14 = vpop.f32.mrb[62].mxu1  ;;  %v1705_v5 = vmul.f32 %v5760_v60, %v5760_v60 }
 0x246   :  { %v5766_v1 = vadd.f32 %v4238_v14, %v5396_v34  ;;  %v1636_v8 = vpop.f32.mrb[63].mxu1  ;;  %v1892_v43 = vsel %vm95_vm0, %v1706_v53, 0.0 }
 0x247   :  { %v5772_v26 = vadd.f32 %v5396_v34, %v1636_v8  ;;  %1887 = vadd.xlane.f32.xlu1 %v1886_v54  ;;  %v1889_v40 = vsel %vm95_vm0, %v1705_v5, 0.0 }
 0x248   :  { %6846 = vst [vmem:[#allocation25_spill] sm:$0xff] %v5766_v1  ;;  %1890 = vadd.xlane.f32.xlu0 %v1889_v40  ;;  %v1708_v14 = vmul.f32 %v5766_v1, %v5766_v1 }
 0x249   :  { %6847 = vst [vmem:[#allocation26_spill] sm:$0xff] %v5772_v26  ;;  %v1707_v46 = vmul.f32 %v5772_v26, %v5772_v26 }
 0x24a   :  { %v1898_v24 = vsel %vm95_vm0, %v1708_v14, 0.0 }
 0x24b   :  { %1893 = vadd.xlane.f32.xlu1 %v1892_v43  ;;  %v1895_v17 = vsel %vm95_vm0, %v1707_v46, 0.0 }
 0x24c   :  { %1896 = vadd.xlane.f32.xlu0 %v1895_v17 }
 0x24f   :  { %1899 = vadd.xlane.f32.xlu1 %v1898_v24 }
 0x25c   :  { %v1714_v34 = vpop.xlane.xlu0 %1713 }
 0x25d   :  { %4383 = vrsqrt.f32 %v1714_v34  ;;  %vm1910_vm5 = vcmp.eq.f32.partialorder %v1714_v34, inf  ;;  %vm1912_vm6 = vcmp.eq.f32.partialorder %v1714_v34, 0.0  ;;  %v1913_v43 = vand.u32 2147483648, %v1714_v34 }
 0x260   :  { %v1720_v8 = vpop.xlane.xlu1 %1719  ;;  %v1711_v5 = vpop.xlane.xlu0 %1710 }
 0x261   :  { %4385 = vrsqrt.f32 %v1720_v8  ;;  %vm1924_vm0 = vcmp.eq.f32.partialorder %v1720_v8, inf  ;;  %vm1926_vm7 = vcmp.eq.f32.partialorder %v1720_v8, 0.0  ;;  %v1927_v14 = vand.u32 2147483648, %v1720_v8 }
 0x262   :  { %4387 = vrsqrt.f32 %v1711_v5  ;;  %vm1903_vm8 = vcmp.eq.f32.partialorder %v1711_v5, inf  ;;  %vm1905_vm9 = vcmp.eq.f32.partialorder %v1711_v5, 0.0  ;;  %v1906_v26 = vand.u32 2147483648, %v1711_v5 }
 0x264   :  { %v5782_v54 = vpop.xlane.xlu1 %1716 }
 0x265   :  { %4389 = vrsqrt.f32 %v5782_v54  ;;  %v5785_v53 = vpop.xlane.xlu0 %1722  ;;  %vm1917_vm10 = vcmp.eq.f32.partialorder %v5782_v54, inf  ;;  %vm1919_vm11 = vcmp.eq.f32.partialorder %v5782_v54, 0.0 }
 0x266   :  { %4391 = vrsqrt.f32 %v5785_v53  ;;  %vm1931_vm12 = vcmp.eq.f32.partialorder %v5785_v53, inf  ;;  %vm1933_vm13 = vcmp.eq.f32.partialorder %v5785_v53, 0.0  ;;  %v1934_v48 = vand.u32 2147483648, %v5785_v53 }
 0x267   :  { %v4384_v40 = vpop.eup %4383 }
 0x268   :  { %v1909_v46 = vmul.f32 %v4384_v40, %v1714_v34  ;;  %v5788_v24 = vpop.xlane.xlu1 %1725  ;;  %v1920_v40 = vand.u32 2147483648, %v5782_v54 }
 0x269   :  { %4393 = vrsqrt.f32 %v5788_v24  ;;  %v5791_v17 = vpop.xlane.xlu0 %1728  ;;  %vm1938_vm14 = vcmp.eq.f32.partialorder %v5788_v24, inf  ;;  %vm1940_vm15 = vcmp.eq.f32.partialorder %v5788_v24, 0.0 }
 0x26a   :  { %v1911_v1 = vsel %vm1910_vm5, %v1714_v34, %v1909_v46  ;;  %4395 = vrsqrt.f32 %v5791_v17  ;;  %vm1945_vm1 = vcmp.eq.f32.partialorder %v5791_v17, inf  ;;  %vm1947_vm2 = vcmp.eq.f32.partialorder %v5791_v17, 0.0 }
 0x26b   :  { %v4386_v60 = vpop.eup %4385  ;;  %v1914_v36 = vsel %vm1912_vm6, %v1913_v43, %v1911_v1  ;;  %v1948_v7 = vand.u32 2147483648, %v5791_v17  ;;  %vm3440_vm6 = vcmask 257024  }
 0x26c   :  { %v4388_v56 = vpop.eup %4387  ;;  %v2350_v13 = vmax.f32 %v1914_v36, 1e-12  ;;  %v1923_v22 = vmul.f32 %v4386_v60, %v1720_v8  ;;  %v5799_v34 = vpop.xlane.xlu1 %1731  ;;  %v1941_v36 = vand.u32 2147483648, %v5788_v24 }
 0x26d   :  { %v1902_v46 = vmul.f32 %v4388_v56, %v1711_v5  ;;  %4397 = vrsqrt.f32 %v5799_v34  ;;  %v5804_v1 = vpop.xlane.xlu0 %1734  ;;  %vm1952_vm3 = vcmp.eq.f32.partialorder %v5799_v34, inf  ;;  %vm1954_vm4 = vcmp.eq.f32.partialorder %v5799_v34, 0.0 }
 0x26e   :  { %4399 = vrcp.f32 %v2350_v13  ;;  %v1925_v43 = vsel %vm1924_vm0, %v1720_v8, %v1923_v22  ;;  %vm1959_vm5 = vcmp.eq.f32.partialorder %v5804_v1, inf  ;;  %vm1961_vm0 = vcmp.eq.f32.partialorder %v5804_v1, 0.0 }
 0x26f   :  { %v4390_v60 = vpop.eup %4389  ;;  %v1928_v56 = vsel %vm1926_vm7, %v1927_v14, %v1925_v43  ;;  %v1904_v0 = vsel %vm1903_vm8, %v1711_v5, %v1902_v46  ;;  %4401 = vrsqrt.f32 %v5804_v1 }
 0x270   :  { %v4392_v16 = vpop.eup %4391  ;;  %v2352_v33 = vmax.f32 %v1928_v56, 1e-12  ;;  %v1907_v13 = vsel %vm1905_vm9, %v1906_v26, %v1904_v0  ;;  %v1916_v22 = vmul.f32 %v4390_v60, %v5782_v54  ;;  %v5817_v29 = vpop.xlane.xlu1 %1737  ;;  %v1955_v26 = vand.u32 2147483648, %v5799_v34 }
 0x271   :  { %v2349_v51 = vmax.f32 %v1907_v13, 1e-12  ;;  %v1930_v8 = vmul.f32 %v4392_v16, %v5785_v53  ;;  %4403 = vrsqrt.f32 %v5817_v29  ;;  %v5822_v14 = vpop.xlane.xlu0 %1740  ;;  %v1962_v13 = vand.u32 2147483648, %v5804_v1 }
 0x272   :  { %4405 = vrcp.f32 %v2352_v33  ;;  %v1918_v0 = vsel %vm1917_vm10, %v5782_v54, %v1916_v22  ;;  %vm1966_vm7 = vcmp.eq.f32.partialorder %v5817_v29, inf  ;;  %vm1968_vm8 = vcmp.eq.f32.partialorder %v5817_v29, 0.0 }
 0x273   :  { %v4394_v5 = vpop.eup %4393  ;;  %4407 = vrcp.f32 %v2349_v51  ;;  %v1921_v16 = vsel %vm1919_vm11, %v1920_v40, %v1918_v0  ;;  %v1932_v46 = vsel %vm1931_vm12, %v5785_v53, %v1930_v8  ;;  %vm1973_vm9 = vcmp.eq.f32.partialorder %v5822_v14, inf }
 0x274   :  { %v4396_v33 = vpop.eup %4395  ;;  %v2351_v43 = vmax.f32 %v1921_v16, 1e-12  ;;  %v1935_v60 = vsel %vm1933_vm13, %v1934_v48, %v1932_v46  ;;  %v1937_v56 = vmul.f32 %v4394_v5, %v5788_v24  ;;  %4409 = vrsqrt.f32 %v5822_v14  ;;  %v5839_v51 = vpop.xlane.xlu1 %1743 }
 0x275   :  { %v2353_v54 = vmax.f32 %v1935_v60, 1e-12  ;;  %v1944_v40 = vmul.f32 %v4396_v33, %v5791_v17  ;;  %v5849_v48 = vpop.xlane.xlu0 %1746  ;;  %v1969_v5 = vand.u32 2147483648, %v5817_v29  ;;  %vm1975_vm10 = vcmp.eq.f32.partialorder %v5822_v14, 0.0 }
 0x276   :  { %4411 = vrcp.f32 %v2351_v43  ;;  %v1939_v22 = vsel %vm1938_vm14, %v5788_v24, %v1937_v56  ;;  %vm1980_vm11 = vcmp.eq.f32.partialorder %v5839_v51, inf  ;;  %vm1982_vm12 = vcmp.eq.f32.partialorder %v5839_v51, 0.0 }
 0x277   :  { %v4398_v53 = vpop.eup %4397  ;;  %4413 = vrcp.f32 %v2353_v54  ;;  %v1942_v8 = vsel %vm1940_vm15, %v1941_v36, %v1939_v22  ;;  %v1946_v0 = vsel %vm1945_vm1, %v5791_v17, %v1944_v40  ;;  %vm1987_vm13 = vcmp.eq.f32.partialorder %v5849_v48, inf }
 0x278   :  { %v4400_v16 = vpop.eup %4399  ;;  %v2354_v46 = vmax.f32 %v1942_v8, 1e-12  ;;  %v1949_v33 = vsel %vm1947_vm2, %v1948_v7, %v1946_v0  ;;  %v1951_v43 = vmul.f32 %v4398_v53, %v5799_v34  ;;  %4415 = vrsqrt.f32 %v5839_v51  ;;  %v5863_v24 = vpop.xlane.xlu1 %1749 }
 0x279   :  { %v4402_v60 = vpop.eup %4401  ;;  %v2416_v56 = vmul.f32 1.4142135, %v4400_v16  ;;  %v2355_v54 = vmax.f32 %v1949_v33, 1e-12  ;;  %4417 = vrsqrt.f32 %v5849_v48  ;;  %v1976_v53 = vand.u32 2147483648, %v5822_v14 }
 0x27a   :  { %4419 = vrcp.f32 %v2354_v46  ;;  %v1953_v36 = vsel %vm1952_vm3, %v5799_v34, %v1951_v43  ;;  %v1958_v7 = vmul.f32 %v4402_v60, %v5804_v1  ;;  %v5884_v60 = vpop.xlane.xlu0 %1752  ;;  %vm1989_vm14 = vcmp.eq.f32.partialorder %v5849_v48, 0.0 }
 0x27b   :  { %v4404_v17 = vpop.eup %4403  ;;  %v2542_v40 = vmul.f32 %v2416_v56, %v5399_v59  ;;  %4421 = vrcp.f32 %v2355_v54  ;;  %v1956_v22 = vsel %vm1954_vm4, %v1955_v26, %v1953_v36  ;;  %v1983_v26 = vand.u32 2147483648, %v5839_v51 }
 0x27c   :  { %v4406_v8 = vpop.eup %4405  ;;  %v2356_v0 = vmax.f32 %v1956_v22, 1e-12  ;;  %v1960_v16 = vsel %vm1959_vm5, %v5804_v1, %v1958_v7  ;;  %v1965_v46 = vmul.f32 %v4404_v17, %v5817_v29  ;;  %4423 = vrsqrt.f32 %v5863_v24 }
 0x27d   :  { %v4408_v33 = vpop.eup %4407  ;;  %v3832_v59 = vpack.c.bf16 %v2542_v40, %v2542_v40  ;;  %v2420_v43 = vmul.f32 1.4142135, %v4406_v8  ;;  %v1963_v34 = vsel %vm1961_vm0, %v1962_v13, %v1960_v16  ;;  %vm1994_vm15 = vcmp.eq.f32.partialorder %v5863_v24, inf }
 0x27e   :  { %v4410_v56 = vpop.eup %4409  ;;  %v2414_v54 = vmul.f32 1.4142135, %v4408_v33  ;;  %4425 = vrcp.f32 %v2356_v0  ;;  %v2357_v36 = vmax.f32 %v1963_v34, 1e-12  ;;  %v1967_v7 = vsel %vm1966_vm7, %v5817_v29, %v1965_v46  ;;  %v5900_v0 = vpop.xlane.xlu1 %1755 }
 0x27f   :  { %3442 = vst.msk [vmem:[%s6797_s5 + $0x4] sm:$0xf] %vm3440_vm6, %v3832_v59  ;;  %v2544_v1 = vmul.f32 %v2420_v43, %v5407_v50  ;;  %v1970_v13 = vsel %vm1968_vm8, %v1969_v5, %v1967_v7  ;;  %v1972_v17 = vmul.f32 %v4410_v56, %v5822_v14  ;;  %v5915_v7 = vpop.xlane.xlu0 %1758  ;;  %vm1996_vm1 = vcmp.eq.f32.partialorder %v5863_v24, 0.0 }
 0x280   :  { %v4412_v40 = vpop.eup %4411  ;;  %v2541_v22 = vmul.f32 %v2414_v54, %v5402_v38  ;;  %4427 = vrcp.f32 %v2357_v36  ;;  %v2358_v8 = vmax.f32 %v1970_v13, 1e-12  ;;  %v1990_v36 = vand.u32 2147483648, %v5849_v48 }
 0x281   :  { %v4414_v16 = vpop.eup %4413  ;;  %v3834_v46 = vpack.c.bf16 %v2544_v1, %v2544_v1  ;;  %v2418_v33 = vmul.f32 1.4142135, %v4412_v40  ;;  %v1974_v50 = vsel %vm1973_vm9, %v5822_v14, %v1972_v17  ;;  %4429 = vrsqrt.f32 %v5884_v60 }
 0x282   :  { %v4416_v29 = vpop.eup %4415  ;;  %v3831_v5 = vpack.c.bf16 %v2541_v22, %v2541_v22  ;;  %v2422_v59 = vmul.f32 1.4142135, %v4414_v16  ;;  %4431 = vrcp.f32 %v2358_v8  ;;  %v1977_v38 = vsel %vm1975_vm10, %v1976_v53, %v1974_v50 }
 0x283   :  { %v4418_v43 = vpop.eup %4417  ;;  %3444 = vst.msk [vmem:[%s6797_s5 + $0xc] sm:$0xf] %vm3440_vm6, %v3834_v46  ;;  %v2543_v34 = vmul.f32 %v2418_v33, %v5413_v4  ;;  %v2359_v56 = vmax.f32 %v1977_v38, 1e-12  ;;  %v1979_v54 = vmul.f32 %v4416_v29, %v5839_v51  ;;  %v5933_v33 = vpop.xlane.xlu1 %1761  ;;  %vm2001_vm2 = vcmp.eq.f32.partialorder %v5884_v60, inf }
 0x284   :  { %v4420_v1 = vpop.eup %4419  ;;  %3441 = vst.msk [vmem:[%s6797_s5] sm:$0xf] %vm3440_vm6, %v3831_v5  ;;  %v2545_v14 = vmul.f32 %v2422_v59, %v5425_v55  ;;  %v1986_v53 = vmul.f32 %v4418_v43, %v5849_v48  ;;  %v1997_v43 = vand.u32 2147483648, %v5863_v24  ;;  %vm2003_vm3 = vcmp.eq.f32.partialorder %v5884_v60, 0.0 }
 0x285   :  { %v4422_v4 = vpop.eup %4421  ;;  %v3833_v13 = vpack.c.bf16 %v2543_v34, %v2543_v34  ;;  %v2424_v17 = vmul.f32 1.4142135, %v4420_v1  ;;  %4433 = vrcp.f32 %v2359_v56  ;;  %v1981_v40 = vsel %vm1980_vm11, %v5839_v51, %v1979_v54  ;;  %v5953_v56 = vpop.xlane.xlu0 %1764 }
 0x286   :  { %v4424_v22 = vpop.eup %4423  ;;  %v3835_v8 = vpack.c.bf16 %v2545_v14, %v2545_v14  ;;  %v2426_v16 = vmul.f32 1.4142135, %v4422_v4  ;;  %v1984_v55 = vsel %vm1982_vm12, %v1983_v26, %v1981_v40  ;;  %v1988_v46 = vsel %vm1987_vm13, %v5849_v48, %v1986_v53 }
 0x287   :  { %3443 = vst.msk [vmem:[%s6797_s5 + $0x8] sm:$0xf] %vm3440_vm6, %v3833_v13  ;;  %v2546_v50 = vmul.f32 %v2424_v17, %v5418_v49  ;;  %v2360_v29 = vmax.f32 %v1984_v55, 1e-12  ;;  %v1991_v5 = vsel %vm1989_vm14, %v1990_v36, %v1988_v46  ;;  %v1993_v51 = vmul.f32 %v4424_v22, %v5863_v24  ;;  %v5970_v40 = vpop.xlane.xlu1 %1767 }
 0x288   :  { %v4426_v26 = vpop.eup %4425  ;;  %3445 = vst.msk [vmem:[%s6797_s5 + $0x10] sm:$0xf] %vm3440_vm6, %v3835_v8  ;;  %v2547_v59 = vmul.f32 %v2426_v16, %v5436_v58  ;;  %v2361_v38 = vmax.f32 %v1991_v5, 1e-12  ;;  %4435 = vrsqrt.f32 %v5900_v0  ;;  %vm2008_vm4 = vcmp.eq.f32.partialorder %v5900_v0, inf }
 0x289   :  { %v3836_v49 = vpack.c.bf16 %v2546_v50, %v2546_v50  ;;  %v2428_v34 = vmul.f32 1.4142135, %v4426_v26  ;;  %4437 = vrcp.f32 %v2360_v29  ;;  %v1995_v48 = vsel %vm1994_vm15, %v5863_v24, %v1993_v51  ;;  %v5981_v5 = vpop.xlane.xlu0 %1770 }
 0x28a   :  { %v4428_v54 = vpop.eup %4427  ;;  %v3837_v36 = vpack.c.bf16 %v2547_v59, %v2547_v59  ;;  %4439 = vrcp.f32 %v2361_v38  ;;  %v1998_v58 = vsel %vm1996_vm1, %v1997_v43, %v1995_v48  ;;  %v2004_v24 = vand.u32 2147483648, %v5884_v60 }
 0x28b   :  { %v4430_v1 = vpop.eup %4429  ;;  %3446 = vst.msk [vmem:[%s6797_s5 + $0x14] sm:$0xf] %vm3440_vm6, %v3836_v49  ;;  %v2548_v14 = vmul.f32 %v2428_v34, %v5430_v57  ;;  %v2430_v53 = vmul.f32 1.4142135, %v4428_v54  ;;  %v2362_v4 = vmax.f32 %v1998_v58, 1e-12  ;;  %4441 = vrsqrt.f32 %v5915_v7  ;;  %v5995_v43 = vpop.xlane.xlu1 %1773 }
 0x28c   :  { %v4432_v13 = vpop.eup %4431  ;;  %3447 = vst.msk [vmem:[%s6797_s5 + $0x18] sm:$0xf] %vm3440_vm6, %v3837_v36  ;;  %v2000_v17 = vmul.f32 %v4430_v1, %v5884_v60  ;;  %vm2010_vm5 = vcmp.eq.f32.partialorder %v5900_v0, 0.0  ;;  %v2011_v26 = vand.u32 2147483648, %v5900_v0  ;;  %vm2015_vm0 = vcmp.eq.f32.partialorder %v5915_v7, inf }
 0x28d   :  { %v3838_v22 = vpack.c.bf16 %v2548_v14, %v2548_v14  ;;  %v2549_v57 = vmul.f32 %v2430_v53, %v5448_v6  ;;  %v2432_v8 = vmul.f32 1.4142135, %v4432_v13  ;;  %4443 = vrcp.f32 %v2362_v4  ;;  %v6012_v14 = vpop.xlane.xlu0 %1776 }
 0x28e   :  { %v2002_v16 = vsel %vm2001_vm2, %v5884_v60, %v2000_v17  ;;  %4445 = vrsqrt.f32 %v5933_v33  ;;  %vm2017_vm7 = vcmp.eq.f32.partialorder %v5915_v7, 0.0  ;;  %v2018_v38 = vand.u32 2147483648, %v5915_v7 }
 0x28f   :  { %v4434_v55 = vpop.eup %4433  ;;  %3448 = vst.msk [vmem:[%s6797_s5 + $0x1c] sm:$0xf] %vm3440_vm6, %v3838_v22  ;;  %v3839_v46 = vpack.c.bf16 %v2549_v57, %v2549_v57  ;;  %v2550_v50 = vmul.f32 %v2432_v8, %v5442_v21  ;;  %v2005_v29 = vsel %vm2003_vm3, %v2004_v24, %v2002_v16  ;;  %4447 = vrsqrt.f32 %v5953_v56 }
 0x290   :  { %v2434_v6 = vmul.f32 1.4142135, %v4434_v55  ;;  %v2363_v51 = vmax.f32 %v2005_v29, 1e-12  ;;  %vm2022_vm8 = vcmp.eq.f32.partialorder %v5933_v33, inf  ;;  %vm2024_vm9 = vcmp.eq.f32.partialorder %v5933_v33, 0.0 }
 0x291   :  { %3449 = vst.msk [vmem:[%s6797_s5 + $0x20] sm:$0xf] %vm3440_vm6, %v3839_v46  ;;  %v3840_v60 = vpack.c.bf16 %v2550_v50, %v2550_v50  ;;  %v2025_v36 = vand.u32 2147483648, %v5933_v33  ;;  %vm2029_vm10 = vcmp.eq.f32.partialorder %v5953_v56, inf  ;;  %vm2031_vm11 = vcmp.eq.f32.partialorder %v5953_v56, 0.0 }
 0x292   :  { %v4436_v21 = vpop.eup %4435  ;;  %v2551_v59 = vmul.f32 %v2434_v6, %v5460_v15  ;;  %4449 = vrcp.f32 %v2363_v51  ;;  %v2032_v17 = vand.u32 2147483648, %v5953_v56  ;;  %vm2036_vm12 = vcmp.eq.f32.partialorder %v5970_v40, inf }
 0x293   :  { %v4438_v49 = vpop.eup %4437  ;;  %3450 = vst.msk [vmem:[%s6797_s5 + $0x24] sm:$0xf] %vm3440_vm6, %v3840_v60  ;;  %v2007_v34 = vmul.f32 %v4436_v21, %v5900_v0  ;;  %4451 = vrsqrt.f32 %v5970_v40  ;;  %vm2038_vm13 = vcmp.eq.f32.partialorder %v5970_v40, 0.0  ;;  %vm2043_vm14 = vcmp.eq.f32.partialorder %v5981_v5, inf }
 0x294   :  { %v4440_v15 = vpop.eup %4439  ;;  %v3841_v48 = vpack.c.bf16 %v2551_v59, %v2551_v59  ;;  %v2436_v54 = vmul.f32 1.4142135, %v4438_v49  ;;  %4453 = vrsqrt.f32 %v5981_v5  ;;  %vm2045_vm15 = vcmp.eq.f32.partialorder %v5981_v5, 0.0 }
 0x295   :  { %v2438_v58 = vmul.f32 1.4142135, %v4440_v15  ;;  %v2009_v1 = vsel %vm2008_vm4, %v5900_v0, %v2007_v34  ;;  %4455 = vrsqrt.f32 %v5995_v43  ;;  %v4442_v53 = vpop.eup %4441  ;;  %v6029_v0 = vpop.xlane.xlu1 %1779  ;;  %v2046_v34 = vand.u32 2147483648, %v5981_v5 }
 0x296   :  { %3451 = vst.msk [vmem:[%s6797_s5 + $0x28] sm:$0xf] %vm3440_vm6, %v3841_v48  ;;  %v2552_v4 = vmul.f32 %v2436_v54, %v5454_v11  ;;  %v2012_v13 = vsel %vm2010_vm5, %v2011_v26, %v2009_v1  ;;  %v2014_v8 = vmul.f32 %v4442_v53, %v5915_v7  ;;  %v2039_v11 = vand.u32 2147483648, %v5970_v40 }
 0x297   :  { %v4444_v24 = vpop.eup %4443  ;;  %v2553_v22 = vmul.f32 %v2438_v58, %v5472_v20  ;;  %v2364_v57 = vmax.f32 %v2012_v13, 1e-12  ;;  %4457 = vrsqrt.f32 %v6012_v14  ;;  %vm2050_vm1 = vcmp.eq.f32.partialorder %v5995_v43, inf }
 0x298   :  { %v4446_v16 = vpop.eup %4445  ;;  %v3842_v55 = vpack.c.bf16 %v2552_v4, %v2552_v4  ;;  %v2440_v46 = vmul.f32 1.4142135, %v4444_v24  ;;  %v2016_v20 = vsel %vm2015_vm0, %v5915_v7, %v2014_v8  ;;  %vm2052_vm2 = vcmp.eq.f32.partialorder %v5995_v43, 0.0 }
 0x299   :  { %v3843_v50 = vpack.c.bf16 %v2553_v22, %v2553_v22  ;;  %4459 = vrcp.f32 %v2364_v57  ;;  %v2021_v29 = vmul.f32 %v4446_v16, %v5933_v33  ;;  %v4448_v6 = vpop.eup %4447  ;;  %v2019_v60 = vsel %vm2017_vm7, %v2018_v38, %v2016_v20  ;;  %v6071_v53 = vpop.xlane.xlu1 %1785 }
 0x29a   :  { %3452 = vst.msk [vmem:[%s6797_s5 + $0x2c] sm:$0xf] %vm3440_vm6, %v3842_v55  ;;  %v2554_v51 = vmul.f32 %v2440_v46, %v5466_v28  ;;  %v2365_v26 = vmax.f32 %v2019_v60, 1e-12  ;;  %v2028_v59 = vmul.f32 %v4448_v6, %v5953_v56  ;;  %4461 = vrsqrt.f32 %v6029_v0  ;;  %v6053_v28 = vpop.xlane.xlu0 %1782 }
 0x29b   :  { %3453 = vst.msk [vmem:[%s6797_s5 + $0x30] sm:$0xf] %vm3440_vm6, %v3843_v50  ;;  %v2023_v21 = vsel %vm2022_vm8, %v5933_v33, %v2021_v29  ;;  %v2053_v57 = vand.u32 2147483648, %v5995_v43  ;;  %vm2057_vm3 = vcmp.eq.f32.partialorder %v6012_v14, inf  ;;  %vm2059_vm4 = vcmp.eq.f32.partialorder %v6012_v14, 0.0 }
 0x29c   :  { %v4450_v7 = vpop.eup %4449  ;;  %v3844_v38 = vpack.c.bf16 %v2554_v51, %v2554_v51  ;;  %v2026_v49 = vsel %vm2024_vm9, %v2025_v36, %v2023_v21  ;;  %4463 = vrcp.f32 %v2365_v26  ;;  %v2030_v58 = vsel %vm2029_vm10, %v5953_v56, %v2028_v59 }
 0x29d   :  { %v4452_v15 = vpop.eup %4451  ;;  %v2442_v48 = vmul.f32 1.4142135, %v4450_v7  ;;  %v2366_v54 = vmax.f32 %v2026_v49, 1e-12  ;;  %v2033_v33 = vsel %vm2031_vm11, %v2032_v17, %v2030_v58  ;;  %4465 = vrsqrt.f32 %v6053_v28  ;;  %v6103_v21 = vpop.xlane.xlu1 %1791 }
 0x29e   :  { %v4454_v1 = vpop.eup %4453  ;;  %3454 = vst.msk [vmem:[%s6797_s5 + $0x34] sm:$0xf] %vm3440_vm6, %v3844_v38  ;;  %v2035_v36 = vmul.f32 %v4452_v15, %v5970_v40  ;;  %v2367_v24 = vmax.f32 %v2033_v33, 1e-12  ;;  %v6086_v55 = vpop.xlane.xlu0 %1788  ;;  %v2060_v26 = vand.u32 2147483648, %v6012_v14  ;;  %vm2064_vm5 = vcmp.eq.f32.partialorder %v6029_v0, inf }
 0x29f   :  { %v4456_v4 = vpop.eup %4455  ;;  %v2555_v13 = vmul.f32 %v2442_v48, %v5484_v27  ;;  %4467 = vrcp.f32 %v2366_v54  ;;  %v2042_v22 = vmul.f32 %v4454_v1, %v5981_v5  ;;  %vm2066_vm0 = vcmp.eq.f32.partialorder %v6029_v0, 0.0 }
 0x2a0   :  { %v2037_v56 = vsel %vm2036_vm12, %v5970_v40, %v2035_v36  ;;  %v2049_v17 = vmul.f32 %v4456_v4, %v5995_v43  ;;  %4469 = vrcp.f32 %v2367_v24  ;;  %v2067_v48 = vand.u32 2147483648, %v6029_v0 }
 0x2a1   :  { %v3845_v8 = vpack.c.bf16 %v2555_v13, %v2555_v13  ;;  %v2040_v16 = vsel %vm2038_vm13, %v2039_v11, %v2037_v56  ;;  %v2044_v27 = vsel %vm2043_vm14, %v5981_v5, %v2042_v22  ;;  %v4458_v46 = vpop.eup %4457  ;;  %4471 = vrsqrt.f32 %v6071_v53 }
 0x2a2   :  { %v2368_v50 = vmax.f32 %v2040_v16, 1e-12  ;;  %v2047_v20 = vsel %vm2045_vm15, %v2046_v34, %v2044_v27  ;;  %v2051_v29 = vsel %vm2050_vm1, %v5995_v43, %v2049_v17  ;;  %v2056_v51 = vmul.f32 %v4458_v46, %v6012_v14  ;;  %v6117_v54 = vpop.xlane.xlu0 %1794  ;;  %v6131_v17 = vpop.xlane.xlu1 %1797 }
 0x2a3   :  { %v4460_v6 = vpop.eup %4459  ;;  %3455 = vst.msk [vmem:[%s6797_s5 + $0x38] sm:$0xf] %vm3440_vm6, %v3845_v8  ;;  %v2369_v40 = vmax.f32 %v2047_v20, 1e-12  ;;  %v2054_v11 = vsel %vm2052_vm2, %v2053_v57, %v2051_v29  ;;  %vm2071_vm7 = vcmp.eq.f32.partialorder %v6053_v28, inf  ;;  %vm2073_vm8 = vcmp.eq.f32.partialorder %v6053_v28, 0.0 }
 0x2a4   :  { %v2444_v5 = vmul.f32 1.4142135, %v4460_v6  ;;  %4473 = vrcp.f32 %v2368_v50  ;;  %v2370_v60 = vmax.f32 %v2054_v11, 1e-12  ;;  %v4462_v59 = vpop.eup %4461  ;;  %v2058_v7 = vsel %vm2057_vm3, %v6012_v14, %v2056_v51 }
 0x2a5   :  { %4475 = vrcp.f32 %v2369_v40  ;;  %v2061_v38 = vsel %vm2059_vm4, %v2060_v26, %v2058_v7  ;;  %v2063_v49 = vmul.f32 %v4462_v59, %v6029_v0  ;;  %v2074_v13 = vand.u32 2147483648, %v6053_v28 }
 0x2a6   :  { %v2556_v43 = vmul.f32 %v2444_v5, %v5478_v25  ;;  %4477 = vrcp.f32 %v2370_v60  ;;  %v4464_v34 = vpop.eup %4463  ;;  %v2371_v15 = vmax.f32 %v2061_v38, 1e-12  ;;  %vm2078_vm9 = vcmp.eq.f32.partialorder %v6071_v53, inf  ;;  %v6145_v20 = vpop.xlane.xlu0 %1800 }
 0x2a7   :  { %4479 = vrsqrt.f32 %v6086_v55  ;;  %v4466_v58 = vpop.eup %4465  ;;  %v2446_v33 = vmul.f32 1.4142135, %v4464_v34  ;;  %v2065_v25 = vsel %vm2064_vm5, %v6029_v0, %v2063_v49  ;;  %vm2080_vm10 = vcmp.eq.f32.partialorder %v6071_v53, 0.0  ;;  %v6163_v7 = vpop.xlane.xlu1 %1803 }
 0x2a8   :  { %v3846_v1 = vpack.c.bf16 %v2556_v43, %v2556_v43  ;;  %4481 = vrcp.f32 %v2371_v15  ;;  %v2068_v36 = vsel %vm2066_vm0, %v2067_v48, %v2065_v25  ;;  %v2070_v4 = vmul.f32 %v4466_v58, %v6053_v28 }
 0x2a9   :  { %v4468_v14 = vpop.eup %4467  ;;  %v2557_v24 = vmul.f32 %v2446_v33, %v5496_v41  ;;  %v2372_v56 = vmax.f32 %v2068_v36, 1e-12  ;;  %4483 = vrsqrt.f32 %v6103_v21  ;;  %v2081_v50 = vand.u32 2147483648, %v6071_v53 }
 0x2aa   :  { %3456 = vst.msk [vmem:[%s6797_s5 + $0x3c] sm:$0xf] %vm3440_vm6, %v3846_v1  ;;  %v2448_v22 = vmul.f32 1.4142135, %v4468_v14  ;;  %v4470_v57 = vpop.eup %4469  ;;  %v2072_v0 = vsel %vm2071_vm7, %v6053_v28, %v2070_v4  ;;  %4485 = vrsqrt.f32 %v6117_v54  ;;  %vm2085_vm11 = vcmp.eq.f32.partialorder %v6086_v55, inf  ;;  %v6179_v25 = vpop.xlane.xlu0 %1806 }
 0x2ab   :  { %v3847_v8 = vpack.c.bf16 %v2557_v24, %v2557_v24  ;;  %v2450_v16 = vmul.f32 1.4142135, %v4470_v57  ;;  %4487 = vrcp.f32 %v2372_v56  ;;  %v4472_v27 = vpop.eup %4471  ;;  %v2075_v46 = vsel %vm2073_vm8, %v2074_v13, %v2072_v0 }
 0x2ac   :  { %v2558_v41 = vmul.f32 %v2448_v22, %v5490_v37  ;;  %vm2087_vm12 = vcmp.eq.f32.partialorder %v6086_v55, 0.0  ;;  %v2373_v40 = vmax.f32 %v2075_v46, 1e-12  ;;  %v2077_v28 = vmul.f32 %v4472_v27, %v6071_v53 }
 0x2ad   :  { %3457 = vst.msk [vmem:[%s6797_s5 + $0x40] sm:$0xf] %vm3440_vm6, %v3847_v8  ;;  %v2559_v6 = vmul.f32 %v2450_v16, %v5508_v9  ;;  %v2088_v5 = vand.u32 2147483648, %v6086_v55  ;;  %vm2092_vm13 = vcmp.eq.f32.partialorder %v6103_v21, inf  ;;  %4489 = vrsqrt.f32 %v6131_v17 }
 0x2ae   :  { %v4474_v29 = vpop.eup %4473  ;;  %v3848_v37 = vpack.c.bf16 %v2558_v41, %v2558_v41  ;;  %4491 = vrcp.f32 %v2373_v40  ;;  %v2079_v9 = vsel %vm2078_vm9, %v6071_v53, %v2077_v28  ;;  %vm2094_vm14 = vcmp.eq.f32.partialorder %v6103_v21, 0.0  ;;  %v6199_v41 = vpop.xlane.xlu1 %1809 }
 0x2af   :  { %v4476_v11 = vpop.eup %4475  ;;  %v2452_v51 = vmul.f32 1.4142135, %v4474_v29  ;;  %v3849_v26 = vpack.c.bf16 %v2559_v6, %v2559_v6  ;;  %v2082_v34 = vsel %vm2080_vm10, %v2081_v50, %v2079_v9  ;;  %4493 = vrsqrt.f32 %v6145_v20  ;;  %v6219_v28 = vpop.xlane.xlu0 %1812 }
 0x2b0   :  { %v4478_v60 = vpop.eup %4477  ;;  %3458 = vst.msk [vmem:[%s6797_s5 + $0x44] sm:$0xf] %vm3440_vm6, %v3848_v37  ;;  %v2454_v59 = vmul.f32 1.4142135, %v4476_v11  ;;  %v2374_v48 = vmax.f32 %v2082_v34, 1e-12 }
 0x2b1   :  { %v4480_v43 = vpop.eup %4479  ;;  %v2560_v38 = vmul.f32 %v2452_v51, %v5502_v47  ;;  %v2456_v49 = vmul.f32 1.4142135, %v4478_v60  ;;  %3459 = vst.msk [vmem:[%s6797_s5 + $0x48] sm:$0xf] %vm3440_vm6, %v3849_v26  ;;  %v2095_v53 = vand.u32 2147483648, %v6103_v21  ;;  %vm2099_vm15 = vcmp.eq.f32.partialorder %v6117_v54, inf }
 0x2b2   :  { %v2561_v15 = vmul.f32 %v2454_v59, %v5520_v62  ;;  %v2084_v58 = vmul.f32 %v4480_v43, %v6086_v55  ;;  %v4482_v1 = vpop.eup %4481  ;;  %4495 = vrcp.f32 %v2374_v48  ;;  %vm2101_vm1 = vcmp.eq.f32.partialorder %v6117_v54, 0.0  ;;  %v6234_v9 = vpop.xlane.xlu1 %1815 }
 0x2b3   :  { %v3850_v47 = vpack.c.bf16 %v2560_v38, %v2560_v38  ;;  %v2562_v33 = vmul.f32 %v2456_v49, %v5514_v63  ;;  %v4484_v14 = vpop.eup %4483  ;;  %v2458_v4 = vmul.f32 1.4142135, %v4482_v1  ;;  %4497 = vrsqrt.f32 %v6163_v7  ;;  %v6252_v1 = vpop.xlane.xlu0 %1818 }
 0x2b4   :  { %v3851_v36 = vpack.c.bf16 %v2561_v15, %v2561_v15  ;;  %v2086_v62 = vsel %vm2085_vm11, %v6086_v55, %v2084_v58  ;;  %v4486_v13 = vpop.eup %4485  ;;  %v2091_v22 = vmul.f32 %v4484_v14, %v6103_v21  ;;  %v2102_v27 = vand.u32 2147483648, %v6117_v54 }
 0x2b5   :  { %3460 = vst.msk [vmem:[%s6797_s5 + $0x4c] sm:$0xf] %vm3440_vm6, %v3850_v47  ;;  %v3852_v63 = vpack.c.bf16 %v2562_v33, %v2562_v33  ;;  %v2089_v24 = vsel %vm2087_vm12, %v2088_v5, %v2086_v62  ;;  %v4488_v56 = vpop.eup %4487  ;;  %v2563_v57 = vmul.f32 %v2458_v4, %v5532_v10  ;;  %v2098_v8 = vmul.f32 %v4486_v13, %v6117_v54 }
 0x2b6   :  { %3461 = vst.msk [vmem:[%s6797_s5 + $0x50] sm:$0xf] %vm3440_vm6, %v3851_v36  ;;  %v2375_v0 = vmax.f32 %v2089_v24, 1e-12  ;;  %v2460_v55 = vmul.f32 1.4142135, %v4488_v56  ;;  %v2093_v16 = vsel %vm2092_vm13, %v6103_v21, %v2091_v22  ;;  %v6269_v62 = vpop.xlane.xlu1 %1821 }
 0x2b7   :  { %3462 = vst.msk [vmem:[%s6797_s5 + $0x54] sm:$0xf] %vm3440_vm6, %v3852_v63  ;;  %vm2106_vm2 = vcmp.eq.f32.partialorder %v6131_v17, inf  ;;  %v3853_v10 = vpack.c.bf16 %v2563_v57, %v2563_v57  ;;  %v2096_v46 = vsel %vm2094_vm14, %v2095_v53, %v2093_v16  ;;  %v2100_v50 = vsel %vm2099_vm15, %v6117_v54, %v2098_v8  ;;  %v4490_v29 = vpop.eup %4489 }
 0x2b8   :  { %4499 = vrcp.f32 %v2375_v0  ;;  %v2564_v37 = vmul.f32 %v2460_v55, %v5526_v3  ;;  %v2376_v6 = vmax.f32 %v2096_v46, 1e-12  ;;  %v2103_v40 = vsel %vm2101_vm1, %v2102_v27, %v2100_v50  ;;  %v4492_v11 = vpop.eup %4491 }
 0x2b9   :  { %vm2108_vm3 = vcmp.eq.f32.partialorder %v6131_v17, 0.0  ;;  %3463 = vst.msk [vmem:[%s6797_s5 + $0x58] sm:$0xf] %vm3440_vm6, %v3853_v10  ;;  %v2377_v21 = vmax.f32 %v2103_v40, 1e-12  ;;  %v2105_v51 = vmul.f32 %v4490_v29, %v6131_v17  ;;  %v2109_v5 = vand.u32 2147483648, %v6131_v17  ;;  %v4494_v60 = vpop.eup %4493 }
 0x2ba   :  { %4501 = vrsqrt.f32 %v6179_v25  ;;  %v3854_v3 = vpack.c.bf16 %v2564_v37, %v2564_v37  ;;  %v2462_v54 = vmul.f32 1.4142135, %v4492_v11  ;;  %vm2113_vm4 = vcmp.eq.f32.partialorder %v6145_v20, inf }
 0x2bb   :  { %4503 = vrcp.f32 %v2376_v6  ;;  %v2107_v26 = vsel %vm2106_vm2, %v6131_v17, %v2105_v51  ;;  %vm2115_vm5 = vcmp.eq.f32.partialorder %v6145_v20, 0.0  ;;  %v2116_v59 = vand.u32 2147483648, %v6145_v20 }
 0x2bc   :  { %4505 = vrcp.f32 %v2377_v21  ;;  %3464 = vst.msk [vmem:[%s6797_s5 + $0x5c] sm:$0xf] %vm3440_vm6, %v3854_v3  ;;  %v2565_v43 = vmul.f32 %v2462_v54, %v5544_v18  ;;  %v2110_v38 = vsel %vm2108_vm3, %v2109_v5, %v2107_v26  ;;  %v2112_v49 = vmul.f32 %v4494_v60, %v6145_v20  ;;  %v4496_v34 = vpop.eup %4495 }
 0x2bd   :  { %4507 = vrsqrt.f32 %v6199_v41  ;;  %v2378_v15 = vmax.f32 %v2110_v38, 1e-12  ;;  %vm2120_vm0 = vcmp.eq.f32.partialorder %v6163_v7, inf  ;;  %vm2122_vm7 = vcmp.eq.f32.partialorder %v6163_v7, 0.0  ;;  %v4498_v47 = vpop.eup %4497 }
 0x2be   :  { %4509 = vrsqrt.f32 %v6219_v28  ;;  %v3855_v48 = vpack.c.bf16 %v2565_v43, %v2565_v43  ;;  %v2464_v58 = vmul.f32 1.4142135, %v4496_v34  ;;  %v2114_v18 = vsel %vm2113_vm4, %v6145_v20, %v2112_v49 }
 0x2bf   :  { %v2123_v17 = vand.u32 2147483648, %v6163_v7  ;;  %4511 = vrcp.f32 %v2378_v15  ;;  %v2117_v33 = vsel %vm2115_vm5, %v2116_v59, %v2114_v18  ;;  %vm2127_vm8 = vcmp.eq.f32.partialorder %v6179_v25, inf }
 0x2c0   :  { %vm2129_vm9 = vcmp.eq.f32.partialorder %v6179_v25, 0.0  ;;  %3465 = vst.msk [vmem:[%s6797_s5 + $0x60] sm:$0xf] %vm3440_vm6, %v3855_v48  ;;  %v2566_v53 = vmul.f32 %v2464_v58, %v5538_v12  ;;  %v2379_v14 = vmax.f32 %v2117_v33, 1e-12  ;;  %v2119_v36 = vmul.f32 %v4498_v47, %v6163_v7 }
 0x2c1   :  { %4513 = vrsqrt.f32 %v6234_v9  ;;  %v2130_v20 = vand.u32 2147483648, %v6179_v25  ;;  %vm2134_vm10 = vcmp.eq.f32.partialorder %v6199_v41, inf  ;;  %vm2136_vm11 = vcmp.eq.f32.partialorder %v6199_v41, 0.0 }
 0x2c2   :  { %v4500_v4 = vpop.eup %4499  ;;  %4515 = vrsqrt.f32 %v6252_v1  ;;  %v3856_v13 = vpack.c.bf16 %v2566_v53, %v2566_v53  ;;  %v2121_v12 = vsel %vm2120_vm0, %v6163_v7, %v2119_v36  ;;  %v2137_v56 = vand.u32 2147483648, %v6199_v41  ;;  %v6286_v7 = vpop.xlane.xlu0 %1824 }
 0x2c3   :  { %v2466_v63 = vmul.f32 1.4142135, %v4500_v4  ;;  %4517 = vrcp.f32 %v2379_v14  ;;  %v2124_v22 = vsel %vm2122_vm7, %v2123_v17, %v2121_v12  ;;  %vm2141_vm12 = vcmp.eq.f32.partialorder %v6219_v28, inf }
 0x2c4   :  { %v4502_v24 = vpop.eup %4501  ;;  %vm2143_vm13 = vcmp.eq.f32.partialorder %v6219_v28, 0.0  ;;  %3466 = vst.msk [vmem:[%s6797_s5 + $0x64] sm:$0xf] %vm3440_vm6, %v3856_v13  ;;  %v2380_v8 = vmax.f32 %v2124_v22, 1e-12  ;;  %4519 = vrsqrt.f32 %v6269_v62  ;;  %v2144_v10 = vand.u32 2147483648, %v6219_v28 }
 0x2c5   :  { %v4504_v57 = vpop.eup %4503  ;;  %v2567_v0 = vmul.f32 %v2466_v63, %v5556_v30  ;;  %v2126_v55 = vmul.f32 %v4502_v24, %v6179_v25  ;;  %vm2148_vm14 = vcmp.eq.f32.partialorder %v6234_v9, inf  ;;  %vm2150_vm15 = vcmp.eq.f32.partialorder %v6234_v9, 0.0 }
 0x2c6   :  { %v4506_v16 = vpop.eup %4505  ;;  %v2468_v27 = vmul.f32 1.4142135, %v4504_v57  ;;  %4521 = vrcp.f32 %v2380_v8  ;;  %v2151_v3 = vand.u32 2147483648, %v6234_v9  ;;  %vm2155_vm1 = vcmp.eq.f32.partialorder %v6252_v1, inf  ;;  %v6315_v38 = vpop.xlane.xlu0 %1830 }
 0x2c7   :  { %v4508_v46 = vpop.eup %4507  ;;  %v3857_v50 = vpack.c.bf16 %v2567_v0, %v2567_v0  ;;  %v2470_v29 = vmul.f32 1.4142135, %v4506_v16  ;;  %v2128_v30 = vsel %vm2127_vm8, %v6179_v25, %v2126_v55  ;;  %4523 = vrsqrt.f32 %v6286_v7 }
 0x2c8   :  { %v4510_v37 = vpop.eup %4509  ;;  %v2568_v6 = vmul.f32 %v2468_v27, %v5550_v44  ;;  %v2131_v40 = vsel %vm2129_vm9, %v2130_v20, %v2128_v30  ;;  %v2133_v11 = vmul.f32 %v4508_v46, %v6199_v41  ;;  %v6306_v44 = vpop.xlane.xlu1 %1827  ;;  %vm2157_vm2 = vcmp.eq.f32.partialorder %v6252_v1, 0.0 }
 0x2c9   :  { %3467 = vst.msk [vmem:[%s6797_s5 + $0x68] sm:$0xf] %vm3440_vm6, %v3857_v50  ;;  %v2569_v21 = vmul.f32 %v2470_v29, %v5568_v45  ;;  %v2381_v51 = vmax.f32 %v2131_v40, 1e-12  ;;  %v2140_v5 = vmul.f32 %v4510_v37, %v6219_v28  ;;  %v4512_v25 = vpop.eup %4511  ;;  %v2158_v47 = vand.u32 2147483648, %v6252_v1 }
 0x2ca   :  { %v3858_v54 = vpack.c.bf16 %v2568_v6, %v2568_v6  ;;  %v2135_v60 = vsel %vm2134_vm10, %v6199_v41, %v2133_v11  ;;  %v2472_v45 = vmul.f32 1.4142135, %v4512_v25  ;;  %vm2162_vm3 = vcmp.eq.f32.partialorder %v6269_v62, inf }
 0x2cb   :  { %v4514_v26 = vpop.eup %4513  ;;  %v3859_v59 = vpack.c.bf16 %v2569_v21, %v2569_v21  ;;  %4525 = vrcp.f32 %v2381_v51  ;;  %v2138_v43 = vsel %vm2136_vm11, %v2137_v56, %v2135_v60  ;;  %v2142_v15 = vsel %vm2141_vm12, %v6219_v28, %v2140_v5  ;;  %v6356_v56 = vpop.xlane.xlu0 %1836 }
 0x2cc   :  { %v4516_v49 = vpop.eup %4515  ;;  %3468 = vst.msk [vmem:[%s6797_s5 + $0x6c] sm:$0xf] %vm3440_vm6, %v3858_v54  ;;  %v2382_v34 = vmax.f32 %v2138_v43, 1e-12  ;;  %v2147_v48 = vmul.f32 %v4514_v26, %v6234_v9  ;;  %4527 = vrsqrt.f32 %v6306_v44  ;;  %v2570_v41 = vmul.f32 %v2472_v45, %v5562_v35  ;;  %v6344_v28 = vpop.xlane.xlu1 %1833 }
 0x2cd   :  { %v4518_v58 = vpop.eup %4517  ;;  %3469 = vst.msk [vmem:[%s6797_s5 + $0x70] sm:$0xf] %vm3440_vm6, %v3859_v59  ;;  %v2145_v18 = vsel %vm2143_vm13, %v2144_v10, %v2142_v15  ;;  %v2154_v17 = vmul.f32 %v4516_v49, %v6252_v1  ;;  %vm2164_vm4 = vcmp.eq.f32.partialorder %v6269_v62, 0.0  ;;  %vm2169_vm5 = vcmp.eq.f32.partialorder %v6286_v7, inf }
 0x2ce   :  { %v2474_v33 = vmul.f32 1.4142135, %v4518_v58  ;;  %4529 = vrcp.f32 %v2382_v34  ;;  %v2383_v53 = vmax.f32 %v2145_v18, 1e-12  ;;  %v2149_v14 = vsel %vm2148_vm14, %v6234_v9, %v2147_v48  ;;  %v4520_v36 = vpop.eup %4519 }
 0x2cf   :  { %v3860_v4 = vpack.c.bf16 %v2570_v41, %v2570_v41  ;;  %v2152_v20 = vsel %vm2150_vm15, %v2151_v3, %v2149_v14  ;;  %v2156_v35 = vsel %vm2155_vm1, %v6252_v1, %v2154_v17  ;;  %v2161_v22 = vmul.f32 %v4520_v36, %v6269_v62  ;;  %v6378_v21 = vpop.xlane.xlu0 %1842 }
 0x2d0   :  { %v2571_v13 = vmul.f32 %v2474_v33, %v5580_v61  ;;  %4531 = vrcp.f32 %v2383_v53  ;;  %v2384_v63 = vmax.f32 %v2152_v20, 1e-12  ;;  %v2159_v12 = vsel %vm2157_vm2, %v2158_v47, %v2156_v35  ;;  %v4522_v24 = vpop.eup %4521  ;;  %v6373_v29 = vpop.xlane.xlu1 %1839 }
 0x2d1   :  { %3470 = vst.msk [vmem:[%s6797_s5 + $0x74] sm:$0xf] %vm3440_vm6, %v3860_v4  ;;  %v2385_v9 = vmax.f32 %v2159_v12, 1e-12  ;;  %4533 = vrsqrt.f32 %v6315_v38  ;;  %v4524_v61 = vpop.eup %4523  ;;  %v2476_v0 = vmul.f32 1.4142135, %v4522_v24  ;;  %v2163_v8 = vsel %vm2162_vm3, %v6269_v62, %v2161_v22 }
 0x2d2   :  { %v3861_v57 = vpack.c.bf16 %v2571_v13, %v2571_v13  ;;  %4535 = vrcp.f32 %v2384_v63  ;;  %v2165_v1 = vand.u32 2147483648, %v6269_v62  ;;  %v2168_v55 = vmul.f32 %v4524_v61, %v6286_v7 }
 0x2d3   :  { %4537 = vrcp.f32 %v2385_v9  ;;  %v2572_v16 = vmul.f32 %v2476_v0, %v5574_v52  ;;  %v2172_v10 = vand.u32 2147483648, %v6286_v7  ;;  %vm2171_vm0 = vcmp.eq.f32.partialorder %v6286_v7, 0.0  ;;  %v6405_v17 = vpop.xlane.xlu0 %1848 }
 0x2d4   :  { %3471 = vst.msk [vmem:[%s6797_s5 + $0x78] sm:$0xf] %vm3440_vm6, %v3861_v57  ;;  %v2166_v27 = vsel %vm2164_vm4, %v2165_v1, %v2163_v8  ;;  %4539 = vrsqrt.f32 %v6344_v28  ;;  %v2170_v62 = vsel %vm2169_vm5, %v6286_v7, %v2168_v55  ;;  %vm2176_vm7 = vcmp.eq.f32.partialorder %v6306_v44, inf  ;;  %v6394_v34 = vpop.xlane.xlu1 %1845 }
 0x2d5   :  { %v4526_v46 = vpop.eup %4525  ;;  %v2386_v50 = vmax.f32 %v2166_v27, 1e-12  ;;  %v3862_v37 = vpack.c.bf16 %v2572_v16, %v2572_v16  ;;  %v2173_v40 = vsel %vm2171_vm0, %v2172_v10, %v2170_v62  ;;  %vm2178_vm8 = vcmp.eq.f32.partialorder %v6306_v44, 0.0 }
 0x2d6   :  { %v4528_v30 = vpop.eup %4527  ;;  %v2478_v6 = vmul.f32 1.4142135, %v4526_v46  ;;  %v2387_v52 = vmax.f32 %v2173_v40, 1e-12  ;;  %v2179_v5 = vand.u32 2147483648, %v6306_v44  ;;  %vm2183_vm9 = vcmp.eq.f32.partialorder %v6315_v38, inf }
 0x2d7   :  { %4541 = vrcp.f32 %v2386_v50  ;;  %v2175_v11 = vmul.f32 %v4528_v30, %v6306_v44  ;;  %3472 = vst.msk [vmem:[%s6797_s5 + $0x7c] sm:$0xf] %vm3440_vm6, %v3862_v37  ;;  %vm2185_vm10 = vcmp.eq.f32.partialorder %v6315_v38, 0.0  ;;  %v2186_v59 = vand.u32 2147483648, %v6315_v38  ;;  %v6443_v8 = vpop.xlane.xlu0 %1854 }
 0x2d8   :  { %v4530_v51 = vpop.eup %4529  ;;  %v2573_v7 = vmul.f32 %v2478_v6, %v5592_v32  ;;  %4543 = vrsqrt.f32 %v6356_v56  ;;  %vm2190_vm11 = vcmp.eq.f32.partialorder %v6344_v28, inf  ;;  %vm2192_vm12 = vcmp.eq.f32.partialorder %v6344_v28, 0.0 }
 0x2d9   :  { %v2480_v3 = vmul.f32 1.4142135, %v4530_v51  ;;  %4545 = vrcp.f32 %v2387_v52  ;;  %v2177_v25 = vsel %vm2176_vm7, %v6306_v44, %v2175_v11  ;;  %v2193_v48 = vand.u32 2147483648, %v6344_v28 }
 0x2da   :  { %v4532_v54 = vpop.eup %4531  ;;  %v3863_v60 = vpack.c.bf16 %v2573_v7, %v2573_v7  ;;  %v2180_v26 = vsel %vm2178_vm8, %v2179_v5, %v2177_v25  ;;  %4547 = vrsqrt.f32 %v6373_v29  ;;  %vm2197_vm13 = vcmp.eq.f32.partialorder %v6356_v56, inf }
 0x2db   :  { %v4534_v32 = vpop.eup %4533  ;;  %v2574_v45 = vmul.f32 %v2480_v3, %v5586_v2  ;;  %v2482_v43 = vmul.f32 1.4142135, %v4532_v54  ;;  %v2388_v49 = vmax.f32 %v2180_v26, 1e-12  ;;  %4549 = vrsqrt.f32 %v6378_v21  ;;  %v6479_v54 = vpop.xlane.xlu0 %1860 }
 0x2dc   :  { %v4536_v15 = vpop.eup %4535  ;;  %3473 = vst.msk [vmem:[%s6797_s5 + $0x80] sm:$0xf] %vm3440_vm6, %v3863_v60  ;;  %v2182_v44 = vmul.f32 %v4534_v32, %v6315_v38  ;;  %vm2199_vm14 = vcmp.eq.f32.partialorder %v6356_v56, 0.0  ;;  %v2200_v13 = vand.u32 2147483648, %v6356_v56  ;;  %vm2204_vm15 = vcmp.eq.f32.partialorder %v6373_v29, inf  ;;  %v6848_v60 = vld [vmem:[#allocation2_spill] sm:$0xff] }
 0x2dd   :  { %v4538_v2 = vpop.eup %4537  ;;  %v3864_v58 = vpack.c.bf16 %v2574_v45, %v2574_v45  ;;  %v2575_v41 = vmul.f32 %v2482_v43, %v5604_v23  ;;  %v2484_v18 = vmul.f32 1.4142135, %v4536_v15  ;;  %4551 = vrcp.f32 %v2388_v49 }
 0x2de   :  { %v4540_v47 = vpop.eup %4539  ;;  %v2486_v33 = vmul.f32 1.4142135, %v4538_v2  ;;  %v2184_v53 = vsel %vm2183_vm9, %v6315_v38, %v2182_v44  ;;  %4553 = vrsqrt.f32 %v6394_v34  ;;  %vm2206_vm1 = vcmp.eq.f32.partialorder %v6373_v29, 0.0 }
 0x2df   :  { %3474 = vst.msk [vmem:[%s6797_s5 + $0x84] sm:$0xf] %vm3440_vm6, %v3864_v58  ;;  %v3865_v23 = vpack.c.bf16 %v2575_v41, %v2575_v41  ;;  %v2576_v14 = vmul.f32 %v2484_v18, %v5598_v39  ;;  %v2187_v36 = vsel %vm2185_vm10, %v2186_v59, %v2184_v53  ;;  %v2189_v4 = vmul.f32 %v4540_v47, %v6344_v28 }
 0x2e0   :  { %v2577_v20 = vmul.f32 %v2486_v33, %v5616_v42  ;;  %v2389_v35 = vmax.f32 %v2187_v36, 1e-12  ;;  %4555 = vrsqrt.f32 %v6405_v17  ;;  %v6432_v42 = vpop.xlane.xlu1 %1851  ;;  %v2207_v1 = vand.u32 2147483648, %v6373_v29  ;;  %v6849_v33 = vld [vmem:[#allocation4_spill] sm:$0xff]  ;;  %v6509_v36 = vpop.xlane.xlu0 %1866 }
 0x2e1   :  { %v4542_v63 = vpop.eup %4541  ;;  %3475 = vst.msk [vmem:[%s6797_s5 + $0x88] sm:$0xf] %vm3440_vm6, %v3865_v23  ;;  %v3866_v12 = vpack.c.bf16 %v2576_v14, %v2576_v14  ;;  %v2191_v39 = vsel %vm2190_vm11, %v6344_v28, %v2189_v4  ;;  %vm2211_vm2 = vcmp.eq.f32.partialorder %v6378_v21, inf  ;;  %vm2213_vm3 = vcmp.eq.f32.partialorder %v6378_v21, 0.0 }
 0x2e2   :  { %v4544_v38 = vpop.eup %4543  ;;  %v3867_v24 = vpack.c.bf16 %v2577_v20, %v2577_v20  ;;  %v2488_v9 = vmul.f32 1.4142135, %v4542_v63  ;;  %4557 = vrcp.f32 %v2389_v35  ;;  %v2194_v22 = vsel %vm2192_vm12, %v2193_v48, %v2191_v39 }
 0x2e3   :  { %v4546_v61 = vpop.eup %4545  ;;  %3476 = vst.msk [vmem:[%s6797_s5 + $0x8c] sm:$0xf] %vm3440_vm6, %v3866_v12  ;;  %v2390_v57 = vmax.f32 %v2194_v22, 1e-12  ;;  %v2196_v0 = vmul.f32 %v4544_v38, %v6356_v56  ;;  %4559 = vrsqrt.f32 %v6432_v42  ;;  %v2214_v30 = vand.u32 2147483648, %v6378_v21  ;;  %v6850_v12 = vld [vmem:[#allocation3_spill] sm:$0xff] }
 0x2e4   :  { %v4548_v55 = vpop.eup %4547  ;;  %3477 = vst.msk [vmem:[%s6797_s5 + $0x90] sm:$0xf] %vm3440_vm6, %v3867_v24  ;;  %v2578_v28 = vmul.f32 %v2488_v9, %v5610_v31  ;;  %v2490_v16 = vmul.f32 1.4142135, %v4546_v61  ;;  %vm2218_vm4 = vcmp.eq.f32.partialorder %v6394_v34, inf  ;;  %v6466_v11 = vpop.xlane.xlu1 %1857  ;;  %vm2220_vm5 = vcmp.eq.f32.partialorder %v6394_v34, 0.0 }
 0x2e5   :  { %4561 = vrcp.f32 %v2390_v57  ;;  %v2198_v27 = vsel %vm2197_vm13, %v6356_v56, %v2196_v0  ;;  %v2203_v10 = vmul.f32 %v4548_v55, %v6373_v29  ;;  %v4550_v46 = vpop.eup %4549  ;;  %v2221_v59 = vand.u32 2147483648, %v6394_v34 }
 0x2e6   :  { %v3868_v50 = vpack.c.bf16 %v2578_v28, %v2578_v28  ;;  %v2579_v62 = vmul.f32 %v2490_v16, %v5628_v19  ;;  %v2201_v31 = vsel %vm2199_vm14, %v2200_v13, %v2198_v27  ;;  %v2210_v52 = vmul.f32 %v4550_v46, %v6378_v21  ;;  %v6534_v16 = vpop.xlane.xlu0 %1872 }
 0x2e7   :  { %v4552_v37 = vpop.eup %4551  ;;  %v2391_v6 = vmax.f32 %v2201_v31, 1e-12  ;;  %v2205_v40 = vsel %vm2204_vm15, %v6373_v29, %v2203_v10  ;;  %4563 = vrsqrt.f32 %v6443_v8  ;;  %vm2225_vm0 = vcmp.eq.f32.partialorder %v6405_v17, inf  ;;  %v6851_v10 = vld [vmem:[#allocation6_spill] sm:$0xff] }
 0x2e8   :  { %v4554_v51 = vpop.eup %4553  ;;  %3478 = vst.msk [vmem:[%s6797_s5 + $0x94] sm:$0xf] %vm3440_vm6, %v3868_v50  ;;  %v3869_v19 = vpack.c.bf16 %v2579_v62, %v2579_v62  ;;  %v2492_v56 = vmul.f32 1.4142135, %v4552_v37  ;;  %v2208_v7 = vsel %vm2206_vm1, %v2207_v1, %v2205_v40  ;;  %v2212_v3 = vsel %vm2211_vm2, %v6378_v21, %v2210_v52  ;;  %v6497_v41 = vpop.xlane.xlu1 %1863 }
 0x2e9   :  { %4565 = vrcp.f32 %v2391_v6  ;;  %v2392_v5 = vmax.f32 %v2208_v7, 1e-12  ;;  %v2217_v25 = vmul.f32 %v4554_v51, %v6394_v34  ;;  %v2215_v26 = vsel %vm2213_vm3, %v2214_v30, %v2212_v3  ;;  %v6852_v51 = vld [vmem:[#allocation5_spill] sm:$0xff] }
 0x2ea   :  { %3479 = vst.msk [vmem:[%s6797_s5 + $0x98] sm:$0xf] %vm3440_vm6, %v3869_v19  ;;  %v2580_v29 = vmul.f32 %v2492_v56, %v6848_v60  ;;  %v4556_v32 = vpop.eup %4555  ;;  %v2393_v45 = vmax.f32 %v2215_v26, 1e-12  ;;  %v2228_v58 = vand.u32 2147483648, %v6405_v17  ;;  %vm2227_vm7 = vcmp.eq.f32.partialorder %v6405_v17, 0.0 }
 0x2eb   :  { %4567 = vrcp.f32 %v2392_v5  ;;  %v2219_v43 = vsel %vm2218_vm4, %v6394_v34, %v2217_v25  ;;  %v2224_v48 = vmul.f32 %v4556_v32, %v6405_v17  ;;  %vm2232_vm8 = vcmp.eq.f32.partialorder %v6432_v42, inf  ;;  %v6853_v60 = vld [vmem:[#allocation8_spill] sm:$0xff] }
 0x2ec   :  { %v4558_v49 = vpop.eup %4557  ;;  %v3870_v15 = vpack.c.bf16 %v2580_v29, %v2580_v29  ;;  %v2222_v44 = vsel %vm2220_vm5, %v2221_v59, %v2219_v43  ;;  %4569 = vrsqrt.f32 %v6466_v11  ;;  %vm2234_vm9 = vcmp.eq.f32.partialorder %v6432_v42, 0.0  ;;  %v6525_v61 = vpop.xlane.xlu1 %1869 }
 0x2ed   :  { %v2494_v21 = vmul.f32 1.4142135, %v4558_v49  ;;  %4571 = vrcp.f32 %v2393_v45  ;;  %v2394_v2 = vmax.f32 %v2222_v44, 1e-12  ;;  %v4560_v18 = vpop.eup %4559  ;;  %v2226_v34 = vsel %vm2225_vm0, %v6405_v17, %v2224_v48  ;;  %v6854_v48 = vld [vmem:[#allocation7_spill] sm:$0xff] }
 0x2ee   :  { %3480 = vst.msk [vmem:[%s6797_s5 + $0x9c] sm:$0xf] %vm3440_vm6, %v3870_v15  ;;  %4573 = vrsqrt.f32 %v6479_v54  ;;  %v2229_v23 = vsel %vm2227_vm7, %v2228_v58, %v2226_v34  ;;  %v2231_v14 = vmul.f32 %v4560_v18, %v6432_v42  ;;  %v2235_v35 = vand.u32 2147483648, %v6432_v42  ;;  %v6568_v15 = vpop.xlane.xlu0 %1878 }
 0x2ef   :  { %v4562_v47 = vpop.eup %4561  ;;  %v2581_v53 = vmul.f32 %v2494_v21, %v6849_v33  ;;  %4575 = vrcp.f32 %v2394_v2  ;;  %v2395_v20 = vmax.f32 %v2229_v23, 1e-12  ;;  %vm2239_vm10 = vcmp.eq.f32.partialorder %v6443_v8, inf  ;;  %v6855_v23 = vld [vmem:[#allocation10_spill] sm:$0xff] }
 0x2f0   :  { %v2496_v4 = vmul.f32 1.4142135, %v4562_v47  ;;  %v2233_v13 = vsel %vm2232_vm8, %v6432_v42, %v2231_v14  ;;  %4577 = vrsqrt.f32 %v6497_v41  ;;  %vm2241_vm11 = vcmp.eq.f32.partialorder %v6443_v8, 0.0  ;;  %v6554_v3 = vpop.xlane.xlu1 %1875 }
 0x2f1   :  { %v3871_v17 = vpack.c.bf16 %v2581_v53, %v2581_v53  ;;  %v4564_v63 = vpop.eup %4563  ;;  %4579 = vrcp.f32 %v2395_v20  ;;  %v2236_v38 = vsel %vm2234_vm9, %v2235_v35, %v2233_v13  ;;  %v2242_v22 = vand.u32 2147483648, %v6443_v8 }
 0x2f2   :  { %v2582_v39 = vmul.f32 %v2496_v4, %v6850_v12  ;;  %v2396_v9 = vmax.f32 %v2236_v38, 1e-12  ;;  %v2238_v42 = vmul.f32 %v4564_v63, %v6443_v8  ;;  %vm2246_vm12 = vcmp.eq.f32.partialorder %v6466_v11, inf }
 0x2f3   :  { %v4566_v24 = vpop.eup %4565  ;;  %3481 = vst.msk [vmem:[%s6797_s5 + $0xa0] sm:$0xf] %vm3440_vm6, %v3871_v17  ;;  %vm2248_vm13 = vcmp.eq.f32.partialorder %v6466_v11, 0.0  ;;  %4581 = vrsqrt.f32 %v6509_v36  ;;  %v2249_v28 = vand.u32 2147483648, %v6466_v11  ;;  %vm2253_vm14 = vcmp.eq.f32.partialorder %v6479_v54, inf }
 0x2f4   :  { %v3872_v57 = vpack.c.bf16 %v2582_v39, %v2582_v39  ;;  %v2498_v0 = vmul.f32 1.4142135, %v4566_v24  ;;  %4583 = vrcp.f32 %v2396_v9  ;;  %v2240_v55 = vsel %vm2239_vm10, %v6443_v8, %v2238_v42  ;;  %v6592_v35 = vpop.xlane.xlu1 %1881  ;;  %v6605_v24 = vpop.xlane.xlu0 %1884  ;;  %v6856_v9 = vld [vmem:[#allocation9_spill] sm:$0xff] }
 0x2f5   :  { %v4568_v1 = vpop.eup %4567  ;;  %v2243_v62 = vsel %vm2241_vm11, %v2242_v22, %v2240_v55  ;;  %4585 = vrsqrt.f32 %v6525_v61  ;;  %vm2255_vm15 = vcmp.eq.f32.partialorder %v6479_v54, 0.0  ;;  %v2256_v6 = vand.u32 2147483648, %v6479_v54 }
 0x2f6   :  { %v4570_v27 = vpop.eup %4569  ;;  %3482 = vst.msk [vmem:[%s6797_s5 + $0xa4] sm:$0xf] %vm3440_vm6, %v3872_v57  ;;  %v2583_v46 = vmul.f32 %v2498_v0, %v6851_v10  ;;  %v2500_v50 = vmul.f32 1.4142135, %v4568_v1  ;;  %v2397_v30 = vmax.f32 %v2243_v62, 1e-12 }
 0x2f7   :  { %v4572_v31 = vpop.eup %4571  ;;  %v2245_v37 = vmul.f32 %v4570_v27, %v6466_v11  ;;  %vm2260_vm1 = vcmp.eq.f32.partialorder %v6497_v41, inf  ;;  %vm2262_vm2 = vcmp.eq.f32.partialorder %v6497_v41, 0.0  ;;  %v2263_v49 = vand.u32 2147483648, %v6497_v41 }
 0x2f8   :  { %v4574_v40 = vpop.eup %4573  ;;  %v3873_v52 = vpack.c.bf16 %v2583_v46, %v2583_v46  ;;  %v2584_v19 = vmul.f32 %v2500_v50, %v6852_v51  ;;  %v2502_v56 = vmul.f32 1.4142135, %v4572_v31  ;;  %4587 = vrcp.f32 %v2397_v30  ;;  %v6621_v62 = vpop.xlane.xlu1 %1887 }
 0x2f9   :  { %v4576_v7 = vpop.eup %4575  ;;  %v2247_v8 = vsel %vm2246_vm12, %v6466_v11, %v2245_v37  ;;  %v2252_v5 = vmul.f32 %v4574_v40, %v6479_v54  ;;  %4589 = vrsqrt.f32 %v6534_v16  ;;  %vm2267_vm3 = vcmp.eq.f32.partialorder %v6509_v36, inf  ;;  %v6634_v40 = vpop.xlane.xlu0 %1890 }
 0x2fa   :  { %3483 = vst.msk [vmem:[%s6797_s5 + $0xa8] sm:$0xf] %vm3440_vm6, %v3873_v52  ;;  %v3874_v25 = vpack.c.bf16 %v2584_v19, %v2584_v19  ;;  %v2585_v29 = vmul.f32 %v2502_v56, %v6853_v60  ;;  %v2504_v26 = vmul.f32 1.4142135, %v4576_v7  ;;  %v2250_v59 = vsel %vm2248_vm13, %v2249_v28, %v2247_v8  ;;  %v4578_v32 = vpop.eup %4577  ;;  %v6858_v60 = vld [vmem:[#allocation11_spill] sm:$0xff] }
 0x2fb   :  { %v2398_v45 = vmax.f32 %v2250_v59, 1e-12  ;;  %v2254_v43 = vsel %vm2253_vm14, %v6479_v54, %v2252_v5  ;;  %v4580_v44 = vpop.eup %4579  ;;  %v2259_v58 = vmul.f32 %v4578_v32, %v6497_v41  ;;  %vm2269_vm4 = vcmp.eq.f32.partialorder %v6509_v36, 0.0 }
 0x2fc   :  { %3484 = vst.msk [vmem:[%s6797_s5 + $0xac] sm:$0xf] %vm3440_vm6, %v3874_v25  ;;  %v3875_v11 = vpack.c.bf16 %v2585_v29, %v2585_v29  ;;  %v2586_v21 = vmul.f32 %v2504_v26, %v6854_v48  ;;  %v2257_v2 = vsel %vm2255_vm15, %v2256_v6, %v2254_v43  ;;  %v2506_v18 = vmul.f32 1.4142135, %v4580_v44  ;;  %v6657_v43 = vpop.xlane.xlu1 %1893 }
 0x2fd   :  { %4591 = vrcp.f32 %v2398_v45  ;;  %v2399_v34 = vmax.f32 %v2257_v2, 1e-12  ;;  %v4582_v47 = vpop.eup %4581  ;;  %v2261_v53 = vsel %vm2260_vm1, %v6497_v41, %v2259_v58  ;;  %v2270_v12 = vand.u32 2147483648, %v6509_v36 }
 0x2fe   :  { %3485 = vst.msk [vmem:[%s6797_s5 + $0xb0] sm:$0xf] %vm3440_vm6, %v3875_v11  ;;  %v3876_v33 = vpack.c.bf16 %v2586_v21, %v2586_v21  ;;  %4593 = vrsqrt.f32 %v6554_v3  ;;  %v4584_v54 = vpop.eup %4583  ;;  %v2587_v14 = vmul.f32 %v2506_v18, %v6855_v23  ;;  %v2264_v4 = vsel %vm2262_vm2, %v2263_v49, %v2261_v53  ;;  %v6859_v11 = vld [vmem:[#allocation14_spill] sm:$0xff] }
 0x2ff   :  { %4595 = vrcp.f32 %v2399_v34  ;;  %v2266_v20 = vmul.f32 %v4582_v47, %v6509_v36  ;;  %v4586_v17 = vpop.eup %4585  ;;  %v2508_v13 = vmul.f32 1.4142135, %v4584_v54  ;;  %v2400_v63 = vmax.f32 %v2264_v4, 1e-12  ;;  %v6664_v34 = vpop.xlane.xlu0 %1896  ;;  %v6860_v54 = vld [vmem:[#allocation13_spill] sm:$0xff] }
 0x300   :  { %3486 = vst.msk [vmem:[%s6797_s5 + $0xb4] sm:$0xf] %vm3440_vm6, %v3876_v33  ;;  %vm2274_vm5 = vcmp.eq.f32.partialorder %v6525_v61, inf  ;;  %v3877_v39 = vpack.c.bf16 %v2587_v14, %v2587_v14  ;;  %v2273_v38 = vmul.f32 %v4586_v17, %v6525_v61  ;;  %4597 = vrsqrt.f32 %v6568_v15 }
 0x301   :  { %v2268_v41 = vsel %vm2267_vm3, %v6509_v36, %v2266_v20  ;;  %v2588_v42 = vmul.f32 %v2508_v13, %v6856_v9  ;;  %4599 = vrcp.f32 %v2400_v63  ;;  %v2277_v57 = vand.u32 2147483648, %v6525_v61 }
 0x302   :  { %v2271_v22 = vsel %vm2269_vm4, %v2270_v12, %v2268_v41  ;;  %v4588_v0 = vpop.eup %4587  ;;  %3487 = vst.msk [vmem:[%s6797_s5 + $0xb8] sm:$0xf] %vm3440_vm6, %v3877_v39  ;;  %v2275_v55 = vsel %vm2274_vm5, %v6525_v61, %v2273_v38  ;;  %vm2276_vm0 = vcmp.eq.f32.partialorder %v6525_v61, 0.0  ;;  %vm2281_vm7 = vcmp.eq.f32.partialorder %v6534_v16, inf  ;;  %v6857_v61 = vld [vmem:[#allocation12_spill] sm:$0xff] }
 0x303   :  { %v2401_v1 = vmax.f32 %v2271_v22, 1e-12  ;;  %v3878_v28 = vpack.c.bf16 %v2588_v42, %v2588_v42  ;;  %v2510_v27 = vmul.f32 1.4142135, %v4588_v0  ;;  %v2278_v10 = vsel %vm2276_vm0, %v2277_v57, %v2275_v55  ;;  %v4590_v36 = vpop.eup %4589  ;;  %v6861_v42 = vld [vmem:[#allocation16_spill] sm:$0xff] }
 0x304   :  { %4601 = vrsqrt.f32 %v6592_v35  ;;  %v2402_v46 = vmax.f32 %v2278_v10, 1e-12  ;;  %vm2283_vm8 = vcmp.eq.f32.partialorder %v6534_v16, 0.0  ;;  %v2284_v50 = vand.u32 2147483648, %v6534_v16 }
 0x305   :  { %4603 = vrcp.f32 %v2401_v1  ;;  %3488 = vst.msk [vmem:[%s6797_s5 + $0xbc] sm:$0xf] %vm3440_vm6, %v3878_v28  ;;  %v2589_v31 = vmul.f32 %v2510_v27, %v6857_v61  ;;  %v2280_v30 = vmul.f32 %v4590_v36, %v6534_v16  ;;  %vm2288_vm9 = vcmp.eq.f32.partialorder %v6554_v3, inf  ;;  %v6702_v28 = vpop.xlane.xlu1 %1899 }
 0x306   :  { %4605 = vrsqrt.f32 %v6605_v24  ;;  %vm2290_vm10 = vcmp.eq.f32.partialorder %v6554_v3, 0.0  ;;  %v2291_v6 = vand.u32 2147483648, %v6554_v3  ;;  %vm2295_vm11 = vcmp.eq.f32.partialorder %v6568_v15, inf }
 0x307   :  { %v4592_v37 = vpop.eup %4591  ;;  %4607 = vrcp.f32 %v2402_v46  ;;  %v3879_v51 = vpack.c.bf16 %v2589_v31, %v2589_v31  ;;  %v2282_v56 = vsel %vm2281_vm7, %v6534_v16, %v2280_v30  ;;  %vm2297_vm12 = vcmp.eq.f32.partialorder %v6568_v15, 0.0 }
 0x308   :  { %v4594_v52 = vpop.eup %4593  ;;  %v2512_v19 = vmul.f32 1.4142135, %v4592_v37  ;;  %4609 = vrsqrt.f32 %v6621_v62  ;;  %v2285_v8 = vsel %vm2283_vm8, %v2284_v50, %v2282_v56  ;;  %v2298_v25 = vand.u32 2147483648, %v6568_v15 }
 0x309   :  { %v4596_v7 = vpop.eup %4595  ;;  %v2287_v5 = vmul.f32 %v4594_v52, %v6554_v3  ;;  %3489 = vst.msk [vmem:[%s6797_s5 + $0xc0] sm:$0xf] %vm3440_vm6, %v3879_v51  ;;  %v2403_v59 = vmax.f32 %v2285_v8, 1e-12  ;;  %vm2302_vm13 = vcmp.eq.f32.partialorder %v6592_v35, inf  ;;  %vm2304_vm14 = vcmp.eq.f32.partialorder %v6592_v35, 0.0 }
 0x30a   :  { %v2590_v29 = vmul.f32 %v2512_v19, %v6858_v60  ;;  %v2514_v26 = vmul.f32 1.4142135, %v4596_v7  ;;  %v4598_v32 = vpop.eup %4597  ;;  %v2305_v45 = vand.u32 2147483648, %v6592_v35  ;;  %4611 = vrsqrt.f32 %v6634_v40  ;;  %v6863_v8 = vld [vmem:[#allocation18_spill] sm:$0xff] }
 0x30b   :  { %v2289_v16 = vsel %vm2288_vm9, %v6554_v3, %v2287_v5  ;;  %v4600_v49 = vpop.eup %4599  ;;  %4613 = vrcp.f32 %v2403_v59  ;;  %v2294_v18 = vmul.f32 %v4598_v32, %v6568_v15  ;;  %vm2309_vm15 = vcmp.eq.f32.partialorder %v6605_v24, inf }
 0x30c   :  { %v3880_v44 = vpack.c.bf16 %v2590_v29, %v2590_v29  ;;  %v2591_v48 = vmul.f32 %v2514_v26, %v6859_v11  ;;  %v2292_v21 = vsel %vm2290_vm10, %v2291_v6, %v2289_v16  ;;  %v2516_v2 = vmul.f32 1.4142135, %v4600_v49  ;;  %v6864_v49 = vld [vmem:[#allocation17_spill] sm:$0xff] }
 0x30d   :  { %v2404_v58 = vmax.f32 %v2292_v21, 1e-12  ;;  %vm2311_vm1 = vcmp.eq.f32.partialorder %v6605_v24, 0.0  ;;  %v2312_v3 = vand.u32 2147483648, %v6605_v24  ;;  %4615 = vrsqrt.f32 %v6657_v43 }
 0x30e   :  { %v4602_v47 = vpop.eup %4601  ;;  %3490 = vst.msk [vmem:[%s6797_s5 + $0xc4] sm:$0xf] %vm3440_vm6, %v3880_v44  ;;  %v3881_v33 = vpack.c.bf16 %v2591_v48, %v2591_v48  ;;  %v2592_v23 = vmul.f32 %v2516_v2, %v6860_v54  ;;  %v2296_v14 = vsel %vm2295_vm11, %v6568_v15, %v2294_v18  ;;  %vm2316_vm2 = vcmp.eq.f32.partialorder %v6621_v62, inf  ;;  %v6865_v54 = vld [vmem:[#allocation20_spill] sm:$0xff] }
 0x30f   :  { %v4604_v53 = vpop.eup %4603  ;;  %4617 = vrcp.f32 %v2404_v58  ;;  %v2301_v4 = vmul.f32 %v4602_v47, %v6592_v35  ;;  %v2299_v13 = vsel %vm2297_vm12, %v2298_v25, %v2296_v14  ;;  %vm2318_vm3 = vcmp.eq.f32.partialorder %v6621_v62, 0.0 }
 0x310   :  { %v4606_v20 = vpop.eup %4605  ;;  %3491 = vst.msk [vmem:[%s6797_s5 + $0xc8] sm:$0xf] %vm3440_vm6, %v3881_v33  ;;  %v2518_v17 = vmul.f32 1.4142135, %v4604_v53  ;;  %4619 = vrsqrt.f32 %v6664_v34  ;;  %v3882_v12 = vpack.c.bf16 %v2592_v23, %v2592_v23  ;;  %v2405_v39 = vmax.f32 %v2299_v13, 1e-12 }
 0x311   :  { %v4608_v63 = vpop.eup %4607  ;;  %v2303_v41 = vsel %vm2302_vm13, %v6592_v35, %v2301_v4  ;;  %v2308_v38 = vmul.f32 %v4606_v20, %v6605_v24  ;;  %v6862_v35 = vld [vmem:[#allocation15_spill] sm:$0xff]  ;;  %v2319_v46 = vand.u32 2147483648, %v6621_v62  ;;  %vm2323_vm4 = vcmp.eq.f32.partialorder %v6634_v40, inf }
 0x312   :  { %v4610_v9 = vpop.eup %4609  ;;  %v2593_v22 = vmul.f32 %v2518_v17, %v6861_v42  ;;  %v2520_v57 = vmul.f32 1.4142135, %v4608_v63  ;;  %v2306_v15 = vsel %vm2304_vm14, %v2305_v45, %v2303_v41  ;;  %3492 = vst.msk [vmem:[%s6797_s5 + $0xcc] sm:$0xf] %vm3440_vm6, %v3882_v12  ;;  %4621 = vrcp.f32 %v2405_v39  ;;  %v6866_v17 = vld [vmem:[#allocation19_spill] sm:$0xff] }
 0x313   :  { %v2406_v0 = vmax.f32 %v2306_v15, 1e-12  ;;  %v2310_v1 = vsel %vm2309_vm15, %v6605_v24, %v2308_v38  ;;  %v2315_v55 = vmul.f32 %v4610_v9, %v6621_v62  ;;  %v2326_v19 = vand.u32 2147483648, %v6634_v40  ;;  %v6867_v9 = vld [vmem:[#allocation22_spill] sm:$0xff] }
 0x314   :  { %v3883_v27 = vpack.c.bf16 %v2593_v22, %v2593_v22  ;;  %v2594_v10 = vmul.f32 %v2520_v57, %v6862_v35  ;;  %v2313_v36 = vsel %vm2311_vm1, %v2312_v3, %v2310_v1  ;;  %v4612_v50 = vpop.eup %4611  ;;  %vm2325_vm5 = vcmp.eq.f32.partialorder %v6634_v40, 0.0 }
 0x315   :  { %4623 = vrcp.f32 %v2406_v0  ;;  %v2407_v61 = vmax.f32 %v2313_v36, 1e-12  ;;  %v2317_v31 = vsel %vm2316_vm2, %v6621_v62, %v2315_v55  ;;  %v4614_v30 = vpop.eup %4613  ;;  %v2322_v6 = vmul.f32 %v4612_v50, %v6634_v40  ;;  %v6868_v55 = vld [vmem:[#allocation21_spill] sm:$0xff]  ;;  %v6869_v36 = vld [vmem:[#allocation24_spill] sm:$0xff] }
 0x316   :  { %3493 = vst.msk [vmem:[%s6797_s5 + $0xd0] sm:$0xf] %vm3440_vm6, %v3883_v27  ;;  %v3884_v37 = vpack.c.bf16 %v2594_v10, %v2594_v10  ;;  %v2320_v24 = vsel %vm2318_vm3, %v2319_v46, %v2317_v31  ;;  %4625 = vrsqrt.f32 %v6702_v28  ;;  %v2522_v52 = vmul.f32 1.4142135, %v4614_v30  ;;  %v6870_v30 = vld [vmem:[#allocation23_spill] sm:$0xff] }
 0x317   :  { %4627 = vrcp.f32 %v2407_v61  ;;  %v2408_v51 = vmax.f32 %v2320_v24, 1e-12  ;;  %v4616_v56 = vpop.eup %4615  ;;  %v2324_v7 = vsel %vm2323_vm4, %v6634_v40, %v2322_v6  ;;  %vm2330_vm0 = vcmp.eq.f32.partialorder %v6657_v43, inf }
 0x318   :  { %3494 = vst.msk [vmem:[%s6797_s5 + $0xd4] sm:$0xf] %vm3440_vm6, %v3884_v37  ;;  %v2595_v5 = vmul.f32 %v2522_v52, %v6863_v8  ;;  %v2327_v25 = vsel %vm2325_vm5, %v2326_v19, %v2324_v7  ;;  %v2329_v60 = vmul.f32 %v4616_v56, %v6657_v43  ;;  %vm2332_vm7 = vcmp.eq.f32.partialorder %v6657_v43, 0.0  ;;  %v6871_v52 = vld [vmem:[#allocation26_spill] sm:$0xff] }
 0x319   :  { %v4618_v62 = vpop.eup %4617  ;;  %4629 = vrcp.f32 %v2408_v51  ;;  %v2409_v59 = vmax.f32 %v2327_v25, 1e-12  ;;  %v2333_v32 = vand.u32 2147483648, %v6657_v43  ;;  %vm2337_vm8 = vcmp.eq.f32.partialorder %v6664_v34, inf }
 0x31a   :  { %v4620_v29 = vpop.eup %4619  ;;  %v2524_v26 = vmul.f32 1.4142135, %v4618_v62  ;;  %v3885_v16 = vpack.c.bf16 %v2595_v5, %v2595_v5  ;;  %v2331_v45 = vsel %vm2330_vm0, %v6657_v43, %v2329_v60  ;;  %v2340_v48 = vand.u32 2147483648, %v6664_v34  ;;  %v6872_v62 = vld [vmem:[#allocation25_spill] sm:$0xff] }
 0x31b   :  { %v2336_v40 = vmul.f32 %v4620_v29, %v6664_v34  ;;  %4631 = vrcp.f32 %v2409_v59  ;;  %v2334_v11 = vsel %vm2332_vm7, %v2333_v32, %v2331_v45  ;;  %vm2339_vm9 = vcmp.eq.f32.partialorder %v6664_v34, 0.0 }
 0x31c   :  { %v2596_v44 = vmul.f32 %v2524_v26, %v6864_v49  ;;  %v4622_v21 = vpop.eup %4621  ;;  %3495 = vst.msk [vmem:[%s6797_s5 + $0xd8] sm:$0xf] %vm3440_vm6, %v3885_v16  ;;  %v2410_v2 = vmax.f32 %v2334_v11, 1e-12  ;;  %vm2344_vm10 = vcmp.eq.f32.partialorder %v6702_v28, inf  ;;  %v2347_v12 = vand.u32 2147483648, %v6702_v28 }
 0x31d   :  { %v2338_v58 = vsel %vm2337_vm8, %v6664_v34, %v2336_v40  ;;  %v2526_v18 = vmul.f32 1.4142135, %v4622_v21  ;;  %vm2346_vm11 = vcmp.eq.f32.partialorder %v6702_v28, 0.0 }
 0x31e   :  { %v3886_v43 = vpack.c.bf16 %v2596_v44, %v2596_v44  ;;  %v2341_v47 = vsel %vm2339_vm9, %v2340_v48, %v2338_v58  ;;  %4633 = vrcp.f32 %v2410_v2 }
 0x31f   :  { %v4624_v33 = vpop.eup %4623  ;;  %v2411_v3 = vmax.f32 %v2341_v47, 1e-12  ;;  %v2597_v23 = vmul.f32 %v2526_v18, %v6865_v54 }
 0x320   :  { %v4626_v53 = vpop.eup %4625  ;;  %3496 = vst.msk [vmem:[%s6797_s5 + $0xdc] sm:$0xf] %vm3440_vm6, %v3886_v43  ;;  %v2528_v14 = vmul.f32 1.4142135, %v4624_v33 }
 0x321   :  { %v4628_v4 = vpop.eup %4627  ;;  %4635 = vrcp.f32 %v2411_v3  ;;  %v2343_v20 = vmul.f32 %v4626_v53, %v6702_v28  ;;  %v3887_v34 = vpack.c.bf16 %v2597_v23, %v2597_v23 }
 0x322   :  { %v2598_v13 = vmul.f32 %v2528_v14, %v6866_v17  ;;  %v2530_v63 = vmul.f32 1.4142135, %v4628_v4 }
 0x323   :  { %v4630_v39 = vpop.eup %4629  ;;  %v2345_v41 = vsel %vm2344_vm10, %v6702_v28, %v2343_v20  ;;  %3497 = vst.msk [vmem:[%s6797_s5 + $0xe0] sm:$0xf] %vm3440_vm6, %v3887_v34 }
 0x324   :  { %v3888_v38 = vpack.c.bf16 %v2598_v13, %v2598_v13  ;;  %v2599_v42 = vmul.f32 %v2530_v63, %v6867_v9  ;;  %v2532_v22 = vmul.f32 1.4142135, %v4630_v39  ;;  %v2348_v57 = vsel %vm2346_vm11, %v2347_v12, %v2345_v41 }
 0x325   :  { %v2412_v15 = vmax.f32 %v2348_v57, 1e-12  ;;  %v4632_v0 = vpop.eup %4631 }
 0x326   :  { %3498 = vst.msk [vmem:[%s6797_s5 + $0xe4] sm:$0xf] %vm3440_vm6, %v3888_v38  ;;  %v3889_v1 = vpack.c.bf16 %v2599_v42, %v2599_v42  ;;  %v2600_v28 = vmul.f32 %v2532_v22, %v6868_v55  ;;  %v2534_v27 = vmul.f32 1.4142135, %v4632_v0 }
 0x327   :  { %4637 = vrcp.f32 %v2412_v15 }
 0x328   :  { %3499 = vst.msk [vmem:[%s6797_s5 + $0xe8] sm:$0xf] %vm3440_vm6, %v3889_v1  ;;  %v3890_v35 = vpack.c.bf16 %v2600_v28, %v2600_v28  ;;  %v4634_v10 = vpop.eup %4633  ;;  %v2601_v46 = vmul.f32 %v2534_v27, %v6869_v36 }
 0x329   :  { %v2536_v50 = vmul.f32 1.4142135, %v4634_v10 }
 0x32a   :  { %3500 = vst.msk [vmem:[%s6797_s5 + $0xec] sm:$0xf] %vm3440_vm6, %v3890_v35  ;;  %v3891_v31 = vpack.c.bf16 %v2601_v46, %v2601_v46 }
 0x32b   :  { %v4636_v61 = vpop.eup %4635  ;;  %v2602_v37 = vmul.f32 %v2536_v50, %v6870_v30 }
 0x32c   :  { %v2538_v24 = vmul.f32 1.4142135, %v4636_v61  ;;  %3501 = vst.msk [vmem:[%s6797_s5 + $0xf0] sm:$0xf] %vm3440_vm6, %v3891_v31 }
 0x32d   :  { %v3892_v6 = vpack.c.bf16 %v2602_v37, %v2602_v37 }
 0x32e   :  { %v2603_v51 = vmul.f32 %v2538_v24, %v6871_v52 }
 0x32f   :  { %3502 = vst.msk [vmem:[%s6797_s5 + $0xf4] sm:$0xf] %vm3440_vm6, %v3892_v6 }
 0x330   :  { %v3893_v19 = vpack.c.bf16 %v2603_v51, %v2603_v51 }
 0x331   :  { %v4638_v56 = vpop.eup %4637 }
 0x332   :  { %3503 = vst.msk [vmem:[%s6797_s5 + $0xf8] sm:$0xf] %vm3440_vm6, %v3893_v19  ;;  %v2540_v7 = vmul.f32 1.4142135, %v4638_v56 }
 0x334   :  { %v2604_v8 = vmul.f32 %v2540_v7, %v6872_v62 }
 0x336   :  { %v3894_v5 = vpack.c.bf16 %v2604_v8, %v2604_v8 }
 0x338   :  { %3504 = vst.msk [vmem:[%s6797_s5 + $0xfc] sm:$0xf] %vm3440_vm6, %v3894_v5 }

// kernel: _lambda_.3
= control target key start
LH: loop header
LB: loop body
LE: loop exit
PB: predicated region body
PF: predicated region fallthrough
CT: control target
= control target key end

     0   :  { %vm554_vm0 = vcmask 261120   ;;  %vm41_vm1 = vcmask 7168   ;;  %s6744_s2 = inlined_call_operand.vmem [shape: bf16[512,32], index: 2, kind: input, shape index: {}, may-alias: {0,1,2}]   ;;  %s6745_s0 = inlined_call_operand.vmem [shape: bf16[512,32], index: 0, kind: input, shape index: {}, may-alias: {0,1,2}]   ;;  %s6746_s1 = inlined_call_operand.vmem [shape: bf16[512,32], index: 1, kind: input, shape index: {}, may-alias: {0,1,2}]   ;;  %s6747_s3 = inlined_call_operand.vmem [shape: f32[1,1,128], index: 3, kind: output, shape index: {}]  }
   0x1   :  { %v4219_v0 = vld [vmem:[%s6744_s2 + $0x40] sm:$0xff]   ;;  %v4223_v5 = vld [vmem:[%s6744_s2 + $0x48] sm:$0xff]   ;;  %v4227_v11 = vld [vmem:[%s6744_s2 + $0x50] sm:$0xff]  }
   0x2   :  { %v4220_v1 = vld [vmem:[%s6744_s2 + $0xc0] sm:$0xff]   ;;  %4200 = vmatprep.subr.msk.bf16.mxu0 %vm554_vm0, %v4219_v0  ;;  %v4224_v7 = vld [vmem:[%s6744_s2 + $0xc8] sm:$0xff]   ;;  %v4228_v13 = vld [vmem:[%s6744_s2 + $0xd0] sm:$0xff]  }
   0x3   :  { %v4221_v2 = vld [vmem:[%s6744_s2] sm:$0xff]   ;;  %4208 = vmatprep.subr.msk.bf16.mxu1 %vm554_vm0, %v4220_v1  ;;  %v4225_v8 = vld [vmem:[%s6744_s2 + $0x8] sm:$0xff]   ;;  %v4229_v14 = vld [vmem:[%s6744_s2 + $0x10] sm:$0xff]  }
   0x4   :  { %v4222_v3 = vld [vmem:[%s6744_s2 + $0x80] sm:$0xff]   ;;  %v652_v4 = vsel %vm554_vm0, %v4221_v2, 0  ;;  %v4226_v9 = vld [vmem:[%s6744_s2 + $0x88] sm:$0xff]   ;;  %v655_v10 = vsel %vm554_vm0, %v4225_v8, 0  ;;  %v4230_v15 = vld [vmem:[%s6744_s2 + $0x90] sm:$0xff]   ;;  %v658_v16 = vsel %vm554_vm0, %v4229_v14, 0 }
   0x5   :  { %4041 = vmatpush3.bf16.xpose.msra.mxu0 %v652_v4  ;;  %v700_v6 = vsel %vm554_vm0, %v4222_v3, 0  ;;  %v703_v12 = vsel %vm554_vm0, %v4226_v9, 0  ;;  %v4231_v17 = vld [vmem:[%s6744_s2 + $0x58] sm:$0xff]   ;;  %v706_v18 = vsel %vm554_vm0, %v4230_v15, 0  ;;  %v4235_v23 = vld [vmem:[%s6744_s2 + $0x60] sm:$0xff]   ;;  %v4239_v30 = vld [vmem:[%s6744_s2 + $0x68] sm:$0xff]  }
   0x6   :  { %4121 = vmatpush3.bf16.xpose.msra.mxu1 %v700_v6  ;;  %4201 = vmatprep.subr.msk.bf16.mxu0 %vm554_vm0, %v4223_v5  ;;  %v4232_v19 = vld [vmem:[%s6744_s2 + $0xd8] sm:$0xff]   ;;  %v4236_v25 = vld [vmem:[%s6744_s2 + $0xe0] sm:$0xff]   ;;  %v4240_v33 = vld [vmem:[%s6744_s2 + $0xe8] sm:$0xff]  }
   0x7   :  { %4209 = vmatprep.subr.msk.bf16.mxu1 %vm554_vm0, %v4224_v7  ;;  %v4233_v20 = vld [vmem:[%s6744_s2 + $0x18] sm:$0xff]   ;;  %v4237_v26 = vld [vmem:[%s6744_s2 + $0x20] sm:$0xff]   ;;  %v4961_v37 = vld [vmem:[%s6746_s1 + $0x88] sm:$0xff]  }
   0x8   :  { %v4234_v21 = vld [vmem:[%s6744_s2 + $0x98] sm:$0xff]   ;;  %v661_v22 = vsel %vm554_vm0, %v4233_v20, 0  ;;  %v4238_v27 = vld [vmem:[%s6744_s2 + $0xa0] sm:$0xff]   ;;  %v664_v29 = vsel %vm554_vm0, %v4237_v26, 0  ;;  %v4967_v39 = vunpack.c.l.bf16 %v4961_v37  ;;  %v4241_v41 = vld [vmem:[%s6744_s2 + $0x28] sm:$0xff]   ;;  %v4994_v49 = vunpack.c.h.bf16 %v4961_v37 }
   0x9   :  { %v709_v24 = vsel %vm554_vm0, %v4234_v21, 0  ;;  %v4931_v28 = vld [vmem:[%s6745_s0] sm:$0xff]   ;;  %v712_v32 = vsel %vm554_vm0, %v4238_v27, 0  ;;  %v4242_v43 = vld [vmem:[%s6744_s2 + $0xa8] sm:$0xff]   ;;  %v667_v53 = vsel %vm554_vm0, %v4241_v41, 0  ;;  %v4243_v54 = vld [vmem:[%s6744_s2 + $0x70] sm:$0xff]  }
   0xa   :  { %v4938_v31 = vunpack.c.h.bf16 %v4931_v28  ;;  %4056 = vmatprep.mubr.msk.bf16.mxu0 %vm554_vm0, %v4931_v28  ;;  %4136 = vmatprep.mubr.msk.bf16.mxu1 %vm554_vm0, %v4931_v28  ;;  %v4949_v34 = vunpack.c.l.bf16 %v4931_v28  ;;  %v4956_v36 = vld [vmem:[%s6746_s1 + $0x80] sm:$0xff]   ;;  %v4983_v44 = vld [vmem:[%s6745_s0 + $0x8] sm:$0xff]   ;;  %v3123_v48 = vmul.f32 %v4967_v39, %v4967_v39  ;;  %v715_v56 = vsel %vm554_vm0, %v4242_v43, 0  ;;  %v4244_v57 = vld [vmem:[%s6744_s2 + $0xf0] sm:$0xff]  }
   0xb   :  { %v4964_v38 = vunpack.c.h.bf16 %v4956_v36  ;;  %v4989_v47 = vunpack.c.l.bf16 %v4956_v36  ;;  %v4997_v50 = vunpack.c.l.bf16 %v4983_v44  ;;  %v5015_v58 = vld [vmem:[%s6745_s0 + $0x10] sm:$0xff]   ;;  %v5019_v60 = vunpack.c.h.bf16 %v4983_v44  ;;  %v4248_v14 = vld [vmem:[%s6744_s2 + $0xf8] sm:$0xff]  }
   0xc   :  { %v2930_v35 = vmul.f32 %v4938_v31, %v4938_v31  ;;  %v2929_v40 = vmul.f32 %v4949_v34, %v4949_v34  ;;  %v3159_v61 = vsel %vm554_vm0, %v3123_v48, 0.0  ;;  %v3124_v62 = vmul.f32 %v4994_v49, %v4994_v49  ;;  %v5031_v1 = vld [vmem:[%s6746_s1 + $0x90] sm:$0xff]   ;;  %v5066_v15 = vld [vmem:[%s6745_s0 + $0x18] sm:$0xff]   ;;  %v5125_v48 = vld [vmem:[%s6746_s1 + $0xa0] sm:$0xff]  }
   0xd   :  { %4043 = vmatpush3.bf16.xpose.msra.mxu0 %v655_v10  ;;  %v3122_v45 = vmul.f32 %v4964_v38, %v4964_v38  ;;  %v3121_v52 = vmul.f32 %v4989_v47, %v4989_v47  ;;  %v2931_v55 = vmul.f32 %v4997_v50, %v4997_v50  ;;  %v5025_v63 = vunpack.c.l.bf16 %v5015_v58  ;;  %v4245_v3 = vld [vmem:[%s6744_s2 + $0x30] sm:$0xff]   ;;  %v5081_v21 = vld [vmem:[%s6746_s1 + $0x98] sm:$0xff]  }
   0xe   :  { %4123 = vmatpush3.bf16.xpose.msra.mxu1 %v703_v12  ;;  %4202 = vmatprep.subr.msk.bf16.mxu0 %vm554_vm0, %v4227_v11  ;;  %v2964_v42 = vsel %vm554_vm0, %v2930_v35, 0.0  ;;  %v2961_v46 = vsel %vm554_vm0, %v2929_v40, 0.0  ;;  %v2932_v2 = vmul.f32 %v5019_v60, %v5019_v60  ;;  %v5040_v4 = vunpack.c.l.bf16 %v5031_v1  ;;  %v4246_v5 = vld [vmem:[%s6744_s2 + $0xb0] sm:$0xff]   ;;  %v4247_v12 = vld [vmem:[%s6744_s2 + $0x78] sm:$0xff]   ;;  %v5110_v40 = vld [vmem:[%s6745_s0 + $0x20] sm:$0xff]  }
   0xf   :  { %4210 = vmatprep.subr.msk.bf16.mxu1 %vm554_vm0, %v4228_v13  ;;  %2965 = vadd.xlane.f32.xlu0 %v2964_v42  ;;  %v3156_v51 = vsel %vm554_vm0, %v3122_v45, 0.0  ;;  %v3153_v59 = vsel %vm554_vm0, %v3121_v52, 0.0  ;;  %v2967_v0 = vsel %vm554_vm0, %v2931_v55, 0.0  ;;  %v3162_v6 = vsel %vm554_vm0, %v3124_v62, 0.0 }
  0x10   :  { %2962 = vadd.xlane.f32.xlu1 %v2961_v46  ;;  %v2933_v7 = vmul.f32 %v5025_v63, %v5025_v63  ;;  %v5050_v8 = vunpack.c.h.bf16 %v5031_v1  ;;  %v2970_v9 = vsel %vm554_vm0, %v2932_v2, 0.0  ;;  %v3125_v10 = vmul.f32 %v5040_v4, %v5040_v4 }
  0x11   :  { %v670_v11 = vsel %vm554_vm0, %v4245_v3, 0  ;;  %v718_v13 = vsel %vm554_vm0, %v4246_v5, 0  ;;  %v5113_v41 = vunpack.c.h.bf16 %v5066_v15  ;;  %v5119_v45 = vunpack.c.l.bf16 %v5110_v40 }
  0x12   :  { %v3165_v20 = vsel %vm554_vm0, %v3125_v10, 0.0  ;;  %v5130_v52 = vunpack.c.l.bf16 %v5125_v48  ;;  %v5136_v55 = vunpack.c.h.bf16 %v5125_v48 }
  0x13   :  { %3157 = vadd.xlane.f32.xlu0 %v3156_v51  ;;  %v2936_v51 = vmul.f32 %v5113_v41, %v5113_v41 }
  0x14   :  { %3154 = vadd.xlane.f32.xlu1 %v3153_v59  ;;  %v5144_v59 = vld [vmem:[%s6745_s0 + $0x28] sm:$0xff]  }
  0x15   :  { %4045 = vmatpush3.bf16.xpose.msra.mxu0 %v658_v16  ;;  %v5069_v16 = vunpack.c.h.bf16 %v5015_v58  ;;  %v5155_v2 = vunpack.c.l.bf16 %v5144_v59  ;;  %v5178_v10 = vunpack.c.h.bf16 %v5144_v59 }
  0x16   :  { %4125 = vmatpush3.bf16.xpose.msra.mxu1 %v706_v18  ;;  %4203 = vmatprep.subr.msk.bf16.mxu0 %vm554_vm0, %v4231_v17  ;;  %v2973_v17 = vsel %vm554_vm0, %v2933_v7, 0.0  ;;  %v3126_v18 = vmul.f32 %v5050_v8, %v5050_v8 }
  0x17   :  { %4211 = vmatprep.subr.msk.bf16.mxu1 %vm554_vm0, %v4232_v19  ;;  %3160 = vadd.xlane.f32.xlu0 %v3159_v61  ;;  %v5075_v19 = vunpack.c.l.bf16 %v5066_v15  ;;  %v5147_v61 = vunpack.c.h.bf16 %v5110_v40 }
  0x18   :  { %2968 = vadd.xlane.f32.xlu1 %v2967_v0  ;;  %v3168_v26 = vsel %vm554_vm0, %v3126_v18, 0.0  ;;  %v3130_v0 = vmul.f32 %v5136_v55, %v5136_v55  ;;  %v2940_v18 = vmul.f32 %v5178_v10, %v5178_v10 }
  0x19   :  { %v2935_v27 = vmul.f32 %v5075_v19, %v5075_v19  ;;  %v2938_v5 = vmul.f32 %v5147_v61, %v5147_v61 }
  0x1b   :  { %3163 = vadd.xlane.f32.xlu0 %v3162_v6  ;;  %v2979_v42 = vsel %vm554_vm0, %v2935_v27, 0.0  ;;  %v5167_v6 = vld [vmem:[%s6746_s1 + $0xa8] sm:$0xff]  }
  0x1c   :  { %2971 = vadd.xlane.f32.xlu1 %v2970_v9  ;;  %v5172_v7 = vunpack.c.l.bf16 %v5167_v6  ;;  %v2939_v9 = vmul.f32 %v5155_v2, %v5155_v2 }
  0x1d   :  { %4047 = vmatpush3.bf16.xpose.msra.mxu0 %v661_v22  ;;  %v2934_v22 = vmul.f32 %v5069_v16, %v5069_v16 }
  0x1e   :  { %4127 = vmatpush3.bf16.xpose.msra.mxu1 %v709_v24  ;;  %4204 = vmatprep.subr.msk.bf16.mxu0 %vm554_vm0, %v4235_v23  ;;  %v4249_v23 = vld [vmem:[%s6744_s2 + $0x38] sm:$0xff]   ;;  %v5090_v24 = vunpack.c.l.bf16 %v5081_v21 }
  0x1f   :  { %4212 = vmatprep.subr.msk.bf16.mxu1 %vm554_vm0, %v4236_v25  ;;  %v4250_v25 = vld [vmem:[%s6744_s2 + $0xb8] sm:$0xff]   ;;  %2974 = vadd.xlane.f32.xlu0 %v2973_v17  ;;  %v2991_v17 = vsel %vm554_vm0, %v2939_v9, 0.0 }
  0x20   :  { %3166 = vadd.xlane.f32.xlu1 %v3165_v20  ;;  %v721_v35 = vsel %vm554_vm0, %v4250_v25, 0  ;;  %v5209_v25 = vld [vmem:[%s6746_s1 + $0xb0] sm:$0xff]  }
  0x23   :  { %3169 = vadd.xlane.f32.xlu0 %v3168_v26  ;;  %v5214_v26 = vunpack.c.l.bf16 %v5209_v25 }
  0x25   :  { %4049 = vmatpush3.bf16.xpose.msra.mxu0 %v664_v29  ;;  %v5100_v29 = vunpack.c.h.bf16 %v5081_v21 }
  0x26   :  { %4129 = vmatpush3.bf16.xpose.msra.mxu1 %v712_v32  ;;  %4205 = vmatprep.subr.msk.bf16.mxu0 %vm554_vm0, %v4239_v30  ;;  %v2976_v30 = vsel %vm554_vm0, %v2934_v22, 0.0  ;;  %v3127_v32 = vmul.f32 %v5090_v24, %v5090_v24 }
  0x27   :  { %4213 = vmatprep.subr.msk.bf16.mxu1 %vm554_vm0, %v4240_v33  ;;  %v673_v33 = vsel %vm554_vm0, %v4249_v23, 0  ;;  %v3128_v43 = vmul.f32 %v5100_v29, %v5100_v29  ;;  %2977 = vadd.xlane.f32.xlu1 %v2976_v30 }
  0x28   :  { %v3171_v46 = vsel %vm554_vm0, %v3127_v32, 0.0  ;;  %2980 = vadd.xlane.f32.xlu0 %v2979_v42  ;;  %v5231_v42 = vunpack.c.h.bf16 %v5209_v25 }
  0x2b   :  { %3172 = vadd.xlane.f32.xlu1 %v3171_v46 }
  0x2d   :  { %4051 = vmatpush3.bf16.xpose.msra.mxu0 %v667_v53  ;;  %v3174_v53 = vsel %vm554_vm0, %v3128_v43, 0.0 }
  0x2e   :  { %4131 = vmatpush3.bf16.xpose.msra.mxu1 %v715_v56  ;;  %4206 = vmatprep.subr.msk.bf16.mxu0 %vm554_vm0, %v4243_v54  ;;  %v2937_v54 = vmul.f32 %v5119_v45, %v5119_v45  ;;  %v2982_v56 = vsel %vm554_vm0, %v2936_v51, 0.0 }
  0x2f   :  { %4214 = vmatprep.subr.msk.bf16.mxu1 %vm554_vm0, %v4244_v57  ;;  %v3129_v57 = vmul.f32 %v5130_v52, %v5130_v52  ;;  %3175 = vadd.xlane.f32.xlu0 %v3174_v53 }
  0x30   :  { %v2985_v62 = vsel %vm554_vm0, %v2937_v54, 0.0  ;;  %2983 = vadd.xlane.f32.xlu1 %v2982_v56  ;;  %v3134_v54 = vmul.f32 %v5231_v42, %v5231_v42  ;;  %v5251_v56 = vld [vmem:[%s6746_s1 + $0xb8] sm:$0xff]  }
  0x31   :  { %v3177_v3 = vsel %vm554_vm0, %v3129_v57, 0.0  ;;  %v5256_v57 = vunpack.c.l.bf16 %v5251_v56  ;;  %v5273_v9 = vunpack.c.h.bf16 %v5251_v56 }
  0x33   :  { %2986 = vadd.xlane.f32.xlu0 %v2985_v62 }
  0x34   :  { %3178 = vadd.xlane.f32.xlu1 %v3177_v3  ;;  %v3192_v3 = vsel %vm554_vm0, %v3134_v54, 0.0  ;;  %v2803_v54 = vmul.f32 %v4967_v39, %v4997_v50  ;;  %v5342_v39 = vld [vmem:[%s6745_s0 + $0x48] sm:$0xff]  }
  0x35   :  { %4053 = vmatpush3.bf16.xpose.msra.mxu0 %v670_v11  ;;  %v2988_v11 = vsel %vm554_vm0, %v2938_v5, 0.0  ;;  %v3135_v5 = vmul.f32 %v5256_v57, %v5256_v57  ;;  %v5345_v50 = vunpack.c.l.bf16 %v5342_v39 }
  0x36   :  { %4133 = vmatpush3.bf16.xpose.msra.mxu1 %v718_v13  ;;  %4207 = vmatprep.subr.msk.bf16.mxu0 %vm554_vm0, %v4247_v12  ;;  %v3131_v12 = vmul.f32 %v5172_v7, %v5172_v7  ;;  %v5186_v13 = vld [vmem:[%s6745_s0 + $0x30] sm:$0xff]  }
  0x37   :  { %4215 = vmatprep.subr.msk.bf16.mxu1 %vm554_vm0, %v4248_v14  ;;  %v5189_v14 = vunpack.c.h.bf16 %v5167_v6  ;;  %v5197_v20 = vunpack.c.l.bf16 %v5186_v13  ;;  %v5220_v30 = vunpack.c.h.bf16 %v5186_v13 }
  0x38   :  { %2989 = vadd.xlane.f32.xlu1 %v2988_v11  ;;  %v3183_v22 = vsel %vm554_vm0, %v3131_v12, 0.0 }
  0x39   :  { %v3132_v23 = vmul.f32 %v5189_v14, %v5189_v14  ;;  %v2941_v27 = vmul.f32 %v5197_v20, %v5197_v20  ;;  %v2942_v46 = vmul.f32 %v5220_v30, %v5220_v30 }
  0x3b   :  { %v3186_v32 = vsel %vm554_vm0, %v3132_v23, 0.0  ;;  %v2997_v43 = vsel %vm554_vm0, %v2941_v27, 0.0  ;;  %v2801_v23 = vmul.f32 %v4989_v47, %v4949_v34 }
  0x3c   :  { %3184 = vadd.xlane.f32.xlu1 %v3183_v22  ;;  %v3136_v22 = vmul.f32 %v5273_v9, %v5273_v9 }
  0x3d   :  { %4055 = vmatpush3.bf16.xpose.msra.mxu0 %v673_v33  ;;  %v3133_v33 = vmul.f32 %v5214_v26, %v5214_v26 }
  0x3e   :  { %4135 = vmatpush3.bf16.xpose.msra.mxu1 %v721_v35  ;;  %v5228_v35 = vld [vmem:[%s6745_s0 + $0x38] sm:$0xff]   ;;  %v3198_v34 = vsel %vm554_vm0, %v3136_v22, 0.0  ;;  %v2839_v22 = vsel %vm554_vm0, %v2803_v54, 0.0 }
  0x3f   :  { %v5239_v51 = vunpack.c.l.bf16 %v5228_v35  ;;  %v3189_v53 = vsel %vm554_vm0, %v3133_v33, 0.0 }
  0x40   :  { %3187 = vadd.xlane.f32.xlu1 %v3186_v32 }
  0x41   :  { %v2943_v62 = vmul.f32 %v5239_v51, %v5239_v51 }
  0x43   :  { %v3003_v11 = vsel %vm554_vm0, %v2943_v62, 0.0 }
  0x44   :  { %4057 = vmatmul.mubr.msk.bf16.vlgmr.msra.gmra.mrb[0].mxu0 %vm554_vm0, %v4931_v28  ;;  %3190 = vadd.xlane.f32.xlu1 %v3189_v53  ;;  %v2802_v53 = vmul.f32 %v4964_v38, %v4938_v31  ;;  %v5337_v38 = vld [vmem:[%s6746_s1 + $0xc8] sm:$0xff]  }
  0x45   :  { %4137 = vmatmul.mubr.msk.bf16.vlgmr.msra.gmra.mrb[0].mxu1 %vm554_vm0, %v4931_v28  ;;  %4058 = vmatprep.mubr.msk.bf16.mxu0 %vm554_vm0, %v4983_v44  ;;  %v3180_v28 = vsel %vm554_vm0, %v3130_v0, 0.0  ;;  %v5262_v0 = vunpack.c.h.bf16 %v5228_v35 }
  0x46   :  { %4138 = vmatprep.mubr.msk.bf16.mxu1 %vm554_vm0, %v4983_v44  ;;  %3181 = vadd.xlane.f32.xlu0 %v3180_v28  ;;  %v5270_v28 = vld [vmem:[%s6745_s0 + $0x40] sm:$0xff]  }
  0x47   :  { %v2944_v12 = vmul.f32 %v5262_v0, %v5262_v0 }
  0x48   :  { %3193 = vadd.xlane.f32.xlu1 %v3192_v3  ;;  %v2836_v3 = vsel %vm554_vm0, %v2802_v53, 0.0  ;;  %v5394_v53 = vld [vmem:[%s6746_s1 + $0xd0] sm:$0xff]  }
  0x49   :  { %v3006_v27 = vsel %vm554_vm0, %v2944_v12, 0.0 }
  0x4a   :  { %2992 = vadd.xlane.f32.xlu0 %v2991_v17  ;;  %v5281_v17 = vunpack.c.l.bf16 %v5270_v28 }
  0x4c   :  { %4059 = vmatmul.mubr.msk.bf16.gmra.mrb[4].mxu0 %vm554_vm0, %v4983_v44  ;;  %v2945_v32 = vmul.f32 %v5281_v17, %v5281_v17 }
  0x4d   :  { %4139 = vmatmul.mubr.msk.bf16.gmra.mrb[4].mxu1 %vm554_vm0, %v4983_v44  ;;  %4060 = vmatprep.mubr.msk.bf16.mxu0 %vm554_vm0, %v5015_v58  ;;  %v2994_v44 = vsel %vm554_vm0, %v2940_v18, 0.0  ;;  %v3195_v18 = vsel %vm554_vm0, %v3135_v5, 0.0 }
  0x4e   :  { %4140 = vmatprep.mubr.msk.bf16.mxu1 %vm554_vm0, %v5015_v58  ;;  %2995 = vadd.xlane.f32.xlu0 %v2994_v44  ;;  %v5295_v44 = vld [vmem:[%s6746_s1 + $0xc0] sm:$0xff]   ;;  %v3009_v33 = vsel %vm554_vm0, %v2945_v32, 0.0  ;;  %v2804_v32 = vmul.f32 %v4994_v49, %v5019_v60 }
  0x4f   :  { %3196 = vadd.xlane.f32.xlu1 %v3195_v18  ;;  %v2947_v18 = vmul.f32 %v5345_v50, %v5345_v50 }
  0x50   :  { %v2842_v49 = vsel %vm554_vm0, %v2804_v32, 0.0 }
  0x52   :  { %2998 = vadd.xlane.f32.xlu0 %v2997_v43  ;;  %v5312_v43 = vunpack.c.h.bf16 %v5270_v28 }
  0x53   :  { %3199 = vadd.xlane.f32.xlu1 %v3198_v34  ;;  %v5372_v34 = vunpack.c.h.bf16 %v5337_v38 }
  0x54   :  { %4061 = vmatmul.mubr.msk.bf16.gmra.mrb[8].mxu0 %vm554_vm0, %v5015_v58  ;;  %v2946_v62 = vmul.f32 %v5312_v43, %v5312_v43 }
  0x55   :  { %4141 = vmatmul.mubr.msk.bf16.gmra.mrb[8].mxu1 %vm554_vm0, %v5015_v58  ;;  %4062 = vmatprep.mubr.msk.bf16.mxu0 %vm554_vm0, %v5066_v15  ;;  %v3000_v58 = vsel %vm554_vm0, %v2942_v46, 0.0  ;;  %v3140_v60 = vmul.f32 %v5372_v34, %v5372_v34 }
  0x56   :  { %4142 = vmatprep.mubr.msk.bf16.mxu1 %vm554_vm0, %v5066_v15  ;;  %3001 = vadd.xlane.f32.xlu0 %v3000_v58  ;;  %v5324_v58 = vunpack.c.h.bf16 %v5295_v44  ;;  %v3012_v5 = vsel %vm554_vm0, %v2946_v62, 0.0  ;;  %v5405_v62 = vunpack.c.l.bf16 %v5394_v53 }
  0x58   :  { %v3138_v31 = vmul.f32 %v5324_v58, %v5324_v58 }
  0x5a   :  { %3004 = vadd.xlane.f32.xlu0 %v3003_v11  ;;  %v5351_v11 = vunpack.c.l.bf16 %v5337_v38  ;;  %v3204_v12 = vsel %vm554_vm0, %v3138_v31, 0.0 }
  0x5c   :  { %4063 = vmatmul.mubr.msk.bf16.gmra.mrb[12].mxu0 %vm554_vm0, %v5066_v15 }
  0x5d   :  { %4143 = vmatmul.mubr.msk.bf16.gmra.mrb[12].mxu1 %vm554_vm0, %v5066_v15  ;;  %4064 = vmatprep.mubr.msk.bf16.mxu0 %vm554_vm0, %v5110_v40  ;;  %v5300_v15 = vunpack.c.l.bf16 %v5295_v44 }
  0x5e   :  { %4144 = vmatprep.mubr.msk.bf16.mxu1 %vm554_vm0, %v5110_v40  ;;  %3007 = vadd.xlane.f32.xlu0 %v3006_v27  ;;  %v3015_v27 = vsel %vm554_vm0, %v2947_v18, 0.0  ;;  %v2806_v18 = vmul.f32 %v5050_v8, %v5069_v16  ;;  %v5439_v8 = vld [vmem:[%s6746_s1 + $0xd8] sm:$0xff]  }
  0x5f   :  { %v3137_v47 = vmul.f32 %v5300_v15, %v5300_v15  ;;  %v5444_v16 = vld [vmem:[%s6745_s0 + $0x58] sm:$0xff]  }
  0x61   :  { %v3201_v46 = vsel %vm554_vm0, %v3137_v47, 0.0  ;;  %v5379_v47 = vld [vmem:[%s6745_s0 + $0x50] sm:$0xff]  }
  0x62   :  { %3010 = vadd.xlane.f32.xlu0 %v3009_v33  ;;  %3202 = vadd.xlane.f32.xlu1 %v3201_v46  ;;  %v5397_v54 = vunpack.c.l.bf16 %v5379_v47 }
  0x64   :  { %4065 = vmatmul.mubr.msk.bf16.gmra.mrb[16].mxu0 %vm554_vm0, %v5110_v40  ;;  %v2949_v31 = vmul.f32 %v5397_v54, %v5397_v54 }
  0x65   :  { %4145 = vmatmul.mubr.msk.bf16.gmra.mrb[16].mxu1 %vm554_vm0, %v5110_v40  ;;  %4066 = vmatprep.mubr.msk.bf16.mxu0 %vm554_vm0, %v5144_v59  ;;  %v2833_v40 = vsel %vm554_vm0, %v2801_v23, 0.0  ;;  %v3139_v23 = vmul.f32 %v5351_v11, %v5351_v11 }
  0x66   :  { %4146 = vmatprep.mubr.msk.bf16.mxu1 %vm554_vm0, %v5144_v59  ;;  %2834 = vadd.xlane.f32.xlu0 %v2833_v40  ;;  %v2805_v40 = vmul.f32 %v5040_v4, %v5025_v63  ;;  %v5416_v63 = vunpack.c.h.bf16 %v5379_v47  ;;  %v3021_v4 = vsel %vm554_vm0, %v2949_v31, 0.0  ;;  %v2808_v31 = vmul.f32 %v5100_v29, %v5113_v41 }
  0x67   :  { %2837 = vadd.xlane.f32.xlu1 %v2836_v3  ;;  %v3207_v33 = vsel %vm554_vm0, %v3139_v23, 0.0  ;;  %v3210_v3 = vsel %vm554_vm0, %v3140_v60, 0.0  ;;  %v5455_v60 = vunpack.c.l.bf16 %v5439_v8 }
  0x68   :  { %v2854_v29 = vsel %vm554_vm0, %v2808_v31, 0.0 }
  0x6a   :  { %3013 = vadd.xlane.f32.xlu0 %v3012_v5  ;;  %v2845_v5 = vsel %vm554_vm0, %v2805_v40, 0.0 }
  0x6b   :  { %3205 = vadd.xlane.f32.xlu1 %v3204_v12  ;;  %v3141_v12 = vmul.f32 %v5405_v62, %v5405_v62 }
  0x6c   :  { %4067 = vmatmul.mubr.msk.bf16.gmra.mrb[20].mxu0 %vm554_vm0, %v5144_v59 }
  0x6d   :  { %4147 = vmatmul.mubr.msk.bf16.gmra.mrb[20].mxu1 %vm554_vm0, %v5144_v59  ;;  %4068 = vmatprep.mubr.msk.bf16.mxu0 %vm554_vm0, %v5186_v13  ;;  %v5366_v59 = vunpack.c.h.bf16 %v5342_v39  ;;  %v3213_v23 = vsel %vm554_vm0, %v3141_v12, 0.0  ;;  %v5483_v12 = vld [vmem:[%s6745_s0 + $0x60] sm:$0xff]  }
  0x6e   :  { %4148 = vmatprep.mubr.msk.bf16.mxu1 %vm554_vm0, %v5186_v13  ;;  %2840 = vadd.xlane.f32.xlu0 %v2839_v22  ;;  %v5426_v22 = vunpack.c.h.bf16 %v5394_v53 }
  0x6f   :  { %3016 = vadd.xlane.f32.xlu1 %v3015_v27  ;;  %v2948_v46 = vmul.f32 %v5366_v59, %v5366_v59  ;;  %v2848_v27 = vsel %vm554_vm0, %v2806_v18, 0.0 }
  0x70   :  { %v3142_v32 = vmul.f32 %v5426_v22, %v5426_v22 }
  0x72   :  { %3208 = vadd.xlane.f32.xlu0 %v3207_v33  ;;  %v5447_v33 = vunpack.c.l.bf16 %v5444_v16 }
  0x73   :  { %2843 = vadd.xlane.f32.xlu1 %v2842_v49  ;;  %v2807_v49 = vmul.f32 %v5090_v24, %v5075_v19  ;;  %v3143_v24 = vmul.f32 %v5455_v60, %v5455_v60 }
  0x74   :  { %4069 = vmatmul.mubr.msk.bf16.gmra.mrb[24].mxu0 %vm554_vm0, %v5186_v13  ;;  %v2951_v40 = vmul.f32 %v5447_v33, %v5447_v33 }
  0x75   :  { %4149 = vmatmul.mubr.msk.bf16.gmra.mrb[24].mxu1 %vm554_vm0, %v5186_v13  ;;  %4070 = vmatprep.mubr.msk.bf16.mxu0 %vm554_vm0, %v5228_v35  ;;  %v3018_v13 = vsel %vm554_vm0, %v2948_v46, 0.0  ;;  %v2851_v19 = vsel %vm554_vm0, %v2807_v49, 0.0 }
  0x76   :  { %4150 = vmatprep.mubr.msk.bf16.mxu1 %vm554_vm0, %v5228_v35  ;;  %3019 = vadd.xlane.f32.xlu0 %v3018_v13  ;;  %v3216_v13 = vsel %vm554_vm0, %v3142_v32, 0.0 }
  0x77   :  { %3211 = vadd.xlane.f32.xlu1 %v3210_v3  ;;  %v3027_v3 = vsel %vm554_vm0, %v2951_v40, 0.0 }
  0x7a   :  { %2846 = vadd.xlane.f32.xlu0 %v2845_v5  ;;  %v5476_v5 = vunpack.c.h.bf16 %v5439_v8 }
  0x7b   :  { %3022 = vadd.xlane.f32.xlu1 %v3021_v4  ;;  %v3219_v4 = vsel %vm554_vm0, %v3143_v24, 0.0 }
  0x7c   :  { %4071 = vmatmul.mubr.msk.bf16.gmra.mrb[28].mxu0 %vm554_vm0, %v5228_v35  ;;  %6766 = vst [vmem:[#allocation4_spill] sm:$0xff] %v5476_v5  ;;  %v3144_v41 = vmul.f32 %v5476_v5, %v5476_v5 }
  0x7d   :  { %4151 = vmatmul.mubr.msk.bf16.gmra.mrb[28].mxu1 %vm554_vm0, %v5228_v35  ;;  %4072 = vmatprep.mubr.msk.bf16.mxu0 %vm554_vm0, %v5270_v28  ;;  %v2950_v35 = vmul.f32 %v5416_v63, %v5416_v63 }
  0x7e   :  { %4152 = vmatprep.mubr.msk.bf16.mxu1 %vm554_vm0, %v5270_v28  ;;  %3214 = vadd.xlane.f32.xlu0 %v3213_v23  ;;  %v5498_v23 = vld [vmem:[%s6746_s1 + $0xe0] sm:$0xff]  }
  0x7f   :  { %v3024_v46 = vsel %vm554_vm0, %v2950_v35, 0.0  ;;  %2849 = vadd.xlane.f32.xlu1 %v2848_v27  ;;  %v5501_v35 = vunpack.c.l.bf16 %v5483_v12  ;;  %v2809_v27 = vmul.f32 %v5130_v52, %v5119_v45  ;;  %v5509_v32 = vunpack.c.l.bf16 %v5498_v23 }
  0x80   :  { %v5520_v45 = vunpack.c.h.bf16 %v5483_v12 }
  0x81   :  { %6767 = vst [vmem:[#allocation5_spill] sm:$0xff] %v5501_v35  ;;  %6768 = vst [vmem:[#allocation6_spill] sm:$0xff] %v5509_v32  ;;  %v2953_v49 = vmul.f32 %v5501_v35, %v5501_v35  ;;  %v3145_v40 = vmul.f32 %v5509_v32, %v5509_v32 }
  0x82   :  { %3025 = vadd.xlane.f32.xlu0 %v3024_v46  ;;  %v3222_v46 = vsel %vm554_vm0, %v3144_v41, 0.0  ;;  %6769 = vst [vmem:[#allocation7_spill] sm:$0xff] %v5520_v45 }
  0x83   :  { %3217 = vadd.xlane.f32.xlu1 %v3216_v13  ;;  %v2857_v13 = vsel %vm554_vm0, %v2809_v27, 0.0  ;;  %v3033_v52 = vsel %vm554_vm0, %v2953_v49, 0.0  ;;  %v3225_v24 = vsel %vm554_vm0, %v3145_v40, 0.0 }
  0x84   :  { %4073 = vmatmul.mubr.msk.bf16.gmra.mrb[32].mxu0 %vm554_vm0, %v5270_v28 }
  0x85   :  { %4153 = vmatmul.mubr.msk.bf16.gmra.mrb[32].mxu1 %vm554_vm0, %v5270_v28  ;;  %4074 = vmatprep.mubr.msk.bf16.mxu0 %vm554_vm0, %v5342_v39  ;;  %v5470_v28 = vunpack.c.h.bf16 %v5444_v16 }
  0x86   :  { %4154 = vmatprep.mubr.msk.bf16.mxu1 %vm554_vm0, %v5342_v39  ;;  %2852 = vadd.xlane.f32.xlu0 %v2851_v19  ;;  %v2810_v19 = vmul.f32 %v5136_v55, %v5147_v61  ;;  %v132_v61 = vld [vmem:[%s6745_s0 + $0x68] sm:$0xff]  }
  0x87   :  { %6765 = vst [vmem:[#allocation3_spill] sm:$0xff] %v5470_v28  ;;  %3028 = vadd.xlane.f32.xlu1 %v3027_v3  ;;  %v2952_v18 = vmul.f32 %v5470_v28, %v5470_v28  ;;  %v2954_v3 = vmul.f32 %v5520_v45, %v5520_v45  ;;  %v5570_v49 = vunpack.c.h.bf16 %v132_v61 }
  0x88   :  { %v2860_v31 = vsel %vm554_vm0, %v2810_v19, 0.0 }
  0x89   :  { %6773 = vst [vmem:[#allocation11_spill] sm:$0xff] %v5570_v49 }
  0x8a   :  { %3220 = vadd.xlane.f32.xlu0 %v3219_v4  ;;  %v5541_v4 = vld [vmem:[%s6746_s1 + $0xe8] sm:$0xff]  }
  0x8b   :  { %2855 = vadd.xlane.f32.xlu1 %v2854_v29  ;;  %v2811_v29 = vmul.f32 %v5172_v7, %v5155_v2  ;;  %v5554_v41 = vunpack.c.l.bf16 %v5541_v4  ;;  %v5581_v19 = vunpack.c.h.bf16 %v5541_v4 }
  0x8c   :  { %4075 = vmatmul.mubr.msk.bf16.gmra.mrb[36].mxu0 %vm554_vm0, %v5342_v39 }
  0x8d   :  { %4155 = vmatmul.mubr.msk.bf16.gmra.mrb[36].mxu1 %vm554_vm0, %v5342_v39  ;;  %4076 = vmatprep.mubr.msk.bf16.mxu0 %vm554_vm0, %v5379_v47  ;;  %v3030_v39 = vsel %vm554_vm0, %v2952_v18, 0.0  ;;  %v3036_v18 = vsel %vm554_vm0, %v2954_v3, 0.0  ;;  %6771 = vst [vmem:[#allocation9_spill] sm:$0xff] %v5554_v41  ;;  %v2863_v2 = vsel %vm554_vm0, %v2811_v29, 0.0  ;;  %v3147_v7 = vmul.f32 %v5554_v41, %v5554_v41  ;;  %6774 = vst [vmem:[#allocation12_spill] sm:$0xff] %v5581_v19 }
  0x8e   :  { %4156 = vmatprep.mubr.msk.bf16.mxu1 %vm554_vm0, %v5379_v47  ;;  %3031 = vadd.xlane.f32.xlu0 %v3030_v39  ;;  %v5556_v39 = vunpack.c.l.bf16 %v132_v61  ;;  %v3148_v3 = vmul.f32 %v5581_v19, %v5581_v19 }
  0x8f   :  { %3223 = vadd.xlane.f32.xlu1 %v3222_v46  ;;  %v3231_v40 = vsel %vm554_vm0, %v3147_v7, 0.0  ;;  %v136_v7 = vld [vmem:[%s6745_s0 + $0x78] sm:$0xff]  }
  0x90   :  { %6772 = vst [vmem:[#allocation10_spill] sm:$0xff] %v5556_v39  ;;  %v2955_v46 = vmul.f32 %v5556_v39, %v5556_v39  ;;  %v3234_v29 = vsel %vm554_vm0, %v3148_v3, 0.0  ;;  %v5637_v3 = vunpack.c.l.bf16 %v136_v7 }
  0x92   :  { %2858 = vadd.xlane.f32.xlu0 %v2857_v13  ;;  %v2812_v13 = vmul.f32 %v5189_v14, %v5178_v10  ;;  %v5590_v14 = vld [vmem:[%s6746_s1 + $0xf0] sm:$0xff]   ;;  %6779 = vst [vmem:[#allocation17_spill] sm:$0xff] %v5637_v3 }
  0x93   :  { %3034 = vadd.xlane.f32.xlu1 %v3033_v52  ;;  %v2956_v52 = vmul.f32 %v5570_v49, %v5570_v49 }
  0x94   :  { %4077 = vmatmul.mubr.msk.bf16.gmra.mrb[40].mxu0 %vm554_vm0, %v5379_v47  ;;  %v2866_v10 = vsel %vm554_vm0, %v2812_v13, 0.0 }
  0x95   :  { %4157 = vmatmul.mubr.msk.bf16.gmra.mrb[40].mxu1 %vm554_vm0, %v5379_v47  ;;  %4078 = vmatprep.mubr.msk.bf16.mxu0 %vm554_vm0, %v5444_v16  ;;  %v5535_v47 = vunpack.c.h.bf16 %v5498_v23 }
  0x96   :  { %4158 = vmatprep.mubr.msk.bf16.mxu1 %vm554_vm0, %v5444_v16  ;;  %3226 = vadd.xlane.f32.xlu0 %v3225_v24  ;;  %v134_v24 = vld [vmem:[%s6745_s0 + $0x70] sm:$0xff]  }
  0x97   :  { %6770 = vst [vmem:[#allocation8_spill] sm:$0xff] %v5535_v47  ;;  %v3146_v55 = vmul.f32 %v5535_v47, %v5535_v47  ;;  %2861 = vadd.xlane.f32.xlu1 %v2860_v31  ;;  %v2813_v31 = vmul.f32 %v5214_v26, %v5197_v20  ;;  %v5613_v20 = vunpack.c.h.bf16 %v134_v24 }
  0x99   :  { %v3228_v27 = vsel %vm554_vm0, %v3146_v55, 0.0  ;;  %v5602_v55 = vunpack.c.l.bf16 %v5590_v14  ;;  %6777 = vst [vmem:[#allocation15_spill] sm:$0xff] %v5613_v20 }
  0x9a   :  { %3037 = vadd.xlane.f32.xlu0 %v3036_v18  ;;  %v5604_v18 = vunpack.c.l.bf16 %v134_v24 }
  0x9b   :  { %3229 = vadd.xlane.f32.xlu1 %v3228_v27  ;;  %6775 = vst [vmem:[#allocation13_spill] sm:$0xff] %v5602_v55 }
  0x9c   :  { %4079 = vmatmul.mubr.msk.bf16.gmra.mrb[44].mxu0 %vm554_vm0, %v5444_v16  ;;  %6776 = vst [vmem:[#allocation14_spill] sm:$0xff] %v5604_v18  ;;  %v2957_v27 = vmul.f32 %v5604_v18, %v5604_v18 }
  0x9d   :  { %4159 = vmatmul.mubr.msk.bf16.gmra.mrb[44].mxu1 %vm554_vm0, %v5444_v16  ;;  %4080 = vmatprep.mubr.msk.bf16.mxu0 %vm554_vm0, %v5483_v12  ;;  %v3039_v16 = vsel %vm554_vm0, %v2955_v46, 0.0  ;;  %v2869_v46 = vsel %vm554_vm0, %v2813_v31, 0.0  ;;  %v5643_v31 = vpop.xlane.xlu0 %2965 }
  0x9e   :  { %4160 = vmatprep.mubr.msk.bf16.mxu1 %vm554_vm0, %v5483_v12  ;;  %2864 = vadd.xlane.f32.xlu0 %v2863_v2  ;;  %v3149_v2 = vmul.f32 %v5602_v55, %v5602_v55  ;;  %v3045_v26 = vsel %vm554_vm0, %v2957_v27, 0.0  ;;  %v5647_v27 = vpop.xlane.xlu1 %2962 }
  0x9f   :  { %3040 = vadd.xlane.f32.xlu1 %v3039_v16  ;;  %v2814_v16 = vmul.f32 %v5231_v42, %v5220_v30  ;;  %v2815_v42 = vmul.f32 %v5256_v57, %v5239_v51 }
  0xa0   :  { %v3237_v13 = vsel %vm554_vm0, %v3149_v2, 0.0 }
  0xa1   :  { %v2875_v51 = vsel %vm554_vm0, %v2815_v42, 0.0 }
  0xa2   :  { %3232 = vadd.xlane.f32.xlu0 %v3231_v40  ;;  %v5628_v40 = vunpack.c.h.bf16 %v5590_v14 }
  0xa3   :  { %2867 = vadd.xlane.f32.xlu1 %v2866_v10 }
  0xa4   :  { %4081 = vmatmul.mubr.msk.bf16.gmra.mrb[48].mxu0 %vm554_vm0, %v5483_v12  ;;  %6778 = vst [vmem:[#allocation16_spill] sm:$0xff] %v5628_v40  ;;  %v3150_v10 = vmul.f32 %v5628_v40, %v5628_v40 }
  0xa5   :  { %4161 = vmatmul.mubr.msk.bf16.gmra.mrb[48].mxu1 %vm554_vm0, %v5483_v12  ;;  %4082 = vmatprep.mubr.msk.bf16.mxu0 %vm554_vm0, %v132_v61  ;;  %v3042_v12 = vsel %vm554_vm0, %v2956_v52, 0.0  ;;  %v2872_v52 = vsel %vm554_vm0, %v2814_v16, 0.0 }
  0xa6   :  { %4162 = vmatprep.mubr.msk.bf16.mxu1 %vm554_vm0, %v132_v61  ;;  %3043 = vadd.xlane.f32.xlu0 %v3042_v12  ;;  %v3240_v12 = vsel %vm554_vm0, %v3150_v10, 0.0 }
  0xa7   :  { %3235 = vadd.xlane.f32.xlu1 %v3234_v29  ;;  %v2959_v29 = vmul.f32 %v5637_v3, %v5637_v3 }
  0xa9   :  { %v3051_v57 = vsel %vm554_vm0, %v2959_v29, 0.0 }
  0xaa   :  { %2870 = vadd.xlane.f32.xlu0 %v2869_v46  ;;  %v5657_v46 = vpop.xlane.xlu1 %3154 }
  0xab   :  { %3046 = vadd.xlane.f32.xlu1 %v3045_v26 }
  0xac   :  { %4083 = vmatmul.mubr.msk.bf16.gmra.mrb[52].mxu0 %vm554_vm0, %v132_v61 }
  0xad   :  { %4163 = vmatmul.mubr.msk.bf16.gmra.mrb[52].mxu1 %vm554_vm0, %v132_v61  ;;  %4084 = vmatprep.mubr.msk.bf16.mxu0 %vm554_vm0, %v134_v24  ;;  %v2958_v61 = vmul.f32 %v5613_v20, %v5613_v20 }
  0xae   :  { %4164 = vmatprep.mubr.msk.bf16.mxu1 %vm554_vm0, %v134_v24  ;;  %3238 = vadd.xlane.f32.xlu0 %v3237_v13  ;;  %v5663_v26 = vpop.xlane.xlu1 %2968 }
  0xaf   :  { %v3048_v30 = vsel %vm554_vm0, %v2958_v61, 0.0  ;;  %2873 = vadd.xlane.f32.xlu1 %v2872_v52 }
  0xb2   :  { %3049 = vadd.xlane.f32.xlu0 %v3048_v30  ;;  %v5675_v16 = vpop.xlane.xlu1 %2971 }
  0xb3   :  { %3241 = vadd.xlane.f32.xlu1 %v3240_v12 }
  0xb4   :  { %4085 = vmatmul.mubr.msk.bf16.gmra.mrb[56].mxu0 %vm554_vm0, %v134_v24 }
  0xb5   :  { %4165 = vmatmul.mubr.msk.bf16.gmra.mrb[56].mxu1 %vm554_vm0, %v134_v24  ;;  %4086 = vmatprep.mubr.msk.bf16.mxu0 %vm554_vm0, %v136_v7  ;;  %v5652_v24 = vpop.xlane.xlu0 %3157 }
  0xb6   :  { %4166 = vmatprep.mubr.msk.bf16.mxu1 %vm554_vm0, %v136_v7  ;;  %2876 = vadd.xlane.f32.xlu0 %v2875_v51  ;;  %v5687_v13 = vpop.xlane.xlu1 %3166 }
  0xb7   :  { %3052 = vadd.xlane.f32.xlu1 %v3051_v57 }
  0xb9   :  { %v5661_v2 = vpop.xlane.xlu0 %3160 }
  0xbc   :  { %4087 = vmatmul.mubr.msk.bf16.gmra.mrb[60].mxu0 %vm554_vm0, %v136_v7 }
  0xbd   :  { %4167 = vmatmul.mubr.msk.bf16.gmra.mrb[60].mxu1 %vm554_vm0, %v136_v7  ;;  %4088 = vmatprep.mubr.msk.bf16.mxu0 %vm554_vm0, %v4956_v36  ;;  %v5673_v7 = vpop.xlane.xlu0 %3163 }
  0xbe   :  { %4168 = vmatprep.mubr.msk.bf16.mxu1 %vm554_vm0, %v4956_v36 }
  0xc4   :  { %4089 = vmatmul.mubr.msk.bf16.gmra.mrb[64].mxu0 %vm554_vm0, %v4956_v36 }
  0xc5   :  { %4169 = vmatmul.mubr.msk.bf16.gmra.mrb[64].mxu1 %vm554_vm0, %v4956_v36  ;;  %4090 = vmatprep.mubr.msk.bf16.mxu0 %vm554_vm0, %v4961_v37  ;;  %v5685_v36 = vpop.xlane.xlu0 %2974 }
  0xc6   :  { %4170 = vmatprep.mubr.msk.bf16.mxu1 %vm554_vm0, %v4961_v37 }
  0xc9   :  { %v5691_v61 = vpop.xlane.xlu0 %3169 }
  0xcc   :  { %4091 = vmatmul.mubr.msk.bf16.gmra.mrb[68].mxu0 %vm554_vm0, %v4961_v37 }
  0xcd   :  { %4171 = vmatmul.mubr.msk.bf16.gmra.mrb[68].mxu1 %vm554_vm0, %v4961_v37  ;;  %4092 = vmatprep.mubr.msk.bf16.mxu0 %vm554_vm0, %v5031_v1  ;;  %v5697_v37 = vpop.xlane.xlu1 %2977  ;;  %v5701_v52 = vpop.xlane.xlu0 %2980 }
  0xce   :  { %4172 = vmatprep.mubr.msk.bf16.mxu1 %vm554_vm0, %v5031_v1  ;;  %6780 = vst [vmem:[#allocation18_spill] sm:$0xff] %v5701_v52 }
  0xd1   :  { %v5703_v10 = vpop.xlane.xlu1 %3172 }
  0xd2   :  { %6781 = vst [vmem:[#allocation19_spill] sm:$0xff] %v5703_v10 }
  0xd4   :  { %4093 = vmatmul.mubr.msk.bf16.gmra.mrb[72].mxu0 %vm554_vm0, %v5031_v1 }
  0xd5   :  { %4173 = vmatmul.mubr.msk.bf16.gmra.mrb[72].mxu1 %vm554_vm0, %v5031_v1  ;;  %4094 = vmatprep.mubr.msk.bf16.mxu0 %vm554_vm0, %v5081_v21  ;;  %v5713_v1 = vpop.xlane.xlu0 %3175  ;;  %v5715_v30 = vpop.xlane.xlu1 %2983 }
  0xd6   :  { %4174 = vmatprep.mubr.msk.bf16.mxu1 %vm554_vm0, %v5081_v21  ;;  %6782 = vst [vmem:[#allocation20_spill] sm:$0xff] %v5713_v1  ;;  %6783 = vst [vmem:[#allocation21_spill] sm:$0xff] %v5715_v30 }
  0xd9   :  { %v5727_v42 = vpop.xlane.xlu1 %3178 }
  0xda   :  { %6785 = vst [vmem:[#allocation23_spill] sm:$0xff] %v5727_v42 }
  0xdc   :  { %4095 = vmatmul.mubr.msk.bf16.gmra.mrb[76].mxu0 %vm554_vm0, %v5081_v21 }
  0xdd   :  { %4175 = vmatmul.mubr.msk.bf16.gmra.mrb[76].mxu1 %vm554_vm0, %v5081_v21  ;;  %4096 = vmatprep.mubr.msk.bf16.mxu0 %vm554_vm0, %v5125_v48  ;;  %v5725_v21 = vpop.xlane.xlu0 %2986 }
  0xde   :  { %4176 = vmatprep.mubr.msk.bf16.mxu1 %vm554_vm0, %v5125_v48  ;;  %6784 = vst [vmem:[#allocation22_spill] sm:$0xff] %v5725_v21 }
  0xe1   :  { %v5731_v12 = vpop.xlane.xlu0 %3181 }
  0xe2   :  { %6786 = vst [vmem:[#allocation24_spill] sm:$0xff] %v5731_v12 }
  0xe4   :  { %4097 = vmatmul.mubr.msk.bf16.gmra.mrb[80].mxu0 %vm554_vm0, %v5125_v48 }
  0xe5   :  { %4177 = vmatmul.mubr.msk.bf16.gmra.mrb[80].mxu1 %vm554_vm0, %v5125_v48  ;;  %4098 = vmatprep.mubr.msk.bf16.mxu0 %vm554_vm0, %v5167_v6  ;;  %v5737_v48 = vpop.xlane.xlu1 %2989  ;;  %v5741_v29 = vpop.xlane.xlu0 %2992 }
  0xe6   :  { %4178 = vmatprep.mubr.msk.bf16.mxu1 %vm554_vm0, %v5167_v6  ;;  %6787 = vst [vmem:[#allocation25_spill] sm:$0xff] %v5737_v48  ;;  %6788 = vst [vmem:[#allocation26_spill] sm:$0xff] %v5741_v29 }
  0xe9   :  { %v5743_v51 = vpop.xlane.xlu1 %3184 }
  0xea   :  { %6789 = vst [vmem:[#allocation27_spill] sm:$0xff] %v5743_v51 }
  0xec   :  { %4099 = vmatmul.mubr.msk.bf16.gmra.mrb[84].mxu0 %vm554_vm0, %v5167_v6 }
  0xed   :  { %4179 = vmatmul.mubr.msk.bf16.gmra.mrb[84].mxu1 %vm554_vm0, %v5167_v6  ;;  %4100 = vmatprep.mubr.msk.bf16.mxu0 %vm554_vm0, %v5209_v25  ;;  %v5753_v6 = vpop.xlane.xlu0 %2995  ;;  %v5755_v57 = vpop.xlane.xlu1 %3187 }
  0xee   :  { %4180 = vmatprep.mubr.msk.bf16.mxu1 %vm554_vm0, %v5209_v25  ;;  %6790 = vst [vmem:[#allocation28_spill] sm:$0xff] %v5753_v6  ;;  %6791 = vst [vmem:[#allocation29_spill] sm:$0xff] %v5755_v57 }
  0xf1   :  { %v5767_v3 = vpop.xlane.xlu1 %3190 }
  0xf2   :  { %6793 = vst [vmem:[#allocation31_spill] sm:$0xff] %v5767_v3 }
  0xf4   :  { %4101 = vmatmul.mubr.msk.bf16.gmra.mrb[88].mxu0 %vm554_vm0, %v5209_v25 }
  0xf5   :  { %4181 = vmatmul.mubr.msk.bf16.gmra.mrb[88].mxu1 %vm554_vm0, %v5209_v25  ;;  %4102 = vmatprep.mubr.msk.bf16.mxu0 %vm554_vm0, %v5251_v56  ;;  %v5765_v25 = vpop.xlane.xlu0 %2998 }
  0xf6   :  { %4182 = vmatprep.mubr.msk.bf16.mxu1 %vm554_vm0, %v5251_v56  ;;  %6792 = vst [vmem:[#allocation30_spill] sm:$0xff] %v5765_v25 }
  0xf9   :  { %v5771_v57 = vpop.xlane.xlu0 %3001 }
  0xfa   :  { %6794 = vst [vmem:[#allocation32_spill] sm:$0xff] %v5771_v57 }
  0xfc   :  { %4103 = vmatmul.mubr.msk.bf16.gmra.mrb[92].mxu0 %vm554_vm0, %v5251_v56 }
  0xfd   :  { %4183 = vmatmul.mubr.msk.bf16.gmra.mrb[92].mxu1 %vm554_vm0, %v5251_v56  ;;  %4104 = vmatprep.mubr.msk.bf16.mxu0 %vm554_vm0, %v5295_v44  ;;  %v5777_v56 = vpop.xlane.xlu1 %3193  ;;  %v5781_v6 = vpop.xlane.xlu0 %3004 }
  0xfe   :  { %4184 = vmatprep.mubr.msk.bf16.mxu1 %vm554_vm0, %v5295_v44  ;;  %6795 = vst [vmem:[#allocation33_spill] sm:$0xff] %v5777_v56  ;;  %6796 = vst [vmem:[#allocation34_spill] sm:$0xff] %v5781_v6 }
 0x101   :  { %v5783_v25 = vpop.xlane.xlu1 %3196 }
 0x102   :  { %6797 = vst [vmem:[#allocation35_spill] sm:$0xff] %v5783_v25 }
 0x104   :  { %4105 = vmatmul.mubr.msk.bf16.gmra.mrb[96].mxu0 %vm554_vm0, %v5295_v44 }
 0x105   :  { %4185 = vmatmul.mubr.msk.bf16.gmra.mrb[96].mxu1 %vm554_vm0, %v5295_v44  ;;  %4106 = vmatprep.mubr.msk.bf16.mxu0 %vm554_vm0, %v5337_v38  ;;  %v5793_v44 = vpop.xlane.xlu0 %3007  ;;  %v5795_v56 = vpop.xlane.xlu1 %3199 }
 0x106   :  { %4186 = vmatprep.mubr.msk.bf16.mxu1 %vm554_vm0, %v5337_v38  ;;  %6798 = vst [vmem:[#allocation36_spill] sm:$0xff] %v5793_v44  ;;  %6799 = vst [vmem:[#allocation37_spill] sm:$0xff] %v5795_v56 }
 0x109   :  { %v5807_v6 = vpop.xlane.xlu1 %3202 }
 0x10a   :  { %6801 = vst [vmem:[#allocation39_spill] sm:$0xff] %v5807_v6 }
 0x10c   :  { %4107 = vmatmul.mubr.msk.bf16.gmra.mrb[100].mxu0 %vm554_vm0, %v5337_v38 }
 0x10d   :  { %4187 = vmatmul.mubr.msk.bf16.gmra.mrb[100].mxu1 %vm554_vm0, %v5337_v38  ;;  %4108 = vmatprep.mubr.msk.bf16.mxu0 %vm554_vm0, %v5394_v53  ;;  %v5805_v38 = vpop.xlane.xlu0 %3010 }
 0x10e   :  { %4188 = vmatprep.mubr.msk.bf16.mxu1 %vm554_vm0, %v5394_v53  ;;  %6800 = vst [vmem:[#allocation38_spill] sm:$0xff] %v5805_v38 }
 0x114   :  { %4109 = vmatmul.mubr.msk.bf16.gmra.mrb[104].mxu0 %vm554_vm0, %v5394_v53 }
 0x115   :  { %4189 = vmatmul.mubr.msk.bf16.gmra.mrb[104].mxu1 %vm554_vm0, %v5394_v53  ;;  %4110 = vmatprep.mubr.msk.bf16.mxu0 %vm554_vm0, %v5439_v8 }
 0x116   :  { %4190 = vmatprep.mubr.msk.bf16.mxu1 %vm554_vm0, %v5439_v8 }
 0x117   :  { %v781_v25 = vpop.f32.mrb[0].mxu0 }
 0x118   :  { %v1134_v44 = vpop.f32.mrb[0].mxu1  ;;  %v783_v57 = vpop.f32.mrb[1].mxu0 }
 0x119   :  { %v1136_v56 = vpop.f32.mrb[1].mxu1  ;;  %v785_v3 = vpop.f32.mrb[2].mxu0 }
 0x11a   :  { %v1453_v40 = vpack.c.bf16 %v785_v3, %v781_v25  ;;  %v1138_v20 = vpop.f32.mrb[2].mxu1  ;;  %v787_v51 = vpop.f32.mrb[3].mxu0 }
 0x11b   :  { %v1455_v29 = vpack.c.bf16 %v1138_v20, %v1134_v44  ;;  %v1454_v53 = vpack.c.bf16 %v787_v51, %v783_v57  ;;  %v1140_v48 = vpop.f32.mrb[3].mxu1  ;;  %v5817_v20 = vpop.xlane.xlu0 %2834 }
 0x11c   :  { %v1582_v19 = vmul.bf16 1069105081, %v1453_v40  ;;  %v1456_v49 = vpack.c.bf16 %v1140_v48, %v1136_v56  ;;  %4111 = vmatmul.mubr.msk.bf16.gmra.mrb[108].mxu0 %vm554_vm0, %v5439_v8  ;;  %6802 = vst [vmem:[#allocation40_spill] sm:$0xff] %v5817_v20  ;;  %v5819_v48 = vpop.xlane.xlu1 %2837 }
 0x11d   :  { %v1588_v55 = vmul.bf16 1069105081, %v1455_v29  ;;  %v1585_v38 = vmul.bf16 1069105081, %v1454_v53  ;;  %4191 = vmatmul.mubr.msk.bf16.gmra.mrb[108].mxu1 %vm554_vm0, %v5439_v8  ;;  %4112 = vmatprep.mubr.msk.bf16.mxu0 %vm554_vm0, %v5498_v23  ;;  %6803 = vst [vmem:[#allocation41_spill] sm:$0xff] %v5819_v48 }
 0x11e   :  { %4315 = vpow.bf16 %v1582_v19  ;;  %v1591_v3 = vmul.bf16 1069105081, %v1456_v49  ;;  %4192 = vmatprep.mubr.msk.bf16.mxu1 %vm554_vm0, %v5498_v23 }
 0x11f   :  { %4317 = vpow.bf16 %v1588_v55  ;;  %v791_v40 = vpop.f32.mrb[4].mxu0 }
 0x120   :  { %4319 = vpow.bf16 %v1585_v38  ;;  %v1144_v29 = vpop.f32.mrb[4].mxu1  ;;  %v793_v51 = vpop.f32.mrb[5].mxu0 }
 0x121   :  { %4321 = vpow.bf16 %v1591_v3  ;;  %v1146_v57 = vpop.f32.mrb[5].mxu1  ;;  %v795_v8 = vpop.f32.mrb[6].mxu0 }
 0x122   :  { %v1457_v25 = vpack.c.bf16 %v795_v8, %v791_v40  ;;  %v1148_v56 = vpop.f32.mrb[6].mxu1  ;;  %v797_v44 = vpop.f32.mrb[7].mxu0 }
 0x123   :  { %v1459_v19 = vpack.c.bf16 %v1148_v56, %v1144_v29  ;;  %v1458_v49 = vpack.c.bf16 %v797_v44, %v793_v51  ;;  %v1150_v53 = vpop.f32.mrb[7].mxu1  ;;  %v5829_v3 = vpop.xlane.xlu0 %3013 }
 0x124   :  { %v1594_v6 = vmul.bf16 1069105081, %v1457_v25  ;;  %v1460_v18 = vpack.c.bf16 %v1150_v53, %v1146_v57  ;;  %4113 = vmatmul.mubr.msk.bf16.gmra.mrb[112].mxu0 %vm554_vm0, %v5498_v23  ;;  %6804 = vst [vmem:[#allocation42_spill] sm:$0xff] %v5829_v3  ;;  %v5831_v29 = vpop.xlane.xlu1 %3205 }
 0x125   :  { %v1600_v55 = vmul.bf16 1069105081, %v1459_v19  ;;  %v1597_v20 = vmul.bf16 1069105081, %v1458_v49  ;;  %4193 = vmatmul.mubr.msk.bf16.gmra.mrb[112].mxu1 %vm554_vm0, %v5498_v23  ;;  %4114 = vmatprep.mubr.msk.bf16.mxu0 %vm554_vm0, %v5541_v4  ;;  %6805 = vst [vmem:[#allocation43_spill] sm:$0xff] %v5831_v29 }
 0x126   :  { %4323 = vpow.bf16 %v1594_v6  ;;  %v1603_v38 = vmul.bf16 1069105081, %v1460_v18  ;;  %4194 = vmatprep.mubr.msk.bf16.mxu1 %vm554_vm0, %v5541_v4 }
 0x127   :  { %4325 = vpow.bf16 %v1600_v55  ;;  %v801_v40 = vpop.f32.mrb[8].mxu0 }
 0x128   :  { %4327 = vpow.bf16 %v1597_v20  ;;  %v1154_v51 = vpop.f32.mrb[8].mxu1  ;;  %v803_v57 = vpop.f32.mrb[9].mxu0 }
 0x129   :  { %v4316_v8 = vpop.eup %4315  ;;  %v1156_v25 = vpop.f32.mrb[9].mxu1  ;;  %4329 = vpow.bf16 %v1603_v38 }
 0x12a   :  { %v805_v23 = vpop.f32.mrb[10].mxu0  ;;  %v4318_v56 = vpop.eup %4317  ;;  %v2029_v19 = vunpack.c.l.bf16 %v4316_v8  ;;  %v2033_v49 = vunpack.c.h.bf16 %v4316_v8 }
 0x12b   :  { %v1461_v44 = vpack.c.bf16 %v805_v23, %v801_v40  ;;  %v1158_v6 = vpop.f32.mrb[10].mxu1  ;;  %v807_v18 = vpop.f32.mrb[11].mxu0  ;;  %v2031_v38 = vunpack.c.l.bf16 %v4318_v56  ;;  %v2035_v40 = vunpack.c.h.bf16 %v4318_v56 }
 0x12c   :  { %v4320_v53 = vpop.eup %4319  ;;  %v1463_v48 = vpack.c.bf16 %v1158_v6, %v1154_v51  ;;  %v1462_v3 = vpack.c.bf16 %v807_v18, %v803_v57  ;;  %v1160_v55 = vpop.f32.mrb[11].mxu1  ;;  %4115 = vmatmul.mubr.msk.bf16.gmra.mrb[116].mxu0 %vm554_vm0, %v5541_v4 }
 0x12d   :  { %v4322_v12 = vpop.eup %4321  ;;  %v1606_v42 = vmul.bf16 1069105081, %v1461_v44  ;;  %v1464_v29 = vpack.c.bf16 %v1160_v55, %v1156_v25  ;;  %v2030_v20 = vunpack.c.l.bf16 %v4320_v53  ;;  %v2034_v21 = vunpack.c.h.bf16 %v4320_v53  ;;  %4195 = vmatmul.mubr.msk.bf16.gmra.mrb[116].mxu1 %vm554_vm0, %v5541_v4  ;;  %4116 = vmatprep.mubr.msk.bf16.mxu0 %vm554_vm0, %v5590_v14  ;;  %v5848_v23 = vpop.xlane.xlu1 %3016 }
 0x12e   :  { %v1612_v47 = vmul.bf16 1069105081, %v1463_v48  ;;  %v1609_v45 = vmul.bf16 1069105081, %v1462_v3  ;;  %4196 = vmatprep.mubr.msk.bf16.mxu1 %vm554_vm0, %v5590_v14  ;;  %v5844_v48 = vld [vmem:[%s6746_s1 + $0xf8] sm:$0xff]   ;;  %v5846_v3 = vpop.xlane.xlu0 %2840  ;;  %v2032_v25 = vunpack.c.l.bf16 %v4322_v12  ;;  %6807 = vst [vmem:[#allocation45_spill] sm:$0xff] %v5848_v23  ;;  %v2036_v44 = vunpack.c.h.bf16 %v4322_v12 }
 0x12f   :  { %4331 = vpow.bf16 %v1606_v42  ;;  %v1615_v51 = vmul.bf16 1069105081, %v1464_v29  ;;  %v2285_v57 = vadd.f32 %v2030_v20, %v2029_v19  ;;  %v2290_v8 = vadd.f32 %v2034_v21, %v2033_v49  ;;  %6806 = vst [vmem:[#allocation44_spill] sm:$0xff] %v5846_v3  ;;  %v811_v4 = vpop.f32.mrb[12].mxu0 }
 0x130   :  { %4333 = vpow.bf16 %v1612_v47  ;;  %v1164_v42 = vpop.f32.mrb[12].mxu1  ;;  %v813_v29 = vpop.f32.mrb[13].mxu0 }
 0x131   :  { %4335 = vpow.bf16 %v1609_v45  ;;  %v2286_v56 = vadd.f32 %v2285_v57, %v2031_v38  ;;  %v2291_v6 = vadd.f32 %v2290_v8, %v2035_v40  ;;  %v4324_v18 = vpop.eup %4323  ;;  %v1166_v21 = vpop.f32.mrb[13].mxu1 }
 0x132   :  { %4337 = vpow.bf16 %v1615_v51  ;;  %v815_v19 = vpop.f32.mrb[14].mxu0  ;;  %v4326_v49 = vpop.eup %4325  ;;  %v2037_v41 = vunpack.c.l.bf16 %v4324_v18  ;;  %v2041_v1 = vunpack.c.h.bf16 %v4324_v18 }
 0x133   :  { %v1465_v53 = vpack.c.bf16 %v815_v19, %v811_v4  ;;  %v1168_v55 = vpop.f32.mrb[14].mxu1  ;;  %v817_v20 = vpop.f32.mrb[15].mxu0  ;;  %v2287_v3 = vadd.f32 %v2286_v56, %v2032_v25  ;;  %v2292_v47 = vadd.f32 %v2291_v6, %v2036_v44 }
 0x134   :  { %v4328_v39 = vpop.eup %4327  ;;  %v1467_v30 = vpack.c.bf16 %v1168_v55, %v1164_v42  ;;  %v1466_v23 = vpack.c.bf16 %v817_v20, %v813_v29  ;;  %v1170_v45 = vpop.f32.mrb[15].mxu1  ;;  %4117 = vmatmul.mubr.msk.bf16.gmra.mrb[120].mxu0 %vm554_vm0, %v5590_v14  ;;  %v2043_v29 = vunpack.c.h.bf16 %v4326_v49 }
 0x135   :  { %v1618_v10 = vmul.bf16 1069105081, %v1465_v53  ;;  %v1468_v38 = vpack.c.bf16 %v1170_v45, %v1166_v21  ;;  %2288 = vadd.xlane.f32.xlu0 %v2287_v3  ;;  %v2038_v12 = vunpack.c.l.bf16 %v4328_v39  ;;  %v2042_v40 = vunpack.c.h.bf16 %v4328_v39  ;;  %v4330_v51 = vpop.eup %4329  ;;  %4197 = vmatmul.mubr.msk.bf16.gmra.mrb[120].mxu1 %vm554_vm0, %v5590_v14  ;;  %v5858_v42 = vpop.xlane.xlu0 %3208 }
 0x136   :  { %v1624_v57 = vmul.bf16 1069105081, %v1467_v30  ;;  %v1621_v8 = vmul.bf16 1069105081, %v1466_v23  ;;  %4118 = vmatprep.mubr.msk.bf16.mxu0 %vm554_vm0, %v5844_v48  ;;  %4198 = vmatprep.mubr.msk.bf16.mxu1 %vm554_vm0, %v5844_v48  ;;  %v2039_v3 = vunpack.c.l.bf16 %v4326_v49  ;;  %6808 = vst [vmem:[#allocation46_spill] sm:$0xff] %v5858_v42  ;;  %v5860_v23 = vpop.xlane.xlu1 %2843  ;;  %v2040_v44 = vunpack.c.l.bf16 %v4330_v51 }
 0x137   :  { %4339 = vpow.bf16 %v1618_v10  ;;  %v1627_v4 = vmul.bf16 1069105081, %v1468_v38  ;;  %v2295_v25 = vadd.f32 %v2038_v12, %v2037_v41  ;;  %v821_v39 = vpop.f32.mrb[16].mxu0  ;;  %v2300_v30 = vadd.f32 %v2042_v40, %v2041_v1  ;;  %6809 = vst [vmem:[#allocation47_spill] sm:$0xff] %v5860_v23 }
 0x138   :  { %4341 = vpow.bf16 %v1624_v57  ;;  %v1174_v14 = vpop.f32.mrb[16].mxu1  ;;  %v823_v56 = vpop.f32.mrb[17].mxu0  ;;  %v2044_v19 = vunpack.c.h.bf16 %v4330_v51 }
 0x139   :  { %4343 = vpow.bf16 %v1621_v8  ;;  %2293 = vadd.xlane.f32.xlu0 %v2292_v47  ;;  %v2296_v10 = vadd.f32 %v2295_v25, %v2039_v3  ;;  %v1176_v18 = vpop.f32.mrb[17].mxu1  ;;  %v825_v21 = vpop.f32.mrb[18].mxu0  ;;  %v2301_v53 = vadd.f32 %v2300_v30, %v2043_v29 }
 0x13a   :  { %v4332_v6 = vpop.eup %4331  ;;  %4345 = vpow.bf16 %v1627_v4  ;;  %v1469_v55 = vpack.c.bf16 %v825_v21, %v821_v39  ;;  %v1178_v20 = vpop.f32.mrb[18].mxu1 }
 0x13b   :  { %v4334_v41 = vpop.eup %4333  ;;  %v827_v45 = vpop.f32.mrb[19].mxu0  ;;  %v2297_v49 = vadd.f32 %v2296_v10, %v2040_v44  ;;  %v2049_v1 = vunpack.c.h.bf16 %v4332_v6  ;;  %v1471_v12 = vpack.c.bf16 %v1178_v20, %v1174_v14  ;;  %v2302_v47 = vadd.f32 %v2301_v53, %v2044_v19 }
 0x13c   :  { %v4336_v38 = vpop.eup %4335  ;;  %v1470_v40 = vpack.c.bf16 %v827_v45, %v823_v56  ;;  %v1180_v57 = vpop.f32.mrb[19].mxu1  ;;  %v2045_v8 = vunpack.c.l.bf16 %v4332_v6  ;;  %v1630_v3 = vmul.bf16 1069105081, %v1469_v55  ;;  %4119 = vmatmul.mubr.msk.bf16.gmra.mrb[124].mxu0 %vm554_vm0, %v5844_v48  ;;  %v2051_v14 = vunpack.c.h.bf16 %v4334_v41 }
 0x13d   :  { %v5862_v23 = vpop.eup %4337  ;;  %v1472_v25 = vpack.c.bf16 %v1180_v57, %v1176_v18  ;;  %2298 = vadd.xlane.f32.xlu1 %v2297_v49  ;;  %v2050_v51 = vunpack.c.h.bf16 %v4336_v38  ;;  %v2046_v4 = vunpack.c.l.bf16 %v4336_v38  ;;  %v1636_v39 = vmul.bf16 1069105081, %v1471_v12  ;;  %4199 = vmatmul.mubr.msk.bf16.gmra.mrb[124].mxu1 %vm554_vm0, %v5844_v48  ;;  %v5868_v44 = vpop.xlane.xlu0 %3019 }
 0x13e   :  { %v1633_v29 = vmul.bf16 1069105081, %v1470_v40  ;;  %4347 = vpow.bf16 %v1630_v3  ;;  %6810 = vst [vmem:[#allocation48_spill] sm:$0xff] %v5868_v44  ;;  %v2047_v6 = vunpack.c.l.bf16 %v4334_v41  ;;  %v5872_v21 = vpop.xlane.xlu1 %3211  ;;  %v2052_v48 = vunpack.c.h.bf16 %v5862_v23 }
 0x13f   :  { %v1639_v30 = vmul.bf16 1069105081, %v1472_v25  ;;  %v2310_v56 = vadd.f32 %v2050_v51, %v2049_v1  ;;  %4349 = vpow.bf16 %v1636_v39  ;;  %v5870_v10 = vpop.f32.mrb[20].mxu0  ;;  %v2305_v18 = vadd.f32 %v2046_v4, %v2045_v8  ;;  %6811 = vst [vmem:[#allocation49_spill] sm:$0xff] %v5872_v21 }
 0x140   :  { %4351 = vpow.bf16 %v1633_v29  ;;  %v5874_v19 = vpop.f32.mrb[20].mxu1  ;;  %v5876_v53 = vpop.f32.mrb[21].mxu0  ;;  %v2048_v41 = vunpack.c.l.bf16 %v5862_v23  ;;  %v4829_v3 = vmov 0.0  }
 0x141   :  { %2303 = vadd.xlane.f32.xlu1 %v2302_v47  ;;  %v2311_v55 = vadd.f32 %v2310_v56, %v2051_v14  ;;  %v5881_v45 = vpop.f32.mrb[21].mxu1  ;;  %v5883_v49 = vpop.f32.mrb[22].mxu0  ;;  %v5886_v1 = vadd.f32 %v2305_v18, %v2047_v6  ;;  %4353 = vpow.bf16 %v1639_v30  ;;  %42 = vst.msk [vmem:[#allocation2] sm:$0xff] %vm41_vm1, %v4829_v3  ;;  %43 = vst.msk [vmem:[#allocation2 + $0x8] sm:$0xff] %vm41_vm1, %v4829_v3 }
 0x142   :  { %v5879_v20 = vpop.eup %4339  ;;  %v1473_v12 = vpack.c.bf16 %v5883_v49, %v5870_v10  ;;  %v5892_v40 = vpop.f32.mrb[22].mxu1  ;;  %44 = vst.msk [vmem:[#allocation2 + $0x10] sm:$0xff] %vm41_vm1, %v4829_v3  ;;  %45 = vst.msk [vmem:[#allocation2 + $0x18] sm:$0xff] %vm41_vm1, %v4829_v3 }
 0x143   :  { %v5888_v38 = vpop.eup %4341  ;;  %v5894_v57 = vpop.f32.mrb[23].mxu0  ;;  %v5896_v47 = vadd.f32 %v2311_v55, %v2052_v48  ;;  %v2057_v8 = vunpack.c.h.bf16 %v5879_v20  ;;  %46 = vst.msk [vmem:[#allocation2 + $0x20] sm:$0xff] %vm41_vm1, %v4829_v3  ;;  %47 = vst.msk [vmem:[#allocation2 + $0x28] sm:$0xff] %vm41_vm1, %v4829_v3  ;;  %v1475_v51 = vpack.c.bf16 %v5892_v40, %v5874_v19  ;;  %v2307_v29 = vadd.f32 %v5886_v1, %v2048_v41 }
 0x144   :  { %48 = vst.msk [vmem:[#allocation2 + $0x30] sm:$0xff] %vm41_vm1, %v4829_v3  ;;  %49 = vst.msk [vmem:[#allocation2 + $0x38] sm:$0xff] %vm41_vm1, %v4829_v3  ;;  %v4344_v25 = vpop.eup %4343  ;;  %v1474_v4 = vpack.c.bf16 %v5894_v57, %v5876_v53  ;;  %v1190_v39 = vpop.f32.mrb[23].mxu1  ;;  %v2053_v30 = vunpack.c.l.bf16 %v5879_v20  ;;  %v1642_v14 = vmul.bf16 1069105081, %v1473_v12  ;;  %v2059_v55 = vunpack.c.h.bf16 %v5888_v38 }
 0x145   :  { %50 = vst.msk [vmem:[#allocation2 + $0x40] sm:$0xff] %vm41_vm1, %v4829_v3  ;;  %51 = vst.msk [vmem:[#allocation2 + $0x48] sm:$0xff] %vm41_vm1, %v4829_v3  ;;  %v1476_v56 = vpack.c.bf16 %v1190_v39, %v5881_v45  ;;  %2313 = vadd.xlane.f32.xlu1 %v5896_v47  ;;  %v2058_v6 = vunpack.c.h.bf16 %v4344_v25  ;;  %v2054_v18 = vunpack.c.l.bf16 %v4344_v25  ;;  %v4346_v19 = vpop.eup %4345  ;;  %v1648_v48 = vmul.bf16 1069105081, %v1475_v51  ;;  %2308 = vadd.xlane.f32.xlu0 %v2307_v29  ;;  %v6043_v1 = vpop.xlane.xlu0 %2846 }
 0x146   :  { %52 = vst.msk [vmem:[#allocation2 + $0x50] sm:$0xff] %vm41_vm1, %v4829_v3  ;;  %53 = vst.msk [vmem:[#allocation2 + $0x58] sm:$0xff] %vm41_vm1, %v4829_v3  ;;  %v1645_v53 = vmul.bf16 1069105081, %v1474_v4  ;;  %4355 = vpow.bf16 %v1642_v14  ;;  %v2055_v45 = vunpack.c.l.bf16 %v5888_v38  ;;  %v6046_v12 = vpop.xlane.xlu1 %3022  ;;  %v2060_v47 = vunpack.c.h.bf16 %v4346_v19 }
 0x147   :  { %54 = vst.msk [vmem:[#allocation2 + $0x60] sm:$0xff] %vm41_vm1, %v4829_v3  ;;  %55 = vst.msk [vmem:[#allocation2 + $0x68] sm:$0xff] %vm41_vm1, %v4829_v3  ;;  %v1651_v23 = vmul.bf16 1069105081, %v1476_v56  ;;  %v2320_v41 = vadd.f32 %v2058_v6, %v2057_v8  ;;  %4357 = vpow.bf16 %v1648_v48  ;;  %v841_v10 = vpop.f32.mrb[24].mxu0  ;;  %v2315_v49 = vadd.f32 %v2054_v18, %v2053_v30 }
 0x148   :  { %56 = vst.msk [vmem:[#allocation2 + $0x70] sm:$0xff] %vm41_vm1, %v4829_v3  ;;  %57 = vst.msk [vmem:[#allocation2 + $0x78] sm:$0xff] %vm41_vm1, %v4829_v3  ;;  %4359 = vpow.bf16 %v1645_v53  ;;  %v1194_v40 = vpop.f32.mrb[24].mxu1  ;;  %v843_v57 = vpop.f32.mrb[25].mxu0  ;;  %v2056_v39 = vunpack.c.l.bf16 %v4346_v19 }
 0x149   :  { %58 = vst.msk [vmem:[#allocation2 + $0x80] sm:$0xff] %vm41_vm1, %v4829_v3  ;;  %59 = vst.msk [vmem:[#allocation2 + $0x88] sm:$0xff] %vm41_vm1, %v4829_v3  ;;  %v4348_v25 = vpop.eup %4347  ;;  %v1196_v51 = vpop.f32.mrb[25].mxu1  ;;  %v2316_v20 = vadd.f32 %v2315_v49, %v2055_v45  ;;  %4361 = vpow.bf16 %v1651_v23 }
 0x14a   :  { %60 = vst.msk [vmem:[#allocation2 + $0x90] sm:$0xff] %vm41_vm1, %v4829_v3  ;;  %61 = vst.msk [vmem:[#allocation2 + $0x98] sm:$0xff] %vm41_vm1, %v4829_v3  ;;  %v845_v4 = vpop.f32.mrb[26].mxu0  ;;  %v4350_v8 = vpop.eup %4349  ;;  %v2061_v38 = vunpack.c.l.bf16 %v4348_v25 }
 0x14b   :  { %62 = vst.msk [vmem:[#allocation2 + $0xa0] sm:$0xff] %vm41_vm1, %v4829_v3  ;;  %63 = vst.msk [vmem:[#allocation2 + $0xa8] sm:$0xff] %vm41_vm1, %v4829_v3  ;;  %v1477_v29 = vpack.c.bf16 %v845_v4, %v841_v10  ;;  %v1198_v14 = vpop.f32.mrb[26].mxu1  ;;  %v847_v56 = vpop.f32.mrb[27].mxu0  ;;  %v2063_v10 = vunpack.c.l.bf16 %v4350_v8 }
 0x14c   :  { %64 = vst.msk [vmem:[#allocation2 + $0xb0] sm:$0xff] %vm41_vm1, %v4829_v3  ;;  %65 = vst.msk [vmem:[#allocation2 + $0xb8] sm:$0xff] %vm41_vm1, %v4829_v3  ;;  %v4352_v30 = vpop.eup %4351  ;;  %v1479_v18 = vpack.c.bf16 %v1198_v14, %v1194_v40  ;;  %v1478_v48 = vpack.c.bf16 %v847_v56, %v843_v57  ;;  %v1200_v53 = vpop.f32.mrb[27].mxu1  ;;  %v2067_v57 = vunpack.c.h.bf16 %v4350_v8 }
 0x14d   :  { %66 = vst.msk [vmem:[#allocation2 + $0xc0] sm:$0xff] %vm41_vm1, %v4829_v3  ;;  %67 = vst.msk [vmem:[#allocation2 + $0xc8] sm:$0xff] %vm41_vm1, %v4829_v3  ;;  %v1654_v21 = vmul.bf16 1069105081, %v1477_v29  ;;  %v2066_v44 = vunpack.c.h.bf16 %v4352_v30  ;;  %v4354_v19 = vpop.eup %4353 }
 0x14e   :  { %68 = vst.msk [vmem:[#allocation2 + $0xd0] sm:$0xff] %vm41_vm1, %v4829_v3  ;;  %69 = vst.msk [vmem:[#allocation2 + $0xd8] sm:$0xff] %vm41_vm1, %v4829_v3  ;;  %v1660_v45 = vmul.bf16 1069105081, %v1479_v18  ;;  %v1657_v49 = vmul.bf16 1069105081, %v1478_v48 }
 0x14f   :  { %70 = vst.msk [vmem:[#allocation2 + $0xe0] sm:$0xff] %vm41_vm1, %v4829_v3  ;;  %71 = vst.msk [vmem:[#allocation2 + $0xe8] sm:$0xff] %vm41_vm1, %v4829_v3  ;;  %4363 = vpow.bf16 %v1654_v21  ;;  %v851_v40 = vpop.f32.mrb[28].mxu0  ;;  %v2068_v21 = vunpack.c.h.bf16 %v4354_v19 }
 0x150   :  { %72 = vst.msk [vmem:[#allocation2 + $0xf0] sm:$0xff] %vm41_vm1, %v4829_v3  ;;  %73 = vst.msk [vmem:[#allocation2 + $0xf8] sm:$0xff] %vm41_vm1, %v4829_v3  ;;  %4365 = vpow.bf16 %v1660_v45 }
 0x151   :  { %74 = vst.msk [vmem:[#allocation2 + $0x100] sm:$0xff] %vm41_vm1, %v4829_v3  ;;  %75 = vst.msk [vmem:[#allocation2 + $0x108] sm:$0xff] %vm41_vm1, %v4829_v3  ;;  %4367 = vpow.bf16 %v1657_v49  ;;  %v4356_v14 = vpop.eup %4355 }
 0x152   :  { %76 = vst.msk [vmem:[#allocation2 + $0x110] sm:$0xff] %vm41_vm1, %v4829_v3  ;;  %77 = vst.msk [vmem:[#allocation2 + $0x118] sm:$0xff] %vm41_vm1, %v4829_v3  ;;  %v2069_v8 = vunpack.c.l.bf16 %v4356_v14  ;;  %v2073_v49 = vunpack.c.h.bf16 %v4356_v14 }
 0x153   :  { %78 = vst.msk [vmem:[#allocation2 + $0x120] sm:$0xff] %vm41_vm1, %v4829_v3  ;;  %79 = vst.msk [vmem:[#allocation2 + $0x128] sm:$0xff] %vm41_vm1, %v4829_v3 }
 0x154   :  { %80 = vst.msk [vmem:[#allocation2 + $0x130] sm:$0xff] %vm41_vm1, %v4829_v3  ;;  %81 = vst.msk [vmem:[#allocation2 + $0x138] sm:$0xff] %vm41_vm1, %v4829_v3 }
 0x155   :  { %82 = vst.msk [vmem:[#allocation2 + $0x140] sm:$0xff] %vm41_vm1, %v4829_v3  ;;  %83 = vst.msk [vmem:[#allocation2 + $0x148] sm:$0xff] %vm41_vm1, %v4829_v3 }
 0x156   :  { %84 = vst.msk [vmem:[#allocation2 + $0x150] sm:$0xff] %vm41_vm1, %v4829_v3  ;;  %85 = vst.msk [vmem:[#allocation2 + $0x158] sm:$0xff] %vm41_vm1, %v4829_v3 }
 0x157   :  { %86 = vst.msk [vmem:[#allocation2 + $0x160] sm:$0xff] %vm41_vm1, %v4829_v3  ;;  %87 = vst.msk [vmem:[#allocation2 + $0x168] sm:$0xff] %vm41_vm1, %v4829_v3 }
 0x158   :  { %88 = vst.msk [vmem:[#allocation2 + $0x170] sm:$0xff] %vm41_vm1, %v4829_v3  ;;  %89 = vst.msk [vmem:[#allocation2 + $0x178] sm:$0xff] %vm41_vm1, %v4829_v3 }
 0x159   :  { %90 = vst.msk [vmem:[#allocation2 + $0x180] sm:$0xff] %vm41_vm1, %v4829_v3  ;;  %91 = vst.msk [vmem:[#allocation2 + $0x188] sm:$0xff] %vm41_vm1, %v4829_v3 }
 0x15a   :  { %92 = vst.msk [vmem:[#allocation2 + $0x190] sm:$0xff] %vm41_vm1, %v4829_v3  ;;  %93 = vst.msk [vmem:[#allocation2 + $0x198] sm:$0xff] %vm41_vm1, %v4829_v3 }
 0x15b   :  { %94 = vst.msk [vmem:[#allocation2 + $0x1a0] sm:$0xff] %vm41_vm1, %v4829_v3  ;;  %95 = vst.msk [vmem:[#allocation2 + $0x1a8] sm:$0xff] %vm41_vm1, %v4829_v3 }
 0x15c   :  { %96 = vst.msk [vmem:[#allocation2 + $0x1b0] sm:$0xff] %vm41_vm1, %v4829_v3  ;;  %97 = vst.msk [vmem:[#allocation2 + $0x1b8] sm:$0xff] %vm41_vm1, %v4829_v3 }
 0x15d   :  { %98 = vst.msk [vmem:[#allocation2 + $0x1c0] sm:$0xff] %vm41_vm1, %v4829_v3  ;;  %99 = vst.msk [vmem:[#allocation2 + $0x1c8] sm:$0xff] %vm41_vm1, %v4829_v3 }
 0x15e   :  { %100 = vst.msk [vmem:[#allocation2 + $0x1d0] sm:$0xff] %vm41_vm1, %v4829_v3  ;;  %101 = vst.msk [vmem:[#allocation2 + $0x1d8] sm:$0xff] %vm41_vm1, %v4829_v3 }
 0x15f   :  { %102 = vst.msk [vmem:[#allocation2 + $0x1e0] sm:$0xff] %vm41_vm1, %v4829_v3  ;;  %103 = vst.msk [vmem:[#allocation2 + $0x1e8] sm:$0xff] %vm41_vm1, %v4829_v3 }
 0x160   :  { %104 = vst.msk [vmem:[#allocation2 + $0x1f0] sm:$0xff] %vm41_vm1, %v4829_v3  ;;  %105 = vst.msk [vmem:[#allocation2 + $0x1f8] sm:$0xff] %vm41_vm1, %v4829_v3  ;;  %v2321_v3 = vadd.f32 %v2320_v41, %v2059_v55  ;;  %v1480_v55 = vpack.c.bf16 %v1200_v53, %v1196_v51  ;;  %v2062_v41 = vunpack.c.l.bf16 %v4352_v30  ;;  %v1204_v51 = vpop.f32.mrb[28].mxu1  ;;  %v4358_v30 = vpop.eup %4357 }
 0x161   :  { %6812 = vst [vmem:[#allocation50_spill] sm:$0xff] %v6043_v1  ;;  %6813 = vst [vmem:[#allocation51_spill] sm:$0xff] %v6046_v12  ;;  %v2317_v1 = vadd.f32 %v2316_v20, %v2056_v39  ;;  %v2065_v12 = vunpack.c.h.bf16 %v4348_v25  ;;  %v6050_v25 = vpop.xlane.xlu1 %2849  ;;  %v853_v39 = vpop.f32.mrb[29].mxu0  ;;  %v2064_v20 = vunpack.c.l.bf16 %v4354_v19 }
 0x162   :  { %v2322_v6 = vadd.f32 %v2321_v3, %v2060_v47  ;;  %v1663_v23 = vmul.bf16 1069105081, %v1480_v55  ;;  %v2325_v47 = vadd.f32 %v2062_v41, %v2061_v38  ;;  %v6048_v3 = vpop.xlane.xlu0 %3214  ;;  %6815 = vst [vmem:[#allocation53_spill] sm:$0xff] %v6050_v25  ;;  %v1206_v56 = vpop.f32.mrb[29].mxu1 }
 0x163   :  { %2318 = vadd.xlane.f32.xlu0 %v2317_v1  ;;  %6814 = vst [vmem:[#allocation52_spill] sm:$0xff] %v6048_v3  ;;  %v2330_v4 = vadd.f32 %v2066_v44, %v2065_v12  ;;  %v855_v1 = vpop.f32.mrb[30].mxu0  ;;  %v1208_v18 = vpop.f32.mrb[30].mxu1 }
 0x164   :  { %2323 = vadd.xlane.f32.xlu1 %v2322_v6  ;;  %v2326_v29 = vadd.f32 %v2325_v47, %v2063_v10  ;;  %4369 = vpow.bf16 %v1663_v23  ;;  %v1481_v38 = vpack.c.bf16 %v855_v1, %v851_v40  ;;  %v857_v48 = vpop.f32.mrb[31].mxu0  ;;  %v4360_v44 = vpop.eup %4359  ;;  %v1483_v12 = vpack.c.bf16 %v1208_v18, %v1204_v51 }
 0x165   :  { %v2331_v6 = vadd.f32 %v2330_v4, %v2067_v57  ;;  %v1482_v55 = vpack.c.bf16 %v857_v48, %v853_v39  ;;  %v1210_v41 = vpop.f32.mrb[31].mxu1  ;;  %v2070_v47 = vunpack.c.l.bf16 %v4360_v44  ;;  %v2074_v3 = vunpack.c.h.bf16 %v4360_v44  ;;  %v4362_v19 = vpop.eup %4361 }
 0x166   :  { %v2327_v53 = vadd.f32 %v2326_v29, %v2064_v20  ;;  %v1666_v25 = vmul.bf16 1069105081, %v1481_v38  ;;  %v1484_v10 = vpack.c.bf16 %v1210_v41, %v1206_v56  ;;  %v1672_v57 = vmul.bf16 1069105081, %v1483_v12  ;;  %v6052_v20 = vpop.xlane.xlu0 %3025  ;;  %v861_v51 = vpop.f32.mrb[32].mxu0 }
 0x167   :  { %v2332_v45 = vadd.f32 %v2331_v6, %v2068_v21  ;;  %v1669_v4 = vmul.bf16 1069105081, %v1482_v55  ;;  %v2071_v40 = vunpack.c.l.bf16 %v4358_v30  ;;  %v2335_v1 = vadd.f32 %v2070_v47, %v2069_v8  ;;  %6816 = vst [vmem:[#allocation54_spill] sm:$0xff] %v6052_v20  ;;  %v6054_v21 = vpop.xlane.xlu1 %3217  ;;  %v1214_v14 = vpop.f32.mrb[32].mxu1 }
 0x168   :  { %2328 = vadd.xlane.f32.xlu0 %v2327_v53  ;;  %4371 = vpow.bf16 %v1666_v25  ;;  %v1675_v23 = vmul.bf16 1069105081, %v1484_v10  ;;  %v2075_v39 = vunpack.c.h.bf16 %v4358_v30  ;;  %v2340_v29 = vadd.f32 %v2074_v3, %v2073_v49  ;;  %6817 = vst [vmem:[#allocation55_spill] sm:$0xff] %v6054_v21  ;;  %v863_v56 = vpop.f32.mrb[33].mxu0  ;;  %v4364_v18 = vpop.eup %4363 }
 0x169   :  { %4373 = vpow.bf16 %v1672_v57  ;;  %v2072_v6 = vunpack.c.l.bf16 %v4362_v19  ;;  %v2336_v38 = vadd.f32 %v2335_v1, %v2071_v40  ;;  %v1216_v48 = vpop.f32.mrb[33].mxu1  ;;  %v865_v25 = vpop.f32.mrb[34].mxu0  ;;  %v2076_v53 = vunpack.c.h.bf16 %v4362_v19 }
 0x16a   :  { %4375 = vpow.bf16 %v1669_v4  ;;  %v2341_v44 = vadd.f32 %v2340_v29, %v2075_v39  ;;  %v4366_v8 = vpop.eup %4365  ;;  %v1485_v12 = vpack.c.bf16 %v865_v25, %v861_v51  ;;  %v1218_v55 = vpop.f32.mrb[34].mxu1  ;;  %v2077_v3 = vunpack.c.l.bf16 %v4364_v18 }
 0x16b   :  { %4377 = vpow.bf16 %v1675_v23  ;;  %v867_v41 = vpop.f32.mrb[35].mxu0  ;;  %v2337_v30 = vadd.f32 %v2336_v38, %v2072_v6  ;;  %v4368_v49 = vpop.eup %4367  ;;  %v1487_v10 = vpack.c.bf16 %v1218_v55, %v1214_v14  ;;  %v2081_v4 = vunpack.c.h.bf16 %v4364_v18 }
 0x16c   :  { %2333 = vadd.xlane.f32.xlu0 %v2332_v45  ;;  %v1486_v47 = vpack.c.bf16 %v867_v41, %v863_v56  ;;  %v1220_v57 = vpop.f32.mrb[35].mxu1  ;;  %v2342_v45 = vadd.f32 %v2341_v44, %v2076_v53  ;;  %v1678_v21 = vmul.bf16 1069105081, %v1485_v12  ;;  %v2078_v1 = vunpack.c.l.bf16 %v4368_v49  ;;  %v6056_v6 = vpop.xlane.xlu0 %2852 }
 0x16d   :  { %v1488_v40 = vpack.c.bf16 %v1220_v57, %v1216_v48  ;;  %v2082_v20 = vunpack.c.h.bf16 %v4368_v49  ;;  %v1684_v39 = vmul.bf16 1069105081, %v1487_v10  ;;  %v2079_v51 = vunpack.c.l.bf16 %v4366_v8  ;;  %6818 = vst [vmem:[#allocation56_spill] sm:$0xff] %v6056_v6  ;;  %v871_v14 = vpop.f32.mrb[36].mxu0  ;;  %v6058_v53 = vpop.xlane.xlu1 %3028 }
 0x16e   :  { %v1681_v29 = vmul.bf16 1069105081, %v1486_v47  ;;  %4379 = vpow.bf16 %v1678_v21  ;;  %v2345_v25 = vadd.f32 %v2078_v1, %v2077_v3  ;;  %v2083_v56 = vunpack.c.h.bf16 %v4366_v8  ;;  %6819 = vst [vmem:[#allocation57_spill] sm:$0xff] %v6058_v53  ;;  %v1224_v18 = vpop.f32.mrb[36].mxu1  ;;  %v873_v48 = vpop.f32.mrb[37].mxu0 }
 0x16f   :  { %v4370_v19 = vpop.eup %4369  ;;  %v1687_v23 = vmul.bf16 1069105081, %v1488_v40  ;;  %4381 = vpow.bf16 %v1684_v39  ;;  %v2350_v38 = vadd.f32 %v2082_v20, %v2081_v4  ;;  %v1226_v41 = vpop.f32.mrb[37].mxu1 }
 0x170   :  { %2338 = vadd.xlane.f32.xlu0 %v2337_v30  ;;  %4383 = vpow.bf16 %v1681_v29  ;;  %v2080_v44 = vunpack.c.l.bf16 %v4370_v19  ;;  %v2346_v12 = vadd.f32 %v2345_v25, %v2079_v51  ;;  %v875_v21 = vpop.f32.mrb[38].mxu0  ;;  %v2084_v30 = vunpack.c.h.bf16 %v4370_v19  ;;  %v1228_v47 = vpop.f32.mrb[38].mxu1 }
 0x171   :  { %v2351_v49 = vadd.f32 %v2350_v38, %v2083_v56  ;;  %4385 = vpow.bf16 %v1687_v23  ;;  %v1489_v10 = vpack.c.bf16 %v875_v21, %v871_v14  ;;  %v877_v57 = vpop.f32.mrb[39].mxu0  ;;  %v1491_v40 = vpack.c.bf16 %v1228_v47, %v1224_v18  ;;  %v1230_v39 = vpop.f32.mrb[39].mxu1 }
 0x172   :  { %v2347_v8 = vadd.f32 %v2346_v12, %v2080_v44  ;;  %v1490_v1 = vpack.c.bf16 %v877_v57, %v873_v48  ;;  %v1492_v51 = vpack.c.bf16 %v1230_v39, %v1226_v41  ;;  %v6060_v44 = vpop.xlane.xlu0 %3220  ;;  %v881_v18 = vpop.f32.mrb[40].mxu0 }
 0x173   :  { %v4372_v55 = vpop.eup %4371  ;;  %v1690_v6 = vmul.bf16 1069105081, %v1489_v10  ;;  %v1696_v56 = vmul.bf16 1069105081, %v1491_v40  ;;  %6820 = vst [vmem:[#allocation58_spill] sm:$0xff] %v6060_v44  ;;  %v883_v41 = vpop.f32.mrb[41].mxu0 }
 0x174   :  { %2343 = vadd.xlane.f32.xlu0 %v2342_v45  ;;  %v4374_v3 = vpop.eup %4373  ;;  %v2085_v20 = vunpack.c.l.bf16 %v4372_v55  ;;  %v2352_v45 = vadd.f32 %v2351_v49, %v2084_v30  ;;  %v2089_v29 = vunpack.c.h.bf16 %v4372_v55  ;;  %v1693_v38 = vmul.bf16 1069105081, %v1490_v1  ;;  %v6062_v30 = vpop.xlane.xlu1 %2855 }
 0x175   :  { %v4376_v4 = vpop.eup %4375  ;;  %4387 = vpow.bf16 %v1690_v6  ;;  %v1699_v23 = vmul.bf16 1069105081, %v1492_v51  ;;  %v2087_v14 = vunpack.c.l.bf16 %v4374_v3  ;;  %v2091_v48 = vunpack.c.h.bf16 %v4374_v3  ;;  %6821 = vst [vmem:[#allocation59_spill] sm:$0xff] %v6062_v30  ;;  %v1234_v55 = vpop.f32.mrb[40].mxu1 }
 0x176   :  { %v2086_v25 = vunpack.c.l.bf16 %v4376_v4  ;;  %v2090_v53 = vunpack.c.h.bf16 %v4376_v4  ;;  %v4378_v19 = vpop.eup %4377  ;;  %4389 = vpow.bf16 %v1696_v56  ;;  %v1236_v57 = vpop.f32.mrb[41].mxu1 }
 0x177   :  { %4391 = vpow.bf16 %v1693_v38  ;;  %v2088_v49 = vunpack.c.l.bf16 %v4378_v19  ;;  %v885_v6 = vpop.f32.mrb[42].mxu0  ;;  %v1238_v1 = vpop.f32.mrb[42].mxu1 }
 0x178   :  { %2348 = vadd.xlane.f32.xlu0 %v2347_v8  ;;  %v2355_v21 = vadd.f32 %v2086_v25, %v2085_v20  ;;  %v2360_v12 = vadd.f32 %v2090_v53, %v2089_v29  ;;  %v2092_v8 = vunpack.c.h.bf16 %v4378_v19  ;;  %4393 = vpow.bf16 %v1699_v23  ;;  %v887_v39 = vpop.f32.mrb[43].mxu0  ;;  %v1240_v56 = vpop.f32.mrb[43].mxu1 }
 0x179   :  { %v4380_v47 = vpop.eup %4379  ;;  %v1493_v40 = vpack.c.bf16 %v885_v6, %v881_v18  ;;  %v1495_v51 = vpack.c.bf16 %v1238_v1, %v1234_v55  ;;  %v1494_v25 = vpack.c.bf16 %v887_v39, %v883_v41  ;;  %v891_v55 = vpop.f32.mrb[44].mxu0 }
 0x17a   :  { %v2356_v10 = vadd.f32 %v2355_v21, %v2087_v14  ;;  %v2361_v4 = vadd.f32 %v2360_v12, %v2091_v48  ;;  %v4382_v20 = vpop.eup %4381  ;;  %v2097_v53 = vunpack.c.h.bf16 %v4380_v47  ;;  %v2093_v38 = vunpack.c.l.bf16 %v4380_v47  ;;  %v1244_v47 = vpop.f32.mrb[44].mxu1 }
 0x17b   :  { %v4384_v29 = vpop.eup %4383  ;;  %v1702_v30 = vmul.bf16 1069105081, %v1493_v40  ;;  %v1496_v14 = vpack.c.bf16 %v1240_v56, %v1236_v57  ;;  %v1708_v48 = vmul.bf16 1069105081, %v1495_v51  ;;  %v1705_v12 = vmul.bf16 1069105081, %v1494_v25 }
 0x17c   :  { %2353 = vadd.xlane.f32.xlu0 %v2352_v45  ;;  %v2357_v3 = vadd.f32 %v2356_v10, %v2088_v49  ;;  %v2362_v45 = vadd.f32 %v2361_v4, %v2092_v8  ;;  %v2098_v21 = vunpack.c.h.bf16 %v4384_v29  ;;  %v2094_v44 = vunpack.c.l.bf16 %v4384_v29  ;;  %v4386_v19 = vpop.eup %4385  ;;  %v6064_v49 = vpop.xlane.xlu0 %3031 }
 0x17d   :  { %4395 = vpow.bf16 %v1702_v30  ;;  %v1711_v23 = vmul.bf16 1069105081, %v1496_v14  ;;  %v2099_v18 = vunpack.c.h.bf16 %v4382_v20  ;;  %6822 = vst [vmem:[#allocation60_spill] sm:$0xff] %v6064_v49  ;;  %v2095_v41 = vunpack.c.l.bf16 %v4382_v20  ;;  %v6066_v8 = vpop.xlane.xlu1 %3223  ;;  %v893_v57 = vpop.f32.mrb[45].mxu0 }
 0x17e   :  { %v2370_v6 = vadd.f32 %v2098_v21, %v2097_v53  ;;  %4397 = vpow.bf16 %v1708_v48  ;;  %v2365_v10 = vadd.f32 %v2094_v44, %v2093_v38  ;;  %6823 = vst [vmem:[#allocation61_spill] sm:$0xff] %v6066_v8  ;;  %v2100_v4 = vunpack.c.h.bf16 %v4386_v19  ;;  %v1246_v39 = vpop.f32.mrb[45].mxu1  ;;  %v895_v30 = vpop.f32.mrb[46].mxu0 }
 0x17f   :  { %4399 = vpow.bf16 %v1705_v12  ;;  %v1497_v51 = vpack.c.bf16 %v895_v30, %v891_v55  ;;  %v1248_v25 = vpop.f32.mrb[46].mxu1  ;;  %v897_v56 = vpop.f32.mrb[47].mxu0 }
 0x180   :  { %2358 = vadd.xlane.f32.xlu0 %v2357_v3  ;;  %v2371_v40 = vadd.f32 %v2370_v6, %v2099_v18  ;;  %v4388_v1 = vpop.eup %4387  ;;  %v2096_v3 = vunpack.c.l.bf16 %v4386_v19  ;;  %v2366_v29 = vadd.f32 %v2365_v10, %v2095_v41  ;;  %4401 = vpow.bf16 %v1711_v23  ;;  %v1250_v48 = vpop.f32.mrb[47].mxu1 }
 0x181   :  { %v4390_v53 = vpop.eup %4389  ;;  %v2105_v44 = vunpack.c.h.bf16 %v4388_v1  ;;  %v1499_v14 = vpack.c.bf16 %v1248_v25, %v1244_v47  ;;  %v1498_v21 = vpack.c.bf16 %v897_v56, %v893_v57  ;;  %v2101_v12 = vunpack.c.l.bf16 %v4388_v1  ;;  %v901_v47 = vpop.f32.mrb[48].mxu0 }
 0x182   :  { %v2372_v20 = vadd.f32 %v2371_v40, %v2100_v4  ;;  %v4392_v38 = vpop.eup %4391  ;;  %v1714_v8 = vmul.bf16 1069105081, %v1497_v51  ;;  %v1500_v18 = vpack.c.bf16 %v1250_v48, %v1246_v39  ;;  %v2107_v55 = vunpack.c.h.bf16 %v4390_v53  ;;  %v6068_v40 = vpop.xlane.xlu0 %2858 }
 0x183   :  { %v2106_v6 = vunpack.c.h.bf16 %v4392_v38  ;;  %v2102_v49 = vunpack.c.l.bf16 %v4392_v38  ;;  %v4394_v19 = vpop.eup %4393  ;;  %v1720_v41 = vmul.bf16 1069105081, %v1499_v14  ;;  %v1717_v10 = vmul.bf16 1069105081, %v1498_v21  ;;  %6824 = vst [vmem:[#allocation62_spill] sm:$0xff] %v6068_v40  ;;  %v6070_v1 = vpop.xlane.xlu1 %3034 }
 0x184   :  { %2363 = vadd.xlane.f32.xlu0 %v2362_v45  ;;  %v2367_v45 = vadd.f32 %v2366_v29, %v2096_v3  ;;  %2373 = vadd.xlane.f32.xlu1 %v2372_v20  ;;  %4403 = vpow.bf16 %v1714_v8  ;;  %v1723_v23 = vmul.bf16 1069105081, %v1500_v18  ;;  %v2103_v57 = vunpack.c.l.bf16 %v4390_v53  ;;  %6825 = vst [vmem:[#allocation63_spill] sm:$0xff] %v6070_v1  ;;  %v1254_v39 = vpop.f32.mrb[48].mxu1  ;;  %v903_v3 = vpop.f32.mrb[49].mxu0 }
 0x185   :  { %v2380_v4 = vadd.f32 %v2106_v6, %v2105_v44  ;;  %4405 = vpow.bf16 %v1720_v41  ;;  %v2375_v30 = vadd.f32 %v2102_v49, %v2101_v12  ;;  %v2108_v29 = vunpack.c.h.bf16 %v4394_v19  ;;  %v1256_v56 = vpop.f32.mrb[49].mxu1  ;;  %v905_v20 = vpop.f32.mrb[50].mxu0 }
 0x186   :  { %4407 = vpow.bf16 %v1717_v10  ;;  %v2104_v8 = vunpack.c.l.bf16 %v4394_v19  ;;  %v1501_v44 = vpack.c.bf16 %v905_v20, %v901_v47  ;;  %v1258_v21 = vpop.f32.mrb[50].mxu1  ;;  %v907_v48 = vpop.f32.mrb[51].mxu0 }
 0x187   :  { %v2381_v51 = vadd.f32 %v2380_v4, %v2107_v55  ;;  %v2376_v38 = vadd.f32 %v2375_v30, %v2103_v57  ;;  %4409 = vpow.bf16 %v1723_v23  ;;  %v1503_v12 = vpack.c.bf16 %v1258_v21, %v1254_v39  ;;  %v1260_v6 = vpop.f32.mrb[51].mxu1  ;;  %v911_v39 = vpop.f32.mrb[52].mxu0 }
 0x188   :  { %2368 = vadd.xlane.f32.xlu0 %v2367_v45  ;;  %v4396_v25 = vpop.eup %4395  ;;  %v1502_v18 = vpack.c.bf16 %v907_v48, %v903_v3  ;;  %v1726_v40 = vmul.bf16 1069105081, %v1501_v44  ;;  %v1504_v55 = vpack.c.bf16 %v1260_v6, %v1256_v56  ;;  %v1264_v56 = vpop.f32.mrb[52].mxu1 }
 0x189   :  { %v4398_v14 = vpop.eup %4397  ;;  %v2382_v45 = vadd.f32 %v2381_v51, %v2108_v29  ;;  %v2113_v53 = vunpack.c.h.bf16 %v4396_v25  ;;  %v2377_v41 = vadd.f32 %v2376_v38, %v2104_v8  ;;  %v2109_v10 = vunpack.c.l.bf16 %v4396_v25  ;;  %v6072_v51 = vpop.xlane.xlu0 %3226 }
 0x18a   :  { %v4400_v49 = vpop.eup %4399  ;;  %v1732_v57 = vmul.bf16 1069105081, %v1503_v12  ;;  %v1729_v30 = vmul.bf16 1069105081, %v1502_v18  ;;  %4411 = vpow.bf16 %v1726_v40  ;;  %v1735_v23 = vmul.bf16 1069105081, %v1504_v55  ;;  %v6074_v25 = vpop.xlane.xlu1 %2861 }
 0x18b   :  { %2383 = vadd.xlane.f32.xlu1 %v2382_v45  ;;  %v2114_v4 = vunpack.c.h.bf16 %v4400_v49  ;;  %v2110_v1 = vunpack.c.l.bf16 %v4400_v49  ;;  %v4402_v19 = vpop.eup %4401  ;;  %v2115_v47 = vunpack.c.h.bf16 %v4398_v14  ;;  %6826 = vst [vmem:[#allocation64_spill] sm:$0xff] %v6072_v51  ;;  %v2111_v3 = vunpack.c.l.bf16 %v4398_v14  ;;  %6827 = vst [vmem:[#allocation65_spill] sm:$0xff] %v6074_v25  ;;  %v913_v8 = vpop.f32.mrb[53].mxu0 }
 0x18c   :  { %2378 = vadd.xlane.f32.xlu0 %v2377_v41  ;;  %4413 = vpow.bf16 %v1732_v57  ;;  %v2116_v38 = vunpack.c.h.bf16 %v4402_v19  ;;  %v1266_v48 = vpop.f32.mrb[53].mxu1  ;;  %v915_v45 = vpop.f32.mrb[54].mxu0  ;;  %v2112_v40 = vunpack.c.l.bf16 %v4402_v19 }
 0x18d   :  { %v2390_v29 = vadd.f32 %v2114_v4, %v2113_v53  ;;  %v2385_v20 = vadd.f32 %v2110_v1, %v2109_v10  ;;  %4415 = vpow.bf16 %v1729_v30  ;;  %v1505_v53 = vpack.c.bf16 %v915_v45, %v911_v39  ;;  %v1268_v18 = vpop.f32.mrb[54].mxu1  ;;  %v917_v6 = vpop.f32.mrb[55].mxu0 }
 0x18e   :  { %4417 = vpow.bf16 %v1735_v23  ;;  %v1507_v10 = vpack.c.bf16 %v1268_v18, %v1264_v56  ;;  %v1506_v55 = vpack.c.bf16 %v917_v6, %v913_v8  ;;  %v1270_v4 = vpop.f32.mrb[55].mxu1  ;;  %v921_v56 = vpop.f32.mrb[56].mxu0 }
 0x18f   :  { %v2391_v44 = vadd.f32 %v2390_v29, %v2115_v47  ;;  %v4404_v21 = vpop.eup %4403  ;;  %v2386_v49 = vadd.f32 %v2385_v20, %v2111_v3  ;;  %v1738_v25 = vmul.bf16 1069105081, %v1505_v53  ;;  %v1508_v47 = vpack.c.bf16 %v1270_v4, %v1266_v48  ;;  %v1274_v48 = vpop.f32.mrb[56].mxu1 }
 0x190   :  { %v4406_v12 = vpop.eup %4405  ;;  %v2121_v14 = vunpack.c.h.bf16 %v4404_v21  ;;  %v2117_v30 = vunpack.c.l.bf16 %v4404_v21  ;;  %v1744_v3 = vmul.bf16 1069105081, %v1507_v10  ;;  %v1741_v20 = vmul.bf16 1069105081, %v1506_v55  ;;  %v6078_v21 = vpop.xlane.xlu1 %3229 }
 0x191   :  { %v2392_v41 = vadd.f32 %v2391_v44, %v2116_v38  ;;  %v4408_v1 = vpop.eup %4407  ;;  %v2387_v57 = vadd.f32 %v2386_v49, %v2112_v40  ;;  %4419 = vpow.bf16 %v1738_v25  ;;  %v1747_v23 = vmul.bf16 1069105081, %v1508_v47  ;;  %v6076_v44 = vpop.xlane.xlu0 %3037  ;;  %6829 = vst [vmem:[#allocation67_spill] sm:$0xff] %v6078_v21 }
 0x192   :  { %v2122_v29 = vunpack.c.h.bf16 %v4408_v1  ;;  %v2118_v51 = vunpack.c.l.bf16 %v4408_v1  ;;  %v4410_v19 = vpop.eup %4409  ;;  %v2123_v39 = vunpack.c.h.bf16 %v4406_v12  ;;  %6828 = vst [vmem:[#allocation66_spill] sm:$0xff] %v6076_v44  ;;  %4421 = vpow.bf16 %v1744_v3  ;;  %v923_v40 = vpop.f32.mrb[57].mxu0 }
 0x193   :  { %2393 = vadd.xlane.f32.xlu1 %v2392_v41  ;;  %2388 = vadd.xlane.f32.xlu0 %v2387_v57  ;;  %v2119_v8 = vunpack.c.l.bf16 %v4406_v12  ;;  %4423 = vpow.bf16 %v1741_v20  ;;  %v2124_v49 = vunpack.c.h.bf16 %v4410_v19  ;;  %v1276_v6 = vpop.f32.mrb[57].mxu1  ;;  %v925_v41 = vpop.f32.mrb[58].mxu0  ;;  %v2120_v25 = vunpack.c.l.bf16 %v4410_v19 }
 0x194   :  { %v2400_v38 = vadd.f32 %v2122_v29, %v2121_v14  ;;  %v2395_v45 = vadd.f32 %v2118_v51, %v2117_v30  ;;  %4425 = vpow.bf16 %v1747_v23  ;;  %v1509_v14 = vpack.c.bf16 %v925_v41, %v921_v56  ;;  %v1278_v55 = vpop.f32.mrb[58].mxu1  ;;  %v927_v4 = vpop.f32.mrb[59].mxu0 }
 0x195   :  { %v4412_v18 = vpop.eup %4411  ;;  %v1511_v30 = vpack.c.bf16 %v1278_v55, %v1274_v48  ;;  %v1510_v47 = vpack.c.bf16 %v927_v4, %v923_v40  ;;  %v1280_v29 = vpop.f32.mrb[59].mxu1 }
 0x196   :  { %v2401_v53 = vadd.f32 %v2400_v38, %v2123_v39  ;;  %v2396_v1 = vadd.f32 %v2395_v45, %v2119_v8  ;;  %v2129_v12 = vunpack.c.h.bf16 %v4412_v18  ;;  %v2125_v20 = vunpack.c.l.bf16 %v4412_v18  ;;  %v931_v48 = vpop.f32.mrb[60].mxu0  ;;  %v6082_v18 = vpop.xlane.xlu1 %3040 }
 0x197   :  { %v4414_v10 = vpop.eup %4413  ;;  %v1750_v21 = vmul.bf16 1069105081, %v1509_v14  ;;  %v1512_v39 = vpack.c.bf16 %v1280_v29, %v1276_v6  ;;  %v1756_v8 = vmul.bf16 1069105081, %v1511_v30  ;;  %v1753_v45 = vmul.bf16 1069105081, %v1510_v47 }
 0x198   :  { %v2402_v57 = vadd.f32 %v2401_v53, %v2124_v49  ;;  %v4416_v51 = vpop.eup %4415  ;;  %v2397_v3 = vadd.f32 %v2396_v1, %v2120_v25  ;;  %v2131_v56 = vunpack.c.h.bf16 %v4414_v10  ;;  %v6080_v53 = vpop.xlane.xlu0 %2864  ;;  %v2127_v40 = vunpack.c.l.bf16 %v4414_v10  ;;  %6831 = vst [vmem:[#allocation69_spill] sm:$0xff] %v6082_v18 }
 0x199   :  { %v2130_v38 = vunpack.c.h.bf16 %v4416_v51  ;;  %v2126_v44 = vunpack.c.l.bf16 %v4416_v51  ;;  %v4418_v19 = vpop.eup %4417  ;;  %4427 = vpow.bf16 %v1750_v21  ;;  %v1759_v23 = vmul.bf16 1069105081, %v1512_v39  ;;  %6830 = vst [vmem:[#allocation68_spill] sm:$0xff] %v6080_v53  ;;  %v1284_v6 = vpop.f32.mrb[60].mxu1 }
 0x19a   :  { %2403 = vadd.xlane.f32.xlu1 %v2402_v57  ;;  %2398 = vadd.xlane.f32.xlu0 %v2397_v3  ;;  %4429 = vpow.bf16 %v1756_v8  ;;  %v933_v25 = vpop.f32.mrb[61].mxu0  ;;  %v2132_v1 = vunpack.c.h.bf16 %v4418_v19  ;;  %v1286_v4 = vpop.f32.mrb[61].mxu1  ;;  %v2128_v21 = vunpack.c.l.bf16 %v4418_v19 }
 0x19b   :  { %v2410_v49 = vadd.f32 %v2130_v38, %v2129_v12  ;;  %v2405_v41 = vadd.f32 %v2126_v44, %v2125_v20  ;;  %4431 = vpow.bf16 %v1753_v45  ;;  %v935_v57 = vpop.f32.mrb[62].mxu0  ;;  %v1288_v47 = vpop.f32.mrb[62].mxu1 }
 0x19c   :  { %v4420_v55 = vpop.eup %4419  ;;  %4433 = vpow.bf16 %v1759_v23  ;;  %v1513_v12 = vpack.c.bf16 %v935_v57, %v931_v48  ;;  %v937_v29 = vpop.f32.mrb[63].mxu0  ;;  %v1515_v20 = vpack.c.bf16 %v1288_v47, %v1284_v6 }
 0x19d   :  { %v2411_v14 = vadd.f32 %v2410_v49, %v2131_v56  ;;  %v2406_v51 = vadd.f32 %v2405_v41, %v2127_v40  ;;  %v4422_v30 = vpop.eup %4421  ;;  %v2137_v10 = vunpack.c.h.bf16 %v4420_v55  ;;  %v1514_v39 = vpack.c.bf16 %v937_v29, %v933_v25  ;;  %v1290_v38 = vpop.f32.mrb[63].mxu1 }
 0x19e   :  { %v4424_v44 = vpop.eup %4423  ;;  %v2133_v45 = vunpack.c.l.bf16 %v4420_v55  ;;  %v1762_v53 = vmul.bf16 1069105081, %v1513_v12  ;;  %v1516_v56 = vpack.c.bf16 %v1290_v38, %v1286_v4  ;;  %v1768_v40 = vmul.bf16 1069105081, %v1515_v20  ;;  %v941_v25 = vpop.f32.mrb[64].mxu0 }
 0x19f   :  { %v2412_v3 = vadd.f32 %v2411_v14, %v2132_v1  ;;  %v2407_v8 = vadd.f32 %v2406_v51, %v2128_v21  ;;  %v2138_v49 = vunpack.c.h.bf16 %v4424_v44  ;;  %v2134_v18 = vunpack.c.l.bf16 %v4424_v44  ;;  %v4426_v19 = vpop.eup %4425  ;;  %v6084_v1 = vpop.xlane.xlu0 %3232 }
 0x1a0   :  { %v1765_v41 = vmul.bf16 1069105081, %v1514_v39  ;;  %4435 = vpow.bf16 %v1762_v53  ;;  %v2139_v23 = vunpack.c.h.bf16 %v4422_v30  ;;  %6832 = vst [vmem:[#allocation70_spill] sm:$0xff] %v6084_v1  ;;  %v1771_v6 = vmul.bf16 1069105081, %v1516_v56  ;;  %v6086_v55 = vpop.xlane.xlu1 %2867  ;;  %v1294_v4 = vpop.f32.mrb[64].mxu1 }
 0x1a1   :  { %2413 = vadd.xlane.f32.xlu1 %v2412_v3  ;;  %2408 = vadd.xlane.f32.xlu0 %v2407_v8  ;;  %v2420_v48 = vadd.f32 %v2138_v49, %v2137_v10  ;;  %4437 = vpow.bf16 %v1768_v40  ;;  %v2135_v14 = vunpack.c.l.bf16 %v4422_v30  ;;  %v2415_v57 = vadd.f32 %v2134_v18, %v2133_v45  ;;  %6833 = vst [vmem:[#allocation71_spill] sm:$0xff] %v6086_v55  ;;  %v943_v21 = vpop.f32.mrb[65].mxu0  ;;  %v1296_v29 = vpop.f32.mrb[65].mxu1 }
 0x1a2   :  { %4439 = vpow.bf16 %v1765_v41  ;;  %v2140_v51 = vunpack.c.h.bf16 %v4426_v19  ;;  %v945_v3 = vpop.f32.mrb[66].mxu0  ;;  %v2136_v53 = vunpack.c.l.bf16 %v4426_v19  ;;  %v1298_v39 = vpop.f32.mrb[66].mxu1 }
 0x1a3   :  { %v2421_v12 = vadd.f32 %v2420_v48, %v2139_v23  ;;  %v2416_v44 = vadd.f32 %v2415_v57, %v2135_v14  ;;  %v1517_v20 = vpack.c.bf16 %v945_v3, %v941_v25  ;;  %v947_v38 = vpop.f32.mrb[67].mxu0  ;;  %4441 = vpow.bf16 %v1771_v6  ;;  %v1300_v49 = vpop.f32.mrb[67].mxu1 }
 0x1a4   :  { %v4428_v47 = vpop.eup %4427  ;;  %v1519_v18 = vpack.c.bf16 %v1298_v39, %v1294_v4  ;;  %v1518_v45 = vpack.c.bf16 %v947_v38, %v943_v21  ;;  %v1520_v55 = vpack.c.bf16 %v1300_v49, %v1296_v29  ;;  %v951_v6 = vpop.f32.mrb[68].mxu0 }
 0x1a5   :  { %v4430_v10 = vpop.eup %4429  ;;  %v2422_v8 = vadd.f32 %v2421_v12, %v2140_v51  ;;  %v2141_v56 = vunpack.c.l.bf16 %v4428_v47  ;;  %v2417_v40 = vadd.f32 %v2416_v44, %v2136_v53  ;;  %v1774_v41 = vmul.bf16 1069105081, %v1517_v20  ;;  %v6088_v51 = vpop.xlane.xlu0 %3043 }
 0x1a6   :  { %v4432_v30 = vpop.eup %4431  ;;  %v1780_v1 = vmul.bf16 1069105081, %v1519_v18  ;;  %v1777_v19 = vmul.bf16 1069105081, %v1518_v45  ;;  %v1783_v25 = vmul.bf16 1069105081, %v1520_v55  ;;  %v2143_v14 = vunpack.c.l.bf16 %v4430_v10  ;;  %v6090_v4 = vpop.xlane.xlu1 %3235 }
 0x1a7   :  { %2423 = vadd.xlane.f32.xlu1 %v2422_v8  ;;  %v2142_v23 = vunpack.c.l.bf16 %v4432_v30  ;;  %v4434_v48 = vpop.eup %4433  ;;  %2418 = vadd.xlane.f32.xlu0 %v2417_v40  ;;  %4443 = vpow.bf16 %v1774_v41  ;;  %6834 = vst [vmem:[#allocation72_spill] sm:$0xff] %v6088_v51  ;;  %6835 = vst [vmem:[#allocation73_spill] sm:$0xff] %v6090_v4  ;;  %v2145_v21 = vunpack.c.h.bf16 %v4428_v47  ;;  %v2146_v12 = vunpack.c.h.bf16 %v4432_v30  ;;  %v1304_v29 = vpop.f32.mrb[68].mxu1 }
 0x1a8   :  { %4445 = vpow.bf16 %v1780_v1  ;;  %v953_v3 = vpop.f32.mrb[69].mxu0  ;;  %v2144_v53 = vunpack.c.l.bf16 %v4434_v48  ;;  %v1306_v39 = vpop.f32.mrb[69].mxu1  ;;  %v2147_v55 = vunpack.c.h.bf16 %v4430_v10  ;;  %v2148_v40 = vunpack.c.h.bf16 %v4434_v48 }
 0x1a9   :  { %v2425_v57 = vadd.f32 %v2142_v23, %v2141_v56  ;;  %4447 = vpow.bf16 %v1777_v19  ;;  %v955_v38 = vpop.f32.mrb[70].mxu0  ;;  %v2430_v8 = vadd.f32 %v2146_v12, %v2145_v21  ;;  %v1308_v1 = vpop.f32.mrb[70].mxu1 }
 0x1aa   :  { %4449 = vpow.bf16 %v1783_v25  ;;  %v1521_v18 = vpack.c.bf16 %v955_v38, %v951_v6  ;;  %v957_v45 = vpop.f32.mrb[71].mxu0  ;;  %v1523_v30 = vpack.c.bf16 %v1308_v1, %v1304_v29  ;;  %v1310_v23 = vpop.f32.mrb[71].mxu1 }
 0x1ab   :  { %v2426_v44 = vadd.f32 %v2425_v57, %v2143_v14  ;;  %v4436_v20 = vpop.eup %4435  ;;  %v1522_v41 = vpack.c.bf16 %v957_v45, %v953_v3  ;;  %v2431_v19 = vadd.f32 %v2430_v8, %v2147_v55  ;;  %v1524_v57 = vpack.c.bf16 %v1310_v23, %v1306_v39  ;;  %v961_v29 = vpop.f32.mrb[72].mxu0 }
 0x1ac   :  { %v6092_v56 = vpop.eup %4437  ;;  %v2149_v4 = vunpack.c.l.bf16 %v4436_v20  ;;  %v1786_v14 = vmul.bf16 1069105081, %v1521_v18  ;;  %v1792_v51 = vmul.bf16 1069105081, %v1523_v30  ;;  %v6101_v3 = vpop.xlane.xlu1 %3046  ;;  %v2153_v39 = vunpack.c.h.bf16 %v4436_v20 }
 0x1ad   :  { %v2427_v49 = vadd.f32 %v2426_v44, %v2144_v53  ;;  %v4440_v47 = vpop.eup %4439  ;;  %v1789_v10 = vmul.bf16 1069105081, %v1522_v41  ;;  %v6094_v21 = vadd.f32 %v2431_v19, %v2148_v40  ;;  %v1795_v6 = vmul.bf16 1069105081, %v1524_v57  ;;  %v6098_v53 = vpop.xlane.xlu0 %2870  ;;  %6837 = vst [vmem:[#allocation75_spill] sm:$0xff] %v6101_v3 }
 0x1ae   :  { %v2150_v25 = vunpack.c.l.bf16 %v4440_v47  ;;  %v6096_v12 = vpop.eup %4441  ;;  %4451 = vpow.bf16 %v1786_v14  ;;  %6836 = vst [vmem:[#allocation74_spill] sm:$0xff] %v6098_v53  ;;  %v2151_v48 = vunpack.c.l.bf16 %v6092_v56  ;;  %v2154_v38 = vunpack.c.h.bf16 %v4440_v47  ;;  %v1314_v55 = vpop.f32.mrb[72].mxu1 }
 0x1af   :  { %2428 = vadd.xlane.f32.xlu0 %v2427_v49  ;;  %4453 = vpow.bf16 %v1792_v51  ;;  %v963_v8 = vpop.f32.mrb[73].mxu0  ;;  %v1316_v1 = vpop.f32.mrb[73].mxu1  ;;  %v2152_v49 = vunpack.c.l.bf16 %v6096_v12  ;;  %v2156_v53 = vunpack.c.h.bf16 %v6096_v12 }
 0x1b0   :  { %v2435_v44 = vadd.f32 %v2150_v25, %v2149_v4  ;;  %4455 = vpow.bf16 %v1789_v10  ;;  %v965_v45 = vpop.f32.mrb[74].mxu0  ;;  %v2440_v30 = vadd.f32 %v2154_v38, %v2153_v39  ;;  %v1318_v51 = vpop.f32.mrb[74].mxu1  ;;  %v2155_v10 = vunpack.c.h.bf16 %v6092_v56 }
 0x1b1   :  { %4457 = vpow.bf16 %v1795_v6  ;;  %v1525_v23 = vpack.c.bf16 %v965_v45, %v961_v29  ;;  %v967_v19 = vpop.f32.mrb[75].mxu0  ;;  %v1527_v20 = vpack.c.bf16 %v1318_v51, %v1314_v55  ;;  %v1320_v25 = vpop.f32.mrb[75].mxu1 }
 0x1b2   :  { %v4444_v18 = vpop.eup %4443  ;;  %v2436_v40 = vadd.f32 %v2435_v44, %v2151_v48  ;;  %v1526_v47 = vpack.c.bf16 %v967_v19, %v963_v8  ;;  %v1528_v52 = vpack.c.bf16 %v1320_v25, %v1316_v1  ;;  %v6106_v55 = vpop.xlane.xlu0 %3238  ;;  %v2441_v1 = vadd.f32 %v2440_v30, %v2155_v10 }
 0x1b3   :  { %v4446_v41 = vpop.eup %4445  ;;  %v2161_v14 = vunpack.c.h.bf16 %v4444_v18  ;;  %v2157_v57 = vunpack.c.l.bf16 %v4444_v18  ;;  %v1798_v42 = vmul.bf16 1069105081, %v1525_v23  ;;  %v1804_v39 = vmul.bf16 1069105081, %v1527_v20  ;;  %6838 = vst [vmem:[#allocation76_spill] sm:$0xff] %v6106_v55  ;;  %v971_v8 = vpop.f32.mrb[76].mxu0 }
 0x1b4   :  { %v4448_v4 = vpop.eup %4447  ;;  %v1801_v6 = vmul.bf16 1069105081, %v1526_v47  ;;  %v2163_v29 = vunpack.c.h.bf16 %v4446_v41  ;;  %v2159_v38 = vunpack.c.l.bf16 %v4446_v41  ;;  %v1807_v45 = vmul.bf16 1069105081, %v1528_v52  ;;  %v6108_v51 = vpop.xlane.xlu1 %2873 }
 0x1b5   :  { %v4450_v3 = vpop.eup %4449  ;;  %v2162_v48 = vunpack.c.h.bf16 %v4448_v4  ;;  %v2158_v44 = vunpack.c.l.bf16 %v4448_v4  ;;  %4459 = vpow.bf16 %v1798_v42  ;;  %6839 = vst [vmem:[#allocation77_spill] sm:$0xff] %v6108_v51  ;;  %v6110_v12 = vadd.f32 %v2436_v40, %v2152_v49  ;;  %v1324_v23 = vpop.f32.mrb[76].mxu1 }
 0x1b6   :  { %4461 = vpow.bf16 %v1804_v39  ;;  %v2164_v56 = vunpack.c.h.bf16 %v4450_v3  ;;  %v973_v19 = vpop.f32.mrb[77].mxu0  ;;  %v2160_v20 = vunpack.c.l.bf16 %v4450_v3  ;;  %v1326_v52 = vpop.f32.mrb[77].mxu1 }
 0x1b7   :  { %v2450_v18 = vadd.f32 %v2162_v48, %v2161_v14  ;;  %v2445_v5 = vadd.f32 %v2158_v44, %v2157_v57  ;;  %4463 = vpow.bf16 %v1801_v6  ;;  %v975_v14 = vpop.f32.mrb[78].mxu0  ;;  %v6112_v57 = vadd.f32 %v2441_v1, %v2156_v53  ;;  %v1328_v48 = vpop.f32.mrb[78].mxu1 }
 0x1b8   :  { %4465 = vpow.bf16 %v1807_v45  ;;  %v1529_v25 = vpack.c.bf16 %v975_v14, %v971_v8  ;;  %v977_v44 = vpop.f32.mrb[79].mxu0  ;;  %v1531_v30 = vpack.c.bf16 %v1328_v48, %v1324_v23  ;;  %v1330_v6 = vpop.f32.mrb[79].mxu1 }
 0x1b9   :  { %v2451_v4 = vadd.f32 %v2450_v18, %v2163_v29  ;;  %v2446_v41 = vadd.f32 %v2445_v5, %v2159_v38  ;;  %v4452_v42 = vpop.eup %4451  ;;  %v1530_v10 = vpack.c.bf16 %v977_v44, %v973_v19  ;;  %v1532_v3 = vpack.c.bf16 %v1330_v6, %v1326_v52  ;;  %v6114_v18 = vpop.xlane.xlu0 %3049 }
 0x1ba   :  { %v4454_v47 = vpop.eup %4453  ;;  %v2169_v51 = vunpack.c.h.bf16 %v4452_v42  ;;  %v1810_v29 = vmul.bf16 1069105081, %v1529_v25  ;;  %v1816_v45 = vmul.bf16 1069105081, %v1531_v30  ;;  %6840 = vst [vmem:[#allocation78_spill] sm:$0xff] %v6114_v18  ;;  %v981_v23 = vpop.f32.mrb[80].mxu0 }
 0x1bb   :  { %v2452_v39 = vadd.f32 %v2451_v4, %v2164_v56  ;;  %v2447_v49 = vadd.f32 %v2446_v41, %v2160_v20  ;;  %v4456_v40 = vpop.eup %4455  ;;  %v1813_v53 = vmul.bf16 1069105081, %v1530_v10  ;;  %v2171_v8 = vunpack.c.h.bf16 %v4454_v47  ;;  %v6116_v20 = vpop.xlane.xlu1 %3241 }
 0x1bc   :  { %v2170_v5 = vunpack.c.h.bf16 %v4456_v40  ;;  %v4458_v38 = vpop.eup %4457  ;;  %4467 = vpow.bf16 %v1810_v29  ;;  %v1819_v1 = vmul.bf16 1069105081, %v1532_v3  ;;  %v2165_v4 = vunpack.c.l.bf16 %v4452_v42  ;;  %6841 = vst [vmem:[#allocation79_spill] sm:$0xff] %v6116_v20  ;;  %v1334_v41 = vpop.f32.mrb[80].mxu1 }
 0x1bd   :  { %2453 = vadd.xlane.f32.xlu0 %v2452_v39  ;;  %2448 = vadd.xlane.f32.xlu1 %v2447_v49  ;;  %4469 = vpow.bf16 %v1816_v45  ;;  %v2166_v19 = vunpack.c.l.bf16 %v4456_v40  ;;  %v983_v52 = vpop.f32.mrb[81].mxu0  ;;  %v2172_v14 = vunpack.c.h.bf16 %v4458_v38  ;;  %v1336_v44 = vpop.f32.mrb[81].mxu1  ;;  %v2167_v49 = vunpack.c.l.bf16 %v4454_v47 }
 0x1be   :  { %v2460_v56 = vadd.f32 %v2170_v5, %v2169_v51  ;;  %4471 = vpow.bf16 %v1813_v53  ;;  %v985_v39 = vpop.f32.mrb[82].mxu0  ;;  %v1338_v51 = vpop.f32.mrb[82].mxu1  ;;  %v2168_v20 = vunpack.c.l.bf16 %v4458_v38 }
 0x1bf   :  { %v2455_v30 = vadd.f32 %v2166_v19, %v2165_v4  ;;  %4473 = vpow.bf16 %v1819_v1  ;;  %v1533_v6 = vpack.c.bf16 %v985_v39, %v981_v23  ;;  %v987_v42 = vpop.f32.mrb[83].mxu0  ;;  %v1535_v5 = vpack.c.bf16 %v1338_v51, %v1334_v41  ;;  %v1340_v53 = vpop.f32.mrb[83].mxu1 }
 0x1c0   :  { %v2461_v25 = vadd.f32 %v2460_v56, %v2171_v8  ;;  %v4460_v48 = vpop.eup %4459  ;;  %v1534_v45 = vpack.c.bf16 %v987_v42, %v983_v52  ;;  %v6118_v55 = vpop.xlane.xlu0 %2876  ;;  %v1536_v28 = vpack.c.bf16 %v1340_v53, %v1336_v44 }
 0x1c1   :  { %v4462_v10 = vpop.eup %4461  ;;  %v2177_v3 = vunpack.c.h.bf16 %v4460_v48  ;;  %v2456_v18 = vadd.f32 %v2455_v30, %v2167_v49  ;;  %6842 = vst [vmem:[#allocation80_spill] sm:$0xff] %v6118_v55  ;;  %v1822_v56 = vmul.bf16 1069105081, %v1533_v6  ;;  %v2173_v4 = vunpack.c.l.bf16 %v4460_v48  ;;  %v991_v39 = vpop.f32.mrb[84].mxu0  ;;  %v1965_v48 = vld [vmem:[#allocation2] sm:$0xff] }
 0x1c2   :  { %v2462_v29 = vadd.f32 %v2461_v25, %v2172_v14  ;;  %v4464_v40 = vpop.eup %4463  ;;  %v1828_v1 = vmul.bf16 1069105081, %v1535_v5  ;;  %v1825_v23 = vmul.bf16 1069105081, %v1534_v45  ;;  %v6123_v14 = vld [vmem:[%s6746_s1 + $0xf8] sm:$0xff]   ;;  %v2179_v38 = vunpack.c.h.bf16 %v4462_v10  ;;  %v6128_v30 = vpop.xlane.xlu1 %3052 }
 0x1c3   :  { %v4466_v8 = vpop.eup %4465  ;;  %v2178_v47 = vunpack.c.h.bf16 %v4464_v40  ;;  %v2457_v19 = vadd.f32 %v2456_v18, %v2168_v20  ;;  %v6126_v41 = vunpack.c.l.bf16 %v6123_v14  ;;  %4475 = vpow.bf16 %v1822_v56  ;;  %6844 = vst [vmem:[#allocation82_spill] sm:$0xff] %v6128_v30  ;;  %v1344_v18 = vpop.f32.mrb[84].mxu1 }
 0x1c4   :  { %2463 = vadd.xlane.f32.xlu0 %v2462_v29  ;;  %v2174_v25 = vunpack.c.l.bf16 %v4464_v40  ;;  %4477 = vpow.bf16 %v1828_v1  ;;  %v1831_v44 = vmul.bf16 1069105081, %v1536_v28  ;;  %v2180_v49 = vunpack.c.h.bf16 %v4466_v8  ;;  %v993_v20 = vpop.f32.mrb[85].mxu0  ;;  %v1346_v5 = vpop.f32.mrb[85].mxu1 }
 0x1c5   :  { %6843 = vst [vmem:[#allocation81_spill] sm:$0xff] %v6126_v41  ;;  %v2470_v52 = vadd.f32 %v2178_v47, %v2177_v3  ;;  %2458 = vadd.xlane.f32.xlu1 %v2457_v19  ;;  %4479 = vpow.bf16 %v1825_v23  ;;  %v2175_v51 = vunpack.c.l.bf16 %v4462_v10  ;;  %v2289_v45 = vpop.xlane.xlu0 %2288  ;;  %v3151_v3 = vmul.f32 %v6126_v41, %v6126_v41  ;;  %v995_v53 = vpop.f32.mrb[86].mxu0 }
 0x1c6   :  { %v2465_v42 = vadd.f32 %v2174_v25, %v2173_v4  ;;  %v2605_v28 = vadd.f32 %v2289_v45, %v1965_v48  ;;  %v1348_v56 = vpop.f32.mrb[86].mxu1  ;;  %v2176_v1 = vunpack.c.l.bf16 %v4466_v8  ;;  %4481 = vpow.bf16 %v1831_v44  ;;  %v997_v10 = vpop.f32.mrb[87].mxu0  ;;  %v4828_v44 = vld [vmem:[%s6745_s0 + $0x78] sm:$0xff]  }
 0x1c7   :  { %v2471_v6 = vadd.f32 %v2470_v52, %v2179_v38  ;;  %v4468_v29 = vpop.eup %4467  ;;  %v1537_v55 = vpack.c.bf16 %v995_v53, %v991_v39  ;;  %v1539_v38 = vpack.c.bf16 %v1348_v56, %v1344_v18  ;;  %v1350_v4 = vpop.f32.mrb[87].mxu1  ;;  %v1966_v52 = vld [vmem:[#allocation2 + $0x8] sm:$0xff]  ;;  %v1538_v30 = vpack.c.bf16 %v997_v10, %v993_v20 }
 0x1c8   :  { %v6132_v40 = vpop.eup %4469  ;;  %v2466_v19 = vadd.f32 %v2465_v42, %v2175_v51  ;;  %v2185_v25 = vunpack.c.h.bf16 %v4468_v29  ;;  %2670 = vst.msk [vmem:[#allocation2] sm:$0xff] %vm41_vm1, %v2605_v28  ;;  %v1540_v41 = vpack.c.bf16 %v1350_v4, %v1346_v5  ;;  %v6139_v39 = vunpack.c.h.bf16 %v4828_v44  ;;  %v1001_v5 = vpop.f32.mrb[88].mxu0  ;;  %v1967_v28 = vld [vmem:[#allocation2 + $0x10] sm:$0xff] }
 0x1c9   :  { %v2472_v47 = vadd.f32 %v2471_v6, %v2180_v49  ;;  %v4472_v23 = vpop.eup %4471  ;;  %v1834_v35 = vmul.bf16 1069105081, %v1537_v55  ;;  %v2294_v49 = vpop.xlane.xlu0 %2293  ;;  %v2187_v8 = vunpack.c.h.bf16 %v6132_v40  ;;  %v2181_v6 = vunpack.c.l.bf16 %v4468_v29 }
 0x1ca   :  { %v2467_v32 = vadd.f32 %v2466_v19, %v2176_v1  ;;  %v2186_v48 = vunpack.c.h.bf16 %v4472_v23  ;;  %v4474_v45 = vpop.eup %4473  ;;  %6845 = vst [vmem:[#allocation83_spill] sm:$0xff] %v6139_v39  ;;  %v1840_v18 = vmul.bf16 1069105081, %v1539_v38  ;;  %v1837_v51 = vmul.bf16 1069105081, %v1538_v30  ;;  %v1354_v29 = vpop.f32.mrb[88].mxu1 }
 0x1cb   :  { %2473 = vadd.xlane.f32.xlu0 %v2472_v47  ;;  %v2606_v20 = vadd.f32 %v2294_v49, %v1966_v52  ;;  %4483 = vpow.bf16 %v1834_v35  ;;  %v2182_v53 = vunpack.c.l.bf16 %v4472_v23  ;;  %v2816_v55 = vmul.f32 %v5273_v9, %v5262_v0  ;;  %v1003_v47 = vpop.f32.mrb[89].mxu0  ;;  %v2299_v10 = vpop.xlane.xlu1 %2298 }
 0x1cc   :  { %2468 = vadd.xlane.f32.xlu1 %v2467_v32  ;;  %v2480_v42 = vadd.f32 %v2186_v48, %v2185_v25  ;;  %v1843_v56 = vmul.bf16 1069105081, %v1540_v41  ;;  %v2188_v1 = vunpack.c.h.bf16 %v4474_v45  ;;  %v3243_v38 = vsel %vm554_vm0, %v3151_v3, 0.0  ;;  %v1356_v32 = vpop.f32.mrb[89].mxu1  ;;  %v1005_v41 = vpop.f32.mrb[90].mxu0 }
 0x1cd   :  { %2671 = vst.msk [vmem:[#allocation2 + $0x8] sm:$0xff] %vm41_vm1, %v2606_v20  ;;  %4485 = vpow.bf16 %v1837_v51  ;;  %v2183_v35 = vunpack.c.l.bf16 %v6132_v40  ;;  %v2475_v4 = vadd.f32 %v2182_v53, %v2181_v6  ;;  %v2960_v23 = vmul.f32 %v6139_v39, %v6139_v39  ;;  %v1358_v52 = vpop.f32.mrb[90].mxu1  ;;  %v1007_v44 = vpop.f32.mrb[91].mxu0 }
 0x1ce   :  { %v2481_v19 = vadd.f32 %v2480_v42, %v2187_v8  ;;  %v4476_v30 = vpop.eup %4475  ;;  %4487 = vpow.bf16 %v1840_v18  ;;  %v2607_v9 = vadd.f32 %v2299_v10, %v1967_v28  ;;  %v2184_v48 = vunpack.c.l.bf16 %v4474_v45  ;;  %v1360_v51 = vpop.f32.mrb[91].mxu1  ;;  %v1968_v42 = vld [vmem:[#allocation2 + $0x18] sm:$0xff] }
 0x1cf   :  { %v6148_v0 = vpop.eup %4477  ;;  %v1541_v3 = vpack.c.bf16 %v1005_v41, %v1001_v5  ;;  %v1543_v8 = vpack.c.bf16 %v1358_v52, %v1354_v29  ;;  %v2476_v20 = vadd.f32 %v2475_v4, %v2183_v35  ;;  %v2189_v40 = vunpack.c.l.bf16 %v4476_v30 }
 0x1d0   :  { %v2482_v25 = vadd.f32 %v2481_v19, %v2188_v1  ;;  %v4480_v49 = vpop.eup %4479  ;;  %4489 = vpow.bf16 %v1843_v56  ;;  %2672 = vst.msk [vmem:[#allocation2 + $0x10] sm:$0xff] %vm41_vm1, %v2607_v9  ;;  %v1542_v6 = vpack.c.bf16 %v1007_v44, %v1003_v47  ;;  %v1544_v53 = vpack.c.bf16 %v1360_v51, %v1356_v32  ;;  %v2304_v1 = vpop.xlane.xlu1 %2303  ;;  %v1970_v47 = vld [vmem:[#allocation2 + $0x28] sm:$0xff] }
 0x1d1   :  { %v2190_v18 = vunpack.c.l.bf16 %v4480_v49  ;;  %v1846_v28 = vmul.bf16 1069105081, %v1541_v3  ;;  %v1852_v10 = vmul.bf16 1069105081, %v1543_v8  ;;  %v2477_v39 = vadd.f32 %v2476_v20, %v2184_v48  ;;  %v4482_v5 = vpop.eup %4481  ;;  %v1011_v56 = vpop.f32.mrb[92].mxu0 }
 0x1d2   :  { %2483 = vadd.xlane.f32.xlu0 %v2482_v25  ;;  %v6152_v45 = vunpack.c.h.bf16 %v6123_v14  ;;  %v1849_v29 = vmul.bf16 1069105081, %v1542_v6  ;;  %v1855_v19 = vmul.bf16 1069105081, %v1544_v53  ;;  %v2608_v35 = vadd.f32 %v2304_v1, %v1968_v42  ;;  %v1364_v52 = vpop.f32.mrb[92].mxu1  ;;  %v1969_v14 = vld [vmem:[#allocation2 + $0x20] sm:$0xff] }
 0x1d3   :  { %v2191_v4 = vunpack.c.l.bf16 %v6148_v0  ;;  %4491 = vpow.bf16 %v1846_v28  ;;  %2478 = vadd.xlane.f32.xlu1 %v2477_v39  ;;  %v2485_v32 = vadd.f32 %v2190_v18, %v2189_v40  ;;  %v2193_v9 = vunpack.c.h.bf16 %v4476_v30  ;;  %v1013_v25 = vpop.f32.mrb[93].mxu0  ;;  %v1366_v8 = vpop.f32.mrb[93].mxu1 }
 0x1d4   :  { %v2194_v41 = vunpack.c.h.bf16 %v4480_v49  ;;  %4493 = vpow.bf16 %v1852_v10  ;;  %2673 = vst.msk [vmem:[#allocation2 + $0x18] sm:$0xff] %vm41_vm1, %v2608_v35  ;;  %v3054_v48 = vsel %vm554_vm0, %v2960_v23, 0.0  ;;  %v2878_v3 = vsel %vm554_vm0, %v2816_v55, 0.0  ;;  %v2314_v44 = vpop.xlane.xlu1 %2313  ;;  %v2309_v49 = vpop.xlane.xlu0 %2308 }
 0x1d5   :  { %4495 = vpow.bf16 %v1849_v29  ;;  %v2192_v39 = vunpack.c.l.bf16 %v4482_v5  ;;  %v2486_v51 = vadd.f32 %v2485_v32, %v2191_v4  ;;  %v2610_v30 = vadd.f32 %v2314_v44, %v1970_v47  ;;  %v1015_v40 = vpop.f32.mrb[94].mxu0  ;;  %v1368_v18 = vpop.f32.mrb[94].mxu1 }
 0x1d6   :  { %3244 = vadd.xlane.f32.xlu0 %v3243_v38  ;;  %v2490_v20 = vadd.f32 %v2194_v41, %v2193_v9  ;;  %v6158_v42 = vpop.eup %4483  ;;  %v3152_v38 = vmul.f32 %v6152_v45, %v6152_v45  ;;  %v2195_v6 = vunpack.c.h.bf16 %v6148_v0  ;;  %v2817_v23 = vmul.f32 %v5300_v15, %v5281_v17  ;;  %v1017_v28 = vpop.f32.mrb[95].mxu0 }
 0x1d7   :  { %4497 = vpow.bf16 %v1855_v19  ;;  %2433 = vadd.xlane.f32.xlu1 %v6094_v21  ;;  %v2609_v55 = vadd.f32 %v2309_v49, %v1969_v14  ;;  %v1545_v53 = vpack.c.bf16 %v1015_v40, %v1011_v56  ;;  %v6166_v10 = vadd.f32 %v2486_v51, %v2192_v39  ;;  %2675 = vst.msk [vmem:[#allocation2 + $0x28] sm:$0xff] %vm41_vm1, %v2610_v30  ;;  %v1370_v4 = vpop.f32.mrb[95].mxu1 }
 0x1d8   :  { %v4486_v1 = vpop.eup %4485  ;;  %v1547_v29 = vpack.c.bf16 %v1368_v18, %v1364_v52  ;;  %v1546_v35 = vpack.c.bf16 %v1017_v28, %v1013_v25  ;;  %v2196_v0 = vunpack.c.h.bf16 %v4482_v5  ;;  %v2491_v47 = vadd.f32 %v2490_v20, %v2195_v6  ;;  %v1021_v5 = vpop.f32.mrb[96].mxu0 }
 0x1d9   :  { %v4488_v32 = vpop.eup %4487  ;;  %2674 = vst.msk [vmem:[#allocation2 + $0x20] sm:$0xff] %vm41_vm1, %v2609_v55  ;;  %v1858_v17 = vmul.bf16 1069105081, %v1545_v53  ;;  %v1548_v15 = vpack.c.bf16 %v1370_v4, %v1366_v8  ;;  %v2197_v21 = vunpack.c.l.bf16 %v6158_v42  ;;  %v2198_v19 = vunpack.c.l.bf16 %v4486_v1  ;;  %v1374_v44 = vpop.f32.mrb[96].mxu1  ;;  %v1971_v8 = vld [vmem:[#allocation2 + $0x30] sm:$0xff] }
 0x1da   :  { %3055 = vadd.xlane.f32.xlu0 %v3054_v48  ;;  %v1864_v56 = vmul.bf16 1069105081, %v1547_v29  ;;  %v1861_v9 = vmul.bf16 1069105081, %v1546_v35  ;;  %v6171_v41 = vadd.f32 %v2491_v47, %v2196_v0  ;;  %v3246_v25 = vsel %vm554_vm0, %v3152_v38, 0.0  ;;  %v1972_v48 = vld [vmem:[#allocation2 + $0x38] sm:$0xff] }
 0x1db   :  { %v4490_v14 = vpop.eup %4489  ;;  %4499 = vpow.bf16 %v1858_v17  ;;  %v1867_v52 = vmul.bf16 1069105081, %v1548_v15  ;;  %2879 = vadd.xlane.f32.xlu1 %v2878_v3  ;;  %v1023_v39 = vpop.f32.mrb[97].mxu0  ;;  %v2199_v51 = vunpack.c.l.bf16 %v4488_v32  ;;  %v2495_v20 = vadd.f32 %v2198_v19, %v2197_v21 }
 0x1dc   :  { %4501 = vpow.bf16 %v1864_v56  ;;  %v2201_v30 = vunpack.c.h.bf16 %v6158_v42  ;;  %v1376_v49 = vpop.f32.mrb[97].mxu1  ;;  %v2202_v6 = vunpack.c.h.bf16 %v4486_v1  ;;  %v2881_v3 = vsel %vm554_vm0, %v2817_v23, 0.0  ;;  %v1025_v18 = vpop.f32.mrb[98].mxu0 }
 0x1dd   :  { %4503 = vpow.bf16 %v1861_v9  ;;  %v2200_v28 = vunpack.c.l.bf16 %v4490_v14  ;;  %v2496_v29 = vadd.f32 %v2495_v20, %v2199_v51  ;;  %v1549_v42 = vpack.c.bf16 %v1025_v18, %v1021_v5  ;;  %v1378_v0 = vpop.f32.mrb[98].mxu1  ;;  %v1027_v47 = vpop.f32.mrb[99].mxu0 }
 0x1de   :  { %2438 = vadd.xlane.f32.xlu0 %v6110_v12  ;;  %v6177_v55 = vpop.eup %4491  ;;  %v2203_v12 = vunpack.c.h.bf16 %v4488_v32  ;;  %4505 = vpow.bf16 %v1867_v52  ;;  %v2500_v17 = vadd.f32 %v2202_v6, %v2201_v30  ;;  %v1551_v23 = vpack.c.bf16 %v1378_v0, %v1374_v44  ;;  %v1380_v21 = vpop.f32.mrb[99].mxu1 }
 0x1df   :  { %v6179_v35 = vpop.eup %4493  ;;  %3247 = vadd.xlane.f32.xlu1 %v3246_v25  ;;  %v1550_v15 = vpack.c.bf16 %v1027_v47, %v1023_v39  ;;  %v6182_v19 = vadd.f32 %v2496_v29, %v2200_v28  ;;  %v2205_v32 = vunpack.c.l.bf16 %v6177_v55  ;;  %v1870_v56 = vmul.bf16 1069105081, %v1549_v42  ;;  %v1031_v44 = vpop.f32.mrb[100].mxu0  ;;  %v1973_v39 = vld [vmem:[#allocation2 + $0x40] sm:$0xff] }
 0x1e0   :  { %v4496_v1 = vpop.eup %4495  ;;  %v1552_v9 = vpack.c.bf16 %v1380_v21, %v1376_v49  ;;  %v2204_v52 = vunpack.c.h.bf16 %v4490_v14  ;;  %v1876_v5 = vmul.bf16 1069105081, %v1551_v23  ;;  %v2207_v30 = vunpack.c.l.bf16 %v6179_v35  ;;  %v1033_v6 = vpop.f32.mrb[101].mxu0 }
 0x1e1   :  { %v2206_v51 = vunpack.c.l.bf16 %v4496_v1  ;;  %4507 = vpow.bf16 %v1870_v56  ;;  %v2209_v14 = vunpack.c.h.bf16 %v6177_v55  ;;  %v2210_v28 = vunpack.c.h.bf16 %v4496_v1 }
 0x1e2   :  { %2882 = vadd.xlane.f32.xlu0 %v2881_v3  ;;  %v4498_v25 = vpop.eup %4497  ;;  %v1879_v20 = vmul.bf16 1069105081, %v1552_v9  ;;  %4509 = vpow.bf16 %v1876_v5  ;;  %v2211_v29 = vunpack.c.h.bf16 %v6179_v35 }
 0x1e3   :  { %2443 = vadd.xlane.f32.xlu1 %v6112_v57  ;;  %v2208_v18 = vunpack.c.l.bf16 %v4498_v25  ;;  %v2212_v47 = vunpack.c.h.bf16 %v4498_v25  ;;  %v2510_v56 = vadd.f32 %v2210_v28, %v2209_v14 }
 0x1e6   :  { %v4500_v57 = vpop.eup %4499 }
 0x1e7   :  { %2488 = vadd.xlane.f32.xlu1 %v6166_v10  ;;  %v2213_v5 = vunpack.c.l.bf16 %v4500_v57  ;;  %v2217_v28 = vunpack.c.h.bf16 %v4500_v57  ;;  %v1976_v57 = vld [vmem:[#allocation2 + $0x58] sm:$0xff] }
 0x1eb   :  { %2493 = vadd.xlane.f32.xlu1 %v6171_v41 }
 0x1ef   :  { %2498 = vadd.xlane.f32.xlu1 %v6182_v19 }
 0x1f0   :  { %v2319_v53 = vpop.xlane.xlu0 %2318 }
 0x1f1   :  { %v2324_v40 = vpop.xlane.xlu1 %2323  ;;  %v2611_v4 = vadd.f32 %v2319_v53, %v1971_v8  ;;  %v2501_v8 = vadd.f32 %v2500_v17, %v2203_v12  ;;  %v4502_v17 = vpop.eup %4501 }
 0x1f2   :  { %v2612_v38 = vadd.f32 %v2324_v40, %v1972_v48  ;;  %v1873_v48 = vmul.bf16 1069105081, %v1550_v15  ;;  %v1384_v40 = vpop.f32.mrb[100].mxu1  ;;  %v4504_v1 = vpop.eup %4503 }
 0x1f3   :  { %2676 = vst.msk [vmem:[#allocation2 + $0x30] sm:$0xff] %vm41_vm1, %v2611_v4  ;;  %v6188_v3 = vadd.f32 %v2501_v8, %v2204_v52  ;;  %v1386_v49 = vpop.f32.mrb[101].mxu1  ;;  %v1035_v4 = vpop.f32.mrb[102].mxu0 }
 0x1f4   :  { %2677 = vst.msk [vmem:[#allocation2 + $0x38] sm:$0xff] %vm41_vm1, %v2612_v38  ;;  %v2505_v38 = vadd.f32 %v2206_v51, %v2205_v32  ;;  %4511 = vpow.bf16 %v1873_v48  ;;  %v1388_v42 = vpop.f32.mrb[102].mxu1  ;;  %v1553_v23 = vpack.c.bf16 %v1035_v4, %v1031_v44  ;;  %v1037_v15 = vpop.f32.mrb[103].mxu0  ;;  %v1974_v32 = vld [vmem:[#allocation2 + $0x48] sm:$0xff]  ;;  %v2511_v51 = vadd.f32 %v2510_v56, %v2211_v29 }
 0x1f5   :  { %v2329_v53 = vpop.xlane.xlu0 %2328  ;;  %4513 = vpow.bf16 %v1879_v20  ;;  %v1555_v55 = vpack.c.bf16 %v1388_v42, %v1384_v40  ;;  %v1390_v21 = vpop.f32.mrb[103].mxu1  ;;  %v1554_v35 = vpack.c.bf16 %v1037_v15, %v1033_v6  ;;  %v2214_v20 = vunpack.c.l.bf16 %v4504_v1  ;;  %2503 = vadd.xlane.f32.xlu1 %v6188_v3 }
 0x1f6   :  { %v2613_v12 = vadd.f32 %v2329_v53, %v1973_v39  ;;  %v2506_v0 = vadd.f32 %v2505_v38, %v2207_v30  ;;  %v1556_v9 = vpack.c.bf16 %v1390_v21, %v1386_v49  ;;  %v1882_v48 = vmul.bf16 1069105081, %v1553_v23  ;;  %v4506_v10 = vpop.eup %4505  ;;  %v1041_v40 = vpop.f32.mrb[104].mxu0  ;;  %v1975_v38 = vld [vmem:[#allocation2 + $0x50] sm:$0xff] }
 0x1f7   :  { %v1888_v25 = vmul.bf16 1069105081, %v1555_v55  ;;  %v1885_v44 = vmul.bf16 1069105081, %v1554_v35  ;;  %v6197_v14 = vadd.f32 %v2511_v51, %v2212_v47  ;;  %v2215_v6 = vunpack.c.l.bf16 %v4502_v17  ;;  %v1394_v53 = vpop.f32.mrb[104].mxu1  ;;  %v4508_v21 = vpop.eup %4507 }
 0x1f8   :  { %2678 = vst.msk [vmem:[#allocation2 + $0x40] sm:$0xff] %vm41_vm1, %v2613_v12  ;;  %v6194_v52 = vadd.f32 %v2506_v0, %v2208_v18  ;;  %v1891_v39 = vmul.bf16 1069105081, %v1556_v9  ;;  %4515 = vpow.bf16 %v1882_v48  ;;  %v2515_v49 = vadd.f32 %v2214_v20, %v2213_v5  ;;  %v1043_v18 = vpop.f32.mrb[105].mxu0  ;;  %v1396_v12 = vpop.f32.mrb[105].mxu1 }
 0x1f9   :  { %v2334_v8 = vpop.xlane.xlu0 %2333  ;;  %4517 = vpow.bf16 %v1888_v25  ;;  %v2218_v29 = vunpack.c.h.bf16 %v4504_v1  ;;  %v2216_v42 = vunpack.c.l.bf16 %v4506_v10  ;;  %v1045_v23 = vpop.f32.mrb[106].mxu0  ;;  %v2219_v47 = vunpack.c.h.bf16 %v4502_v17 }
 0x1fa   :  { %v2614_v30 = vadd.f32 %v2334_v8, %v1974_v32  ;;  %4519 = vpow.bf16 %v1885_v44  ;;  %v2516_v0 = vadd.f32 %v2515_v49, %v2215_v6  ;;  %v1398_v55 = vpop.f32.mrb[106].mxu1  ;;  %v1557_v32 = vpack.c.bf16 %v1045_v23, %v1041_v40  ;;  %v1047_v35 = vpop.f32.mrb[107].mxu0  ;;  %2508 = vadd.xlane.f32.xlu1 %v6194_v52 }
 0x1fb   :  { %4521 = vpow.bf16 %v1891_v39  ;;  %v2520_v15 = vadd.f32 %v2218_v29, %v2217_v28  ;;  %v1559_v56 = vpack.c.bf16 %v1398_v55, %v1394_v53  ;;  %v1400_v9 = vpop.f32.mrb[107].mxu1  ;;  %v4510_v5 = vpop.eup %4509  ;;  %v1558_v48 = vpack.c.bf16 %v1047_v35, %v1043_v18  ;;  %v1977_v29 = vld [vmem:[#allocation2 + $0x60] sm:$0xff] }
 0x1fc   :  { %2679 = vst.msk [vmem:[#allocation2 + $0x48] sm:$0xff] %vm41_vm1, %v2614_v30  ;;  %v6201_v1 = vadd.f32 %v2516_v0, %v2216_v42  ;;  %v1560_v25 = vpack.c.bf16 %v1400_v9, %v1396_v12  ;;  %v2225_v8 = vunpack.c.h.bf16 %v4508_v21  ;;  %v1894_v17 = vmul.bf16 1069105081, %v1557_v32  ;;  %v1051_v28 = vpop.f32.mrb[108].mxu0 }
 0x1fd   :  { %v2339_v4 = vpop.xlane.xlu0 %2338  ;;  %v2521_v51 = vadd.f32 %v2520_v15, %v2219_v47  ;;  %v1900_v44 = vmul.bf16 1069105081, %v1559_v56  ;;  %v2220_v30 = vunpack.c.h.bf16 %v4506_v10  ;;  %v2221_v19 = vunpack.c.l.bf16 %v4508_v21  ;;  %v1053_v42 = vpop.f32.mrb[109].mxu0 }
 0x1fe   :  { %v2615_v41 = vadd.f32 %v2339_v4, %v1975_v38  ;;  %v1897_v38 = vmul.bf16 1069105081, %v1558_v48  ;;  %v1903_v6 = vmul.bf16 1069105081, %v1560_v25  ;;  %4523 = vpow.bf16 %v1894_v17  ;;  %v1404_v4 = vpop.f32.mrb[108].mxu1  ;;  %v1055_v32 = vpop.f32.mrb[110].mxu0  ;;  %2513 = vadd.xlane.f32.xlu1 %v6197_v14 }
 0x1ff   :  { %v4512_v20 = vpop.eup %4511  ;;  %v6205_v18 = vadd.f32 %v2521_v51, %v2220_v30  ;;  %4525 = vpow.bf16 %v1900_v44  ;;  %v2227_v10 = vunpack.c.h.bf16 %v4510_v5  ;;  %v2223_v47 = vunpack.c.l.bf16 %v4510_v5  ;;  %v1057_v51 = vpop.f32.mrb[111].mxu0 }
 0x200   :  { %2680 = vst.msk [vmem:[#allocation2 + $0x50] sm:$0xff] %vm41_vm1, %v2615_v41  ;;  %v4514_v40 = vpop.eup %4513  ;;  %v2226_v53 = vunpack.c.h.bf16 %v4512_v20  ;;  %v2222_v12 = vunpack.c.l.bf16 %v4512_v20  ;;  %4527 = vpow.bf16 %v1897_v38  ;;  %v1406_v41 = vpop.f32.mrb[109].mxu1  ;;  %v1561_v48 = vpack.c.bf16 %v1055_v32, %v1051_v28  ;;  %v1978_v20 = vld [vmem:[#allocation2 + $0x68] sm:$0xff] }
 0x201   :  { %v2344_v39 = vpop.xlane.xlu0 %2343  ;;  %v2228_v55 = vunpack.c.h.bf16 %v4514_v40  ;;  %4529 = vpow.bf16 %v1903_v6  ;;  %v1408_v56 = vpop.f32.mrb[110].mxu1  ;;  %v2224_v9 = vunpack.c.l.bf16 %v4514_v40  ;;  %v1562_v5 = vpack.c.bf16 %v1057_v51, %v1053_v42 }
 0x202   :  { %v2616_v49 = vadd.f32 %v2344_v39, %v1976_v57  ;;  %v2530_v0 = vadd.f32 %v2226_v53, %v2225_v8  ;;  %v2525_v15 = vadd.f32 %v2222_v12, %v2221_v19  ;;  %v1563_v25 = vpack.c.bf16 %v1408_v56, %v1404_v4  ;;  %v1410_v8 = vpop.f32.mrb[111].mxu1  ;;  %2518 = vadd.xlane.f32.xlu1 %v6201_v1 }
 0x203   :  { %v4516_v21 = vpop.eup %4515  ;;  %v1564_v30 = vpack.c.bf16 %v1410_v8, %v1406_v41  ;;  %v1906_v6 = vmul.bf16 1069105081, %v1561_v48  ;;  %v1909_v52 = vmul.bf16 1069105081, %v1562_v5 }
 0x204   :  { %2681 = vst.msk [vmem:[#allocation2 + $0x58] sm:$0xff] %vm41_vm1, %v2616_v49  ;;  %v2531_v35 = vadd.f32 %v2530_v0, %v2227_v10  ;;  %v4518_v57 = vpop.eup %4517  ;;  %v2233_v17 = vunpack.c.h.bf16 %v4516_v21  ;;  %v2526_v44 = vadd.f32 %v2525_v15, %v2223_v47  ;;  %v1912_v49 = vmul.bf16 1069105081, %v1563_v25  ;;  %v1061_v10 = vpop.f32.mrb[112].mxu0  ;;  %v1979_v0 = vld [vmem:[#allocation2 + $0x70] sm:$0xff] }
 0x205   :  { %v2349_v23 = vpop.xlane.xlu0 %2348  ;;  %v4520_v39 = vpop.eup %4519  ;;  %v1915_v28 = vmul.bf16 1069105081, %v1564_v30  ;;  %v2235_v4 = vunpack.c.h.bf16 %v4518_v57  ;;  %4531 = vpow.bf16 %v1906_v6  ;;  %v2229_v41 = vunpack.c.l.bf16 %v4516_v21  ;;  %v1980_v30 = vld [vmem:[#allocation2 + $0x78] sm:$0xff] }
 0x206   :  { %v2617_v3 = vadd.f32 %v2349_v23, %v1977_v29  ;;  %v2532_v19 = vadd.f32 %v2531_v35, %v2228_v55  ;;  %v4522_v38 = vpop.eup %4521  ;;  %v2234_v53 = vunpack.c.h.bf16 %v4520_v39  ;;  %v6210_v29 = vadd.f32 %v2526_v44, %v2224_v9  ;;  %v1414_v55 = vpop.f32.mrb[112].mxu1  ;;  %2523 = vadd.xlane.f32.xlu1 %v6205_v18 }
 0x207   :  { %v2230_v23 = vunpack.c.l.bf16 %v4520_v39  ;;  %4533 = vpow.bf16 %v1912_v49  ;;  %v1063_v47 = vpop.f32.mrb[113].mxu0  ;;  %v2236_v15 = vunpack.c.h.bf16 %v4522_v38  ;;  %v2231_v35 = vunpack.c.l.bf16 %v4518_v57 }
 0x208   :  { %2682 = vst.msk [vmem:[#allocation2 + $0x60] sm:$0xff] %vm41_vm1, %v2617_v3  ;;  %2533 = vadd.xlane.f32.xlu0 %v2532_v19  ;;  %v2540_v42 = vadd.f32 %v2234_v53, %v2233_v17  ;;  %4535 = vpow.bf16 %v1909_v52  ;;  %v1416_v3 = vpop.f32.mrb[113].mxu1  ;;  %v1065_v25 = vpop.f32.mrb[114].mxu0  ;;  %v2232_v8 = vunpack.c.l.bf16 %v4522_v38 }
 0x209   :  { %v2354_v40 = vpop.xlane.xlu0 %2353  ;;  %v2535_v9 = vadd.f32 %v2230_v23, %v2229_v41  ;;  %v4524_v48 = vpop.eup %4523  ;;  %4537 = vpow.bf16 %v1915_v28  ;;  %v1982_v23 = vld [vmem:[#allocation2 + $0x88] sm:$0xff] }
 0x20a   :  { %v2618_v12 = vadd.f32 %v2354_v40, %v1978_v20  ;;  %v2541_v56 = vadd.f32 %v2540_v42, %v2235_v4  ;;  %v1418_v51 = vpop.f32.mrb[114].mxu1  ;;  %v4526_v21 = vpop.eup %4525  ;;  %v1565_v20 = vpack.c.bf16 %v1065_v25, %v1061_v10  ;;  %v2241_v40 = vunpack.c.h.bf16 %v4524_v48  ;;  %2528 = vadd.xlane.f32.xlu1 %v6210_v29 }
 0x20b   :  { %v1567_v17 = vpack.c.bf16 %v1418_v51, %v1414_v55  ;;  %v1067_v44 = vpop.f32.mrb[115].mxu0  ;;  %v1420_v39 = vpop.f32.mrb[115].mxu1  ;;  %v2536_v19 = vadd.f32 %v2535_v9, %v2231_v35  ;;  %v2243_v42 = vunpack.c.h.bf16 %v4526_v21  ;;  %v2239_v51 = vunpack.c.l.bf16 %v4526_v21 }
 0x20c   :  { %2683 = vst.msk [vmem:[#allocation2 + $0x68] sm:$0xff] %vm41_vm1, %v2618_v12  ;;  %v2542_v5 = vadd.f32 %v2541_v56, %v2236_v15  ;;  %v4528_v6 = vpop.eup %4527  ;;  %v1566_v57 = vpack.c.bf16 %v1067_v44, %v1063_v47  ;;  %v1568_v49 = vpack.c.bf16 %v1420_v39, %v1416_v3  ;;  %v1918_v52 = vmul.bf16 1069105081, %v1565_v20  ;;  %v1071_v41 = vpop.f32.mrb[116].mxu0 }
 0x20d   :  { %v2359_v32 = vpop.xlane.xlu0 %2358  ;;  %v4530_v53 = vpop.eup %4529  ;;  %v1924_v28 = vmul.bf16 1069105081, %v1567_v17  ;;  %v2537_v12 = vadd.f32 %v2536_v19, %v2232_v8  ;;  %v2242_v1 = vunpack.c.h.bf16 %v4528_v6  ;;  %v2237_v47 = vunpack.c.l.bf16 %v4524_v48 }
 0x20e   :  { %v2619_v14 = vadd.f32 %v2359_v32, %v1979_v0  ;;  %2543 = vadd.xlane.f32.xlu0 %v2542_v5  ;;  %v1921_v4 = vmul.bf16 1069105081, %v1566_v57  ;;  %v1927_v10 = vmul.bf16 1069105081, %v1568_v49  ;;  %4539 = vpow.bf16 %v1918_v52  ;;  %v1424_v3 = vpop.f32.mrb[116].mxu1  ;;  %v1981_v32 = vld [vmem:[#allocation2 + $0x80] sm:$0xff] }
 0x20f   :  { %v2550_v55 = vadd.f32 %v2242_v1, %v2241_v40  ;;  %v2238_v15 = vunpack.c.l.bf16 %v4528_v6  ;;  %4541 = vpow.bf16 %v1924_v28  ;;  %v1073_v56 = vpop.f32.mrb[117].mxu0  ;;  %v2244_v35 = vunpack.c.h.bf16 %v4530_v53  ;;  %v1426_v9 = vpop.f32.mrb[117].mxu1  ;;  %2538 = vadd.xlane.f32.xlu1 %v2537_v12 }
 0x210   :  { %2684 = vst.msk [vmem:[#allocation2 + $0x70] sm:$0xff] %vm41_vm1, %v2619_v14  ;;  %4543 = vpow.bf16 %v1921_v4  ;;  %v4532_v20 = vpop.eup %4531  ;;  %v1075_v44 = vpop.f32.mrb[118].mxu0  ;;  %v2240_v48 = vunpack.c.l.bf16 %v4530_v53 }
 0x211   :  { %v2364_v38 = vpop.xlane.xlu0 %2363  ;;  %v2374_v14 = vpop.xlane.xlu1 %2373  ;;  %v2551_v25 = vadd.f32 %v2550_v55, %v2243_v42  ;;  %v2545_v8 = vadd.f32 %v2238_v15, %v2237_v47  ;;  %4545 = vpow.bf16 %v1927_v10  ;;  %v1984_v15 = vld [vmem:[#allocation2 + $0x98] sm:$0xff] }
 0x212   :  { %v2620_v0 = vadd.f32 %v2364_v38, %v1980_v30  ;;  %v2622_v18 = vadd.f32 %v2374_v14, %v1982_v23  ;;  %v4534_v39 = vpop.eup %4533  ;;  %v1569_v30 = vpack.c.bf16 %v1075_v44, %v1071_v41  ;;  %v1428_v19 = vpop.f32.mrb[118].mxu1  ;;  %v2249_v38 = vunpack.c.h.bf16 %v4532_v20 }
 0x213   :  { %v1077_v6 = vpop.f32.mrb[119].mxu0  ;;  %v2552_v57 = vadd.f32 %v2551_v25, %v2244_v35  ;;  %v2546_v49 = vadd.f32 %v2545_v8, %v2239_v51  ;;  %v4536_v40 = vpop.eup %4535  ;;  %v1571_v21 = vpack.c.bf16 %v1428_v19, %v1424_v3  ;;  %v2251_v41 = vunpack.c.h.bf16 %v4534_v39  ;;  %v1983_v35 = vld [vmem:[#allocation2 + $0x90] sm:$0xff] }
 0x214   :  { %2685 = vst.msk [vmem:[#allocation2 + $0x78] sm:$0xff] %vm41_vm1, %v2620_v0  ;;  %2687 = vst.msk [vmem:[#allocation2 + $0x88] sm:$0xff] %vm41_vm1, %v2622_v18  ;;  %v1570_v52 = vpack.c.bf16 %v1077_v6, %v1073_v56  ;;  %v1430_v28 = vpop.f32.mrb[119].mxu1  ;;  %v4538_v1 = vpop.eup %4537  ;;  %v1930_v53 = vmul.bf16 1069105081, %v1569_v30  ;;  %v2250_v10 = vunpack.c.h.bf16 %v4536_v40  ;;  %v2245_v23 = vunpack.c.l.bf16 %v4532_v20 }
 0x215   :  { %v2369_v17 = vpop.xlane.xlu0 %2368  ;;  %v1572_v4 = vpack.c.bf16 %v1430_v28, %v1426_v9  ;;  %2553 = vadd.xlane.f32.xlu0 %v2552_v57  ;;  %v2547_v29 = vadd.f32 %v2546_v49, %v2240_v48  ;;  %v1936_v0 = vmul.bf16 1069105081, %v1571_v21  ;;  %v1081_v47 = vpop.f32.mrb[120].mxu0  ;;  %v2252_v25 = vunpack.c.h.bf16 %v4538_v1 }
 0x216   :  { %v2621_v5 = vadd.f32 %v2369_v17, %v1981_v32  ;;  %v1933_v42 = vmul.bf16 1069105081, %v1570_v52  ;;  %4547 = vpow.bf16 %v1930_v53  ;;  %v2560_v3 = vadd.f32 %v2250_v10, %v2249_v38  ;;  %v1434_v56 = vpop.f32.mrb[120].mxu1  ;;  %v1083_v14 = vpop.f32.mrb[121].mxu0 }
 0x217   :  { %v1939_v55 = vmul.bf16 1069105081, %v1572_v4  ;;  %v2246_v32 = vunpack.c.l.bf16 %v4536_v40  ;;  %4549 = vpow.bf16 %v1936_v0  ;;  %v1436_v9 = vpop.f32.mrb[121].mxu1  ;;  %v2247_v18 = vunpack.c.l.bf16 %v4534_v39  ;;  %v1085_v12 = vpop.f32.mrb[122].mxu0  ;;  %2548 = vadd.xlane.f32.xlu1 %v2547_v29 }
 0x218   :  { %2686 = vst.msk [vmem:[#allocation2 + $0x80] sm:$0xff] %vm41_vm1, %v2621_v5  ;;  %4551 = vpow.bf16 %v1933_v42  ;;  %v2384_v51 = vpop.xlane.xlu1 %2383  ;;  %v2561_v8 = vadd.f32 %v2560_v3, %v2251_v41  ;;  %v2248_v5 = vunpack.c.l.bf16 %v4538_v1  ;;  %v1573_v6 = vpack.c.bf16 %v1085_v12, %v1081_v47  ;;  %v1438_v57 = vpop.f32.mrb[122].mxu1  ;;  %v1986_v3 = vld [vmem:[#allocation2 + $0xa8] sm:$0xff] }
 0x219   :  { %v2555_v17 = vadd.f32 %v2246_v32, %v2245_v23  ;;  %v4540_v44 = vpop.eup %4539  ;;  %4553 = vpow.bf16 %v1939_v55  ;;  %v2624_v20 = vadd.f32 %v2384_v51, %v1984_v15  ;;  %v2379_v48 = vpop.xlane.xlu0 %2378  ;;  %v1575_v28 = vpack.c.bf16 %v1438_v57, %v1434_v56 }
 0x21a   :  { %v4542_v30 = vpop.eup %4541  ;;  %v2623_v19 = vadd.f32 %v2379_v48, %v1983_v35  ;;  %v1087_v49 = vpop.f32.mrb[123].mxu0  ;;  %v2562_v40 = vadd.f32 %v2561_v8, %v2252_v25  ;;  %v2257_v53 = vunpack.c.h.bf16 %v4540_v44  ;;  %v1942_v10 = vmul.bf16 1069105081, %v1573_v6 }
 0x21b   :  { %v2556_v21 = vadd.f32 %v2555_v17, %v2247_v18  ;;  %v4544_v52 = vpop.eup %4543  ;;  %2689 = vst.msk [vmem:[#allocation2 + $0x98] sm:$0xff] %vm41_vm1, %v2624_v20  ;;  %v1574_v39 = vpack.c.bf16 %v1087_v49, %v1083_v14  ;;  %v1440_v38 = vpop.f32.mrb[123].mxu1  ;;  %v1948_v42 = vmul.bf16 1069105081, %v1575_v28  ;;  %v2259_v23 = vunpack.c.h.bf16 %v4542_v30  ;;  %v1985_v14 = vld [vmem:[#allocation2 + $0xa0] sm:$0xff] }
 0x21c   :  { %v4546_v4 = vpop.eup %4545  ;;  %2688 = vst.msk [vmem:[#allocation2 + $0x90] sm:$0xff] %vm41_vm1, %v2623_v19  ;;  %v1576_v1 = vpack.c.bf16 %v1440_v38, %v1436_v9  ;;  %2563 = vadd.xlane.f32.xlu0 %v2562_v40  ;;  %v2258_v0 = vunpack.c.h.bf16 %v4544_v52  ;;  %v2253_v55 = vunpack.c.l.bf16 %v4540_v44  ;;  %4555 = vpow.bf16 %v1942_v10  ;;  %v1091_v15 = vpop.f32.mrb[124].mxu0 }
 0x21d   :  { %v2557_v29 = vadd.f32 %v2556_v21, %v2248_v5  ;;  %v1945_v41 = vmul.bf16 1069105081, %v1574_v39  ;;  %v2254_v56 = vunpack.c.l.bf16 %v4544_v52  ;;  %4557 = vpow.bf16 %v1948_v42  ;;  %v1444_v35 = vpop.f32.mrb[124].mxu1  ;;  %v1093_v25 = vpop.f32.mrb[125].mxu0 }
 0x21e   :  { %v1951_v47 = vmul.bf16 1069105081, %v1576_v1  ;;  %v2570_v32 = vadd.f32 %v2258_v0, %v2257_v53  ;;  %v2260_v51 = vunpack.c.h.bf16 %v4546_v4  ;;  %v1446_v9 = vpop.f32.mrb[125].mxu1  ;;  %v2255_v17 = vunpack.c.l.bf16 %v4542_v30  ;;  %v1095_v5 = vpop.f32.mrb[126].mxu0 }
 0x21f   :  { %2558 = vadd.xlane.f32.xlu1 %v2557_v29  ;;  %4559 = vpow.bf16 %v1945_v41  ;;  %v2565_v20 = vadd.f32 %v2254_v56, %v2253_v55  ;;  %v2256_v19 = vunpack.c.l.bf16 %v4546_v4  ;;  %v1577_v49 = vpack.c.bf16 %v1095_v5, %v1091_v15  ;;  %v1448_v40 = vpop.f32.mrb[126].mxu1  ;;  %v1097_v21 = vpop.f32.mrb[127].mxu0 }
 0x220   :  { %v2394_v8 = vpop.xlane.xlu1 %2393  ;;  %v2571_v18 = vadd.f32 %v2570_v32, %v2259_v23  ;;  %4561 = vpow.bf16 %v1951_v47  ;;  %v2389_v12 = vpop.xlane.xlu0 %2388  ;;  %v1579_v38 = vpack.c.bf16 %v1448_v40, %v1444_v35  ;;  %v1578_v53 = vpack.c.bf16 %v1097_v21, %v1093_v25  ;;  %v1987_v35 = vld [vmem:[#allocation2 + $0xb0] sm:$0xff] }
 0x221   :  { %v4548_v48 = vpop.eup %4547  ;;  %v2626_v44 = vadd.f32 %v2394_v8, %v1986_v3  ;;  %v2625_v57 = vadd.f32 %v2389_v12, %v1985_v14  ;;  %v2566_v28 = vadd.f32 %v2565_v20, %v2255_v17  ;;  %v1450_v30 = vpop.f32.mrb[127].mxu1  ;;  %v1954_v29 = vmul.bf16 1069105081, %v1577_v49  ;;  %v1988_v3 = vld [vmem:[#allocation2 + $0xb8] sm:$0xff] }
 0x222   :  { %v4550_v6 = vpop.eup %4549  ;;  %v2572_v52 = vadd.f32 %v2571_v18, %v2260_v51  ;;  %v2265_v10 = vunpack.c.h.bf16 %v4548_v48  ;;  %v1580_v0 = vpack.c.bf16 %v1450_v30, %v1446_v9  ;;  %v1960_v41 = vmul.bf16 1069105081, %v1579_v38 }
 0x223   :  { %v4552_v39 = vpop.eup %4551  ;;  %2691 = vst.msk [vmem:[#allocation2 + $0xa8] sm:$0xff] %vm41_vm1, %v2626_v44  ;;  %2690 = vst.msk [vmem:[#allocation2 + $0xa0] sm:$0xff] %vm41_vm1, %v2625_v57  ;;  %v2567_v4 = vadd.f32 %v2566_v28, %v2256_v19  ;;  %v1957_v23 = vmul.bf16 1069105081, %v1578_v53  ;;  %v2267_v55 = vunpack.c.h.bf16 %v4550_v6  ;;  %v2261_v47 = vunpack.c.l.bf16 %v4548_v48 }
 0x224   :  { %v4554_v1 = vpop.eup %4553  ;;  %2573 = vadd.xlane.f32.xlu0 %v2572_v52  ;;  %v2266_v42 = vunpack.c.h.bf16 %v4552_v39  ;;  %4563 = vpow.bf16 %v1954_v29  ;;  %v1963_v15 = vmul.bf16 1069105081, %v1580_v0  ;;  %v2262_v56 = vunpack.c.l.bf16 %v4552_v39  ;;  %v1990_v39 = vld [vmem:[#allocation2 + $0xc8] sm:$0xff] }
 0x225   :  { %2568 = vadd.xlane.f32.xlu1 %v2567_v4  ;;  %4565 = vpow.bf16 %v1960_v41  ;;  %v2268_v14 = vunpack.c.h.bf16 %v4554_v1  ;;  %v2263_v9 = vunpack.c.l.bf16 %v4550_v6  ;;  %v2264_v44 = vunpack.c.l.bf16 %v4554_v1  ;;  %v1989_v1 = vld [vmem:[#allocation2 + $0xc0] sm:$0xff] }
 0x226   :  { %v2580_v32 = vadd.f32 %v2266_v42, %v2265_v10  ;;  %4567 = vpow.bf16 %v1957_v23  ;;  %v2575_v8 = vadd.f32 %v2262_v56, %v2261_v47 }
 0x227   :  { %v2404_v25 = vpop.xlane.xlu1 %2403  ;;  %v4556_v18 = vpop.eup %4555  ;;  %4569 = vpow.bf16 %v1963_v15 }
 0x228   :  { %v2581_v51 = vadd.f32 %v2580_v32, %v2267_v55  ;;  %v2628_v17 = vadd.f32 %v2404_v25, %v1988_v3  ;;  %v2399_v20 = vpop.xlane.xlu0 %2398  ;;  %v4558_v48 = vpop.eup %4557  ;;  %v2576_v19 = vadd.f32 %v2575_v8, %v2263_v9  ;;  %v2273_v57 = vunpack.c.h.bf16 %v4556_v18 }
 0x229   :  { %v2627_v12 = vadd.f32 %v2399_v20, %v1987_v35  ;;  %v2269_v40 = vunpack.c.l.bf16 %v4556_v18  ;;  %v2275_v38 = vunpack.c.h.bf16 %v4558_v48  ;;  %v2271_v30 = vunpack.c.l.bf16 %v4558_v48 }
 0x22a   :  { %v2582_v5 = vadd.f32 %v2581_v51, %v2268_v14  ;;  %v4560_v49 = vpop.eup %4559  ;;  %2693 = vst.msk [vmem:[#allocation2 + $0xb8] sm:$0xff] %vm41_vm1, %v2628_v17  ;;  %v2577_v6 = vadd.f32 %v2576_v19, %v2264_v44  ;;  %v3059_v18 = vmul.f32 1.442695, %v5643_v31  ;;  %v1992_v17 = vld [vmem:[#allocation2 + $0xd8] sm:$0xff]  ;;  %v3057_v19 = vmul.f32 1.442695, %v5647_v27 }
 0x22b   :  { %v4562_v21 = vpop.eup %4561  ;;  %2692 = vst.msk [vmem:[#allocation2 + $0xb0] sm:$0xff] %vm41_vm1, %v2627_v12  ;;  %v2274_v52 = vunpack.c.h.bf16 %v4560_v49  ;;  %v2270_v28 = vunpack.c.l.bf16 %v4560_v49  ;;  %v2819_v31 = vmul.f32 %v5351_v11, %v5345_v50  ;;  %v2820_v11 = vmul.f32 %v5372_v34, %v5366_v59 }
 0x22c   :  { %2583 = vadd.xlane.f32.xlu0 %v2582_v5  ;;  %2578 = vadd.xlane.f32.xlu1 %v2577_v6  ;;  %v2276_v0 = vunpack.c.h.bf16 %v4562_v21  ;;  %v2272_v42 = vunpack.c.l.bf16 %v4562_v21  ;;  %v3251_v5 = vmul.f32 1.442695, %v5652_v24  ;;  %4571 = vpow2.f32 %v3059_v18 }
 0x22d   :  { %v2590_v53 = vadd.f32 %v2274_v52, %v2273_v57  ;;  %v2585_v10 = vadd.f32 %v2270_v28, %v2269_v40  ;;  %v1991_v57 = vld [vmem:[#allocation2 + $0xd0] sm:$0xff]  ;;  %4573 = vpow2.f32 %v3057_v19  ;;  %v2887_v50 = vsel %vm554_vm0, %v2819_v31, 0.0 }
 0x22e   :  { %v2414_v29 = vpop.xlane.xlu1 %2413  ;;  %v2409_v47 = vpop.xlane.xlu0 %2408  ;;  %4575 = vpow2.f32 %v3251_v5  ;;  %v2890_v59 = vsel %vm554_vm0, %v2820_v11, 0.0  ;;  %v2822_v34 = vmul.f32 %v5426_v22, %v5416_v63  ;;  %v6846_v22 = vld [vmem:[#allocation5_spill] sm:$0xff]  ;;  %v1998_v11 = vld [vmem:[#allocation2 + $0x108] sm:$0xff] }
 0x22f   :  { %v2591_v4 = vadd.f32 %v2590_v53, %v2275_v38  ;;  %v2586_v41 = vadd.f32 %v2585_v10, %v2271_v30  ;;  %v4564_v23 = vpop.eup %4563  ;;  %v2630_v55 = vadd.f32 %v2414_v29, %v1990_v39  ;;  %v2629_v3 = vadd.f32 %v2409_v47, %v1989_v1  ;;  %v6862_v31 = vld [vmem:[#allocation13_spill] sm:$0xff] }
 0x230   :  { %v4566_v15 = vpop.eup %4565  ;;  %v2281_v35 = vunpack.c.h.bf16 %v4564_v23  ;;  %v2277_v25 = vunpack.c.l.bf16 %v4564_v23  ;;  %v2818_v38 = vmul.f32 %v5324_v58, %v5312_v43  ;;  %v3249_v53 = vmul.f32 1.442695, %v5657_v46  ;;  %v6848_v23 = vld [vmem:[#allocation3_spill] sm:$0xff] }
 0x231   :  { %v2592_v32 = vadd.f32 %v2591_v4, %v2276_v0  ;;  %v2587_v56 = vadd.f32 %v2586_v41, %v2272_v42  ;;  %v4568_v14 = vpop.eup %4567  ;;  %2695 = vst.msk [vmem:[#allocation2 + $0xc8] sm:$0xff] %vm41_vm1, %v2630_v55  ;;  %2694 = vst.msk [vmem:[#allocation2 + $0xc0] sm:$0xff] %vm41_vm1, %v2629_v3  ;;  %v2283_v20 = vunpack.c.h.bf16 %v4566_v15  ;;  %v2279_v48 = vunpack.c.l.bf16 %v4566_v15  ;;  %v6849_v55 = vld [vmem:[#allocation4_spill] sm:$0xff]  ;;  %v6850_v15 = vld [vmem:[#allocation18_spill] sm:$0xff] }
 0x232   :  { %v4570_v51 = vpop.eup %4569  ;;  %v2282_v9 = vunpack.c.h.bf16 %v4568_v14  ;;  %v2278_v8 = vunpack.c.l.bf16 %v4568_v14  ;;  %v3253_v10 = vmul.f32 1.442695, %v5661_v2  ;;  %v3061_v1 = vmul.f32 1.442695, %v5663_v26  ;;  %v1993_v2 = vld [vmem:[#allocation2 + $0xe0] sm:$0xff] }
 0x233   :  { %2593 = vadd.xlane.f32.xlu0 %v2592_v32  ;;  %2588 = vadd.xlane.f32.xlu1 %v2587_v56  ;;  %v2284_v40 = vunpack.c.h.bf16 %v4570_v51  ;;  %v2280_v6 = vunpack.c.l.bf16 %v4570_v51  ;;  %v2884_v43 = vsel %vm554_vm0, %v2818_v38, 0.0  ;;  %v2821_v58 = vmul.f32 %v5405_v62, %v5397_v54 }
 0x234   :  { %v2600_v44 = vadd.f32 %v2282_v9, %v2281_v35  ;;  %v2595_v12 = vadd.f32 %v2278_v8, %v2277_v25  ;;  %v2424_v49 = vpop.xlane.xlu1 %2423  ;;  %v2419_v39 = vpop.xlane.xlu0 %2418  ;;  %v3255_v46 = vmul.f32 1.442695, %v5673_v7  ;;  %4577 = vpow2.f32 %v3249_v53  ;;  %v6852_v35 = vld [vmem:[#allocation20_spill] sm:$0xff]  ;;  %v6853_v25 = vld [vmem:[#allocation21_spill] sm:$0xff]  ;;  %v6863_v53 = vld [vmem:[#allocation11_spill] sm:$0xff] }
 0x235   :  { %v2632_v28 = vadd.f32 %v2424_v49, %v1992_v17  ;;  %v2631_v24 = vadd.f32 %v2419_v39, %v1991_v57  ;;  %4579 = vpow2.f32 %v3253_v10  ;;  %v3063_v26 = vmul.f32 1.442695, %v5675_v16  ;;  %v6854_v17 = vld [vmem:[#allocation10_spill] sm:$0xff] }
 0x236   :  { %v2601_v21 = vadd.f32 %v2600_v44, %v2283_v20  ;;  %v2596_v52 = vadd.f32 %v2595_v12, %v2279_v48  ;;  %v3065_v29 = vmul.f32 1.442695, %v5685_v36  ;;  %4581 = vpow2.f32 %v3061_v1  ;;  %v6257_v16 = vpop.eup %4571  ;;  %v6855_v20 = vld [vmem:[#allocation9_spill] sm:$0xff]  ;;  %v6856_v48 = vld [vmem:[#allocation7_spill] sm:$0xff]  ;;  %v6857_v12 = vld [vmem:[#allocation8_spill] sm:$0xff] }
 0x237   :  { %2697 = vst.msk [vmem:[#allocation2 + $0xd8] sm:$0xff] %vm41_vm1, %v2632_v28  ;;  %2696 = vst.msk [vmem:[#allocation2 + $0xd0] sm:$0xff] %vm41_vm1, %v2631_v24  ;;  %v2823_v4 = vmul.f32 %v5455_v60, %v5447_v33  ;;  %v2893_v62 = vsel %vm554_vm0, %v2821_v58, 0.0  ;;  %4583 = vpow2.f32 %v3255_v46  ;;  %v3257_v7 = vmul.f32 1.442695, %v5687_v13  ;;  %v6262_v60 = vpop.eup %4573  ;;  %v6847_v13 = vld [vmem:[#allocation6_spill] sm:$0xff] }
 0x238   :  { %v2602_v30 = vadd.f32 %v2601_v21, %v2284_v40  ;;  %v2597_v27 = vadd.f32 %v2596_v52, %v2280_v6  ;;  %v3259_v36 = vmul.f32 1.442695, %v5691_v61  ;;  %4585 = vpow2.f32 %v3063_v26  ;;  %v6270_v47 = vpop.eup %4575  ;;  %v6858_v57 = vld [vmem:[#allocation22_spill] sm:$0xff]  ;;  %v6859_v40 = vld [vmem:[#allocation23_spill] sm:$0xff]  ;;  %v6860_v52 = vld [vmem:[#allocation24_spill] sm:$0xff] }
 0x239   :  { %4587 = vpow2.f32 %v3065_v29  ;;  %v3067_v33 = vmul.f32 1.442695, %v5697_v37  ;;  %v2899_v42 = vsel %vm554_vm0, %v2823_v4, 0.0  ;;  %v2896_v63 = vsel %vm554_vm0, %v2822_v34, 0.0  ;;  %v6851_v37 = vld [vmem:[#allocation19_spill] sm:$0xff]  ;;  %v6861_v39 = vld [vmem:[#allocation14_spill] sm:$0xff] }
 0x23a   :  { %2603 = vadd.xlane.f32.xlu0 %v2602_v30  ;;  %2598 = vadd.xlane.f32.xlu1 %v2597_v27  ;;  %v2825_v41 = vmul.f32 %v6847_v13, %v6846_v22  ;;  %v2824_v61 = vmul.f32 %v6849_v55, %v6848_v23  ;;  %v3069_v3 = vmul.f32 1.442695, %v6850_v15  ;;  %4589 = vpow2.f32 %v3257_v7  ;;  %v6864_v24 = vld [vmem:[#allocation12_spill] sm:$0xff]  ;;  %v1997_v46 = vld [vmem:[#allocation2 + $0x100] sm:$0xff]  ;;  %v6870_v13 = vld [vmem:[#allocation17_spill] sm:$0xff] }
 0x23b   :  { %4591 = vpow2.f32 %v3259_v36  ;;  %v3261_v32 = vmul.f32 1.442695, %v6851_v37  ;;  %v3263_v14 = vmul.f32 1.442695, %v6852_v35  ;;  %v3071_v51 = vmul.f32 1.442695, %v6853_v25 }
 0x23c   :  { %v2429_v0 = vpop.xlane.xlu0 %2428  ;;  %4593 = vpow2.f32 %v3067_v33  ;;  %v2905_v8 = vsel %vm554_vm0, %v2825_v41, 0.0  ;;  %v2902_v18 = vsel %vm554_vm0, %v2824_v61, 0.0  ;;  %v2827_v44 = vmul.f32 %v6855_v20, %v6854_v17  ;;  %v6871_v41 = vld [vmem:[#allocation81_spill] sm:$0xff]  ;;  %v6872_v61 = vld [vmem:[#allocation28_spill] sm:$0xff]  ;;  %v6874_v35 = vld [vmem:[#allocation30_spill] sm:$0xff] }
 0x23d   :  { %v2633_v54 = vadd.f32 %v2429_v0, %v1993_v2  ;;  %v2826_v5 = vmul.f32 %v6857_v12, %v6856_v48  ;;  %4595 = vpow2.f32 %v3069_v3  ;;  %v3073_v49 = vmul.f32 1.442695, %v6858_v57  ;;  %v6866_v2 = vld [vmem:[#allocation26_spill] sm:$0xff]  ;;  %v6867_v0 = vld [vmem:[#allocation27_spill] sm:$0xff]  ;;  %v6873_v3 = vld [vmem:[#allocation29_spill] sm:$0xff] }
 0x23e   :  { %2888 = vadd.xlane.f32.xlu0 %v2887_v50  ;;  %2885 = vadd.xlane.f32.xlu1 %v2884_v43  ;;  %v6274_v56 = vpop.eup %4577  ;;  %4597 = vpow2.f32 %v3261_v32  ;;  %v3265_v21 = vmul.f32 1.442695, %v6859_v40  ;;  %v3267_v28 = vmul.f32 1.442695, %v6860_v52  ;;  %v2829_v38 = vmul.f32 %v6862_v31, %v6861_v39  ;;  %v6865_v43 = vld [vmem:[#allocation25_spill] sm:$0xff]  ;;  %v6876_v20 = vld [vmem:[#allocation83_spill] sm:$0xff] }
 0x23f   :  { %2698 = vst.msk [vmem:[#allocation2 + $0xe0] sm:$0xff] %vm41_vm1, %v2633_v54  ;;  %v6278_v9 = vpop.eup %4579  ;;  %4599 = vpow2.f32 %v3263_v14  ;;  %v2828_v30 = vmul.f32 %v6864_v24, %v6863_v53  ;;  %v2911_v10 = vsel %vm554_vm0, %v2827_v44, 0.0  ;;  %v2908_v1 = vsel %vm554_vm0, %v2826_v5, 0.0  ;;  %v6877_v12 = vld [vmem:[#allocation32_spill] sm:$0xff]  ;;  %v2000_v57 = vld [vmem:[#allocation2 + $0x118] sm:$0xff]  ;;  %v6878_v40 = vld [vmem:[#allocation33_spill] sm:$0xff] }
 0x240   :  { %v6286_v19 = vpop.eup %4581  ;;  %4601 = vpow2.f32 %v3071_v51  ;;  %v3075_v58 = vmul.f32 1.442695, %v6865_v43  ;;  %v3077_v26 = vmul.f32 1.442695, %v6866_v2  ;;  %v3269_v4 = vmul.f32 1.442695, %v6867_v0 }
 0x241   :  { %v6290_v6 = vpop.eup %4583  ;;  %4603 = vpow2.f32 %v3073_v49  ;;  %v2914_v34 = vsel %vm554_vm0, %v2828_v30, 0.0  ;;  %v2831_v23 = vmul.f32 %v6871_v41, %v6870_v13  ;;  %v3079_v15 = vmul.f32 1.442695, %v6872_v61  ;;  %v6875_v51 = vld [vmem:[#allocation31_spill] sm:$0xff]  ;;  %v1999_v30 = vld [vmem:[#allocation2 + $0x110] sm:$0xff]  ;;  %v6881_v43 = vld [vmem:[#allocation36_spill] sm:$0xff] }
 0x242   :  { %2894 = vadd.xlane.f32.xlu0 %v2893_v62  ;;  %2891 = vadd.xlane.f32.xlu1 %v2890_v59  ;;  %v6297_v27 = vpop.eup %4585  ;;  %4605 = vpow2.f32 %v3265_v21  ;;  %v2917_v59 = vsel %vm554_vm0, %v2829_v38, 0.0  ;;  %v3271_v37 = vmul.f32 1.442695, %v6873_v3  ;;  %v3081_v14 = vmul.f32 1.442695, %v6874_v35  ;;  %v6880_v38 = vld [vmem:[#allocation35_spill] sm:$0xff] }
 0x243   :  { %v6301_v50 = vpop.eup %4587  ;;  %4607 = vpow2.f32 %v3267_v28  ;;  %v2923_v17 = vsel %vm554_vm0, %v2831_v23, 0.0  ;;  %v2832_v44 = vmul.f32 %v6152_v45, %v6876_v20  ;;  %v3083_v5 = vmul.f32 1.442695, %v6877_v12  ;;  %v6879_v28 = vld [vmem:[#allocation34_spill] sm:$0xff]  ;;  %v6887_v23 = vld [vmem:[#allocation45_spill] sm:$0xff]  ;;  %v2001_v3 = vld [vmem:[#allocation2 + $0x120] sm:$0xff] }
 0x244   :  { %v6305_v29 = vpop.eup %4589  ;;  %4609 = vpow2.f32 %v3075_v58  ;;  %v3275_v21 = vmul.f32 1.442695, %v6878_v40  ;;  %v3085_v39 = vmul.f32 1.442695, %v6879_v28  ;;  %v3277_v53 = vmul.f32 1.442695, %v6880_v38 }
 0x245   :  { %v6310_v7 = vpop.eup %4591  ;;  %4611 = vpow2.f32 %v3077_v26  ;;  %v3087_v58 = vmul.f32 1.442695, %v6881_v43  ;;  %v6883_v0 = vld [vmem:[#allocation38_spill] sm:$0xff]  ;;  %v3093_v61 = vmul.f32 1.442695, %v6887_v23  ;;  %v6890_v12 = vld [vmem:[#allocation49_spill] sm:$0xff] }
 0x246   :  { %2900 = vadd.xlane.f32.xlu0 %v2899_v42  ;;  %2897 = vadd.xlane.f32.xlu1 %v2896_v63  ;;  %v6868_v42 = vld [vmem:[#allocation15_spill] sm:$0xff]  ;;  %v6869_v63 = vld [vmem:[#allocation16_spill] sm:$0xff]  ;;  %v6316_v55 = vpop.eup %4593  ;;  %4613 = vpow2.f32 %v3269_v4  ;;  %v3089_v4 = vmul.f32 1.442695, %v6883_v0  ;;  %v6888_v35 = vld [vmem:[#allocation46_spill] sm:$0xff] }
 0x247   :  { %v2830_v22 = vmul.f32 %v6869_v63, %v6868_v42  ;;  %v6322_v32 = vpop.eup %4595  ;;  %4615 = vpow2.f32 %v3079_v15  ;;  %v2002_v63 = vld [vmem:[#allocation2 + $0x128] sm:$0xff] }
 0x248   :  { %v6325_v25 = vpop.eup %4597  ;;  %4617 = vpow2.f32 %v3271_v37 }
 0x249   :  { %v6332_v48 = vpop.eup %4599  ;;  %4619 = vpow2.f32 %v3081_v14  ;;  %v3285_v14 = vmul.f32 1.442695, %v6888_v35 }
 0x24a   :  { %2906 = vadd.xlane.f32.xlu0 %v2905_v8  ;;  %2903 = vadd.xlane.f32.xlu1 %v2902_v18  ;;  %v2454_v54 = vpop.xlane.xlu0 %2453  ;;  %v2449_v62 = vpop.xlane.xlu1 %2448  ;;  %v3273_v8 = vmul.f32 1.442695, %v6875_v51  ;;  %v2920_v18 = vsel %vm554_vm0, %v2830_v22, 0.0  ;;  %v6886_v22 = vld [vmem:[#allocation43_spill] sm:$0xff] }
 0x24b   :  { %v2638_v36 = vadd.f32 %v2454_v54, %v1998_v11  ;;  %v2637_v33 = vadd.f32 %v2449_v62, %v1997_v46  ;;  %v6335_v49 = vpop.eup %4601  ;;  %v6882_v11 = vld [vmem:[#allocation37_spill] sm:$0xff]  ;;  %v3283_v13 = vmul.f32 1.442695, %v6886_v22  ;;  %v6897_v22 = vld [vmem:[#allocation60_spill] sm:$0xff] }
 0x24c   :  { %v6338_v52 = vpop.eup %4603  ;;  %4621 = vpow2.f32 %v3273_v8  ;;  %v3279_v46 = vmul.f32 1.442695, %v6882_v11 }
 0x24d   :  { %2703 = vst.msk [vmem:[#allocation2 + $0x108] sm:$0xff] %vm41_vm1, %v2638_v36  ;;  %2702 = vst.msk [vmem:[#allocation2 + $0x100] sm:$0xff] %vm41_vm1, %v2637_v33  ;;  %v6341_v45 = vpop.eup %4605  ;;  %4623 = vpow2.f32 %v3083_v5  ;;  %v6885_v33 = vld [vmem:[#allocation42_spill] sm:$0xff]  ;;  %v3287_v5 = vmul.f32 1.442695, %v6890_v12  ;;  %v6900_v12 = vld [vmem:[#allocation63_spill] sm:$0xff] }
 0x24e   :  { %2912 = vadd.xlane.f32.xlu0 %v2911_v10  ;;  %2909 = vadd.xlane.f32.xlu1 %v2908_v1  ;;  %v2926_v10 = vsel %vm554_vm0, %v2832_v44, 0.0  ;;  %v6345_v1 = vpop.eup %4607  ;;  %4625 = vpow2.f32 %v3275_v21  ;;  %v3091_v42 = vmul.f32 1.442695, %v6885_v33  ;;  %v6891_v21 = vld [vmem:[#allocation51_spill] sm:$0xff] }
 0x24f   :  { %v6350_v26 = vpop.eup %4609  ;;  %4627 = vpow2.f32 %v3085_v39  ;;  %v3097_v28 = vmul.f32 1.442695, %v6891_v21 }
 0x250   :  { %v6353_v62 = vpop.eup %4611  ;;  %4629 = vpow2.f32 %v3277_v53 }
 0x251   :  { %v2464_v31 = vpop.xlane.xlu0 %2463  ;;  %v6356_v36 = vpop.eup %4613  ;;  %4631 = vpow2.f32 %v3087_v58  ;;  %v6894_v58 = vld [vmem:[#allocation55_spill] sm:$0xff] }
 0x252   :  { %2918 = vadd.xlane.f32.xlu0 %v2917_v59  ;;  %2915 = vadd.xlane.f32.xlu1 %v2914_v34  ;;  %v2640_v24 = vadd.f32 %v2464_v31, %v2000_v57  ;;  %v2459_v2 = vpop.xlane.xlu1 %2458  ;;  %v6884_v59 = vld [vmem:[#allocation39_spill] sm:$0xff]  ;;  %4633 = vpow2.f32 %v3279_v46  ;;  %v6361_v41 = vpop.eup %4615  ;;  %v6892_v31 = vld [vmem:[#allocation52_spill] sm:$0xff]  ;;  %v3291_v11 = vmul.f32 1.442695, %v6894_v58 }
 0x253   :  { %v2639_v54 = vadd.f32 %v2459_v2, %v1999_v30  ;;  %v3281_v34 = vmul.f32 1.442695, %v6884_v59  ;;  %4635 = vpow2.f32 %v3089_v4  ;;  %v6364_v37 = vpop.eup %4617  ;;  %v3289_v38 = vmul.f32 1.442695, %v6892_v31  ;;  %v6895_v2 = vld [vmem:[#allocation58_spill] sm:$0xff]  ;;  %v6896_v59 = vld [vmem:[#allocation57_spill] sm:$0xff] }
 0x254   :  { %2705 = vst.msk [vmem:[#allocation2 + $0x118] sm:$0xff] %vm41_vm1, %v2640_v24  ;;  %v6367_v8 = vpop.eup %4619  ;;  %v6893_v24 = vld [vmem:[#allocation54_spill] sm:$0xff]  ;;  %v3293_v0 = vmul.f32 1.442695, %v6895_v2 }
 0x255   :  { %2704 = vst.msk [vmem:[#allocation2 + $0x110] sm:$0xff] %vm41_vm1, %v2639_v54  ;;  %4637 = vpow2.f32 %v3281_v34  ;;  %v3099_v30 = vmul.f32 1.442695, %v6893_v24  ;;  %v3101_v34 = vmul.f32 1.442695, %v6896_v59  ;;  %v6902_v24 = vld [vmem:[#allocation67_spill] sm:$0xff] }
 0x256   :  { %2921 = vadd.xlane.f32.xlu1 %v2920_v18  ;;  %2924 = vadd.xlane.f32.xlu0 %v2923_v17  ;;  %4639 = vpow2.f32 %v3091_v42  ;;  %v6889_v18 = vld [vmem:[#allocation48_spill] sm:$0xff]  ;;  %v6370_v44 = vpop.eup %4621  ;;  %v2003_v42 = vld [vmem:[#allocation2 + $0x130] sm:$0xff] }
 0x257   :  { %v3095_v17 = vmul.f32 1.442695, %v6889_v18  ;;  %4641 = vpow2.f32 %v3283_v13  ;;  %v6374_v40 = vpop.eup %4623  ;;  %v3103_v13 = vmul.f32 1.442695, %v6897_v22  ;;  %v6906_v22 = vld [vmem:[#allocation72_spill] sm:$0xff] }
 0x258   :  { %v2474_v15 = vpop.xlane.xlu0 %2473  ;;  %4643 = vpow2.f32 %v3093_v61  ;;  %v6377_v39 = vpop.eup %4625  ;;  %v6898_v61 = vld [vmem:[#allocation61_spill] sm:$0xff] }
 0x259   :  { %v2642_v51 = vadd.f32 %v2474_v15, %v2002_v63  ;;  %v2469_v20 = vpop.xlane.xlu1 %2468  ;;  %4645 = vpow2.f32 %v3285_v14  ;;  %v6381_v53 = vpop.eup %4627  ;;  %v3295_v15 = vmul.f32 1.442695, %v6898_v61  ;;  %v6899_v14 = vld [vmem:[#allocation64_spill] sm:$0xff]  ;;  %v1995_v61 = vld [vmem:[#allocation2 + $0xf0] sm:$0xff] }
 0x25a   :  { %2927 = vadd.xlane.f32.xlu1 %v2926_v10  ;;  %v2641_v57 = vadd.f32 %v2469_v20, %v2001_v3  ;;  %4647 = vpow2.f32 %v3095_v17  ;;  %v2004_v10 = vld [vmem:[#allocation2 + $0x138] sm:$0xff]  ;;  %v6384_v43 = vpop.eup %4629 }
 0x25b   :  { %2707 = vst.msk [vmem:[#allocation2 + $0x128] sm:$0xff] %vm41_vm1, %v2642_v51  ;;  %4649 = vpow2.f32 %v3287_v5  ;;  %v6387_v46 = vpop.eup %4631  ;;  %v3297_v51 = vmul.f32 1.442695, %v6899_v14  ;;  %v3105_v5 = vmul.f32 1.442695, %v6900_v12  ;;  %v6910_v12 = vld [vmem:[#allocation76_spill] sm:$0xff] }
 0x25c   :  { %2706 = vst.msk [vmem:[#allocation2 + $0x120] sm:$0xff] %vm41_vm1, %v2641_v57  ;;  %4651 = vpow2.f32 %v3097_v28  ;;  %v6390_v54 = vpop.eup %4633  ;;  %v1994_v57 = vld [vmem:[#allocation2 + $0xe8] sm:$0xff]  ;;  %v6901_v28 = vld [vmem:[#allocation66_spill] sm:$0xff] }
 0x25d   :  { %4653 = vpow2.f32 %v3289_v38  ;;  %v6393_v63 = vpop.eup %4635  ;;  %v3107_v31 = vmul.f32 1.442695, %v6901_v28 }
 0x25e   :  { %4655 = vpow2.f32 %v3099_v30  ;;  %v3299_v30 = vmul.f32 1.442695, %v6902_v24 }
 0x25f   :  { %v2484_v4 = vpop.xlane.xlu0 %2483  ;;  %v6396_v23 = vpop.eup %4637  ;;  %4657 = vpow2.f32 %v3291_v11  ;;  %v6903_v11 = vld [vmem:[#allocation70_spill] sm:$0xff] }
 0x260   :  { %v2644_v33 = vadd.f32 %v2484_v4, %v2004_v10  ;;  %v2479_v3 = vpop.xlane.xlu1 %2478  ;;  %v6400_v35 = vpop.eup %4639  ;;  %4659 = vpow2.f32 %v3293_v0  ;;  %v3301_v2 = vmul.f32 1.442695, %v6903_v11 }
 0x261   :  { %v2643_v18 = vadd.f32 %v2479_v3, %v2003_v42  ;;  %v6405_v20 = vpop.eup %4641  ;;  %4661 = vpow2.f32 %v3101_v34  ;;  %v6905_v34 = vld [vmem:[#allocation69_spill] sm:$0xff] }
 0x262   :  { %2709 = vst.msk [vmem:[#allocation2 + $0x138] sm:$0xff] %vm41_vm1, %v2644_v33  ;;  %v6408_v21 = vpop.eup %4643  ;;  %4663 = vpow2.f32 %v3103_v13  ;;  %v3109_v33 = vmul.f32 1.442695, %v6905_v34  ;;  %v3111_v13 = vmul.f32 1.442695, %v6906_v22  ;;  %v6908_v3 = vld [vmem:[#allocation73_spill] sm:$0xff] }
 0x263   :  { %v6403_v17 = vpop.xlane.xlu0 %3244  ;;  %2708 = vst.msk [vmem:[#allocation2 + $0x130] sm:$0xff] %vm41_vm1, %v2643_v18  ;;  %v6412_v38 = vpop.eup %4645  ;;  %4665 = vpow2.f32 %v3295_v15  ;;  %v3303_v14 = vmul.f32 1.442695, %v6908_v3  ;;  %v3313_v34 = vld [vmem:[#allocation2] sm:$0xff] }
 0x264   :  { %v2434_v10 = vpop.xlane.xlu1 %2433  ;;  %v6415_v58 = vpop.eup %4647  ;;  %4667 = vpow2.f32 %v3297_v51  ;;  %v6915_v3 = vld [vmem:[#allocation79_spill] sm:$0xff] }
 0x265   :  { %v2634_v0 = vadd.f32 %v2434_v10, %v1994_v57  ;;  %v6420_v59 = vpop.eup %4649  ;;  %4669 = vpow2.f32 %v3105_v5  ;;  %v3305_v5 = vmul.f32 1.442695, %v6910_v12 }
 0x266   :  { %6904 = vst [vmem:[#allocation5_spill] sm:$0xff] %v6420_v59  ;;  %v6423_v42 = vpop.eup %4651  ;;  %4671 = vpow2.f32 %v3107_v31  ;;  %v6912_v31 = vld [vmem:[#allocation75_spill] sm:$0xff] }
 0x267   :  { %v6418_v4 = vpop.xlane.xlu0 %3055  ;;  %2699 = vst.msk [vmem:[#allocation2 + $0xe8] sm:$0xff] %vm41_vm1, %v2634_v0  ;;  %v6427_v15 = vpop.eup %4653  ;;  %4673 = vpow2.f32 %v3299_v30  ;;  %v3113_v24 = vmul.f32 1.442695, %v6912_v31  ;;  %v6914_v30 = vld [vmem:[#allocation78_spill] sm:$0xff]  ;;  %v3315_v31 = vld [vmem:[#allocation2 + $0x10] sm:$0xff] }
 0x268   :  { %6907 = vst [vmem:[#allocation6_spill] sm:$0xff] %v6427_v15  ;;  %v6430_v51 = vpop.xlane.xlu1 %2879  ;;  %v6432_v18 = vpop.eup %4655  ;;  %4675 = vpow2.f32 %v3301_v2  ;;  %v3115_v0 = vmul.f32 1.442695, %v6914_v30  ;;  %v3307_v2 = vmul.f32 1.442695, %v6915_v3  ;;  %v3377_v30 = vsub.f32 %v3313_v34, %v6262_v60  ;;  %v3317_v3 = vld [vmem:[#allocation2 + $0x20] sm:$0xff] }
 0x269   :  { %6909 = vst [vmem:[#allocation3_spill] sm:$0xff] %v6430_v51  ;;  %v6435_v28 = vpop.eup %4657  ;;  %4677 = vpow2.f32 %v3109_v33  ;;  %v3314_v51 = vld [vmem:[#allocation2 + $0x8] sm:$0xff] }
 0x26a   :  { %6911 = vst [vmem:[#allocation4_spill] sm:$0xff] %v6435_v28  ;;  %v6438_v11 = vpop.eup %4659  ;;  %4679 = vpow2.f32 %v3111_v13  ;;  %v3331_v28 = vld [vmem:[#allocation2 + $0x90] sm:$0xff] }
 0x26b   :  { %v2439_v57 = vpop.xlane.xlu0 %2438  ;;  %6913 = vst [vmem:[#allocation18_spill] sm:$0xff] %v6438_v11  ;;  %v6441_v22 = vpop.eup %4661  ;;  %4681 = vpow2.f32 %v3303_v14  ;;  %v3316_v11 = vld [vmem:[#allocation2 + $0x18] sm:$0xff] }
 0x26c   :  { %v2635_v10 = vadd.f32 %v2439_v57, %v1995_v61  ;;  %v6445_v12 = vpop.xlane.xlu1 %3247  ;;  %v6447_v33 = vpop.eup %4663  ;;  %4683 = vpow2.f32 %v3305_v5  ;;  %v6917_v61 = vld [vmem:[#allocation82_spill] sm:$0xff]  ;;  %v3379_v5 = vsub.f32 %v3315_v31, %v6286_v19  ;;  %v3380_v60 = vsub.f32 %v3316_v11, %v6297_v27  ;;  %v3321_v11 = vld [vmem:[#allocation2 + $0x40] sm:$0xff] }
 0x26d   :  { %6916 = vst [vmem:[#allocation19_spill] sm:$0xff] %v6445_v12  ;;  %v3117_v57 = vmul.f32 1.442695, %v6917_v61  ;;  %v6450_v13 = vpop.eup %4665  ;;  %4685 = vpow2.f32 %v3113_v24  ;;  %v1996_v14 = vld [vmem:[#allocation2 + $0xf8] sm:$0xff]  ;;  %v3318_v24 = vld [vmem:[#allocation2 + $0x28] sm:$0xff]  ;;  %v3395_v19 = vsub.f32 %v3331_v28, %v6408_v21  ;;  %v3323_v21 = vld [vmem:[#allocation2 + $0x50] sm:$0xff] }
 0x26e   :  { %2700 = vst.msk [vmem:[#allocation2 + $0xf0] sm:$0xff] %vm41_vm1, %v2635_v10  ;;  %6918 = vst [vmem:[#allocation20_spill] sm:$0xff] %v6450_v13  ;;  %v6453_v15 = vpop.eup %4667  ;;  %4687 = vpow2.f32 %v3115_v0  ;;  %v3378_v10 = vsub.f32 %v3314_v51, %v6257_v16  ;;  %v3381_v16 = vsub.f32 %v3317_v3, %v6301_v50  ;;  %v2005_v51 = vld [vmem:[#allocation2 + $0x140] sm:$0xff]  ;;  %v3319_v0 = vld [vmem:[#allocation2 + $0x30] sm:$0xff]  ;;  %v3382_v31 = vsub.f32 %v3318_v24, %v6316_v55 }
 0x26f   :  { %6919 = vst [vmem:[#allocation21_spill] sm:$0xff] %v6453_v15  ;;  %v6456_v12 = vpop.eup %4669  ;;  %4689 = vpow2.f32 %v3307_v2  ;;  %v3320_v2 = vld [vmem:[#allocation2 + $0x38] sm:$0xff]  ;;  %v3383_v3 = vsub.f32 %v3319_v0, %v6322_v32  ;;  %v3385_v55 = vsub.f32 %v3321_v11, %v6338_v52  ;;  %v3345_v24 = vld [vmem:[#allocation2 + $0x100] sm:$0xff]  ;;  %v2007_v52 = vld [vmem:[#allocation2 + $0x150] sm:$0xff] }
 0x270   :  { %v2444_v61 = vpop.xlane.xlu1 %2443  ;;  %v6459_v59 = vpop.eup %4671  ;;  %4691 = vpow2.f32 %v3117_v57  ;;  %v3384_v28 = vsub.f32 %v3320_v2, %v6335_v49  ;;  %v3387_v49 = vsub.f32 %v3323_v21, %v6353_v62 }
 0x271   :  { %v2636_v34 = vadd.f32 %v2444_v61, %v1996_v14  ;;  %v6462_v13 = vpop.eup %4673  ;;  %4693 = vlog2.f32 %v3377_v30  ;;  %v3322_v14 = vld [vmem:[#allocation2 + $0x48] sm:$0xff] }
 0x272   :  { %v6465_v15 = vpop.eup %4675  ;;  %4695 = vlog2.f32 %v3378_v10  ;;  %v2006_v61 = vld [vmem:[#allocation2 + $0x148] sm:$0xff]  ;;  %v3386_v32 = vsub.f32 %v3322_v14, %v6350_v26  ;;  %v3325_v26 = vld [vmem:[#allocation2 + $0x60] sm:$0xff] }
 0x273   :  { %6920 = vst [vmem:[#allocation10_spill] sm:$0xff] %v6465_v15  ;;  %2701 = vst.msk [vmem:[#allocation2 + $0xf8] sm:$0xff] %vm41_vm1, %v2636_v34  ;;  %v6469_v57 = vpop.eup %4677  ;;  %4697 = vlog2.f32 %v3379_v5  ;;  %v3346_v5 = vld [vmem:[#allocation2 + $0x108] sm:$0xff]  ;;  %v3352_v15 = vld [vmem:[#allocation2 + $0x138] sm:$0xff] }
 0x274   :  { %v2489_v27 = vpop.xlane.xlu1 %2488  ;;  %v6472_v30 = vpop.eup %4679  ;;  %4699 = vlog2.f32 %v3380_v60 }
 0x275   :  { %v2645_v50 = vadd.f32 %v2489_v27, %v2005_v51  ;;  %v6475_v10 = vpop.eup %4681  ;;  %4701 = vlog2.f32 %v3381_v16  ;;  %v3324_v27 = vld [vmem:[#allocation2 + $0x58] sm:$0xff] }
 0x276   :  { %v6478_v34 = vpop.eup %4683  ;;  %4703 = vlog2.f32 %v3395_v19  ;;  %v3410_v19 = vsub.f32 %v3346_v5, %v6270_v47  ;;  %v3388_v62 = vsub.f32 %v3324_v27, %v6361_v41  ;;  %v3327_v5 = vld [vmem:[#allocation2 + $0x70] sm:$0xff]  ;;  %v3349_v27 = vld [vmem:[#allocation2 + $0x120] sm:$0xff] }
 0x277   :  { %6921 = vst [vmem:[#allocation9_spill] sm:$0xff] %v6478_v34  ;;  %2710 = vst.msk [vmem:[#allocation2 + $0x140] sm:$0xff] %vm41_vm1, %v2645_v50  ;;  %v6482_v60 = vpop.eup %4685  ;;  %4705 = vlog2.f32 %v3382_v31  ;;  %v3347_v50 = vld [vmem:[#allocation2 + $0x110] sm:$0xff]  ;;  %v3409_v34 = vsub.f32 %v3345_v24, %v6274_v56  ;;  %v2008_v56 = vld [vmem:[#allocation2 + $0x158] sm:$0xff]  ;;  %v3389_v24 = vsub.f32 %v3325_v26, %v6367_v8  ;;  %v6504_v8 = vpop.xlane.xlu0 %2882 }
 0x278   :  { %v2494_v51 = vpop.xlane.xlu1 %2493  ;;  %v6485_v16 = vpop.eup %4687  ;;  %4707 = vlog2.f32 %v3383_v3  ;;  %v3411_v47 = vsub.f32 %v3347_v50, %v6278_v9  ;;  %v3391_v9 = vsub.f32 %v3327_v5, %v6381_v53  ;;  %6924 = vst [vmem:[#allocation22_spill] sm:$0xff] %v6504_v8  ;;  %v2009_v26 = vld [vmem:[#allocation2 + $0x160] sm:$0xff]  ;;  %v3413_v53 = vsub.f32 %v3349_v27, %v6305_v29  ;;  %v2010_v29 = vld [vmem:[#allocation2 + $0x168] sm:$0xff]  ;;  %v3332_v27 = vld [vmem:[#allocation2 + $0x98] sm:$0xff] }
 0x279   :  { %v2646_v0 = vadd.f32 %v2494_v51, %v2006_v61  ;;  %v6488_v2 = vpop.eup %4689  ;;  %4709 = vlog2.f32 %v3384_v28  ;;  %v3326_v61 = vld [vmem:[#allocation2 + $0x68] sm:$0xff]  ;;  %v3348_v51 = vld [vmem:[#allocation2 + $0x118] sm:$0xff] }
 0x27a   :  { %6922 = vst [vmem:[#allocation7_spill] sm:$0xff] %v6488_v2  ;;  %v6491_v11 = vpop.eup %4691  ;;  %4711 = vlog2.f32 %v3385_v55  ;;  %v3328_v55 = vld [vmem:[#allocation2 + $0x78] sm:$0xff]  ;;  %v3390_v41 = vsub.f32 %v3326_v61, %v6374_v40 }
 0x27b   :  { %6923 = vst [vmem:[#allocation8_spill] sm:$0xff] %v6491_v11  ;;  %2711 = vst.msk [vmem:[#allocation2 + $0x148] sm:$0xff] %vm41_vm1, %v2646_v0  ;;  %v4694_v31 = vpop.eup %4693  ;;  %4713 = vlog2.f32 %v3386_v32  ;;  %v3392_v40 = vsub.f32 %v3328_v55, %v6387_v46  ;;  %v2014_v46 = vld [vmem:[#allocation2 + $0x188] sm:$0xff] }
 0x27c   :  { %v2499_v14 = vpop.xlane.xlu1 %2498  ;;  %v4696_v3 = vpop.eup %4695  ;;  %4715 = vlog2.f32 %v3387_v49 }
 0x27d   :  { %v2647_v21 = vadd.f32 %v2499_v14, %v2007_v52  ;;  %v4698_v28 = vpop.eup %4697  ;;  %4717 = vlog2.f32 %v3410_v19  ;;  %v3412_v19 = vsub.f32 %v3348_v51, %v6290_v6  ;;  %v3330_v14 = vld [vmem:[#allocation2 + $0x88] sm:$0xff] }
 0x27e   :  { %v4700_v0 = vpop.eup %4699  ;;  %4719 = vlog2.f32 %v3409_v34  ;;  %v3329_v34 = vld [vmem:[#allocation2 + $0x80] sm:$0xff] }
 0x27f   :  { %2712 = vst.msk [vmem:[#allocation2 + $0x150] sm:$0xff] %vm41_vm1, %v2647_v21  ;;  %v4702_v32 = vpop.eup %4701  ;;  %4721 = vlog2.f32 %v3388_v62  ;;  %v3350_v21 = vld [vmem:[#allocation2 + $0x128] sm:$0xff] }
 0x280   :  { %v6501_v49 = vpop.eup %4703  ;;  %4723 = vlog2.f32 %v3411_v47  ;;  %v3333_v47 = vld [vmem:[#allocation2 + $0xa0] sm:$0xff]  ;;  %v6533_v11 = vmul.f32 0.6931472, %v4702_v32 }
 0x281   :  { %v4706_v52 = vpop.eup %4705  ;;  %4725 = vlog2.f32 %v3389_v24  ;;  %v3394_v24 = vsub.f32 %v3330_v14, %v6400_v35  ;;  %v3335_v35 = vld [vmem:[#allocation2 + $0xb0] sm:$0xff] }
 0x282   :  { %v2504_v2 = vpop.xlane.xlu1 %2503  ;;  %v4708_v61 = vpop.eup %4707  ;;  %4727 = vlog2.f32 %v3390_v41  ;;  %v3414_v41 = vsub.f32 %v3350_v21, %v6310_v7 }
 0x283   :  { %v2648_v50 = vadd.f32 %v2504_v2, %v2008_v56  ;;  %v6509_v62 = vpop.eup %4709  ;;  %v3393_v2 = vsub.f32 %v3329_v34, %v6393_v63  ;;  %4729 = vlog2.f32 %v3391_v9  ;;  %v3351_v56 = vld [vmem:[#allocation2 + $0x130] sm:$0xff]  ;;  %v6520_v63 = vmul.f32 0.6931472, %v4694_v31 }
 0x284   :  { %v6512_v5 = vpop.eup %4711  ;;  %4731 = vlog2.f32 %v3412_v19  ;;  %v6522_v9 = vmul.f32 0.6931472, %v4696_v3  ;;  %v3397_v34 = vsub.f32 %v3333_v47, %v6423_v42  ;;  %v3415_v7 = vsub.f32 %v3351_v56, %v6325_v25  ;;  %v2011_v3 = vld [vmem:[#allocation2 + $0x170] sm:$0xff]  ;;  %v2016_v47 = vld [vmem:[#allocation2 + $0x198] sm:$0xff] }
 0x285   :  { %2713 = vst.msk [vmem:[#allocation2 + $0x158] sm:$0xff] %vm41_vm1, %v2648_v50  ;;  %v6515_v55 = vpop.eup %4713  ;;  %4733 = vlog2.f32 %v3392_v40  ;;  %v6527_v40 = vmul.f32 0.6931472, %v4698_v28  ;;  %v3399_v25 = vsub.f32 %v3335_v35, %v6441_v22  ;;  %v3353_v22 = vld [vmem:[#allocation2 + $0x140] sm:$0xff] }
 0x286   :  { %v6518_v50 = vpop.eup %4715  ;;  %4735 = vlog2.f32 %v3413_v53  ;;  %v6529_v53 = vmul.f32 0.6931472, %v4700_v0  ;;  %v6539_v0 = vmul.f32 0.6931472, %v6501_v49 }
 0x287   :  { %v2509_v6 = vpop.xlane.xlu1 %2508  ;;  %v4718_v14 = vpop.eup %4717  ;;  %4737 = vlog2.f32 %v3393_v2  ;;  %v3337_v2 = vld [vmem:[#allocation2 + $0xc0] sm:$0xff] }
 0x288   :  { %v2649_v51 = vadd.f32 %v2509_v6, %v2009_v26  ;;  %v3334_v26 = vld [vmem:[#allocation2 + $0xa8] sm:$0xff]  ;;  %v4720_v31 = vpop.eup %4719  ;;  %4739 = vlog2.f32 %v3394_v24  ;;  %v6543_v24 = vmul.f32 0.6931472, %v4708_v61  ;;  %v3401_v49 = vsub.f32 %v3337_v2, %v6456_v12  ;;  %v2012_v61 = vld [vmem:[#allocation2 + $0x178] sm:$0xff] }
 0x289   :  { %v4722_v42 = vpop.eup %4721  ;;  %4741 = vlog2.f32 %v3414_v41  ;;  %v3398_v28 = vsub.f32 %v3334_v26, %v6432_v18  ;;  %v3416_v18 = vsub.f32 %v3352_v15, %v6332_v48  ;;  %v6547_v26 = vmul.f32 0.6931472, %v6509_v62 }
 0x28a   :  { %2714 = vst.msk [vmem:[#allocation2 + $0x160] sm:$0xff] %vm41_vm1, %v2649_v51  ;;  %v3396_v51 = vsub.f32 %v3332_v27, %v6415_v58  ;;  %v4724_v56 = vpop.eup %4723  ;;  %v6541_v58 = vmul.f32 0.6931472, %v4706_v52  ;;  %4743 = vlog2.f32 %v3397_v34  ;;  %v3338_v27 = vld [vmem:[#allocation2 + $0xc8] sm:$0xff]  ;;  %v3417_v62 = vsub.f32 %v3353_v22, %v6341_v45 }
 0x28b   :  { %v2514_v6 = vpop.xlane.xlu1 %2513  ;;  %v4726_v32 = vpop.eup %4725  ;;  %4745 = vlog2.f32 %v3415_v7  ;;  %v3402_v12 = vsub.f32 %v3338_v27, %v6459_v59  ;;  %v6558_v2 = vmul.f32 0.6931472, %v6515_v55  ;;  %v6567_v55 = vmul.f32 0.6931472, %v4722_v42  ;;  %v2018_v27 = vld [vmem:[#allocation2 + $0x1a8] sm:$0xff] }
 0x28c   :  { %v2650_v21 = vadd.f32 %v2514_v6, %v2010_v29  ;;  %v3506_v29 = vmul.f32 0.6931472, %v4720_v31  ;;  %4747 = vlog2.f32 %v3396_v51  ;;  %v3354_v6 = vld [vmem:[#allocation2 + $0x148] sm:$0xff]  ;;  %v3510_v31 = vmul.f32 0.6931472, %v4724_v56  ;;  %v3355_v51 = vld [vmem:[#allocation2 + $0x150] sm:$0xff] }
 0x28d   :  { %4749 = vlog2.f32 %v3399_v25  ;;  %v3418_v45 = vsub.f32 %v3354_v6, %v6345_v1  ;;  %v3356_v56 = vld [vmem:[#allocation2 + $0x158] sm:$0xff] }
 0x28e   :  { %2715 = vst.msk [vmem:[#allocation2 + $0x168] sm:$0xff] %vm41_vm1, %v2650_v21  ;;  %4751 = vlog2.f32 %v3398_v28  ;;  %v2013_v28 = vld [vmem:[#allocation2 + $0x180] sm:$0xff]  ;;  %v3420_v6 = vsub.f32 %v3356_v56, %v6364_v37 }
 0x28f   :  { %v2519_v41 = vpop.xlane.xlu1 %2518  ;;  %4753 = vlog2.f32 %v3416_v18 }
 0x290   :  { %v2651_v35 = vadd.f32 %v2519_v41, %v2011_v3  ;;  %4755 = vlog2.f32 %v3401_v49 }
 0x291   :  { %v3357_v42 = vld [vmem:[#allocation2 + $0x160] sm:$0xff] }
 0x292   :  { %2716 = vst.msk [vmem:[#allocation2 + $0x170] sm:$0xff] %vm41_vm1, %v2651_v35 }
 0x293   :  { %v2524_v3 = vpop.xlane.xlu1 %2523 }
 0x295   :  { %v2534_v19 = vpop.xlane.xlu0 %2533  ;;  %v3358_v37 = vld [vmem:[#allocation2 + $0x168] sm:$0xff] }
 0x296   :  { %v2654_v8 = vadd.f32 %v2534_v19, %v2014_v46  ;;  %v3336_v46 = vld [vmem:[#allocation2 + $0xb8] sm:$0xff]  ;;  %v4728_v19 = vpop.eup %4727 }
 0x297   :  { %v4730_v52 = vpop.eup %4729  ;;  %v3400_v48 = vsub.f32 %v3336_v46, %v6447_v33  ;;  %v2652_v46 = vadd.f32 %v2524_v3, %v2012_v61  ;;  %v6574_v1 = vmul.f32 0.6931472, %v4728_v19  ;;  %v2529_v18 = vpop.xlane.xlu1 %2528 }
 0x298   :  { %2719 = vst.msk [vmem:[#allocation2 + $0x188] sm:$0xff] %vm41_vm1, %v2654_v8  ;;  %v3508_v8 = vmul.f32 0.6931472, %v4718_v14  ;;  %v6551_v14 = vmul.f32 0.6931472, %v6512_v5  ;;  %v4732_v15 = vpop.eup %4731  ;;  %v3569_v5 = vadd.f32 %v3506_v29, %v6520_v63  ;;  %v3571_v63 = vadd.f32 %v3510_v31, %v6527_v40 }
 0x299   :  { %v4734_v21 = vpop.eup %4733  ;;  %v3512_v41 = vmul.f32 0.6931472, %v4732_v15  ;;  %4757 = vlog2.f32 %v3400_v48  ;;  %2717 = vst.msk [vmem:[#allocation2 + $0x178] sm:$0xff] %vm41_vm1, %v2652_v46  ;;  %v6572_v29 = vmul.f32 0.6931472, %v4726_v32  ;;  %v2015_v32 = vld [vmem:[#allocation2 + $0x190] sm:$0xff] }
 0x29a   :  { %v3570_v33 = vadd.f32 %v3508_v8, %v6522_v9  ;;  %v4736_v25 = vpop.eup %4735  ;;  %v3419_v8 = vsub.f32 %v3355_v51, %v6356_v36  ;;  %4759 = vlog2.f32 %v3417_v62  ;;  %v3601_v49 = vmul.f32 0.5, %v3569_v5  ;;  %v6582_v62 = vld [vmem:[#allocation2 + $0xd0] sm:$0xff]  ;;  %v6925_v46 = vld [vmem:[#allocation40_spill] sm:$0xff] }
 0x29b   :  { %v2544_v34 = vpop.xlane.xlu0 %2543  ;;  %v4738_v59 = vpop.eup %4737  ;;  %v3514_v35 = vmul.f32 0.6931472, %v4736_v25  ;;  %4761 = vlog2.f32 %v3402_v12  ;;  %v6577_v31 = vmul.f32 0.6931472, %v4730_v52  ;;  %v6579_v48 = vmul.f32 0.6931472, %v4734_v21 }
 0x29c   :  { %v2656_v7 = vadd.f32 %v2544_v34, %v2016_v47  ;;  %v6565_v47 = vmul.f32 0.6931472, %v6518_v50  ;;  %v4740_v9 = vpop.eup %4739  ;;  %v3340_v50 = vld [vmem:[#allocation2 + $0xd8] sm:$0xff]  ;;  %v3602_v61 = vmul.f32 0.5, %v3570_v33  ;;  %v2653_v34 = vadd.f32 %v2529_v18, %v2013_v28  ;;  %v2539_v25 = vpop.xlane.xlu1 %2538  ;;  %v6926_v28 = vld [vmem:[#allocation41_spill] sm:$0xff] }
 0x29d   :  { %v4742_v22 = vpop.eup %4741  ;;  %4763 = vlog2.f32 %v3418_v45  ;;  %v3572_v15 = vadd.f32 %v3512_v41, %v6529_v53  ;;  %v3404_v3 = vsub.f32 %v3340_v50, %v6472_v30  ;;  %v3421_v52 = vsub.f32 %v3357_v42, %v6370_v44 }
 0x29e   :  { %2721 = vst.msk [vmem:[#allocation2 + $0x198] sm:$0xff] %vm41_vm1, %v2656_v7  ;;  %v4744_v40 = vpop.eup %4743  ;;  %v3603_v7 = vmul.f32 0.5, %v3571_v63  ;;  %2718 = vst.msk [vmem:[#allocation2 + $0x180] sm:$0xff] %vm41_vm1, %v2653_v34  ;;  %v3516_v5 = vmul.f32 0.6931472, %v4742_v22  ;;  %4765 = vlog2.f32 %v3419_v8  ;;  %v3573_v53 = vadd.f32 %v3514_v35, %v6533_v11  ;;  %v3359_v63 = vld [vmem:[#allocation2 + $0x170] sm:$0xff] }
 0x29f   :  { %v4746_v36 = vpop.eup %4745  ;;  %v6587_v21 = vmul.f32 0.6931472, %v4738_v59  ;;  %v3633_v45 = vsub.f32 %v3601_v49, %v6925_v46  ;;  %v3634_v56 = vsub.f32 %v3602_v61, %v6926_v28  ;;  %v2655_v41 = vadd.f32 %v2539_v25, %v2015_v32  ;;  %v2017_v22 = vld [vmem:[#allocation2 + $0x1a0] sm:$0xff]  ;;  %v6927_v11 = vld [vmem:[#allocation44_spill] sm:$0xff] }
 0x2a0   :  { %v4748_v12 = vpop.eup %4747  ;;  %v3518_v50 = vmul.f32 0.6931472, %v4746_v36  ;;  %4767 = vlog2.f32 %v3420_v6  ;;  %v3403_v44 = vsub.f32 %v6582_v62, %v6469_v57  ;;  %v3422_v59 = vsub.f32 %v3358_v37, %v6377_v39  ;;  %v3360_v35 = vld [vmem:[#allocation2 + $0x178] sm:$0xff]  ;;  %v2019_v37 = vld [vmem:[#allocation2 + $0x1b0] sm:$0xff] }
 0x2a1   :  { %v4750_v33 = vpop.eup %4749  ;;  %v6596_v18 = vmul.f32 0.6931472, %v4740_v9  ;;  %4769 = vlog2.f32 %v3404_v3  ;;  %2720 = vst.msk [vmem:[#allocation2 + $0x190] sm:$0xff] %vm41_vm1, %v2655_v41  ;;  %v3574_v49 = vadd.f32 %v3516_v5, %v6541_v58  ;;  %v3604_v61 = vmul.f32 0.5, %v3572_v15  ;;  %v2020_v36 = vld [vmem:[#allocation2 + $0x1b8] sm:$0xff] }
 0x2a2   :  { %v2554_v19 = vpop.xlane.xlu0 %2553  ;;  %v4752_v30 = vpop.eup %4751  ;;  %4771 = vlog2.f32 %v3421_v52  ;;  %v6601_v34 = vmul.f32 0.6931472, %v4744_v40  ;;  %v3423_v39 = vsub.f32 %v3359_v63, %v6384_v43  ;;  %v3605_v9 = vmul.f32 0.5, %v3573_v53 }
 0x2a3   :  { %v2658_v51 = vadd.f32 %v2554_v19, %v2018_v27  ;;  %v4754_v8 = vpop.eup %4753  ;;  %v3635_v27 = vsub.f32 %v3603_v7, %v6927_v11  ;;  %v3796_v32 = vsel %vm41_vm1, %v3633_v45, 0.0  ;;  %v3797_v19 = vsel %vm41_vm1, %v3634_v56, 0.0  ;;  %v3341_v56 = vld [vmem:[#allocation2 + $0xe0] sm:$0xff] }
 0x2a4   :  { %v4756_v42 = vpop.eup %4755  ;;  %v2549_v6 = vpop.xlane.xlu1 %2548  ;;  %v3520_v3 = vmul.f32 0.6931472, %v4754_v8  ;;  %v6609_v58 = vmul.f32 0.6931472, %v4748_v12  ;;  %v3424_v5 = vsub.f32 %v3360_v35, %v6390_v54  ;;  %4773 = vlog2.f32 %v3422_v59  ;;  %v6929_v54 = vld [vmem:[#allocation50_spill] sm:$0xff] }
 0x2a5   :  { %2723 = vst.msk [vmem:[#allocation2 + $0x1a8] sm:$0xff] %vm41_vm1, %v2658_v51  ;;  %v6603_v57 = vpop.eup %4757  ;;  %v2657_v62 = vadd.f32 %v2549_v6, %v2017_v22  ;;  %v3575_v51 = vadd.f32 %v3518_v50, %v6543_v24  ;;  %v3361_v52 = vld [vmem:[#allocation2 + $0x180] sm:$0xff]  ;;  %v3799_v43 = vsel %vm41_vm1, %v3635_v27, 0.0  ;;  %v6615_v25 = vmul.f32 0.6931472, %v4750_v33 }
 0x2a6   :  { %v4760_v7 = vpop.eup %4759  ;;  %v3606_v45 = vmul.f32 0.5, %v3574_v49  ;;  %v6928_v24 = vld [vmem:[#allocation47_spill] sm:$0xff]  ;;  %v3798_v28 = vadd.f32 %v3797_v19, %v3796_v32  ;;  %v3425_v63 = vsub.f32 %v3361_v52, %v6396_v23  ;;  %4775 = vlog2.f32 %v3423_v39  ;;  %v2022_v32 = vld [vmem:[#allocation2 + $0x1c8] sm:$0xff] }
 0x2a7   :  { %v6611_v40 = vpop.eup %4761  ;;  %2722 = vst.msk [vmem:[#allocation2 + $0x1a0] sm:$0xff] %vm41_vm1, %v2657_v62  ;;  %v3636_v12 = vsub.f32 %v3604_v61, %v6928_v24  ;;  %v3522_v50 = vmul.f32 0.6931472, %v4760_v7  ;;  %v3637_v8 = vsub.f32 %v3605_v9, %v6929_v54  ;;  %v3576_v59 = vadd.f32 %v3520_v3, %v6547_v26  ;;  %v6930_v3 = vld [vmem:[#allocation53_spill] sm:$0xff]  ;;  %v6932_v54 = vld [vmem:[#allocation59_spill] sm:$0xff] }
 0x2a8   :  { %v4764_v53 = vpop.eup %4763  ;;  %v3607_v11 = vmul.f32 0.5, %v3575_v51  ;;  %v3800_v27 = vadd.f32 %v3799_v43, %v3798_v28  ;;  %4777 = vlog2.f32 %v3424_v5  ;;  %v6623_v49 = vmul.f32 0.6931472, %v4752_v30  ;;  %v3363_v19 = vld [vmem:[#allocation2 + $0x190] sm:$0xff]  ;;  %v2021_v5 = vld [vmem:[#allocation2 + $0x1c0] sm:$0xff]  ;;  %v3364_v28 = vld [vmem:[#allocation2 + $0x198] sm:$0xff] }
 0x2a9   :  { %v2564_v15 = vpop.xlane.xlu0 %2563  ;;  %v4766_v22 = vpop.eup %4765  ;;  %v3524_v35 = vmul.f32 0.6931472, %v4764_v53  ;;  %v3405_v61 = vsub.f32 %v3341_v56, %v6482_v60  ;;  %v3119_v23 = vmul.f32 1.442695, %v6418_v4  ;;  %v3801_v39 = vsel %vm41_vm1, %v3636_v12, 0.0 }
 0x2aa   :  { %v2660_v46 = vadd.f32 %v2564_v15, %v2020_v36  ;;  %v4768_v6 = vpop.eup %4767  ;;  %v3362_v36 = vld [vmem:[#allocation2 + $0x188] sm:$0xff]  ;;  %v6629_v9 = vmul.f32 0.6931472, %v4756_v42  ;;  %4779 = vlog2.f32 %v3403_v44  ;;  %v3526_v7 = vmul.f32 0.6931472, %v4766_v22 }
 0x2ab   :  { %v6631_v26 = vpop.eup %4769  ;;  %4781 = vlog2.f32 %v3425_v63  ;;  %v3577_v30 = vadd.f32 %v3522_v50, %v6551_v14  ;;  %v3803_v60 = vsel %vm41_vm1, %v3637_v8, 0.0  ;;  %v3608_v4 = vmul.f32 0.5, %v3576_v59  ;;  %v6931_v15 = vld [vmem:[#allocation56_spill] sm:$0xff] }
 0x2ac   :  { %v2559_v41 = vpop.xlane.xlu1 %2558  ;;  %2725 = vst.msk [vmem:[#allocation2 + $0x1b8] sm:$0xff] %vm41_vm1, %v2660_v46  ;;  %v4772_v62 = vpop.eup %4771  ;;  %v3638_v51 = vsub.f32 %v3606_v45, %v6930_v3  ;;  %v3802_v52 = vadd.f32 %v3801_v39, %v3800_v27  ;;  %v3426_v44 = vsub.f32 %v3362_v36, %v6405_v20  ;;  %v3528_v43 = vmul.f32 0.6931472, %v4768_v6  ;;  %v3366_v20 = vld [vmem:[#allocation2 + $0x1a8] sm:$0xff]  ;;  %v6933_v27 = vld [vmem:[#allocation5_spill] sm:$0xff]  ;;  %v6937_v3 = vld [vmem:[#allocation19_spill] sm:$0xff] }
 0x2ad   :  { %v2659_v33 = vadd.f32 %v2559_v41, %v2019_v37  ;;  %v3639_v37 = vsub.f32 %v3607_v11, %v6931_v15  ;;  %v3578_v53 = vadd.f32 %v3524_v35, %v6558_v2  ;;  %4783 = vlog2.f32 %v3405_v61 }
 0x2ae   :  { %v6640_v46 = vmul.f32 1.442695, %v6403_v17  ;;  %v3427_v24 = vsub.f32 %v3363_v19, %v6412_v38  ;;  %v3804_v12 = vadd.f32 %v3803_v60, %v3802_v52  ;;  %v4774_v45 = vpop.eup %4773  ;;  %4785 = vpow2.f32 %v3119_v23  ;;  %v3365_v38 = vld [vmem:[#allocation2 + $0x1a0] sm:$0xff]  ;;  %v6934_v23 = vld [vmem:[#allocation4_spill] sm:$0xff] }
 0x2af   :  { %2724 = vst.msk [vmem:[#allocation2 + $0x1b0] sm:$0xff] %vm41_vm1, %v2659_v33  ;;  %v3530_v41 = vmul.f32 0.6931472, %v4772_v62  ;;  %v3579_v63 = vadd.f32 %v3526_v7, %v6565_v47  ;;  %v3609_v50 = vmul.f32 0.5, %v3577_v30  ;;  %v3640_v8 = vsub.f32 %v3608_v4, %v6932_v54  ;;  %v6935_v30 = vld [vmem:[#allocation62_spill] sm:$0xff] }
 0x2b0   :  { %v3805_v17 = vsel %vm41_vm1, %v3638_v51, 0.0  ;;  %v3807_v22 = vsel %vm41_vm1, %v3639_v37, 0.0  ;;  %v4776_v33 = vpop.eup %4775  ;;  %4787 = vlog2.f32 %v3426_v44  ;;  %v3580_v59 = vadd.f32 %v3528_v43, %v6567_v55  ;;  %v6936_v62 = vld [vmem:[#allocation6_spill] sm:$0xff]  ;;  %v2023_v44 = vld [vmem:[#allocation2 + $0x1d0] sm:$0xff] }
 0x2b1   :  { %v2574_v42 = vpop.xlane.xlu0 %2573  ;;  %v3610_v11 = vmul.f32 0.5, %v3578_v53  ;;  %v3428_v35 = vsub.f32 %v3364_v28, %v6933_v27  ;;  %4789 = vlog2.f32 %v3427_v24  ;;  %v3532_v47 = vmul.f32 0.6931472, %v4774_v45  ;;  %v6938_v53 = vld [vmem:[#allocation65_spill] sm:$0xff] }
 0x2b2   :  { %v2662_v14 = vadd.f32 %v2574_v42, %v2022_v32  ;;  %v2569_v56 = vpop.xlane.xlu1 %2568  ;;  %v3806_v61 = vadd.f32 %v3805_v17, %v3804_v12  ;;  %v3430_v36 = vsub.f32 %v3366_v20, %v6934_v23  ;;  %v4778_v39 = vpop.eup %4777  ;;  %v2024_v32 = vld [vmem:[#allocation2 + $0x1d8] sm:$0xff]  ;;  %v3581_v19 = vadd.f32 %v3530_v41, %v6572_v29  ;;  %v3342_v41 = vld [vmem:[#allocation2 + $0xe8] sm:$0xff] }
 0x2b3   :  { %v2661_v2 = vadd.f32 %v2569_v56, %v2021_v5  ;;  %v3611_v7 = vmul.f32 0.5, %v3579_v63  ;;  %v3641_v60 = vsub.f32 %v3609_v50, %v6935_v30  ;;  %v3429_v55 = vsub.f32 %v3365_v38, %v6936_v62  ;;  %v6939_v29 = vld [vmem:[#allocation18_spill] sm:$0xff] }
 0x2b4   :  { %2727 = vst.msk [vmem:[#allocation2 + $0x1c8] sm:$0xff] %vm41_vm1, %v2662_v14  ;;  %v6655_v4 = vpop.eup %4779  ;;  %v3311_v51 = vmul.f32 1.442695, %v6937_v3  ;;  %v3534_v15 = vmul.f32 0.6931472, %v4776_v33  ;;  %v3808_v37 = vadd.f32 %v3807_v22, %v3806_v61  ;;  %v3809_v52 = vsel %vm41_vm1, %v3640_v8, 0.0 }
 0x2b5   :  { %2726 = vst.msk [vmem:[#allocation2 + $0x1c0] sm:$0xff] %vm41_vm1, %v2661_v2  ;;  %v4782_v42 = vpop.eup %4781  ;;  %v3612_v43 = vmul.f32 0.5, %v3580_v59  ;;  %v3642_v14 = vsub.f32 %v3610_v11, %v6938_v53  ;;  %4791 = vlog2.f32 %v3428_v35  ;;  %v3368_v12 = vld [vmem:[#allocation2 + $0x1b8] sm:$0xff]  ;;  %v3536_v45 = vmul.f32 0.6931472, %v4778_v39  ;;  %v6940_v2 = vld [vmem:[#allocation68_spill] sm:$0xff] }
 0x2b6   :  { %v3367_v6 = vld [vmem:[#allocation2 + $0x1b0] sm:$0xff]  ;;  %v3582_v56 = vadd.f32 %v3532_v47, %v6574_v1  ;;  %4793 = vlog2.f32 %v3430_v36  ;;  %v3613_v20 = vmul.f32 0.5, %v3581_v19  ;;  %v3643_v54 = vsub.f32 %v3611_v7, %v6940_v2  ;;  %v6941_v33 = vld [vmem:[#allocation20_spill] sm:$0xff]  ;;  %v6942_v11 = vld [vmem:[#allocation71_spill] sm:$0xff] }
 0x2b7   :  { %v3431_v24 = vsub.f32 %v3367_v6, %v6939_v29  ;;  %v6662_v63 = vpop.eup %4783  ;;  %v3811_v8 = vsel %vm41_vm1, %v3641_v60, 0.0  ;;  %4795 = vlog2.f32 %v3429_v55  ;;  %v3538_v22 = vmul.f32 0.6931472, %v4782_v42  ;;  %v2025_v19 = vld [vmem:[#allocation2 + $0x1e0] sm:$0xff]  ;;  %v6943_v60 = vld [vmem:[#allocation21_spill] sm:$0xff]  ;;  %v6944_v3 = vld [vmem:[#allocation74_spill] sm:$0xff] }
 0x2b8   :  { %v3583_v38 = vadd.f32 %v3534_v15, %v6577_v31  ;;  %v3432_v59 = vsub.f32 %v3368_v12, %v6941_v33  ;;  %v6669_v1 = vpop.eup %4785  ;;  %v3644_v27 = vsub.f32 %v3612_v43, %v6942_v11  ;;  %v3810_v35 = vadd.f32 %v3809_v52, %v3808_v37  ;;  %v6945_v53 = vld [vmem:[#allocation77_spill] sm:$0xff] }
 0x2b9   :  { %v2584_v5 = vpop.xlane.xlu0 %2583  ;;  %v2579_v50 = vpop.xlane.xlu1 %2578  ;;  %4797 = vlog2.f32 %v3431_v24  ;;  %v3406_v61 = vsub.f32 %v3342_v41, %v6485_v16  ;;  %v3584_v6 = vadd.f32 %v3536_v45, %v6579_v48  ;;  %v3614_v23 = vmul.f32 0.5, %v3582_v56  ;;  %v3343_v29 = vld [vmem:[#allocation2 + $0xf0] sm:$0xff] }
 0x2ba   :  { %v2664_v28 = vadd.f32 %v2584_v5, %v2024_v32  ;;  %v2663_v17 = vadd.f32 %v2579_v50, %v2023_v44  ;;  %4799 = vpow2.f32 %v6640_v46  ;;  %v3813_v31 = vsel %vm41_vm1, %v3642_v14, 0.0  ;;  %v4788_v39 = vpop.eup %4787  ;;  %v2026_v32 = vld [vmem:[#allocation2 + $0x1e8] sm:$0xff] }
 0x2bb   :  { %v3370_v36 = vld [vmem:[#allocation2 + $0x1c8] sm:$0xff]  ;;  %4801 = vpow2.f32 %v3311_v51  ;;  %v3812_v7 = vadd.f32 %v3811_v8, %v3810_v35  ;;  %v3815_v30 = vsel %vm41_vm1, %v3643_v54, 0.0  ;;  %v4790_v16 = vpop.eup %4789  ;;  %v3585_v46 = vadd.f32 %v3538_v22, %v6587_v21  ;;  %v6949_v35 = vld [vmem:[#allocation10_spill] sm:$0xff] }
 0x2bc   :  { %2729 = vst.msk [vmem:[#allocation2 + $0x1d8] sm:$0xff] %vm41_vm1, %v2664_v28  ;;  %v3369_v47 = vld [vmem:[#allocation2 + $0x1c0] sm:$0xff]  ;;  %2728 = vst.msk [vmem:[#allocation2 + $0x1d0] sm:$0xff] %vm41_vm1, %v2663_v17  ;;  %v3615_v55 = vmul.f32 0.5, %v3583_v38  ;;  %v3645_v15 = vsub.f32 %v3613_v20, %v6944_v3  ;;  %4803 = vlog2.f32 %v3432_v59  ;;  %v3817_v42 = vsel %vm41_vm1, %v3644_v27, 0.0  ;;  %v6947_v38 = vld [vmem:[#allocation8_spill] sm:$0xff] }
 0x2bd   :  { %v3433_v62 = vsub.f32 %v3369_v47, %v6943_v60  ;;  %v3814_v52 = vadd.f32 %v3813_v31, %v3812_v7  ;;  %v3434_v51 = vsub.f32 %v3370_v36, %v6462_v13  ;;  %4805 = vlog2.f32 %v3406_v61  ;;  %v6946_v13 = vld [vmem:[#allocation80_spill] sm:$0xff]  ;;  %v6948_v59 = vld [vmem:[#allocation3_spill] sm:$0xff]  ;;  %v3344_v61 = vld [vmem:[#allocation2 + $0xf8] sm:$0xff] }
 0x2be   :  { %v3616_v43 = vmul.f32 0.5, %v3584_v6  ;;  %v3646_v14 = vsub.f32 %v3614_v23, %v6945_v53  ;;  %v3542_v21 = vmul.f32 0.6931472, %v4790_v16  ;;  %v3540_v12 = vmul.f32 0.6931472, %v4788_v39  ;;  %v2028_v23 = vld [vmem:[#allocation2 + $0x1f8] sm:$0xff] }
 0x2bf   :  { %v4792_v24 = vpop.eup %4791  ;;  %v3816_v28 = vadd.f32 %v3815_v30, %v3814_v52  ;;  %4807 = vlog2.f32 %v3433_v62  ;;  %v3617_v41 = vmul.f32 0.5, %v3585_v46  ;;  %v3647_v50 = vsub.f32 %v3615_v55, %v6946_v13 }
 0x2c0   :  { %v2594_v48 = vpop.xlane.xlu0 %2593  ;;  %v2589_v37 = vpop.xlane.xlu1 %2588  ;;  %v3819_v20 = vsel %vm41_vm1, %v3645_v15, 0.0  ;;  %v6690_v17 = vmul.f32 0.6931472, %v6603_v57  ;;  %4809 = vlog2.f32 %v3434_v51  ;;  %v3407_v33 = vsub.f32 %v3343_v29, %v6947_v38 }
 0x2c1   :  { %v2666_v5 = vadd.f32 %v2594_v48, %v2026_v32  ;;  %v2665_v44 = vadd.f32 %v2589_v37, %v2025_v19  ;;  %v4794_v56 = vpop.eup %4793  ;;  %v3818_v8 = vadd.f32 %v3817_v42, %v3816_v28  ;;  %v3648_v11 = vsub.f32 %v3616_v43, %v6948_v59  ;;  %v6950_v19 = vld [vmem:[#allocation22_spill] sm:$0xff] }
 0x2c2   :  { %v4796_v54 = vpop.eup %4795  ;;  %v3821_v27 = vsel %vm41_vm1, %v3646_v14, 0.0  ;;  %v3587_v31 = vadd.f32 %v3542_v21, %v6539_v0  ;;  %v3586_v57 = vadd.f32 %v3540_v12, %v6596_v18  ;;  %v3544_v39 = vmul.f32 0.6931472, %v4792_v24  ;;  %v6951_v24 = vld [vmem:[#allocation9_spill] sm:$0xff]  ;;  %v6952_v12 = vld [vmem:[#allocation7_spill] sm:$0xff] }
 0x2c3   :  { %v3372_v45 = vld [vmem:[#allocation2 + $0x1d8] sm:$0xff]  ;;  %2731 = vst.msk [vmem:[#allocation2 + $0x1e8] sm:$0xff] %vm41_vm1, %v2666_v5  ;;  %2730 = vst.msk [vmem:[#allocation2 + $0x1e0] sm:$0xff] %vm41_vm1, %v2665_v44  ;;  %v3371_v22 = vld [vmem:[#allocation2 + $0x1d0] sm:$0xff]  ;;  %v4798_v6 = vpop.eup %4797  ;;  %v3820_v36 = vadd.f32 %v3819_v20, %v3818_v8  ;;  %v3649_v7 = vsub.f32 %v3617_v41, %v6950_v19  ;;  %v3823_v30 = vsel %vm41_vm1, %v3647_v50, 0.0  ;;  %v3408_v0 = vsub.f32 %v3344_v61, %v6669_v1 }
 0x2c4   :  { %v3436_v2 = vsub.f32 %v3372_v45, %v6475_v10  ;;  %v3435_v47 = vsub.f32 %v3371_v22, %v6949_v35  ;;  %v2027_v10 = vld [vmem:[#allocation2 + $0x1f0] sm:$0xff]  ;;  %v6698_v32 = vpop.eup %4799  ;;  %v3546_v60 = vmul.f32 0.6931472, %v4796_v54  ;;  %v3548_v3 = vmul.f32 0.6931472, %v4794_v56 }
 0x2c5   :  { %v6702_v62 = vpop.eup %4801  ;;  %v3822_v55 = vadd.f32 %v3821_v27, %v3820_v36  ;;  %v3825_v37 = vsel %vm41_vm1, %v3648_v11, 0.0  ;;  %v3550_v52 = vmul.f32 0.6931472, %v4798_v6  ;;  %v3619_v51 = vmul.f32 0.5, %v3587_v31 }
 0x2c6   :  { %4811 = vlog2.f32 %v3436_v2  ;;  %v4804_v18 = vpop.eup %4803  ;;  %v3618_v5 = vmul.f32 0.5, %v3586_v57  ;;  %v3588_v43 = vadd.f32 %v3544_v39, %v6609_v58  ;;  %v3827_v1 = vsel %vm41_vm1, %v3649_v7, 0.0 }
 0x2c7   :  { %4813 = vlog2.f32 %v3435_v47  ;;  %v2604_v16 = vpop.xlane.xlu0 %2603  ;;  %v2599_v46 = vpop.xlane.xlu1 %2598  ;;  %v3824_v44 = vadd.f32 %v3823_v30, %v3822_v55  ;;  %v3589_v29 = vadd.f32 %v3546_v60, %v6601_v34  ;;  %v3590_v58 = vadd.f32 %v3548_v3, %v6623_v49 }
 0x2c8   :  { %4815 = vlog2.f32 %v3407_v33  ;;  %v2668_v15 = vadd.f32 %v2604_v16, %v2028_v23  ;;  %v2667_v48 = vadd.f32 %v2599_v46, %v2027_v10  ;;  %v6706_v42 = vpop.eup %4805  ;;  %v3552_v50 = vmul.f32 0.6931472, %v4804_v18 }
 0x2c9   :  { %v4808_v45 = vpop.eup %4807  ;;  %v3826_v41 = vadd.f32 %v3825_v37, %v3824_v44  ;;  %4817 = vlog2.f32 %v3408_v0  ;;  %v3591_v54 = vadd.f32 %v3550_v52, %v6615_v25  ;;  %v3494_v34 = vmul.f32 0.6931472, %v6655_v4 }
 0x2ca   :  { %v3373_v53 = vld [vmem:[#allocation2 + $0x1e0] sm:$0xff]  ;;  %v3374_v14 = vld [vmem:[#allocation2 + $0x1e8] sm:$0xff]  ;;  %2733 = vst.msk [vmem:[#allocation2 + $0x1f8] sm:$0xff] %vm41_vm1, %v2668_v15  ;;  %2732 = vst.msk [vmem:[#allocation2 + $0x1f0] sm:$0xff] %vm41_vm1, %v2667_v48  ;;  %v4810_v8 = vpop.eup %4809  ;;  %v3496_v38 = vmul.f32 0.6931472, %v6631_v26  ;;  %v3592_v25 = vadd.f32 %v3552_v50, %v6690_v17 }
 0x2cb   :  { %v3437_v21 = vsub.f32 %v3373_v53, %v6951_v24  ;;  %v3438_v28 = vsub.f32 %v3374_v14, %v6952_v12  ;;  %v2889_v56 = vpop.xlane.xlu0 %2888  ;;  %v2886_v13 = vpop.xlane.xlu1 %2885  ;;  %v3828_v22 = vadd.f32 %v3827_v1, %v3826_v41  ;;  %v3621_v11 = vmul.f32 0.5, %v3589_v29 }
 0x2cc   :  { %v3651_v20 = vsub.f32 %v3619_v51, %v2889_v56  ;;  %v3650_v2 = vsub.f32 %v3618_v5, %v2886_v13  ;;  %v3620_v27 = vmul.f32 0.5, %v3588_v43  ;;  %v3554_v49 = vmul.f32 0.6931472, %v4808_v45 }
 0x2cd   :  { %4819 = vlog2.f32 %v3437_v21  ;;  %v3622_v6 = vmul.f32 0.5, %v3590_v58  ;;  %v3623_v26 = vmul.f32 0.5, %v3591_v54  ;;  %v3556_v7 = vmul.f32 0.6931472, %v4810_v8 }
 0x2ce   :  { %4821 = vlog2.f32 %v3438_v28  ;;  %v3829_v59 = vsel %vm41_vm1, %v3650_v2, 0.0  ;;  %v3831_v31 = vsel %vm41_vm1, %v3651_v20, 0.0  ;;  %v3593_v55 = vadd.f32 %v3554_v49, %v6629_v9 }
 0x2cf   :  { %v3830_v35 = vadd.f32 %v3829_v59, %v3828_v22  ;;  %v2895_v47 = vpop.xlane.xlu0 %2894  ;;  %v2892_v61 = vpop.xlane.xlu1 %2891  ;;  %v3492_v37 = vmul.f32 0.6931472, %v6611_v40  ;;  %v3624_v14 = vmul.f32 0.5, %v3592_v25  ;;  %v3498_v40 = vmul.f32 0.6931472, %v6662_v63 }
 0x2d0   :  { %v4812_v33 = vpop.eup %4811  ;;  %v3653_v4 = vsub.f32 %v3621_v11, %v2895_v47  ;;  %v3652_v57 = vsub.f32 %v3620_v27, %v2892_v61  ;;  %v3500_v28 = vmul.f32 0.6931472, %v6706_v42 }
 0x2d1   :  { %v3560_v23 = vmul.f32 0.6931472, %v4812_v33  ;;  %v4814_v10 = vpop.eup %4813  ;;  %v3832_v39 = vadd.f32 %v3831_v31, %v3830_v35  ;;  %v3375_v60 = vld [vmem:[#allocation2 + $0x1f0] sm:$0xff]  ;;  %v3376_v16 = vld [vmem:[#allocation2 + $0x1f8] sm:$0xff] }
 0x2d2   :  { %v4816_v36 = vpop.eup %4815  ;;  %v3558_v19 = vmul.f32 0.6931472, %v4814_v10  ;;  %v3833_v46 = vsel %vm41_vm1, %v3652_v57, 0.0  ;;  %v3439_v17 = vsub.f32 %v3375_v60, %v6698_v32  ;;  %v3440_v3 = vsub.f32 %v3376_v16, %v6702_v62 }
 0x2d3   :  { %v3596_v30 = vadd.f32 %v3560_v23, %v3496_v38  ;;  %v3834_v0 = vadd.f32 %v3833_v46, %v3832_v39  ;;  %v2901_v18 = vpop.xlane.xlu0 %2900  ;;  %v2898_v15 = vpop.xlane.xlu1 %2897  ;;  %v3835_v52 = vsel %vm41_vm1, %v3653_v4, 0.0  ;;  %v3625_v32 = vmul.f32 0.5, %v3593_v55 }
 0x2d4   :  { %v3595_v48 = vadd.f32 %v3558_v19, %v3494_v34  ;;  %v3655_v51 = vsub.f32 %v3623_v26, %v2901_v18  ;;  %v3654_v5 = vsub.f32 %v3622_v6, %v2898_v15  ;;  %4823 = vlog2.f32 %v3439_v17  ;;  %v4818_v44 = vpop.eup %4817 }
 0x2d5   :  { %v3836_v43 = vadd.f32 %v3835_v52, %v3834_v0  ;;  %4825 = vlog2.f32 %v3440_v3  ;;  %v3594_v62 = vadd.f32 %v3556_v7, %v3492_v37  ;;  %v3628_v35 = vmul.f32 0.5, %v3596_v30 }
 0x2d6   :  { %v3837_v9 = vsel %vm41_vm1, %v3654_v5, 0.0  ;;  %v3839_v45 = vsel %vm41_vm1, %v3655_v51, 0.0  ;;  %v3627_v2 = vmul.f32 0.5, %v3595_v48  ;;  %v3502_v23 = vmul.f32 0.6931472, %v4816_v36 }
 0x2d7   :  { %v4820_v53 = vpop.eup %4819  ;;  %v3838_v29 = vadd.f32 %v3837_v9, %v3836_v43  ;;  %v2907_v24 = vpop.xlane.xlu0 %2906  ;;  %v3626_v54 = vmul.f32 0.5, %v3594_v62  ;;  %v3504_v31 = vmul.f32 0.6931472, %v4818_v44 }
 0x2d8   :  { %v4822_v1 = vpop.eup %4821  ;;  %v2904_v21 = vpop.xlane.xlu1 %2903  ;;  %v3562_v12 = vmul.f32 0.6931472, %v4820_v53  ;;  %v3657_v56 = vsub.f32 %v3625_v32, %v2907_v24 }
 0x2d9   :  { %v3656_v41 = vsub.f32 %v3624_v14, %v2904_v21  ;;  %v3564_v13 = vmul.f32 0.6931472, %v4822_v1  ;;  %v3840_v58 = vadd.f32 %v3839_v45, %v3838_v29 }
 0x2da   :  { %v3597_v50 = vadd.f32 %v3562_v12, %v3498_v40  ;;  %v3843_v63 = vsel %vm41_vm1, %v3657_v56, 0.0 }
 0x2db   :  { %v3841_v20 = vsel %vm41_vm1, %v3656_v41, 0.0  ;;  %v3598_v8 = vadd.f32 %v3564_v13, %v3500_v28  ;;  %v2913_v34 = vpop.xlane.xlu0 %2912 }
 0x2dc   :  { %v3842_v22 = vadd.f32 %v3841_v20, %v3840_v58  ;;  %v2910_v38 = vpop.xlane.xlu1 %2909  ;;  %v3659_v33 = vsub.f32 %v3627_v2, %v2913_v34  ;;  %v3629_v49 = vmul.f32 0.5, %v3597_v50 }
 0x2dd   :  { %v3658_v59 = vsub.f32 %v3626_v54, %v2910_v38  ;;  %v3630_v16 = vmul.f32 0.5, %v3598_v8 }
 0x2de   :  { %v3844_v42 = vadd.f32 %v3843_v63, %v3842_v22  ;;  %v4824_v11 = vpop.eup %4823  ;;  %v3847_v4 = vsel %vm41_vm1, %v3659_v33, 0.0 }
 0x2df   :  { %v3845_v27 = vsel %vm41_vm1, %v3658_v59, 0.0  ;;  %v4826_v47 = vpop.eup %4825  ;;  %v2919_v6 = vpop.xlane.xlu0 %2918  ;;  %v3566_v10 = vmul.f32 0.6931472, %v4824_v11 }
 0x2e0   :  { %v3846_v61 = vadd.f32 %v3845_v27, %v3844_v42  ;;  %v2916_v25 = vpop.xlane.xlu1 %2915  ;;  %v3661_v57 = vsub.f32 %v3629_v49, %v2919_v6  ;;  %v3568_v39 = vmul.f32 0.6931472, %v4826_v47 }
 0x2e1   :  { %v3660_v26 = vsub.f32 %v3628_v35, %v2916_v25  ;;  %v3599_v7 = vadd.f32 %v3566_v10, %v3502_v23 }
 0x2e2   :  { %v3848_v19 = vadd.f32 %v3847_v4, %v3846_v61  ;;  %v3600_v46 = vadd.f32 %v3568_v39, %v3504_v31  ;;  %v3851_v0 = vsel %vm41_vm1, %v3661_v57, 0.0 }
 0x2e3   :  { %v3849_v60 = vsel %vm41_vm1, %v3660_v26, 0.0  ;;  %v2925_v17 = vpop.xlane.xlu0 %2924  ;;  %v3631_v3 = vmul.f32 0.5, %v3599_v7 }
 0x2e4   :  { %v3850_v55 = vadd.f32 %v3849_v60, %v3848_v19  ;;  %v2922_v30 = vpop.xlane.xlu1 %2921  ;;  %v3632_v37 = vmul.f32 0.5, %v3600_v46 }
 0x2e5   :  { %v3662_v36 = vsub.f32 %v3630_v16, %v2922_v30  ;;  %v3663_v15 = vsub.f32 %v3631_v3, %v2925_v17 }
 0x2e6   :  { %v3852_v18 = vadd.f32 %v3851_v0, %v3850_v55 }
 0x2e7   :  { %v3853_v48 = vsel %vm41_vm1, %v3662_v36, 0.0  ;;  %v3855_v51 = vsel %vm41_vm1, %v3663_v15, 0.0 }
 0x2e8   :  { %v3854_v52 = vadd.f32 %v3853_v48, %v3852_v18  ;;  %v2928_v5 = vpop.xlane.xlu1 %2927 }
 0x2e9   :  { %v3664_v44 = vsub.f32 %v3632_v37, %v2928_v5 }
 0x2ea   :  { %v3856_v43 = vadd.f32 %v3855_v51, %v3854_v52 }
 0x2eb   :  { %v3857_v53 = vsel %vm41_vm1, %v3664_v44, 0.0 }
 0x2ec   :  { %v3858_v9 = vadd.f32 %v3857_v53, %v3856_v43 }
 0x2ee   :  { %3859 = vadd.xlane.f32.xlu0 %v3858_v9 }
 0x37b   :  { %v3860_v32 = vpop.xlane.xlu0 %3859 }
 0x37c   :  { %v3861_v14 = vrot.slane %v3860_v32, 4 }
 0x37e   :  { %v3862_v62 = vadd.f32 %v3861_v14, %v3860_v32 }
 0x380   :  { %v3863_v1 = vrot.slane %v3862_v62, 2 }
 0x382   :  { %v3864_v29 = vadd.f32 %v3863_v1, %v3862_v62 }
 0x384   :  { %v3865_v24 = vrot.slane %v3864_v29, 1 }
 0x386   :  { %v3866_v21 = vadd.f32 %v3865_v24, %v3864_v29 }
 0x388   :  { %4216 = vpush %v3866_v21 }
 0x3b9   :  { %s4217_s0 = spop %4216 }
 0x3ba   :  { %v3868_v40 = vstv %s4217_s0 }
 0x3bb   :  { %3869 = vst [vmem:[%s6747_s3] sm:$0x1] %v3868_v40 }

</bundles_post_ra>
